<compile_context>
chip_gen: v7x
topology: tpu7x:2x2x1
jax: 0.10.0
libtpu: 0.0.40
codegen_flags: <defaults>
</compile_context>

<pallas_src>
import functools

import jax
import jax.numpy as jnp
from jax.experimental import pallas as pl
from jax.experimental.pallas import tpu as pltpu

ACTIONS = 2  # undefined global in the reference module; typical Flappy-Bird DQN value


# ----------------------------------------------------------------------------
# Pallas kernels
# ----------------------------------------------------------------------------
def _matmul_bias_kernel(x_ref, w_ref, b_ref, o_ref, *, relu):
    """(M, K) x (K, Nout) MXU matmul + bias + optional ReLU (single grid step)."""
    acc = jnp.dot(x_ref[...], w_ref[...], preferred_element_type=jnp.float32)
    acc = acc + b_ref[...]
    if relu:
        acc = jnp.maximum(acc, 0.0)
    o_ref[...] = acc.astype(o_ref.dtype)


def _fused_fc_kernel(x_ref, w1_ref, s1_ref, b1_ref, w2_ref, s2_ref, b2_ref,
                     w3_ref, b3_ref, wh_ref, bh_ref, o_ref, acc2_ref):
    """Fused fc1 -> fc2 -> fc3 -> head with fc1/fc2 weight streaming.

    Grid step j (over fc1's output-column tiles == fc2's input-row tiles):
        h1_j   = relu((x @ W1[:, j*tn:(j+1)*tn]) * s1_j + b1_j)   (stays on-chip)
        acc2  += h1_j @ W2[j*tn:(j+1)*tn, :]
    Last step:
        h2 = relu(acc2 * s2 + b2); h3 = relu(h2 @ W3 + b3); q = h3 @ Wh + bh

    W1/W2 are int8 with per-output-column f32 scales (HBM-byte reduction only);
    they are converted to f32 before the dot, so no int MXU mode is required.
    """
    j = pl.program_id(0)

    @pl.when(j == 0)
    def _():
        acc2_ref[...] = jnp.zeros_like(acc2_ref)

    # fc1 tile: (M, K1) @ (K1, tn) -> (M, tn); scale + bias + ReLU.
    w1 = w1_ref[...].astype(jnp.float32)
    h1 = jnp.dot(x_ref[...].astype(jnp.float32), w1,
                 preferred_element_type=jnp.float32)
    h1 = jnp.maximum(h1 * s1_ref[...] + b1_ref[...], 0.0)

    # fc2 partial sum: (M, tn) @ (tn, N2) accumulated in f32 VMEM scratch.
    w2 = w2_ref[...].astype(jnp.float32)
    acc2_ref[...] += jnp.dot(h1, w2, preferred_element_type=jnp.float32)

    @pl.when(j == pl.num_programs(0) - 1)
    def _():
        h2 = jnp.maximum(acc2_ref[...] * s2_ref[...] + b2_ref[...], 0.0)
        h2 = h2.astype(jnp.bfloat16)                                    # (M, 1024)
        h3 = jnp.dot(h2, w3_ref[...], preferred_element_type=jnp.float32)
        h3 = jnp.maximum(h3 + b3_ref[...], 0.0).astype(jnp.bfloat16)    # (M, 256)
        q = jnp.dot(h3, wh_ref[...], preferred_element_type=jnp.float32)
        o_ref[...] = (q + bh_ref[...]).astype(o_ref.dtype)              # (M, 128)


# ----------------------------------------------------------------------------
# Pallas wrappers
# ----------------------------------------------------------------------------
def conv_matmul(cols, w, b, *, relu=True, out_dtype=jnp.bfloat16):
    """y = relu(cols @ w + b).  Nout pre-padded to 128 (lane-dense stores).

    Single grid step: at these sizes the conv compute is negligible and
    M-tiling only adds per-step pipeline overhead on single-TC chips.
    """
    M, K = cols.shape
    Kw, Nout = w.shape
    assert K == Kw and Nout % 128 == 0

    kernel = functools.partial(_matmul_bias_kernel, relu=relu)
    return pl.pallas_call(
        kernel,
        out_shape=jax.ShapeDtypeStruct((M, Nout), out_dtype),
        grid_spec=pltpu.PrefetchScalarGridSpec(
            num_scalar_prefetch=0,
            grid=(1,),
            in_specs=[
                pl.BlockSpec((M, K), lambda i: (0, 0)),
                pl.BlockSpec((K, Nout), lambda i: (0, 0)),
                pl.BlockSpec((1, Nout), lambda i: (0, 0)),
            ],
            out_specs=pl.BlockSpec((M, Nout), lambda i: (0, 0)),
        ),
        compiler_params=pltpu.CompilerParams(
            dimension_semantics=("arbitrary",)),
    )(cols, w, b)


def fused_fc(x, params, *, tn=512):
    """Single pallas_call for the whole FC stack.  x: (M, 1600) -> (M, 128)."""
    M = x.shape[0]
    K1, N1 = params['wfc1'].shape    # 1600, 2048  (int8)
    K2, N2 = params['wfc2'].shape    # 2048, 1024  (int8)
    K3, N3 = params['wfc3'].shape    # 1024, 256   (bf16)
    K4, N4 = params['whead'].shape   # 256, 128    (bf16, ACTIONS padded to 128)
    assert N1 % tn == 0 and K2 == N1

    flops = 2 * M * (K1 * N1 + K2 * N2 + K3 * N3 + K4 * N4)
    bytes_accessed = (
        K1 * N1 + K2 * N2                          # int8 weights
        + 2 * (K3 * N3 + K4 * N4)                  # bf16 weights
        + 4 * (2 * N1 + 2 * N2 + N3 + N4)          # f32 scales + biases
        + 2 * M * K1 + 4 * M * N4                  # activations in / Q out
    )

    return pl.pallas_call(
        _fused_fc_kernel,
        out_shape=jax.ShapeDtypeStruct((M, N4), jnp.float32),
        grid_spec=pltpu.PrefetchScalarGridSpec(
            num_scalar_prefetch=0,
            grid=(N1 // tn,),
            in_specs=[
                pl.BlockSpec((M, K1), lambda j: (0, 0)),    # x        (resident)
                pl.BlockSpec((K1, tn), lambda j: (0, j)),   # fc1 W    (int8, streamed)
                pl.BlockSpec((1, tn), lambda j: (0, j)),    # fc1 scale
                pl.BlockSpec((1, tn), lambda j: (0, j)),    # fc1 bias
                pl.BlockSpec((tn, N2), lambda j: (j, 0)),   # fc2 W    (int8, streamed along K)
                pl.BlockSpec((1, N2), lambda j: (0, 0)),    # fc2 scale (resident)
                pl.BlockSpec((1, N2), lambda j: (0, 0)),    # fc2 bias
                pl.BlockSpec((K3, N3), lambda j: (0, 0)),   # fc3 W    (resident)
                pl.BlockSpec((1, N3), lambda j: (0, 0)),
                pl.BlockSpec((K4, N4), lambda j: (0, 0)),   # head W   (resident)
                pl.BlockSpec((1, N4), lambda j: (0, 0)),
            ],
            out_specs=pl.BlockSpec((M, N4), lambda j: (0, 0)),
            scratch_shapes=[pltpu.VMEM((M, N2), jnp.float32)],   # fc2 accumulator
        ),
        compiler_params=pltpu.CompilerParams(
            # Sequential: fc2-K accumulation + output written only on last step.
            dimension_semantics=("arbitrary",),
            vmem_limit_bytes=32 * 1024 * 1024),
        cost_estimate=pl.CostEstimate(
            flops=flops, transcendentals=0, bytes_accessed=bytes_accessed),
    )(x.astype(jnp.bfloat16),
      params['wfc1'], params['sfc1'], params['bfc1'],
      params['wfc2'], params['sfc2'], params['bfc2'],
      params['wfc3'], params['bfc3'],
      params['whead'], params['bhead'])


# ----------------------------------------------------------------------------
# Plain-JAX glue: im2col patch extraction (layout plumbing for the conv matmuls)
# ----------------------------------------------------------------------------
def im2col(x, k, stride, pad):
    """x: (N, H, W, C) NHWC -> (N*OH*OW, k*k*C), column order (ki, kj, cin)."""
    if pad:
        x = jnp.pad(x, ((0, 0), (pad, pad), (pad, pad), (0, 0)))
    N, H, W, C = x.shape
    oh = (H - k) // stride + 1
    ow = (W - k) // stride + 1
    cols = []
    for i in range(k):
        for j in range(k):
            cols.append(
                x[:, i:i + stride * (oh - 1) + 1:stride,
                     j:j + stride * (ow - 1) + 1:stride, :]
            )
    p = jnp.stack(cols, axis=3)  # (N, oh, ow, k*k, C)
    return p.reshape(N * oh * ow, k * k * C), oh, ow


def pad_last(a, target):
    """Zero-pad the last (lane/K) axis up to `target` columns."""
    extra = target - a.shape[-1]
    return jnp.pad(a, ((0, 0), (0, extra))) if extra else a


# ----------------------------------------------------------------------------
# Parameter construction (deterministic, PyTorch-default-like uniform init)
# ----------------------------------------------------------------------------
def _uniform(key, shape, fan_in):
    bound = 1.0 / jnp.sqrt(jnp.float32(fan_in))
    return jax.random.uniform(key, shape, jnp.float32, -bound, bound)


def _round_up(v, m):
    return ((v + m - 1) // m) * m


def init_params(key):
    ks = jax.random.split(key, 16)
    p = {}

    def conv_w(kw, kb, cout, cin, k):
        fan = cin * k * k
        w_pt = _uniform(kw, (cout, cin, k, k), fan)           # PyTorch layout
        b = _uniform(kb, (cout,), fan)
        # matmul weight: column order (ki, kj, cin) -> cout
        w_mat = jnp.transpose(w_pt, (2, 3, 1, 0)).reshape(k * k * cin, cout)
        K, kpad = k * k * cin, _round_up(k * k * cin, 128)
        npad = max(128, _round_up(cout, 128))
        w_mat = jnp.pad(w_mat, ((0, kpad - K), (0, npad - cout))).astype(jnp.bfloat16)
        b_mat = jnp.pad(b, (0, npad - cout)).reshape(1, npad).astype(jnp.float32)
        return w_mat, b_mat

    def fc_w(kw, kb, cout, cin, n_pad=None, quant=False):
        w_pt = _uniform(kw, (cout, cin), cin)                 # PyTorch (out, in)
        b = _uniform(kb, (cout,), cin)
        w = w_pt.T                                            # (in, out) for x @ W
        if n_pad is not None and n_pad > cout:
            w = jnp.pad(w, ((0, 0), (0, n_pad - cout)))
            b = jnp.pad(b, (0, n_pad - cout))
        b = b.reshape(1, -1).astype(jnp.float32)
        if quant:
            # Symmetric per-output-column int8 quantization; scales stay f32.
            amax = jnp.max(jnp.abs(w), axis=0, keepdims=True)
            scale = jnp.where(amax > 0, amax / 127.0, 1.0)
            q = jnp.clip(jnp.round(w / scale), -127, 127).astype(jnp.int8)
            return q, scale.astype(jnp.float32), b
        return w.astype(jnp.bfloat16), b

    p['w1'], p['b1'] = conv_w(ks[0], ks[1], 32, 4, 8)         # (256, 128)
    p['w2'], p['b2'] = conv_w(ks[2], ks[3], 64, 32, 4)        # (512, 128)
    p['w3'], p['b3'] = conv_w(ks[4], ks[5], 64, 64, 3)        # (640, 128)  K 576->640
    p['wfc1'], p['sfc1'], p['bfc1'] = fc_w(ks[6], ks[7], 2048, 1600, quant=True)
    p['wfc2'], p['sfc2'], p['bfc2'] = fc_w(ks[8], ks[9], 1024, 2048, quant=True)
    p['wfc3'], p['bfc3'] = fc_w(ks[10], ks[11], 256, 1024)
    p['whead'], p['bhead'] = fc_w(ks[12], ks[13], ACTIONS, 256, n_pad=128)
    return p


# ----------------------------------------------------------------------------
# DQN forward
# ----------------------------------------------------------------------------
def dqn_forward(x_nchw, params):
    x = jnp.transpose(x_nchw, (0, 2, 3, 1)).astype(jnp.bfloat16)  # NCHW -> NHWC
    N = x.shape[0]

    # conv1 (4->32, k=8, s=4, p=2) + ReLU                       -> (N, 20, 20, 32)
    cols, oh, ow = im2col(x, 8, 4, 2)
    cols = pad_last(cols, params['w1'].shape[0])
    y = conv_matmul(cols, params['w1'], params['b1'])[:, :32].reshape(N, oh, ow, 32)
    # maxpool 2x2 (plain reshape+max; XLA fuses it)             -> (N, 10, 10, 32)
    y = y.reshape(N, oh // 2, 2, ow // 2, 2, 32).max(axis=(2, 4))
    # conv2 (32->64, k=4, s=2, p=1) + ReLU                      -> (N, 5, 5, 64)
    cols, oh, ow = im2col(y, 4, 2, 1)
    cols = pad_last(cols, params['w2'].shape[0])
    y = conv_matmul(cols, params['w2'], params['b2'])[:, :64].reshape(N, oh, ow, 64)
    # conv3 (64->64, k=3, s=1, p=1) + ReLU                      -> (N, 5, 5, 64)
    cols, oh, ow = im2col(y, 3, 1, 1)
    cols = pad_last(cols, params['w3'].shape[0])
    y = conv_matmul(cols, params['w3'], params['b3'])[:, :64].reshape(N, oh, ow, 64)

    # flatten in PyTorch NCHW order: (N, C, H, W) -> (N, 1600)
    flat = jnp.transpose(y, (0, 3, 1, 2)).reshape(N, -1)

    # fused fc1 -> fc2 -> fc3 -> head (single Pallas call, weight streaming)
    q_padded = fused_fc(flat, params)          # (N, 128), lanes >= ACTIONS are zero
    return q_padded[:, :ACTIONS]


if __name__ == "__main__":
    key = jax.random.PRNGKey(0)
    k_param, k_x = jax.random.split(key)
    params = init_params(k_param)
    # Input shape is forced to (N, 4, 80, 80) by fc1 = Linear(1600, 2048).
    x = jax.random.normal(k_x, (2, 4, 80, 80), jnp.float32)

    fwd = jax.jit(dqn_forward)
    q = fwd(x, params)
    q = jax.block_until_ready(q)
    assert q.shape == (2, ACTIONS), q.shape
    assert bool(jnp.all(jnp.isfinite(q)))
    print("KERNEL_OK")
</pallas_src>

<mosaic_0001>
module attributes {stable_mosaic.version = 11 : i64} {
  func.func @_matmul_bias_kernel(%arg0: i32, %arg1: memref<800x256xbf16, #tpu.memory_space<vmem>>, %arg2: memref<256x128xbf16, #tpu.memory_space<vmem>>, %arg3: memref<1x128xf32, #tpu.memory_space<vmem>>, %arg4: memref<800x128xbf16, #tpu.memory_space<vmem>>) attributes {dimension_semantics = [#tpu.dimension_semantics<arbitrary>], iteration_bounds = array<i64: 1>, scalar_prefetch = 0 : i64, scratch_operands = 0 : i64, tpu.core_type = #tpu.core_type<tc>, window_params = [{pipeline_mode = #tpu.pipeline_mode<synchronous>, transform_indices = @transform_0, window_bounds = array<i64: 800, 256>}, {pipeline_mode = #tpu.pipeline_mode<synchronous>, transform_indices = @transform_1, window_bounds = array<i64: 256, 128>}, {pipeline_mode = #tpu.pipeline_mode<synchronous>, transform_indices = @transform_2, window_bounds = array<i64: 1, 128>}, {pipeline_mode = #tpu.pipeline_mode<synchronous>, transform_indices = @transform_3, window_bounds = array<i64: 800, 128>}]} {
    %c0 = arith.constant 0 : index
    %c0_0 = arith.constant 0 : index
    %0 = vector.load %arg1[%c0, %c0_0] : memref<800x256xbf16, #tpu.memory_space<vmem>>, vector<800x256xbf16>
    %c0_1 = arith.constant 0 : index
    %c0_2 = arith.constant 0 : index
    %1 = vector.load %arg2[%c0_1, %c0_2] : memref<256x128xbf16, #tpu.memory_space<vmem>>, vector<256x128xbf16>
    %cst = arith.constant dense<0.000000e+00> : vector<800x128xf32>
    %2 = tpu.matmul %0, %1, %cst {dimension_numbers = #tpu.dot_dimension_numbers<[1], [0], [0], [1], [0, 0, 1, 1], [], []>} : vector<800x256xbf16>, vector<256x128xbf16>, vector<800x128xf32> -> vector<800x128xf32>
    %c0_3 = arith.constant 0 : index
    %c0_4 = arith.constant 0 : index
    %3 = vector.load %arg3[%c0_3, %c0_4] : memref<1x128xf32, #tpu.memory_space<vmem>>, vector<1x128xf32>
    %4 = vector.broadcast %3 : vector<1x128xf32> to vector<800x128xf32>
    %5 = arith.addf %2, %4 : vector<800x128xf32>
    %cst_5 = arith.constant 0.000000e+00 : f32
    %6 = vector.broadcast %cst_5 : f32 to vector<800x128xf32>
    %7 = arith.maximumf %5, %6 : vector<800x128xf32>
    %8 = arith.truncf %7 : vector<800x128xf32> to vector<800x128xbf16>
    %c0_6 = arith.constant 0 : index
    %c0_7 = arith.constant 0 : index
    %9 = vector.load %arg4[%c0_6, %c0_7] : memref<800x128xbf16, #tpu.memory_space<vmem>>, vector<800x128xbf16>
    tpu.vector_store %arg4[%c0_6, %c0_7], %8 {strides = array<i32>} : memref<800x128xbf16, #tpu.memory_space<vmem>>, vector<800x128xbf16>,
    return
  }
  func.func @transform_0(%arg0: i32) -> (i32, i32) {
    %c0_i32 = arith.constant 0 : i32
    %c0_i32_0 = arith.constant 0 : i32
    %c0_i32_1 = arith.constant 0 : i32
    return %c0_i32, %c0_i32_0 : i32, i32
  }
  func.func @transform_1(%arg0: i32) -> (i32, i32) {
    %c0_i32 = arith.constant 0 : i32
    %c0_i32_0 = arith.constant 0 : i32
    %c0_i32_1 = arith.constant 0 : i32
    return %c0_i32, %c0_i32_0 : i32, i32
  }
  func.func @transform_2(%arg0: i32) -> (i32, i32) {
    %c0_i32 = arith.constant 0 : i32
    %c0_i32_0 = arith.constant 0 : i32
    %c0_i32_1 = arith.constant 0 : i32
    return %c0_i32, %c0_i32_0 : i32, i32
  }
  func.func @transform_3(%arg0: i32) -> (i32, i32) {
    %c0_i32 = arith.constant 0 : i32
    %c0_i32_0 = arith.constant 0 : i32
    %c0_i32_1 = arith.constant 0 : i32
    return %c0_i32, %c0_i32_0 : i32, i32
  }
}

module attributes {stable_mosaic.version = 11 : i64} {
  func.func @_matmul_bias_kernel(%arg0: i32, %arg1: memref<50x512xbf16, #tpu.memory_space<vmem>>, %arg2: memref<512x128xbf16, #tpu.memory_space<vmem>>, %arg3: memref<1x128xf32, #tpu.memory_space<vmem>>, %arg4: memref<50x128xbf16, #tpu.memory_space<vmem>>) attributes {dimension_semantics = [#tpu.dimension_semantics<arbitrary>], iteration_bounds = array<i64: 1>, scalar_prefetch = 0 : i64, scratch_operands = 0 : i64, tpu.core_type = #tpu.core_type<tc>, window_params = [{pipeline_mode = #tpu.pipeline_mode<synchronous>, transform_indices = @transform_0, window_bounds = array<i64: 50, 512>}, {pipeline_mode = #tpu.pipeline_mode<synchronous>, transform_indices = @transform_1, window_bounds = array<i64: 512, 128>}, {pipeline_mode = #tpu.pipeline_mode<synchronous>, transform_indices = @transform_2, window_bounds = array<i64: 1, 128>}, {pipeline_mode = #tpu.pipeline_mode<synchronous>, transform_indices = @transform_3, window_bounds = array<i64: 50, 128>}]} {
    %c0 = arith.constant 0 : index
    %c0_0 = arith.constant 0 : index
    %0 = vector.load %arg1[%c0, %c0_0] : memref<50x512xbf16, #tpu.memory_space<vmem>>, vector<50x512xbf16>
    %c0_1 = arith.constant 0 : index
    %c0_2 = arith.constant 0 : index
    %1 = vector.load %arg2[%c0_1, %c0_2] : memref<512x128xbf16, #tpu.memory_space<vmem>>, vector<512x128xbf16>
    %cst = arith.constant dense<0.000000e+00> : vector<50x128xf32>
    %2 = tpu.matmul %0, %1, %cst {dimension_numbers = #tpu.dot_dimension_numbers<[1], [0], [0], [1], [0, 0, 1, 1], [], []>} : vector<50x512xbf16>, vector<512x128xbf16>, vector<50x128xf32> -> vector<50x128xf32>
    %c0_3 = arith.constant 0 : index
    %c0_4 = arith.constant 0 : index
    %3 = vector.load %arg3[%c0_3, %c0_4] : memref<1x128xf32, #tpu.memory_space<vmem>>, vector<1x128xf32>
    %4 = vector.broadcast %3 : vector<1x128xf32> to vector<50x128xf32>
    %5 = arith.addf %2, %4 : vector<50x128xf32>
    %cst_5 = arith.constant 0.000000e+00 : f32
    %6 = vector.broadcast %cst_5 : f32 to vector<50x128xf32>
    %7 = arith.maximumf %5, %6 : vector<50x128xf32>
    %8 = arith.truncf %7 : vector<50x128xf32> to vector<50x128xbf16>
    %c0_6 = arith.constant 0 : index
    %c0_7 = arith.constant 0 : index
    %9 = vector.load %arg4[%c0_6, %c0_7] : memref<50x128xbf16, #tpu.memory_space<vmem>>, vector<50x128xbf16>
    tpu.vector_store %arg4[%c0_6, %c0_7], %8 {strides = array<i32>} : memref<50x128xbf16, #tpu.memory_space<vmem>>, vector<50x128xbf16>,
    return
  }
  func.func @transform_0(%arg0: i32) -> (i32, i32) {
    %c0_i32 = arith.constant 0 : i32
    %c0_i32_0 = arith.constant 0 : i32
    %c0_i32_1 = arith.constant 0 : i32
    return %c0_i32, %c0_i32_0 : i32, i32
  }
  func.func @transform_1(%arg0: i32) -> (i32, i32) {
    %c0_i32 = arith.constant 0 : i32
    %c0_i32_0 = arith.constant 0 : i32
    %c0_i32_1 = arith.constant 0 : i32
    return %c0_i32, %c0_i32_0 : i32, i32
  }
  func.func @transform_2(%arg0: i32) -> (i32, i32) {
    %c0_i32 = arith.constant 0 : i32
    %c0_i32_0 = arith.constant 0 : i32
    %c0_i32_1 = arith.constant 0 : i32
    return %c0_i32, %c0_i32_0 : i32, i32
  }
  func.func @transform_3(%arg0: i32) -> (i32, i32) {
    %c0_i32 = arith.constant 0 : i32
    %c0_i32_0 = arith.constant 0 : i32
    %c0_i32_1 = arith.constant 0 : i32
    return %c0_i32, %c0_i32_0 : i32, i32
  }
}

module attributes {stable_mosaic.version = 11 : i64} {
  func.func @_matmul_bias_kernel(%arg0: i32, %arg1: memref<50x640xbf16, #tpu.memory_space<vmem>>, %arg2: memref<640x128xbf16, #tpu.memory_space<vmem>>, %arg3: memref<1x128xf32, #tpu.memory_space<vmem>>, %arg4: memref<50x128xbf16, #tpu.memory_space<vmem>>) attributes {dimension_semantics = [#tpu.dimension_semantics<arbitrary>], iteration_bounds = array<i64: 1>, scalar_prefetch = 0 : i64, scratch_operands = 0 : i64, tpu.core_type = #tpu.core_type<tc>, window_params = [{pipeline_mode = #tpu.pipeline_mode<synchronous>, transform_indices = @transform_0, window_bounds = array<i64: 50, 640>}, {pipeline_mode = #tpu.pipeline_mode<synchronous>, transform_indices = @transform_1, window_bounds = array<i64: 640, 128>}, {pipeline_mode = #tpu.pipeline_mode<synchronous>, transform_indices = @transform_2, window_bounds = array<i64: 1, 128>}, {pipeline_mode = #tpu.pipeline_mode<synchronous>, transform_indices = @transform_3, window_bounds = array<i64: 50, 128>}]} {
    %c0 = arith.constant 0 : index
    %c0_0 = arith.constant 0 : index
    %0 = vector.load %arg1[%c0, %c0_0] : memref<50x640xbf16, #tpu.memory_space<vmem>>, vector<50x640xbf16>
    %c0_1 = arith.constant 0 : index
    %c0_2 = arith.constant 0 : index
    %1 = vector.load %arg2[%c0_1, %c0_2] : memref<640x128xbf16, #tpu.memory_space<vmem>>, vector<640x128xbf16>
    %cst = arith.constant dense<0.000000e+00> : vector<50x128xf32>
    %2 = tpu.matmul %0, %1, %cst {dimension_numbers = #tpu.dot_dimension_numbers<[1], [0], [0], [1], [0, 0, 1, 1], [], []>} : vector<50x640xbf16>, vector<640x128xbf16>, vector<50x128xf32> -> vector<50x128xf32>
    %c0_3 = arith.constant 0 : index
    %c0_4 = arith.constant 0 : index
    %3 = vector.load %arg3[%c0_3, %c0_4] : memref<1x128xf32, #tpu.memory_space<vmem>>, vector<1x128xf32>
    %4 = vector.broadcast %3 : vector<1x128xf32> to vector<50x128xf32>
    %5 = arith.addf %2, %4 : vector<50x128xf32>
    %cst_5 = arith.constant 0.000000e+00 : f32
    %6 = vector.broadcast %cst_5 : f32 to vector<50x128xf32>
    %7 = arith.maximumf %5, %6 : vector<50x128xf32>
    %8 = arith.truncf %7 : vector<50x128xf32> to vector<50x128xbf16>
    %c0_6 = arith.constant 0 : index
    %c0_7 = arith.constant 0 : index
    %9 = vector.load %arg4[%c0_6, %c0_7] : memref<50x128xbf16, #tpu.memory_space<vmem>>, vector<50x128xbf16>
    tpu.vector_store %arg4[%c0_6, %c0_7], %8 {strides = array<i32>} : memref<50x128xbf16, #tpu.memory_space<vmem>>, vector<50x128xbf16>,
    return
  }
  func.func @transform_0(%arg0: i32) -> (i32, i32) {
    %c0_i32 = arith.constant 0 : i32
    %c0_i32_0 = arith.constant 0 : i32
    %c0_i32_1 = arith.constant 0 : i32
    return %c0_i32, %c0_i32_0 : i32, i32
  }
  func.func @transform_1(%arg0: i32) -> (i32, i32) {
    %c0_i32 = arith.constant 0 : i32
    %c0_i32_0 = arith.constant 0 : i32
    %c0_i32_1 = arith.constant 0 : i32
    return %c0_i32, %c0_i32_0 : i32, i32
  }
  func.func @transform_2(%arg0: i32) -> (i32, i32) {
    %c0_i32 = arith.constant 0 : i32
    %c0_i32_0 = arith.constant 0 : i32
    %c0_i32_1 = arith.constant 0 : i32
    return %c0_i32, %c0_i32_0 : i32, i32
  }
  func.func @transform_3(%arg0: i32) -> (i32, i32) {
    %c0_i32 = arith.constant 0 : i32
    %c0_i32_0 = arith.constant 0 : i32
    %c0_i32_1 = arith.constant 0 : i32
    return %c0_i32, %c0_i32_0 : i32, i32
  }
}

module attributes {stable_mosaic.version = 11 : i64} {
  func.func @_fused_fc_kernel(%arg0: i32, %arg1: memref<2x1600xbf16, #tpu.memory_space<vmem>>, %arg2: memref<1600x512xi8, #tpu.memory_space<vmem>>, %arg3: memref<1x512xf32, #tpu.memory_space<vmem>>, %arg4: memref<1x512xf32, #tpu.memory_space<vmem>>, %arg5: memref<512x1024xi8, #tpu.memory_space<vmem>>, %arg6: memref<1x1024xf32, #tpu.memory_space<vmem>>, %arg7: memref<1x1024xf32, #tpu.memory_space<vmem>>, %arg8: memref<1024x256xbf16, #tpu.memory_space<vmem>>, %arg9: memref<1x256xf32, #tpu.memory_space<vmem>>, %arg10: memref<256x128xbf16, #tpu.memory_space<vmem>>, %arg11: memref<1x128xf32, #tpu.memory_space<vmem>>, %arg12: memref<2x128xf32, #tpu.memory_space<vmem>>, %arg13: memref<2x1024xf32, #tpu.memory_space<vmem>>) attributes {dimension_semantics = [#tpu.dimension_semantics<arbitrary>], iteration_bounds = array<i64: 4>, scalar_prefetch = 0 : i64, scratch_operands = 1 : i64, tpu.core_type = #tpu.core_type<tc>, window_params = [{pipeline_mode = #tpu.pipeline_mode<synchronous>, transform_indices = @transform_0, window_bounds = array<i64: 2, 1600>}, {transform_indices = @transform_1, window_bounds = array<i64: 1600, 512>}, {transform_indices = @transform_2, window_bounds = array<i64: 1, 512>}, {transform_indices = @transform_3, window_bounds = array<i64: 1, 512>}, {transform_indices = @transform_4, window_bounds = array<i64: 512, 1024>}, {pipeline_mode = #tpu.pipeline_mode<synchronous>, transform_indices = @transform_5, window_bounds = array<i64: 1, 1024>}, {pipeline_mode = #tpu.pipeline_mode<synchronous>, transform_indices = @transform_6, window_bounds = array<i64: 1, 1024>}, {pipeline_mode = #tpu.pipeline_mode<synchronous>, transform_indices = @transform_7, window_bounds = array<i64: 1024, 256>}, {pipeline_mode = #tpu.pipeline_mode<synchronous>, transform_indices = @transform_8, window_bounds = array<i64: 1, 256>}, {pipeline_mode = #tpu.pipeline_mode<synchronous>, transform_indices = @transform_9, window_bounds = array<i64: 256, 128>}, {pipeline_mode = #tpu.pipeline_mode<synchronous>, transform_indices = @transform_10, window_bounds = array<i64: 1, 128>}, {pipeline_mode = #tpu.pipeline_mode<synchronous>, transform_indices = @transform_11, window_bounds = array<i64: 2, 128>}]} {
    %c0_i32 = arith.constant 0 : i32
    %0 = arith.cmpi eq, %arg0, %c0_i32 : i32
    %1 = arith.extui %0 : i1 to i32
    %c0_i32_0 = arith.constant 0 : i32
    %2 = arith.cmpi ne, %1, %c0_i32_0 : i32
    scf.if %2 {
      %cst_17 = arith.constant 0.000000e+00 : f32
      %25 = vector.broadcast %cst_17 : f32 to vector<2x1024xf32>
      %c0_18 = arith.constant 0 : index
      %c0_19 = arith.constant 0 : index
      %26 = vector.load %arg13[%c0_18, %c0_19] : memref<2x1024xf32, #tpu.memory_space<vmem>>, vector<2x1024xf32>
      tpu.vector_store %arg13[%c0_18, %c0_19], %25 {strides = array<i32>} : memref<2x1024xf32, #tpu.memory_space<vmem>>, vector<2x1024xf32>,
    } else {
    }
    %c0 = arith.constant 0 : index
    %c0_1 = arith.constant 0 : index
    %3 = vector.load %arg2[%c0, %c0_1] : memref<1600x512xi8, #tpu.memory_space<vmem>>, vector<1600x512xi8>
    %4 = arith.sitofp %3 : vector<1600x512xi8> to vector<1600x512xf32>
    %c0_2 = arith.constant 0 : index
    %c0_3 = arith.constant 0 : index
    %5 = vector.load %arg1[%c0_2, %c0_3] : memref<2x1600xbf16, #tpu.memory_space<vmem>>, vector<2x1600xbf16>
    %6 = arith.extf %5 : vector<2x1600xbf16> to vector<2x1600xf32>
    %cst = arith.constant dense<0.000000e+00> : vector<2x512xf32>
    %7 = tpu.matmul %6, %4, %cst {dimension_numbers = #tpu.dot_dimension_numbers<[1], [0], [0], [1], [0, 0, 1, 1], [], []>} : vector<2x1600xf32>, vector<1600x512xf32>, vector<2x512xf32> -> vector<2x512xf32>
    %c0_4 = arith.constant 0 : index
    %c0_5 = arith.constant 0 : index
    %8 = vector.load %arg3[%c0_4, %c0_5] : memref<1x512xf32, #tpu.memory_space<vmem>>, vector<1x512xf32>
    %9 = vector.broadcast %8 : vector<1x512xf32> to vector<2x512xf32>
    %10 = arith.mulf %7, %9 : vector<2x512xf32>
    %c0_6 = arith.constant 0 : index
    %c0_7 = arith.constant 0 : index
    %11 = vector.load %arg4[%c0_6, %c0_7] : memref<1x512xf32, #tpu.memory_space<vmem>>, vector<1x512xf32>
    %12 = vector.broadcast %11 : vector<1x512xf32> to vector<2x512xf32>
    %13 = arith.addf %10, %12 : vector<2x512xf32>
    %cst_8 = arith.constant 0.000000e+00 : f32
    %14 = vector.broadcast %cst_8 : f32 to vector<2x512xf32>
    %15 = arith.maximumf %13, %14 : vector<2x512xf32>
    %c0_9 = arith.constant 0 : index
    %c0_10 = arith.constant 0 : index
    %16 = vector.load %arg5[%c0_9, %c0_10] : memref<512x1024xi8, #tpu.memory_space<vmem>>, vector<512x1024xi8>
    %17 = arith.sitofp %16 : vector<512x1024xi8> to vector<512x1024xf32>
    %c0_11 = arith.constant 0 : index
    %c0_12 = arith.constant 0 : index
    %18 = vector.load %arg13[%c0_11, %c0_12] : memref<2x1024xf32, #tpu.memory_space<vmem>>, vector<2x1024xf32>
    %cst_13 = arith.constant dense<0.000000e+00> : vector<2x1024xf32>
    %19 = tpu.matmul %15, %17, %cst_13 {dimension_numbers = #tpu.dot_dimension_numbers<[1], [0], [0], [1], [0, 0, 1, 1], [], []>} : vector<2x512xf32>, vector<512x1024xf32>, vector<2x1024xf32> -> vector<2x1024xf32>
    %20 = arith.addf %18, %19 : vector<2x1024xf32>
    %c0_14 = arith.constant 0 : index
    %c0_15 = arith.constant 0 : index
    %21 = vector.load %arg13[%c0_14, %c0_15] : memref<2x1024xf32, #tpu.memory_space<vmem>>, vector<2x1024xf32>
    tpu.vector_store %arg13[%c0_14, %c0_15], %20 {strides = array<i32>} : memref<2x1024xf32, #tpu.memory_space<vmem>>, vector<2x1024xf32>,
    %c3_i32 = arith.constant 3 : i32
    %22 = arith.cmpi eq, %arg0, %c3_i32 : i32
    %23 = arith.extui %22 : i1 to i32
    %c0_i32_16 = arith.constant 0 : i32
    %24 = arith.cmpi ne, %23, %c0_i32_16 : i32
    scf.if %24 {
      %c0_17 = arith.constant 0 : index
      %c0_18 = arith.constant 0 : index
      %25 = vector.load %arg13[%c0_17, %c0_18] : memref<2x1024xf32, #tpu.memory_space<vmem>>, vector<2x1024xf32>
      %c0_19 = arith.constant 0 : index
      %c0_20 = arith.constant 0 : index
      %26 = vector.load %arg6[%c0_19, %c0_20] : memref<1x1024xf32, #tpu.memory_space<vmem>>, vector<1x1024xf32>
      %27 = vector.broadcast %26 : vector<1x1024xf32> to vector<2x1024xf32>
      %28 = arith.mulf %25, %27 : vector<2x1024xf32>
      %c0_21 = arith.constant 0 : index
      %c0_22 = arith.constant 0 : index
      %29 = vector.load %arg7[%c0_21, %c0_22] : memref<1x1024xf32, #tpu.memory_space<vmem>>, vector<1x1024xf32>
      %30 = vector.broadcast %29 : vector<1x1024xf32> to vector<2x1024xf32>
      %31 = arith.addf %28, %30 : vector<2x1024xf32>
      %cst_23 = arith.constant 0.000000e+00 : f32
      %32 = vector.broadcast %cst_23 : f32 to vector<2x1024xf32>
      %33 = arith.maximumf %31, %32 : vector<2x1024xf32>
      %34 = arith.truncf %33 : vector<2x1024xf32> to vector<2x1024xbf16>
      %c0_24 = arith.constant 0 : index
      %c0_25 = arith.constant 0 : index
      %35 = vector.load %arg8[%c0_24, %c0_25] : memref<1024x256xbf16, #tpu.memory_space<vmem>>, vector<1024x256xbf16>
      %cst_26 = arith.constant dense<0.000000e+00> : vector<2x256xf32>
      %36 = tpu.matmul %34, %35, %cst_26 {dimension_numbers = #tpu.dot_dimension_numbers<[1], [0], [0], [1], [0, 0, 1, 1], [], []>} : vector<2x1024xbf16>, vector<1024x256xbf16>, vector<2x256xf32> -> vector<2x256xf32>
      %c0_27 = arith.constant 0 : index
      %c0_28 = arith.constant 0 : index
      %37 = vector.load %arg9[%c0_27, %c0_28] : memref<1x256xf32, #tpu.memory_space<vmem>>, vector<1x256xf32>
      %38 = vector.broadcast %37 : vector<1x256xf32> to vector<2x256xf32>
      %39 = arith.addf %36, %38 : vector<2x256xf32>
      %cst_29 = arith.constant 0.000000e+00 : f32
      %40 = vector.broadcast %cst_29 : f32 to vector<2x256xf32>
      %41 = arith.maximumf %39, %40 : vector<2x256xf32>
      %42 = arith.truncf %41 : vector<2x256xf32> to vector<2x256xbf16>
      %c0_30 = arith.constant 0 : index
      %c0_31 = arith.constant 0 : index
      %43 = vector.load %arg10[%c0_30, %c0_31] : memref<256x128xbf16, #tpu.memory_space<vmem>>, vector<256x128xbf16>
      %cst_32 = arith.constant dense<0.000000e+00> : vector<2x128xf32>
      %44 = tpu.matmul %42, %43, %cst_32 {dimension_numbers = #tpu.dot_dimension_numbers<[1], [0], [0], [1], [0, 0, 1, 1], [], []>} : vector<2x256xbf16>, vector<256x128xbf16>, vector<2x128xf32> -> vector<2x128xf32>
      %c0_33 = arith.constant 0 : index
      %c0_34 = arith.constant 0 : index
      %45 = vector.load %arg11[%c0_33, %c0_34] : memref<1x128xf32, #tpu.memory_space<vmem>>, vector<1x128xf32>
      %46 = vector.broadcast %45 : vector<1x128xf32> to vector<2x128xf32>
      %47 = arith.addf %44, %46 : vector<2x128xf32>
      %c0_35 = arith.constant 0 : index
      %c0_36 = arith.constant 0 : index
      %48 = vector.load %arg12[%c0_35, %c0_36] : memref<2x128xf32, #tpu.memory_space<vmem>>, vector<2x128xf32>
      tpu.vector_store %arg12[%c0_35, %c0_36], %47 {strides = array<i32>} : memref<2x128xf32, #tpu.memory_space<vmem>>, vector<2x128xf32>,
    } else {
    }
    return
  }
  func.func @transform_0(%arg0: i32) -> (i32, i32) {
    %c0_i32 = arith.constant 0 : i32
    %c0_i32_0 = arith.constant 0 : i32
    %c0_i32_1 = arith.constant 0 : i32
    return %c0_i32, %c0_i32_0 : i32, i32
  }
  func.func @transform_1(%arg0: i32) -> (i32, i32) {
    %c0_i32 = arith.constant 0 : i32
    %c0_i32_0 = arith.constant 0 : i32
    return %c0_i32, %arg0 : i32, i32
  }
  func.func @transform_2(%arg0: i32) -> (i32, i32) {
    %c0_i32 = arith.constant 0 : i32
    %c0_i32_0 = arith.constant 0 : i32
    return %c0_i32, %arg0 : i32, i32
  }
  func.func @transform_3(%arg0: i32) -> (i32, i32) {
    %c0_i32 = arith.constant 0 : i32
    %c0_i32_0 = arith.constant 0 : i32
    return %c0_i32, %arg0 : i32, i32
  }
  func.func @transform_4(%arg0: i32) -> (i32, i32) {
    %c0_i32 = arith.constant 0 : i32
    %c0_i32_0 = arith.constant 0 : i32
    return %arg0, %c0_i32 : i32, i32
  }
  func.func @transform_5(%arg0: i32) -> (i32, i32) {
    %c0_i32 = arith.constant 0 : i32
    %c0_i32_0 = arith.constant 0 : i32
    %c0_i32_1 = arith.constant 0 : i32
    return %c0_i32, %c0_i32_0 : i32, i32
  }
  func.func @transform_6(%arg0: i32) -> (i32, i32) {
    %c0_i32 = arith.constant 0 : i32
    %c0_i32_0 = arith.constant 0 : i32
    %c0_i32_1 = arith.constant 0 : i32
    return %c0_i32, %c0_i32_0 : i32, i32
  }
  func.func @transform_7(%arg0: i32) -> (i32, i32) {
    %c0_i32 = arith.constant 0 : i32
    %c0_i32_0 = arith.constant 0 : i32
    %c0_i32_1 = arith.constant 0 : i32
    return %c0_i32, %c0_i32_0 : i32, i32
  }
  func.func @transform_8(%arg0: i32) -> (i32, i32) {
    %c0_i32 = arith.constant 0 : i32
    %c0_i32_0 = arith.constant 0 : i32
    %c0_i32_1 = arith.constant 0 : i32
    return %c0_i32, %c0_i32_0 : i32, i32
  }
  func.func @transform_9(%arg0: i32) -> (i32, i32) {
    %c0_i32 = arith.constant 0 : i32
    %c0_i32_0 = arith.constant 0 : i32
    %c0_i32_1 = arith.constant 0 : i32
    return %c0_i32, %c0_i32_0 : i32, i32
  }
  func.func @transform_10(%arg0: i32) -> (i32, i32) {
    %c0_i32 = arith.constant 0 : i32
    %c0_i32_0 = arith.constant 0 : i32
    %c0_i32_1 = arith.constant 0 : i32
    return %c0_i32, %c0_i32_0 : i32, i32
  }
  func.func @transform_11(%arg0: i32) -> (i32, i32) {
    %c0_i32 = arith.constant 0 : i32
    %c0_i32_0 = arith.constant 0 : i32
    %c0_i32_1 = arith.constant 0 : i32
    return %c0_i32, %c0_i32_0 : i32, i32
  }
}

</mosaic_0001>

<bundles_post_ra>
// kernel: dqn_forward.4
= control target key start
LH: loop header
LB: loop body
LE: loop exit
PB: predicated region body
PF: predicated region fallthrough
CT: control target
= control target key end

     0   :  { %v2602_v0 = vmov 0   ;;  %s3258_s1 = inlined_call_operand.vmem [shape: bf16[256,128], index: 1, kind: input, shape index: {}]   ;;  %s3259_s0 = inlined_call_operand.vmem [shape: bf16[800,256], index: 0, kind: input, shape index: {}]   ;;  %s3260_s2 = inlined_call_operand.vmem [shape: f32[1,128], index: 2, kind: input, shape index: {}]   ;;  %s3261_s3 = inlined_call_operand.vmem [shape: bf16[800,128], index: 3, kind: output, shape index: {}]  }
   0x1   :  { %750 = vmatprep.subr.bf16.mxu0 %v2602_v0  ;;  %2403 = vmatprep.subr.bf16.mxu1 %v2602_v0  ;;  %v2436_v1 = vld [vmem:[%s3258_s1] sm:$0xff]   ;;  %v2437_v2 = vld [vmem:[%s3258_s1 + $0x8] sm:$0xff]   ;;  %v2438_v3 = vld [vmem:[%s3258_s1 + $0x10] sm:$0xff]  }
   0x2   :  { %751 = vmatpush1.bf16.msra.mxu0 %v2436_v1  ;;  %2419 = vmatpush1.bf16.msra.mxu1 %v2436_v1  ;;  %v2439_v4 = vld [vmem:[%s3258_s1 + $0x18] sm:$0xff]   ;;  %v2440_v5 = vld [vmem:[%s3258_s1 + $0x20] sm:$0xff]   ;;  %v2441_v7 = vld [vmem:[%s3258_s1 + $0x28] sm:$0xff]  }
   0x3   :  { %752 = vmatprep.subr.bf16.mxu0 %v2602_v0  ;;  %2404 = vmatprep.subr.bf16.mxu1 %v2602_v0  ;;  %v2454_v6 = vld [vmem:[%s3259_s0 + $0x4] ss:$8 sps:$4 sm:$0xff]   ;;  %v2457_v8 = vld [vmem:[%s3259_s0 + $0x194] ss:$8 sps:$4 sm:$0xff]   ;;  %v2452_v19 = vld [vmem:[%s3259_s0] ss:$8 sps:$4 sm:$0xff]  }
   0x4   :  { %782 = vmatprep.mubr.bf16.mxu0 %v2454_v6  ;;  %982 = vmatprep.mubr.bf16.mxu1 %v2457_v8  ;;  %v2442_v9 = vld [vmem:[%s3258_s1 + $0x30] sm:$0xff]   ;;  %v2443_v10 = vld [vmem:[%s3258_s1 + $0x38] sm:$0xff]   ;;  %v2444_v11 = vld [vmem:[%s3258_s1 + $0x40] sm:$0xff]  }
   0x5   :  { %v2445_v12 = vld [vmem:[%s3258_s1 + $0x48] sm:$0xff]   ;;  %v2446_v13 = vld [vmem:[%s3258_s1 + $0x50] sm:$0xff]   ;;  %v2447_v14 = vld [vmem:[%s3258_s1 + $0x58] sm:$0xff]  }
   0x6   :  { %753 = vmatpush1.bf16.msra.mxu0 %v2437_v2  ;;  %2420 = vmatpush1.bf16.msra.mxu1 %v2437_v2  ;;  %v2448_v15 = vld [vmem:[%s3258_s1 + $0x60] sm:$0xff]   ;;  %v2449_v16 = vld [vmem:[%s3258_s1 + $0x68] sm:$0xff]   ;;  %v2450_v17 = vld [vmem:[%s3258_s1 + $0x70] sm:$0xff]  }
   0x7   :  { %754 = vmatprep.subr.bf16.mxu0 %v2602_v0  ;;  %2405 = vmatprep.subr.bf16.mxu1 %v2602_v0  ;;  %v2451_v18 = vld [vmem:[%s3258_s1 + $0x78] sm:$0xff]   ;;  %v2460_v22 = vld [vmem:[%s3259_s0 + $0x1a4] ss:$8 sps:$4 sm:$0xff]   ;;  %v2463_v24 = vld [vmem:[%s3259_s0 + $0x1a0] ss:$8 sps:$4 sm:$0xff]  }
   0x8   :  { %v2455_v20 = vld [vmem:[%s3259_s0 + $0x190] ss:$8 sps:$4 sm:$0xff]   ;;  %v2458_v21 = vld [vmem:[%s3259_s0 + $0x14] ss:$8 sps:$4 sm:$0xff]   ;;  %v2464_v25 = vld [vmem:[%s3259_s0 + $0x24] ss:$8 sps:$4 sm:$0xff]  }
   0x9   :  { %v2462_v23 = vld [vmem:[%s3259_s0 + $0x10] ss:$8 sps:$4 sm:$0xff]   ;;  %v2466_v26 = vld [vmem:[%s3259_s0 + $0x1b4] ss:$8 sps:$4 sm:$0xff]   ;;  %v2468_v27 = vld [vmem:[%s3259_s0 + $0x20] ss:$8 sps:$4 sm:$0xff]  }
   0xa   :  { %755 = vmatpush1.bf16.msra.mxu0 %v2438_v3  ;;  %2421 = vmatpush1.bf16.msra.mxu1 %v2438_v3  ;;  %v2469_v28 = vld [vmem:[%s3259_s0 + $0x1b0] ss:$8 sps:$4 sm:$0xff]   ;;  %v2470_v29 = vld [vmem:[%s3259_s0 + $0x34] ss:$8 sps:$4 sm:$0xff]   ;;  %v2472_v30 = vld [vmem:[%s3259_s0 + $0x1c4] ss:$8 sps:$4 sm:$0xff]  }
   0xb   :  { %756 = vmatprep.subr.bf16.mxu0 %v2602_v0  ;;  %2406 = vmatprep.subr.bf16.mxu1 %v2602_v0  ;;  %v2474_v31 = vld [vmem:[%s3259_s0 + $0x30] ss:$8 sps:$4 sm:$0xff]   ;;  %v2475_v32 = vld [vmem:[%s3259_s0 + $0x1c0] ss:$8 sps:$4 sm:$0xff]   ;;  %v2476_v33 = vld [vmem:[%s3259_s0 + $0x44] ss:$8 sps:$4 sm:$0xff]  }
   0xc   :  { %v2478_v34 = vld [vmem:[%s3259_s0 + $0x1d4] ss:$8 sps:$4 sm:$0xff]   ;;  %v2480_v35 = vld [vmem:[%s3259_s0 + $0x40] ss:$8 sps:$4 sm:$0xff]   ;;  %v2481_v36 = vld [vmem:[%s3259_s0 + $0x1d0] ss:$8 sps:$4 sm:$0xff]  }
   0xd   :  { %v2482_v37 = vld [vmem:[%s3259_s0 + $0x54] ss:$8 sps:$4 sm:$0xff]   ;;  %v2484_v38 = vld [vmem:[%s3259_s0 + $0x1e4] ss:$8 sps:$4 sm:$0xff]   ;;  %v2486_v39 = vld [vmem:[%s3259_s0 + $0x50] ss:$8 sps:$4 sm:$0xff]  }
   0xe   :  { %757 = vmatpush1.bf16.msra.mxu0 %v2439_v4  ;;  %2422 = vmatpush1.bf16.msra.mxu1 %v2439_v4  ;;  %v2487_v40 = vld [vmem:[%s3259_s0 + $0x1e0] ss:$8 sps:$4 sm:$0xff]   ;;  %v2488_v41 = vld [vmem:[%s3259_s0 + $0x64] ss:$8 sps:$4 sm:$0xff]   ;;  %v2490_v42 = vld [vmem:[%s3259_s0 + $0x1f4] ss:$8 sps:$4 sm:$0xff]  }
   0xf   :  { %758 = vmatprep.subr.bf16.mxu0 %v2602_v0  ;;  %2407 = vmatprep.subr.bf16.mxu1 %v2602_v0  ;;  %v2492_v43 = vld [vmem:[%s3259_s0 + $0x60] ss:$8 sps:$4 sm:$0xff]   ;;  %v2493_v44 = vld [vmem:[%s3259_s0 + $0x1f0] ss:$8 sps:$4 sm:$0xff]   ;;  %v2494_v45 = vld [vmem:[%s3259_s0 + $0x74] ss:$8 sps:$4 sm:$0xff]  }
  0x10   :  { %v2496_v46 = vld [vmem:[%s3259_s0 + $0x204] ss:$8 sps:$4 sm:$0xff]   ;;  %v2498_v47 = vld [vmem:[%s3259_s0 + $0x70] ss:$8 sps:$4 sm:$0xff]   ;;  %v2499_v48 = vld [vmem:[%s3259_s0 + $0x200] ss:$8 sps:$4 sm:$0xff]  }
  0x11   :  { %v2500_v49 = vld [vmem:[%s3259_s0 + $0x84] ss:$8 sps:$4 sm:$0xff]   ;;  %v2502_v50 = vld [vmem:[%s3259_s0 + $0x214] ss:$8 sps:$4 sm:$0xff]   ;;  %v2504_v51 = vld [vmem:[%s3259_s0 + $0x80] ss:$8 sps:$4 sm:$0xff]  }
  0x12   :  { %759 = vmatpush1.bf16.msra.mxu0 %v2440_v5  ;;  %2423 = vmatpush1.bf16.msra.mxu1 %v2440_v5  ;;  %v2505_v52 = vld [vmem:[%s3259_s0 + $0x210] ss:$8 sps:$4 sm:$0xff]   ;;  %v2506_v53 = vld [vmem:[%s3259_s0 + $0x94] ss:$8 sps:$4 sm:$0xff]   ;;  %v2508_v54 = vld [vmem:[%s3259_s0 + $0x224] ss:$8 sps:$4 sm:$0xff]  }
  0x13   :  { %760 = vmatprep.subr.bf16.mxu0 %v2602_v0  ;;  %2408 = vmatprep.subr.bf16.mxu1 %v2602_v0  ;;  %v2510_v55 = vld [vmem:[%s3259_s0 + $0x90] ss:$8 sps:$4 sm:$0xff]   ;;  %v2511_v56 = vld [vmem:[%s3259_s0 + $0x220] ss:$8 sps:$4 sm:$0xff]   ;;  %v2512_v57 = vld [vmem:[%s3259_s0 + $0xa4] ss:$8 sps:$4 sm:$0xff]  }
  0x14   :  { %v2514_v58 = vld [vmem:[%s3259_s0 + $0x234] ss:$8 sps:$4 sm:$0xff]   ;;  %v2516_v59 = vld [vmem:[%s3259_s0 + $0xa0] ss:$8 sps:$4 sm:$0xff]   ;;  %v2517_v60 = vld [vmem:[%s3259_s0 + $0x230] ss:$8 sps:$4 sm:$0xff]  }
  0x15   :  { %v2518_v61 = vld [vmem:[%s3259_s0 + $0xb4] ss:$8 sps:$4 sm:$0xff]   ;;  %v2520_v62 = vld [vmem:[%s3259_s0 + $0x244] ss:$8 sps:$4 sm:$0xff]   ;;  %v2522_v63 = vld [vmem:[%s3259_s0 + $0xb0] ss:$8 sps:$4 sm:$0xff]  }
  0x16   :  { %761 = vmatpush1.bf16.msra.mxu0 %v2441_v7  ;;  %2424 = vmatpush1.bf16.msra.mxu1 %v2441_v7  ;;  %v2524_v1 = vld [vmem:[%s3259_s0 + $0xc4] ss:$8 sps:$4 sm:$0xff]   ;;  %v2526_v2 = vld [vmem:[%s3259_s0 + $0x254] ss:$8 sps:$4 sm:$0xff]   ;;  %v2528_v3 = vld [vmem:[%s3259_s0 + $0xc0] ss:$8 sps:$4 sm:$0xff]  }
  0x17   :  { %762 = vmatprep.subr.bf16.mxu0 %v2602_v0  ;;  %2409 = vmatprep.subr.bf16.mxu1 %v2602_v0  ;;  %v2529_v4 = vld [vmem:[%s3259_s0 + $0x250] ss:$8 sps:$4 sm:$0xff]   ;;  %v2530_v5 = vld [vmem:[%s3259_s0 + $0xd4] ss:$8 sps:$4 sm:$0xff]   ;;  %v2532_v6 = vld [vmem:[%s3259_s0 + $0x264] ss:$8 sps:$4 sm:$0xff]  }
  0x18   :  { %v2534_v7 = vld [vmem:[%s3259_s0 + $0xd0] ss:$8 sps:$4 sm:$0xff]   ;;  %v2535_v8 = vld [vmem:[%s3259_s0 + $0x260] ss:$8 sps:$4 sm:$0xff]  }
  0x1a   :  { %763 = vmatpush1.bf16.msra.mxu0 %v2442_v9  ;;  %2425 = vmatpush1.bf16.msra.mxu1 %v2442_v9  ;;  %v2536_v9 = vld [vmem:[%s3259_s0 + $0xe4] ss:$8 sps:$4 sm:$0xff]  }
  0x1b   :  { %764 = vmatprep.subr.bf16.mxu0 %v2602_v0  ;;  %2410 = vmatprep.subr.bf16.mxu1 %v2602_v0 }
  0x1e   :  { %765 = vmatpush1.bf16.msra.mxu0 %v2443_v10  ;;  %2426 = vmatpush1.bf16.msra.mxu1 %v2443_v10  ;;  %v2538_v10 = vld [vmem:[%s3259_s0 + $0x274] ss:$8 sps:$4 sm:$0xff]  }
  0x1f   :  { %766 = vmatprep.subr.bf16.mxu0 %v2602_v0  ;;  %2411 = vmatprep.subr.bf16.mxu1 %v2602_v0 }
  0x22   :  { %767 = vmatpush1.bf16.msra.mxu0 %v2444_v11  ;;  %2427 = vmatpush1.bf16.msra.mxu1 %v2444_v11  ;;  %v2540_v11 = vld [vmem:[%s3259_s0 + $0xe0] ss:$8 sps:$4 sm:$0xff]  }
  0x23   :  { %768 = vmatprep.subr.bf16.mxu0 %v2602_v0  ;;  %2412 = vmatprep.subr.bf16.mxu1 %v2602_v0 }
  0x26   :  { %769 = vmatpush1.bf16.msra.mxu0 %v2445_v12  ;;  %2428 = vmatpush1.bf16.msra.mxu1 %v2445_v12  ;;  %v2541_v12 = vld [vmem:[%s3259_s0 + $0x270] ss:$8 sps:$4 sm:$0xff]  }
  0x27   :  { %770 = vmatprep.subr.bf16.mxu0 %v2602_v0  ;;  %2413 = vmatprep.subr.bf16.mxu1 %v2602_v0 }
  0x2a   :  { %771 = vmatpush1.bf16.msra.mxu0 %v2446_v13  ;;  %2429 = vmatpush1.bf16.msra.mxu1 %v2446_v13  ;;  %v2542_v13 = vld [vmem:[%s3259_s0 + $0xf4] ss:$8 sps:$4 sm:$0xff]  }
  0x2b   :  { %772 = vmatprep.subr.bf16.mxu0 %v2602_v0  ;;  %2414 = vmatprep.subr.bf16.mxu1 %v2602_v0 }
  0x2e   :  { %773 = vmatpush1.bf16.msra.mxu0 %v2447_v14  ;;  %2430 = vmatpush1.bf16.msra.mxu1 %v2447_v14  ;;  %v2544_v14 = vld [vmem:[%s3259_s0 + $0x284] ss:$8 sps:$4 sm:$0xff]  }
  0x2f   :  { %774 = vmatprep.subr.bf16.mxu0 %v2602_v0  ;;  %2415 = vmatprep.subr.bf16.mxu1 %v2602_v0 }
  0x32   :  { %775 = vmatpush1.bf16.msra.mxu0 %v2448_v15  ;;  %2431 = vmatpush1.bf16.msra.mxu1 %v2448_v15  ;;  %v2546_v15 = vld [vmem:[%s3259_s0 + $0xf0] ss:$8 sps:$4 sm:$0xff]  }
  0x33   :  { %776 = vmatprep.subr.bf16.mxu0 %v2602_v0  ;;  %2416 = vmatprep.subr.bf16.mxu1 %v2602_v0 }
  0x36   :  { %777 = vmatpush1.bf16.msra.mxu0 %v2449_v16  ;;  %2432 = vmatpush1.bf16.msra.mxu1 %v2449_v16  ;;  %v2547_v16 = vld [vmem:[%s3259_s0 + $0x280] ss:$8 sps:$4 sm:$0xff]  }
  0x37   :  { %778 = vmatprep.subr.bf16.mxu0 %v2602_v0  ;;  %2417 = vmatprep.subr.bf16.mxu1 %v2602_v0 }
  0x3a   :  { %779 = vmatpush1.bf16.msra.mxu0 %v2450_v17  ;;  %2433 = vmatpush1.bf16.msra.mxu1 %v2450_v17  ;;  %v2548_v17 = vld [vmem:[%s3259_s0 + $0x104] ss:$8 sps:$4 sm:$0xff]  }
  0x3b   :  { %780 = vmatprep.subr.bf16.mxu0 %v2602_v0  ;;  %2418 = vmatprep.subr.bf16.mxu1 %v2602_v0  ;;  %v2523_v0 = vld [vmem:[%s3259_s0 + $0x240] ss:$8 sps:$4 sm:$0xff]  }
  0x3e   :  { %781 = vmatpush1.bf16.msra.mxu0 %v2451_v18  ;;  %2434 = vmatpush1.bf16.msra.mxu1 %v2451_v18  ;;  %v2550_v18 = vld [vmem:[%s3259_s0 + $0x294] ss:$8 sps:$4 sm:$0xff]  }
  0x41   :  { %783 = vmatmul.mubr.bf16.vlgmr.msra.gmra.mrb[0].mxu0 %v2452_v19  ;;  %983 = vmatmul.mubr.bf16.vlgmr.msra.gmra.mrb[0].mxu1 %v2455_v20  ;;  %v2552_v19 = vld [vmem:[%s3259_s0 + $0x100] ss:$8 sps:$4 sm:$0xff]   ;;  %v2553_v20 = vld [vmem:[%s3259_s0 + $0x290] ss:$8 sps:$4 sm:$0xff]  }
  0x42   :  { %790 = vmatprep.mubr.bf16.mxu0 %v2458_v21  ;;  %990 = vmatprep.mubr.bf16.mxu1 %v2460_v22  ;;  %v2554_v21 = vld [vmem:[%s3259_s0 + $0x114] ss:$8 sps:$4 sm:$0xff]   ;;  %v2556_v22 = vld [vmem:[%s3259_s0 + $0x2a4] ss:$8 sps:$4 sm:$0xff]  }
  0x49   :  { %791 = vmatmul.mubr.bf16.gmra.mrb[4].mxu0 %v2462_v23  ;;  %991 = vmatmul.mubr.bf16.gmra.mrb[4].mxu1 %v2463_v24  ;;  %v2558_v23 = vld [vmem:[%s3259_s0 + $0x110] ss:$8 sps:$4 sm:$0xff]   ;;  %v2559_v24 = vld [vmem:[%s3259_s0 + $0x2a0] ss:$8 sps:$4 sm:$0xff]  }
  0x4a   :  { %798 = vmatprep.mubr.bf16.mxu0 %v2464_v25  ;;  %998 = vmatprep.mubr.bf16.mxu1 %v2466_v26  ;;  %v2560_v25 = vld [vmem:[%s3259_s0 + $0x124] ss:$8 sps:$4 sm:$0xff]   ;;  %v2562_v26 = vld [vmem:[%s3259_s0 + $0x2b4] ss:$8 sps:$4 sm:$0xff]  }
  0x51   :  { %799 = vmatmul.mubr.bf16.gmra.mrb[8].mxu0 %v2468_v27  ;;  %999 = vmatmul.mubr.bf16.gmra.mrb[8].mxu1 %v2469_v28  ;;  %v2564_v27 = vld [vmem:[%s3259_s0 + $0x120] ss:$8 sps:$4 sm:$0xff]   ;;  %v2565_v28 = vld [vmem:[%s3259_s0 + $0x2b0] ss:$8 sps:$4 sm:$0xff]  }
  0x52   :  { %806 = vmatprep.mubr.bf16.mxu0 %v2470_v29  ;;  %1006 = vmatprep.mubr.bf16.mxu1 %v2472_v30  ;;  %v2566_v29 = vld [vmem:[%s3259_s0 + $0x134] ss:$8 sps:$4 sm:$0xff]   ;;  %v2568_v30 = vld [vmem:[%s3259_s0 + $0x2c4] ss:$8 sps:$4 sm:$0xff]  }
  0x59   :  { %807 = vmatmul.mubr.bf16.gmra.mrb[12].mxu0 %v2474_v31  ;;  %1007 = vmatmul.mubr.bf16.gmra.mrb[12].mxu1 %v2475_v32  ;;  %v2570_v31 = vld [vmem:[%s3259_s0 + $0x130] ss:$8 sps:$4 sm:$0xff]   ;;  %v2571_v32 = vld [vmem:[%s3259_s0 + $0x2c0] ss:$8 sps:$4 sm:$0xff]  }
  0x5a   :  { %814 = vmatprep.mubr.bf16.mxu0 %v2476_v33  ;;  %1014 = vmatprep.mubr.bf16.mxu1 %v2478_v34  ;;  %v2572_v33 = vld [vmem:[%s3259_s0 + $0x144] ss:$8 sps:$4 sm:$0xff]   ;;  %v2574_v34 = vld [vmem:[%s3259_s0 + $0x2d4] ss:$8 sps:$4 sm:$0xff]  }
  0x61   :  { %815 = vmatmul.mubr.bf16.gmra.mrb[16].mxu0 %v2480_v35  ;;  %1015 = vmatmul.mubr.bf16.gmra.mrb[16].mxu1 %v2481_v36  ;;  %v2576_v35 = vld [vmem:[%s3259_s0 + $0x140] ss:$8 sps:$4 sm:$0xff]   ;;  %v2577_v36 = vld [vmem:[%s3259_s0 + $0x2d0] ss:$8 sps:$4 sm:$0xff]  }
  0x62   :  { %822 = vmatprep.mubr.bf16.mxu0 %v2482_v37  ;;  %1022 = vmatprep.mubr.bf16.mxu1 %v2484_v38  ;;  %v2578_v37 = vld [vmem:[%s3259_s0 + $0x154] ss:$8 sps:$4 sm:$0xff]   ;;  %v2580_v38 = vld [vmem:[%s3259_s0 + $0x2e4] ss:$8 sps:$4 sm:$0xff]  }
  0x69   :  { %823 = vmatmul.mubr.bf16.gmra.mrb[20].mxu0 %v2486_v39  ;;  %1023 = vmatmul.mubr.bf16.gmra.mrb[20].mxu1 %v2487_v40  ;;  %v2582_v39 = vld [vmem:[%s3259_s0 + $0x150] ss:$8 sps:$4 sm:$0xff]   ;;  %v2583_v40 = vld [vmem:[%s3259_s0 + $0x2e0] ss:$8 sps:$4 sm:$0xff]  }
  0x6a   :  { %830 = vmatprep.mubr.bf16.mxu0 %v2488_v41  ;;  %1030 = vmatprep.mubr.bf16.mxu1 %v2490_v42  ;;  %v2584_v41 = vld [vmem:[%s3259_s0 + $0x164] ss:$8 sps:$4 sm:$0xff]   ;;  %v2586_v42 = vld [vmem:[%s3259_s0 + $0x2f4] ss:$8 sps:$4 sm:$0xff]  }
  0x71   :  { %831 = vmatmul.mubr.bf16.gmra.mrb[24].mxu0 %v2492_v43  ;;  %1031 = vmatmul.mubr.bf16.gmra.mrb[24].mxu1 %v2493_v44  ;;  %v2588_v43 = vld [vmem:[%s3259_s0 + $0x160] ss:$8 sps:$4 sm:$0xff]   ;;  %v2589_v44 = vld [vmem:[%s3259_s0 + $0x2f0] ss:$8 sps:$4 sm:$0xff]  }
  0x72   :  { %838 = vmatprep.mubr.bf16.mxu0 %v2494_v45  ;;  %1038 = vmatprep.mubr.bf16.mxu1 %v2496_v46  ;;  %v2590_v45 = vld [vmem:[%s3259_s0 + $0x174] ss:$8 sps:$4 sm:$0xff]   ;;  %v2592_v46 = vld [vmem:[%s3259_s0 + $0x304] ss:$8 sps:$4 sm:$0xff]  }
  0x79   :  { %839 = vmatmul.mubr.bf16.gmra.mrb[28].mxu0 %v2498_v47  ;;  %1039 = vmatmul.mubr.bf16.gmra.mrb[28].mxu1 %v2499_v48  ;;  %v2594_v47 = vld [vmem:[%s3259_s0 + $0x170] ss:$8 sps:$4 sm:$0xff]   ;;  %v2595_v48 = vld [vmem:[%s3259_s0 + $0x300] ss:$8 sps:$4 sm:$0xff]  }
  0x7a   :  { %846 = vmatprep.mubr.bf16.mxu0 %v2500_v49  ;;  %1046 = vmatprep.mubr.bf16.mxu1 %v2502_v50  ;;  %v2596_v49 = vld [vmem:[%s3259_s0 + $0x184] ss:$8 sps:$4 sm:$0xff]   ;;  %v2598_v50 = vld [vmem:[%s3259_s0 + $0x314] ss:$8 sps:$4 sm:$0xff]  }
  0x81   :  { %847 = vmatmul.mubr.bf16.gmra.mrb[32].mxu0 %v2504_v51  ;;  %1047 = vmatmul.mubr.bf16.gmra.mrb[32].mxu1 %v2505_v52  ;;  %v2600_v51 = vld [vmem:[%s3259_s0 + $0x180] ss:$8 sps:$4 sm:$0xff]   ;;  %v2601_v52 = vld [vmem:[%s3259_s0 + $0x310] ss:$8 sps:$4 sm:$0xff]  }
  0x82   :  { %854 = vmatprep.mubr.bf16.mxu0 %v2506_v53  ;;  %1054 = vmatprep.mubr.bf16.mxu1 %v2508_v54  ;;  %v3006_v53 = vld [vmem:[%s3260_s2] ss:$0 sm:$0xff] }
  0x89   :  { %855 = vmatmul.mubr.bf16.gmra.mrb[36].mxu0 %v2510_v55  ;;  %1055 = vmatmul.mubr.bf16.gmra.mrb[36].mxu1 %v2511_v56 }
  0x8a   :  { %862 = vmatprep.mubr.bf16.mxu0 %v2512_v57  ;;  %1062 = vmatprep.mubr.bf16.mxu1 %v2514_v58 }
  0x91   :  { %863 = vmatmul.mubr.bf16.gmra.mrb[40].mxu0 %v2516_v59  ;;  %1063 = vmatmul.mubr.bf16.gmra.mrb[40].mxu1 %v2517_v60 }
  0x92   :  { %870 = vmatprep.mubr.bf16.mxu0 %v2518_v61  ;;  %1070 = vmatprep.mubr.bf16.mxu1 %v2520_v62 }
  0x99   :  { %871 = vmatmul.mubr.bf16.gmra.mrb[44].mxu0 %v2522_v63  ;;  %1071 = vmatmul.mubr.bf16.gmra.mrb[44].mxu1 %v2523_v0 }
  0x9a   :  { %878 = vmatprep.mubr.bf16.mxu0 %v2524_v1  ;;  %1078 = vmatprep.mubr.bf16.mxu1 %v2526_v2 }
  0xa1   :  { %879 = vmatmul.mubr.bf16.gmra.mrb[48].mxu0 %v2528_v3  ;;  %1079 = vmatmul.mubr.bf16.gmra.mrb[48].mxu1 %v2529_v4 }
  0xa2   :  { %886 = vmatprep.mubr.bf16.mxu0 %v2530_v5  ;;  %1086 = vmatprep.mubr.bf16.mxu1 %v2532_v6 }
  0xa9   :  { %887 = vmatmul.mubr.bf16.gmra.mrb[52].mxu0 %v2534_v7  ;;  %1087 = vmatmul.mubr.bf16.gmra.mrb[52].mxu1 %v2535_v8 }
  0xaa   :  { %894 = vmatprep.mubr.bf16.mxu0 %v2536_v9  ;;  %1094 = vmatprep.mubr.bf16.mxu1 %v2538_v10 }
  0xb1   :  { %895 = vmatmul.mubr.bf16.gmra.mrb[56].mxu0 %v2540_v11  ;;  %1095 = vmatmul.mubr.bf16.gmra.mrb[56].mxu1 %v2541_v12 }
  0xb2   :  { %902 = vmatprep.mubr.bf16.mxu0 %v2542_v13  ;;  %1102 = vmatprep.mubr.bf16.mxu1 %v2544_v14 }
  0xb9   :  { %903 = vmatmul.mubr.bf16.gmra.mrb[60].mxu0 %v2546_v15  ;;  %1103 = vmatmul.mubr.bf16.gmra.mrb[60].mxu1 %v2547_v16 }
  0xba   :  { %910 = vmatprep.mubr.bf16.mxu0 %v2548_v17  ;;  %1110 = vmatprep.mubr.bf16.mxu1 %v2550_v18 }
  0xc1   :  { %911 = vmatmul.mubr.bf16.gmra.mrb[64].mxu0 %v2552_v19  ;;  %1111 = vmatmul.mubr.bf16.gmra.mrb[64].mxu1 %v2553_v20 }
  0xc2   :  { %918 = vmatprep.mubr.bf16.mxu0 %v2554_v21  ;;  %1118 = vmatprep.mubr.bf16.mxu1 %v2556_v22 }
  0xc9   :  { %919 = vmatmul.mubr.bf16.gmra.mrb[68].mxu0 %v2558_v23  ;;  %1119 = vmatmul.mubr.bf16.gmra.mrb[68].mxu1 %v2559_v24 }
  0xca   :  { %926 = vmatprep.mubr.bf16.mxu0 %v2560_v25  ;;  %1126 = vmatprep.mubr.bf16.mxu1 %v2562_v26 }
  0xd1   :  { %927 = vmatmul.mubr.bf16.gmra.mrb[72].mxu0 %v2564_v27  ;;  %1127 = vmatmul.mubr.bf16.gmra.mrb[72].mxu1 %v2565_v28 }
  0xd2   :  { %934 = vmatprep.mubr.bf16.mxu0 %v2566_v29  ;;  %1134 = vmatprep.mubr.bf16.mxu1 %v2568_v30 }
  0xd9   :  { %935 = vmatmul.mubr.bf16.gmra.mrb[76].mxu0 %v2570_v31  ;;  %1135 = vmatmul.mubr.bf16.gmra.mrb[76].mxu1 %v2571_v32 }
  0xda   :  { %942 = vmatprep.mubr.bf16.mxu0 %v2572_v33  ;;  %1142 = vmatprep.mubr.bf16.mxu1 %v2574_v34 }
  0xe1   :  { %943 = vmatmul.mubr.bf16.gmra.mrb[80].mxu0 %v2576_v35  ;;  %1143 = vmatmul.mubr.bf16.gmra.mrb[80].mxu1 %v2577_v36 }
  0xe2   :  { %950 = vmatprep.mubr.bf16.mxu0 %v2578_v37  ;;  %1150 = vmatprep.mubr.bf16.mxu1 %v2580_v38 }
  0xe9   :  { %951 = vmatmul.mubr.bf16.gmra.mrb[84].mxu0 %v2582_v39  ;;  %1151 = vmatmul.mubr.bf16.gmra.mrb[84].mxu1 %v2583_v40 }
  0xea   :  { %958 = vmatprep.mubr.bf16.mxu0 %v2584_v41  ;;  %1158 = vmatprep.mubr.bf16.mxu1 %v2586_v42 }
  0xf1   :  { %959 = vmatmul.mubr.bf16.gmra.mrb[88].mxu0 %v2588_v43  ;;  %1159 = vmatmul.mubr.bf16.gmra.mrb[88].mxu1 %v2589_v44 }
  0xf2   :  { %966 = vmatprep.mubr.bf16.mxu0 %v2590_v45  ;;  %1166 = vmatprep.mubr.bf16.mxu1 %v2592_v46 }
  0xf9   :  { %967 = vmatmul.mubr.bf16.gmra.mrb[92].mxu0 %v2594_v47  ;;  %1167 = vmatmul.mubr.bf16.gmra.mrb[92].mxu1 %v2595_v48 }
  0xfa   :  { %974 = vmatprep.mubr.bf16.mxu0 %v2596_v49  ;;  %1174 = vmatprep.mubr.bf16.mxu1 %v2598_v50 }
 0x101   :  { %975 = vmatmul.mubr.bf16.gmra.mrb[96].mxu0 %v2600_v51  ;;  %1175 = vmatmul.mubr.bf16.gmra.mrb[96].mxu1 %v2601_v52 }
 0x114   :  { %v784_v54 = vpop.f32.mrb[0].mxu0  ;;  %v984_v55 = vpop.f32.mrb[0].mxu1 }
 0x115   :  { %v785_v56 = vadd.f32 %v3006_v53, %v784_v54  ;;  %v985_v57 = vadd.f32 %v3006_v53, %v984_v55  ;;  %v786_v58 = vpop.f32.mrb[1].mxu0  ;;  %v986_v59 = vpop.f32.mrb[1].mxu1 }
 0x116   :  { %v787_v60 = vpop.f32.mrb[2].mxu0  ;;  %v987_v61 = vpop.f32.mrb[2].mxu1 }
 0x117   :  { %v788_v62 = vadd.f32 %v3006_v53, %v787_v60  ;;  %v988_v63 = vadd.f32 %v3006_v53, %v987_v61  ;;  %v789_v0 = vpop.f32.mrb[3].mxu0  ;;  %v989_v1 = vpop.f32.mrb[3].mxu1  ;;  %v1183_v2 = vmax.f32 %v785_v56, 0.0  ;;  %v1233_v3 = vmax.f32 %v985_v57, 0.0 }
 0x119   :  { %v1184_v4 = vmax.f32 %v788_v62, 0.0  ;;  %v1234_v5 = vmax.f32 %v988_v63, 0.0 }
 0x11b   :  { %v2107_v6 = vpack.c.bf16 %v1184_v4, %v1183_v2  ;;  %v2232_v7 = vpack.c.bf16 %v1234_v5, %v1233_v3 }
 0x11c   :  { %v792_v8 = vpop.f32.mrb[4].mxu0  ;;  %v992_v9 = vpop.f32.mrb[4].mxu1 }
 0x11d   :  { %2108 = vst [vmem:[%s3261_s3] sm:$0xff] %v2107_v6   ;;  %2378 = vst [vmem:[%s3261_s3 + $0xc8] sm:$0xff] %v2232_v7   ;;  %v793_v10 = vadd.f32 %v3006_v53, %v792_v8  ;;  %v993_v11 = vadd.f32 %v3006_v53, %v992_v9  ;;  %v794_v12 = vpop.f32.mrb[5].mxu0  ;;  %v994_v13 = vpop.f32.mrb[5].mxu1 }
 0x11e   :  { %v795_v14 = vpop.f32.mrb[6].mxu0  ;;  %v995_v15 = vpop.f32.mrb[6].mxu1 }
 0x11f   :  { %v796_v16 = vadd.f32 %v3006_v53, %v795_v14  ;;  %v996_v17 = vadd.f32 %v3006_v53, %v995_v15  ;;  %v797_v18 = vpop.f32.mrb[7].mxu0  ;;  %v997_v19 = vpop.f32.mrb[7].mxu1  ;;  %v1185_v20 = vmax.f32 %v793_v10, 0.0  ;;  %v1235_v21 = vmax.f32 %v993_v11, 0.0 }
 0x121   :  { %v1186_v22 = vmax.f32 %v796_v16, 0.0  ;;  %v1236_v23 = vmax.f32 %v996_v17, 0.0 }
 0x123   :  { %v2112_v24 = vpack.c.bf16 %v1186_v22, %v1185_v20  ;;  %v2237_v25 = vpack.c.bf16 %v1236_v23, %v1235_v21 }
 0x124   :  { %v800_v26 = vpop.f32.mrb[8].mxu0  ;;  %v1000_v27 = vpop.f32.mrb[8].mxu1 }
 0x125   :  { %2354 = vst [vmem:[%s3261_s3 + $0x8] sm:$0xff] %v2112_v24   ;;  %2379 = vst [vmem:[%s3261_s3 + $0xd0] sm:$0xff] %v2237_v25   ;;  %v801_v28 = vadd.f32 %v3006_v53, %v800_v26  ;;  %v1001_v29 = vadd.f32 %v3006_v53, %v1000_v27  ;;  %v802_v30 = vpop.f32.mrb[9].mxu0  ;;  %v1002_v31 = vpop.f32.mrb[9].mxu1 }
 0x126   :  { %v803_v32 = vpop.f32.mrb[10].mxu0  ;;  %v1003_v33 = vpop.f32.mrb[10].mxu1 }
 0x127   :  { %v804_v34 = vadd.f32 %v3006_v53, %v803_v32  ;;  %v1004_v35 = vadd.f32 %v3006_v53, %v1003_v33  ;;  %v805_v36 = vpop.f32.mrb[11].mxu0  ;;  %v1005_v37 = vpop.f32.mrb[11].mxu1  ;;  %v1187_v38 = vmax.f32 %v801_v28, 0.0  ;;  %v1237_v39 = vmax.f32 %v1001_v29, 0.0 }
 0x129   :  { %v1188_v40 = vmax.f32 %v804_v34, 0.0  ;;  %v1238_v41 = vmax.f32 %v1004_v35, 0.0 }
 0x12b   :  { %v2117_v42 = vpack.c.bf16 %v1188_v40, %v1187_v38  ;;  %v2242_v43 = vpack.c.bf16 %v1238_v41, %v1237_v39 }
 0x12c   :  { %v808_v44 = vpop.f32.mrb[12].mxu0  ;;  %v1008_v45 = vpop.f32.mrb[12].mxu1 }
 0x12d   :  { %2355 = vst [vmem:[%s3261_s3 + $0x10] sm:$0xff] %v2117_v42   ;;  %2380 = vst [vmem:[%s3261_s3 + $0xd8] sm:$0xff] %v2242_v43   ;;  %v809_v46 = vadd.f32 %v3006_v53, %v808_v44  ;;  %v1009_v47 = vadd.f32 %v3006_v53, %v1008_v45  ;;  %v810_v48 = vpop.f32.mrb[13].mxu0  ;;  %v1010_v49 = vpop.f32.mrb[13].mxu1 }
 0x12e   :  { %v811_v50 = vpop.f32.mrb[14].mxu0  ;;  %v1011_v51 = vpop.f32.mrb[14].mxu1 }
 0x12f   :  { %v812_v52 = vadd.f32 %v3006_v53, %v811_v50  ;;  %v1012_v54 = vadd.f32 %v3006_v53, %v1011_v51  ;;  %v813_v55 = vpop.f32.mrb[15].mxu0  ;;  %v1013_v56 = vpop.f32.mrb[15].mxu1  ;;  %v1189_v57 = vmax.f32 %v809_v46, 0.0  ;;  %v1239_v58 = vmax.f32 %v1009_v47, 0.0 }
 0x131   :  { %v1190_v59 = vmax.f32 %v812_v52, 0.0  ;;  %v1240_v60 = vmax.f32 %v1012_v54, 0.0 }
 0x133   :  { %v2122_v61 = vpack.c.bf16 %v1190_v59, %v1189_v57  ;;  %v2247_v62 = vpack.c.bf16 %v1240_v60, %v1239_v58 }
 0x134   :  { %v816_v63 = vpop.f32.mrb[16].mxu0  ;;  %v1016_v0 = vpop.f32.mrb[16].mxu1 }
 0x135   :  { %2356 = vst [vmem:[%s3261_s3 + $0x18] sm:$0xff] %v2122_v61   ;;  %2381 = vst [vmem:[%s3261_s3 + $0xe0] sm:$0xff] %v2247_v62   ;;  %v817_v1 = vadd.f32 %v3006_v53, %v816_v63  ;;  %v1017_v2 = vadd.f32 %v3006_v53, %v1016_v0  ;;  %v818_v3 = vpop.f32.mrb[17].mxu0  ;;  %v1018_v4 = vpop.f32.mrb[17].mxu1 }
 0x136   :  { %v819_v5 = vpop.f32.mrb[18].mxu0  ;;  %v1019_v6 = vpop.f32.mrb[18].mxu1 }
 0x137   :  { %v820_v7 = vadd.f32 %v3006_v53, %v819_v5  ;;  %v1020_v8 = vadd.f32 %v3006_v53, %v1019_v6  ;;  %v821_v9 = vpop.f32.mrb[19].mxu0  ;;  %v1021_v10 = vpop.f32.mrb[19].mxu1  ;;  %v1191_v11 = vmax.f32 %v817_v1, 0.0  ;;  %v1241_v12 = vmax.f32 %v1017_v2, 0.0 }
 0x139   :  { %v1192_v13 = vmax.f32 %v820_v7, 0.0  ;;  %v1242_v14 = vmax.f32 %v1020_v8, 0.0 }
 0x13b   :  { %v2127_v15 = vpack.c.bf16 %v1192_v13, %v1191_v11  ;;  %v2252_v16 = vpack.c.bf16 %v1242_v14, %v1241_v12 }
 0x13c   :  { %v824_v17 = vpop.f32.mrb[20].mxu0  ;;  %v1024_v18 = vpop.f32.mrb[20].mxu1 }
 0x13d   :  { %2357 = vst [vmem:[%s3261_s3 + $0x20] sm:$0xff] %v2127_v15   ;;  %2382 = vst [vmem:[%s3261_s3 + $0xe8] sm:$0xff] %v2252_v16   ;;  %v825_v19 = vadd.f32 %v3006_v53, %v824_v17  ;;  %v1025_v20 = vadd.f32 %v3006_v53, %v1024_v18  ;;  %v826_v21 = vpop.f32.mrb[21].mxu0  ;;  %v1026_v22 = vpop.f32.mrb[21].mxu1 }
 0x13e   :  { %v827_v23 = vpop.f32.mrb[22].mxu0  ;;  %v1027_v24 = vpop.f32.mrb[22].mxu1 }
 0x13f   :  { %v828_v25 = vadd.f32 %v3006_v53, %v827_v23  ;;  %v1028_v26 = vadd.f32 %v3006_v53, %v1027_v24  ;;  %v829_v27 = vpop.f32.mrb[23].mxu0  ;;  %v1029_v28 = vpop.f32.mrb[23].mxu1  ;;  %v1193_v29 = vmax.f32 %v825_v19, 0.0  ;;  %v1243_v30 = vmax.f32 %v1025_v20, 0.0 }
 0x141   :  { %v1194_v31 = vmax.f32 %v828_v25, 0.0  ;;  %v1244_v32 = vmax.f32 %v1028_v26, 0.0 }
 0x143   :  { %v2132_v33 = vpack.c.bf16 %v1194_v31, %v1193_v29  ;;  %v2257_v34 = vpack.c.bf16 %v1244_v32, %v1243_v30 }
 0x144   :  { %v832_v35 = vpop.f32.mrb[24].mxu0  ;;  %v1032_v36 = vpop.f32.mrb[24].mxu1 }
 0x145   :  { %2358 = vst [vmem:[%s3261_s3 + $0x28] sm:$0xff] %v2132_v33   ;;  %2383 = vst [vmem:[%s3261_s3 + $0xf0] sm:$0xff] %v2257_v34   ;;  %v833_v37 = vadd.f32 %v3006_v53, %v832_v35  ;;  %v1033_v38 = vadd.f32 %v3006_v53, %v1032_v36  ;;  %v834_v39 = vpop.f32.mrb[25].mxu0  ;;  %v1034_v40 = vpop.f32.mrb[25].mxu1 }
 0x146   :  { %v835_v41 = vpop.f32.mrb[26].mxu0  ;;  %v1035_v42 = vpop.f32.mrb[26].mxu1 }
 0x147   :  { %v836_v43 = vadd.f32 %v3006_v53, %v835_v41  ;;  %v1036_v44 = vadd.f32 %v3006_v53, %v1035_v42  ;;  %v837_v45 = vpop.f32.mrb[27].mxu0  ;;  %v1037_v46 = vpop.f32.mrb[27].mxu1  ;;  %v1195_v47 = vmax.f32 %v833_v37, 0.0  ;;  %v1245_v48 = vmax.f32 %v1033_v38, 0.0 }
 0x149   :  { %v1196_v49 = vmax.f32 %v836_v43, 0.0  ;;  %v1246_v50 = vmax.f32 %v1036_v44, 0.0 }
 0x14b   :  { %v2137_v51 = vpack.c.bf16 %v1196_v49, %v1195_v47  ;;  %v2262_v52 = vpack.c.bf16 %v1246_v50, %v1245_v48 }
 0x14c   :  { %v840_v54 = vpop.f32.mrb[28].mxu0  ;;  %v1040_v55 = vpop.f32.mrb[28].mxu1 }
 0x14d   :  { %2359 = vst [vmem:[%s3261_s3 + $0x30] sm:$0xff] %v2137_v51   ;;  %2384 = vst [vmem:[%s3261_s3 + $0xf8] sm:$0xff] %v2262_v52   ;;  %v841_v56 = vadd.f32 %v3006_v53, %v840_v54  ;;  %v1041_v57 = vadd.f32 %v3006_v53, %v1040_v55  ;;  %v842_v58 = vpop.f32.mrb[29].mxu0  ;;  %v1042_v59 = vpop.f32.mrb[29].mxu1 }
 0x14e   :  { %v843_v60 = vpop.f32.mrb[30].mxu0  ;;  %v1043_v61 = vpop.f32.mrb[30].mxu1 }
 0x14f   :  { %v844_v62 = vadd.f32 %v3006_v53, %v843_v60  ;;  %v1044_v63 = vadd.f32 %v3006_v53, %v1043_v61  ;;  %v845_v0 = vpop.f32.mrb[31].mxu0  ;;  %v1045_v1 = vpop.f32.mrb[31].mxu1  ;;  %v1197_v2 = vmax.f32 %v841_v56, 0.0  ;;  %v1247_v3 = vmax.f32 %v1041_v57, 0.0 }
 0x151   :  { %v1198_v4 = vmax.f32 %v844_v62, 0.0  ;;  %v1248_v5 = vmax.f32 %v1044_v63, 0.0 }
 0x153   :  { %v2142_v6 = vpack.c.bf16 %v1198_v4, %v1197_v2  ;;  %v2267_v7 = vpack.c.bf16 %v1248_v5, %v1247_v3 }
 0x154   :  { %v848_v8 = vpop.f32.mrb[32].mxu0  ;;  %v1048_v9 = vpop.f32.mrb[32].mxu1 }
 0x155   :  { %2360 = vst [vmem:[%s3261_s3 + $0x38] sm:$0xff] %v2142_v6   ;;  %2385 = vst [vmem:[%s3261_s3 + $0x100] sm:$0xff] %v2267_v7   ;;  %v849_v10 = vadd.f32 %v3006_v53, %v848_v8  ;;  %v1049_v11 = vadd.f32 %v3006_v53, %v1048_v9  ;;  %v850_v12 = vpop.f32.mrb[33].mxu0  ;;  %v1050_v13 = vpop.f32.mrb[33].mxu1 }
 0x156   :  { %v851_v14 = vpop.f32.mrb[34].mxu0  ;;  %v1051_v15 = vpop.f32.mrb[34].mxu1 }
 0x157   :  { %v852_v16 = vadd.f32 %v3006_v53, %v851_v14  ;;  %v1052_v17 = vadd.f32 %v3006_v53, %v1051_v15  ;;  %v853_v18 = vpop.f32.mrb[35].mxu0  ;;  %v1053_v19 = vpop.f32.mrb[35].mxu1  ;;  %v1199_v20 = vmax.f32 %v849_v10, 0.0  ;;  %v1249_v21 = vmax.f32 %v1049_v11, 0.0 }
 0x159   :  { %v1200_v22 = vmax.f32 %v852_v16, 0.0  ;;  %v1250_v23 = vmax.f32 %v1052_v17, 0.0 }
 0x15b   :  { %v2147_v24 = vpack.c.bf16 %v1200_v22, %v1199_v20  ;;  %v2272_v25 = vpack.c.bf16 %v1250_v23, %v1249_v21 }
 0x15c   :  { %v856_v26 = vpop.f32.mrb[36].mxu0  ;;  %v1056_v27 = vpop.f32.mrb[36].mxu1 }
 0x15d   :  { %2361 = vst [vmem:[%s3261_s3 + $0x40] sm:$0xff] %v2147_v24   ;;  %2386 = vst [vmem:[%s3261_s3 + $0x108] sm:$0xff] %v2272_v25   ;;  %v857_v28 = vadd.f32 %v3006_v53, %v856_v26  ;;  %v1057_v29 = vadd.f32 %v3006_v53, %v1056_v27  ;;  %v858_v30 = vpop.f32.mrb[37].mxu0  ;;  %v1058_v31 = vpop.f32.mrb[37].mxu1 }
 0x15e   :  { %v859_v32 = vpop.f32.mrb[38].mxu0  ;;  %v1059_v33 = vpop.f32.mrb[38].mxu1 }
 0x15f   :  { %v860_v34 = vadd.f32 %v3006_v53, %v859_v32  ;;  %v1060_v35 = vadd.f32 %v3006_v53, %v1059_v33  ;;  %v861_v36 = vpop.f32.mrb[39].mxu0  ;;  %v1061_v37 = vpop.f32.mrb[39].mxu1  ;;  %v1201_v38 = vmax.f32 %v857_v28, 0.0  ;;  %v1251_v39 = vmax.f32 %v1057_v29, 0.0 }
 0x161   :  { %v1202_v40 = vmax.f32 %v860_v34, 0.0  ;;  %v1252_v41 = vmax.f32 %v1060_v35, 0.0 }
 0x163   :  { %v2152_v42 = vpack.c.bf16 %v1202_v40, %v1201_v38  ;;  %v2277_v43 = vpack.c.bf16 %v1252_v41, %v1251_v39 }
 0x164   :  { %v864_v44 = vpop.f32.mrb[40].mxu0  ;;  %v1064_v45 = vpop.f32.mrb[40].mxu1 }
 0x165   :  { %2362 = vst [vmem:[%s3261_s3 + $0x48] sm:$0xff] %v2152_v42   ;;  %2387 = vst [vmem:[%s3261_s3 + $0x110] sm:$0xff] %v2277_v43   ;;  %v865_v46 = vadd.f32 %v3006_v53, %v864_v44  ;;  %v1065_v47 = vadd.f32 %v3006_v53, %v1064_v45  ;;  %v866_v48 = vpop.f32.mrb[41].mxu0  ;;  %v1066_v49 = vpop.f32.mrb[41].mxu1 }
 0x166   :  { %v867_v50 = vpop.f32.mrb[42].mxu0  ;;  %v1067_v51 = vpop.f32.mrb[42].mxu1 }
 0x167   :  { %v868_v52 = vadd.f32 %v3006_v53, %v867_v50  ;;  %v1068_v54 = vadd.f32 %v3006_v53, %v1067_v51  ;;  %v869_v55 = vpop.f32.mrb[43].mxu0  ;;  %v1069_v56 = vpop.f32.mrb[43].mxu1  ;;  %v1203_v57 = vmax.f32 %v865_v46, 0.0  ;;  %v1253_v58 = vmax.f32 %v1065_v47, 0.0 }
 0x169   :  { %v1204_v59 = vmax.f32 %v868_v52, 0.0  ;;  %v1254_v60 = vmax.f32 %v1068_v54, 0.0 }
 0x16b   :  { %v2157_v61 = vpack.c.bf16 %v1204_v59, %v1203_v57  ;;  %v2282_v62 = vpack.c.bf16 %v1254_v60, %v1253_v58 }
 0x16c   :  { %v872_v63 = vpop.f32.mrb[44].mxu0  ;;  %v1072_v0 = vpop.f32.mrb[44].mxu1 }
 0x16d   :  { %2363 = vst [vmem:[%s3261_s3 + $0x50] sm:$0xff] %v2157_v61   ;;  %2388 = vst [vmem:[%s3261_s3 + $0x118] sm:$0xff] %v2282_v62   ;;  %v873_v1 = vadd.f32 %v3006_v53, %v872_v63  ;;  %v1073_v2 = vadd.f32 %v3006_v53, %v1072_v0  ;;  %v874_v3 = vpop.f32.mrb[45].mxu0  ;;  %v1074_v4 = vpop.f32.mrb[45].mxu1 }
 0x16e   :  { %v875_v5 = vpop.f32.mrb[46].mxu0  ;;  %v1075_v6 = vpop.f32.mrb[46].mxu1 }
 0x16f   :  { %v876_v7 = vadd.f32 %v3006_v53, %v875_v5  ;;  %v1076_v8 = vadd.f32 %v3006_v53, %v1075_v6  ;;  %v877_v9 = vpop.f32.mrb[47].mxu0  ;;  %v1077_v10 = vpop.f32.mrb[47].mxu1  ;;  %v1205_v11 = vmax.f32 %v873_v1, 0.0  ;;  %v1255_v12 = vmax.f32 %v1073_v2, 0.0 }
 0x171   :  { %v1206_v13 = vmax.f32 %v876_v7, 0.0  ;;  %v1256_v14 = vmax.f32 %v1076_v8, 0.0 }
 0x173   :  { %v2162_v15 = vpack.c.bf16 %v1206_v13, %v1205_v11  ;;  %v2287_v16 = vpack.c.bf16 %v1256_v14, %v1255_v12 }
 0x174   :  { %v880_v17 = vpop.f32.mrb[48].mxu0  ;;  %v1080_v18 = vpop.f32.mrb[48].mxu1 }
 0x175   :  { %2364 = vst [vmem:[%s3261_s3 + $0x58] sm:$0xff] %v2162_v15   ;;  %2389 = vst [vmem:[%s3261_s3 + $0x120] sm:$0xff] %v2287_v16   ;;  %v881_v19 = vadd.f32 %v3006_v53, %v880_v17  ;;  %v1081_v20 = vadd.f32 %v3006_v53, %v1080_v18  ;;  %v882_v21 = vpop.f32.mrb[49].mxu0  ;;  %v1082_v22 = vpop.f32.mrb[49].mxu1 }
 0x176   :  { %v883_v23 = vpop.f32.mrb[50].mxu0  ;;  %v1083_v24 = vpop.f32.mrb[50].mxu1 }
 0x177   :  { %v884_v25 = vadd.f32 %v3006_v53, %v883_v23  ;;  %v1084_v26 = vadd.f32 %v3006_v53, %v1083_v24  ;;  %v885_v27 = vpop.f32.mrb[51].mxu0  ;;  %v1085_v28 = vpop.f32.mrb[51].mxu1  ;;  %v1207_v29 = vmax.f32 %v881_v19, 0.0  ;;  %v1257_v30 = vmax.f32 %v1081_v20, 0.0 }
 0x179   :  { %v1208_v31 = vmax.f32 %v884_v25, 0.0  ;;  %v1258_v32 = vmax.f32 %v1084_v26, 0.0 }
 0x17b   :  { %v2167_v33 = vpack.c.bf16 %v1208_v31, %v1207_v29  ;;  %v2292_v34 = vpack.c.bf16 %v1258_v32, %v1257_v30 }
 0x17c   :  { %v888_v35 = vpop.f32.mrb[52].mxu0  ;;  %v1088_v36 = vpop.f32.mrb[52].mxu1 }
 0x17d   :  { %2365 = vst [vmem:[%s3261_s3 + $0x60] sm:$0xff] %v2167_v33   ;;  %2390 = vst [vmem:[%s3261_s3 + $0x128] sm:$0xff] %v2292_v34   ;;  %v889_v37 = vadd.f32 %v3006_v53, %v888_v35  ;;  %v1089_v38 = vadd.f32 %v3006_v53, %v1088_v36  ;;  %v890_v39 = vpop.f32.mrb[53].mxu0  ;;  %v1090_v40 = vpop.f32.mrb[53].mxu1 }
 0x17e   :  { %v891_v41 = vpop.f32.mrb[54].mxu0  ;;  %v1091_v42 = vpop.f32.mrb[54].mxu1 }
 0x17f   :  { %v892_v43 = vadd.f32 %v3006_v53, %v891_v41  ;;  %v1092_v44 = vadd.f32 %v3006_v53, %v1091_v42  ;;  %v893_v45 = vpop.f32.mrb[55].mxu0  ;;  %v1093_v46 = vpop.f32.mrb[55].mxu1  ;;  %v1209_v47 = vmax.f32 %v889_v37, 0.0  ;;  %v1259_v48 = vmax.f32 %v1089_v38, 0.0 }
 0x181   :  { %v1210_v49 = vmax.f32 %v892_v43, 0.0  ;;  %v1260_v50 = vmax.f32 %v1092_v44, 0.0 }
 0x183   :  { %v2172_v51 = vpack.c.bf16 %v1210_v49, %v1209_v47  ;;  %v2297_v52 = vpack.c.bf16 %v1260_v50, %v1259_v48 }
 0x184   :  { %v896_v54 = vpop.f32.mrb[56].mxu0  ;;  %v1096_v55 = vpop.f32.mrb[56].mxu1 }
 0x185   :  { %2366 = vst [vmem:[%s3261_s3 + $0x68] sm:$0xff] %v2172_v51   ;;  %2391 = vst [vmem:[%s3261_s3 + $0x130] sm:$0xff] %v2297_v52   ;;  %v897_v56 = vadd.f32 %v3006_v53, %v896_v54  ;;  %v1097_v57 = vadd.f32 %v3006_v53, %v1096_v55  ;;  %v898_v58 = vpop.f32.mrb[57].mxu0  ;;  %v1098_v59 = vpop.f32.mrb[57].mxu1 }
 0x186   :  { %v899_v60 = vpop.f32.mrb[58].mxu0  ;;  %v1099_v61 = vpop.f32.mrb[58].mxu1 }
 0x187   :  { %v900_v62 = vadd.f32 %v3006_v53, %v899_v60  ;;  %v1100_v63 = vadd.f32 %v3006_v53, %v1099_v61  ;;  %v901_v0 = vpop.f32.mrb[59].mxu0  ;;  %v1101_v1 = vpop.f32.mrb[59].mxu1  ;;  %v1211_v2 = vmax.f32 %v897_v56, 0.0  ;;  %v1261_v3 = vmax.f32 %v1097_v57, 0.0 }
 0x189   :  { %v1212_v4 = vmax.f32 %v900_v62, 0.0  ;;  %v1262_v5 = vmax.f32 %v1100_v63, 0.0 }
 0x18b   :  { %v2177_v6 = vpack.c.bf16 %v1212_v4, %v1211_v2  ;;  %v2302_v7 = vpack.c.bf16 %v1262_v5, %v1261_v3 }
 0x18c   :  { %v904_v8 = vpop.f32.mrb[60].mxu0  ;;  %v1104_v9 = vpop.f32.mrb[60].mxu1 }
 0x18d   :  { %2367 = vst [vmem:[%s3261_s3 + $0x70] sm:$0xff] %v2177_v6   ;;  %2392 = vst [vmem:[%s3261_s3 + $0x138] sm:$0xff] %v2302_v7   ;;  %v905_v10 = vadd.f32 %v3006_v53, %v904_v8  ;;  %v1105_v11 = vadd.f32 %v3006_v53, %v1104_v9  ;;  %v906_v12 = vpop.f32.mrb[61].mxu0  ;;  %v1106_v13 = vpop.f32.mrb[61].mxu1 }
 0x18e   :  { %v907_v14 = vpop.f32.mrb[62].mxu0  ;;  %v1107_v15 = vpop.f32.mrb[62].mxu1 }
 0x18f   :  { %v908_v16 = vadd.f32 %v3006_v53, %v907_v14  ;;  %v1108_v17 = vadd.f32 %v3006_v53, %v1107_v15  ;;  %v909_v18 = vpop.f32.mrb[63].mxu0  ;;  %v1109_v19 = vpop.f32.mrb[63].mxu1  ;;  %v1213_v20 = vmax.f32 %v905_v10, 0.0  ;;  %v1263_v21 = vmax.f32 %v1105_v11, 0.0 }
 0x191   :  { %v1214_v22 = vmax.f32 %v908_v16, 0.0  ;;  %v1264_v23 = vmax.f32 %v1108_v17, 0.0 }
 0x193   :  { %v2182_v24 = vpack.c.bf16 %v1214_v22, %v1213_v20  ;;  %v2307_v25 = vpack.c.bf16 %v1264_v23, %v1263_v21 }
 0x194   :  { %v912_v26 = vpop.f32.mrb[64].mxu0  ;;  %v1112_v27 = vpop.f32.mrb[64].mxu1 }
 0x195   :  { %2368 = vst [vmem:[%s3261_s3 + $0x78] sm:$0xff] %v2182_v24   ;;  %2393 = vst [vmem:[%s3261_s3 + $0x140] sm:$0xff] %v2307_v25   ;;  %v913_v28 = vadd.f32 %v3006_v53, %v912_v26  ;;  %v1113_v29 = vadd.f32 %v3006_v53, %v1112_v27  ;;  %v914_v30 = vpop.f32.mrb[65].mxu0  ;;  %v1114_v31 = vpop.f32.mrb[65].mxu1 }
 0x196   :  { %v915_v32 = vpop.f32.mrb[66].mxu0  ;;  %v1115_v33 = vpop.f32.mrb[66].mxu1 }
 0x197   :  { %v916_v34 = vadd.f32 %v3006_v53, %v915_v32  ;;  %v1116_v35 = vadd.f32 %v3006_v53, %v1115_v33  ;;  %v917_v36 = vpop.f32.mrb[67].mxu0  ;;  %v1117_v37 = vpop.f32.mrb[67].mxu1  ;;  %v1215_v38 = vmax.f32 %v913_v28, 0.0  ;;  %v1265_v39 = vmax.f32 %v1113_v29, 0.0 }
 0x199   :  { %v1216_v40 = vmax.f32 %v916_v34, 0.0  ;;  %v1266_v41 = vmax.f32 %v1116_v35, 0.0 }
 0x19b   :  { %v2187_v42 = vpack.c.bf16 %v1216_v40, %v1215_v38  ;;  %v2312_v43 = vpack.c.bf16 %v1266_v41, %v1265_v39 }
 0x19c   :  { %v920_v44 = vpop.f32.mrb[68].mxu0  ;;  %v1120_v45 = vpop.f32.mrb[68].mxu1 }
 0x19d   :  { %2369 = vst [vmem:[%s3261_s3 + $0x80] sm:$0xff] %v2187_v42   ;;  %2394 = vst [vmem:[%s3261_s3 + $0x148] sm:$0xff] %v2312_v43   ;;  %v921_v46 = vadd.f32 %v3006_v53, %v920_v44  ;;  %v1121_v47 = vadd.f32 %v3006_v53, %v1120_v45  ;;  %v922_v48 = vpop.f32.mrb[69].mxu0  ;;  %v1122_v49 = vpop.f32.mrb[69].mxu1 }
 0x19e   :  { %v923_v50 = vpop.f32.mrb[70].mxu0  ;;  %v1123_v51 = vpop.f32.mrb[70].mxu1 }
 0x19f   :  { %v924_v52 = vadd.f32 %v3006_v53, %v923_v50  ;;  %v1124_v54 = vadd.f32 %v3006_v53, %v1123_v51  ;;  %v925_v55 = vpop.f32.mrb[71].mxu0  ;;  %v1125_v56 = vpop.f32.mrb[71].mxu1  ;;  %v1217_v57 = vmax.f32 %v921_v46, 0.0  ;;  %v1267_v58 = vmax.f32 %v1121_v47, 0.0 }
 0x1a1   :  { %v1218_v59 = vmax.f32 %v924_v52, 0.0  ;;  %v1268_v60 = vmax.f32 %v1124_v54, 0.0 }
 0x1a3   :  { %v2192_v61 = vpack.c.bf16 %v1218_v59, %v1217_v57  ;;  %v2317_v62 = vpack.c.bf16 %v1268_v60, %v1267_v58 }
 0x1a4   :  { %v928_v63 = vpop.f32.mrb[72].mxu0  ;;  %v1128_v0 = vpop.f32.mrb[72].mxu1 }
 0x1a5   :  { %2370 = vst [vmem:[%s3261_s3 + $0x88] sm:$0xff] %v2192_v61   ;;  %2395 = vst [vmem:[%s3261_s3 + $0x150] sm:$0xff] %v2317_v62   ;;  %v929_v1 = vadd.f32 %v3006_v53, %v928_v63  ;;  %v1129_v2 = vadd.f32 %v3006_v53, %v1128_v0  ;;  %v930_v3 = vpop.f32.mrb[73].mxu0  ;;  %v1130_v4 = vpop.f32.mrb[73].mxu1 }
 0x1a6   :  { %v931_v5 = vpop.f32.mrb[74].mxu0  ;;  %v1131_v6 = vpop.f32.mrb[74].mxu1 }
 0x1a7   :  { %v932_v7 = vadd.f32 %v3006_v53, %v931_v5  ;;  %v1132_v8 = vadd.f32 %v3006_v53, %v1131_v6  ;;  %v933_v9 = vpop.f32.mrb[75].mxu0  ;;  %v1133_v10 = vpop.f32.mrb[75].mxu1  ;;  %v1219_v11 = vmax.f32 %v929_v1, 0.0  ;;  %v1269_v12 = vmax.f32 %v1129_v2, 0.0 }
 0x1a9   :  { %v1220_v13 = vmax.f32 %v932_v7, 0.0  ;;  %v1270_v14 = vmax.f32 %v1132_v8, 0.0 }
 0x1ab   :  { %v2197_v15 = vpack.c.bf16 %v1220_v13, %v1219_v11  ;;  %v2322_v16 = vpack.c.bf16 %v1270_v14, %v1269_v12 }
 0x1ac   :  { %v936_v17 = vpop.f32.mrb[76].mxu0  ;;  %v1136_v18 = vpop.f32.mrb[76].mxu1 }
 0x1ad   :  { %2371 = vst [vmem:[%s3261_s3 + $0x90] sm:$0xff] %v2197_v15   ;;  %2396 = vst [vmem:[%s3261_s3 + $0x158] sm:$0xff] %v2322_v16   ;;  %v937_v19 = vadd.f32 %v3006_v53, %v936_v17  ;;  %v1137_v20 = vadd.f32 %v3006_v53, %v1136_v18  ;;  %v938_v21 = vpop.f32.mrb[77].mxu0  ;;  %v1138_v22 = vpop.f32.mrb[77].mxu1 }
 0x1ae   :  { %v939_v23 = vpop.f32.mrb[78].mxu0  ;;  %v1139_v24 = vpop.f32.mrb[78].mxu1 }
 0x1af   :  { %v940_v25 = vadd.f32 %v3006_v53, %v939_v23  ;;  %v1140_v26 = vadd.f32 %v3006_v53, %v1139_v24  ;;  %v941_v27 = vpop.f32.mrb[79].mxu0  ;;  %v1141_v28 = vpop.f32.mrb[79].mxu1  ;;  %v1221_v29 = vmax.f32 %v937_v19, 0.0  ;;  %v1271_v30 = vmax.f32 %v1137_v20, 0.0 }
 0x1b1   :  { %v1222_v31 = vmax.f32 %v940_v25, 0.0  ;;  %v1272_v32 = vmax.f32 %v1140_v26, 0.0 }
 0x1b3   :  { %v2202_v33 = vpack.c.bf16 %v1222_v31, %v1221_v29  ;;  %v2327_v34 = vpack.c.bf16 %v1272_v32, %v1271_v30 }
 0x1b4   :  { %v944_v35 = vpop.f32.mrb[80].mxu0  ;;  %v1144_v36 = vpop.f32.mrb[80].mxu1 }
 0x1b5   :  { %2372 = vst [vmem:[%s3261_s3 + $0x98] sm:$0xff] %v2202_v33   ;;  %2397 = vst [vmem:[%s3261_s3 + $0x160] sm:$0xff] %v2327_v34   ;;  %v945_v37 = vadd.f32 %v3006_v53, %v944_v35  ;;  %v1145_v38 = vadd.f32 %v3006_v53, %v1144_v36  ;;  %v946_v39 = vpop.f32.mrb[81].mxu0  ;;  %v1146_v40 = vpop.f32.mrb[81].mxu1 }
 0x1b6   :  { %v947_v41 = vpop.f32.mrb[82].mxu0  ;;  %v1147_v42 = vpop.f32.mrb[82].mxu1 }
 0x1b7   :  { %v948_v43 = vadd.f32 %v3006_v53, %v947_v41  ;;  %v1148_v44 = vadd.f32 %v3006_v53, %v1147_v42  ;;  %v949_v45 = vpop.f32.mrb[83].mxu0  ;;  %v1149_v46 = vpop.f32.mrb[83].mxu1  ;;  %v1223_v47 = vmax.f32 %v945_v37, 0.0  ;;  %v1273_v48 = vmax.f32 %v1145_v38, 0.0 }
 0x1b9   :  { %v1224_v49 = vmax.f32 %v948_v43, 0.0  ;;  %v1274_v50 = vmax.f32 %v1148_v44, 0.0 }
 0x1bb   :  { %v2207_v51 = vpack.c.bf16 %v1224_v49, %v1223_v47  ;;  %v2332_v52 = vpack.c.bf16 %v1274_v50, %v1273_v48 }
 0x1bc   :  { %v952_v54 = vpop.f32.mrb[84].mxu0  ;;  %v1152_v55 = vpop.f32.mrb[84].mxu1 }
 0x1bd   :  { %2373 = vst [vmem:[%s3261_s3 + $0xa0] sm:$0xff] %v2207_v51   ;;  %2398 = vst [vmem:[%s3261_s3 + $0x168] sm:$0xff] %v2332_v52   ;;  %v953_v56 = vadd.f32 %v3006_v53, %v952_v54  ;;  %v1153_v57 = vadd.f32 %v3006_v53, %v1152_v55  ;;  %v954_v58 = vpop.f32.mrb[85].mxu0  ;;  %v1154_v59 = vpop.f32.mrb[85].mxu1 }
 0x1be   :  { %v955_v60 = vpop.f32.mrb[86].mxu0  ;;  %v1155_v61 = vpop.f32.mrb[86].mxu1 }
 0x1bf   :  { %v956_v62 = vadd.f32 %v3006_v53, %v955_v60  ;;  %v1156_v63 = vadd.f32 %v3006_v53, %v1155_v61  ;;  %v957_v0 = vpop.f32.mrb[87].mxu0  ;;  %v1157_v1 = vpop.f32.mrb[87].mxu1  ;;  %v1225_v2 = vmax.f32 %v953_v56, 0.0  ;;  %v1275_v3 = vmax.f32 %v1153_v57, 0.0 }
 0x1c1   :  { %v1226_v4 = vmax.f32 %v956_v62, 0.0  ;;  %v1276_v5 = vmax.f32 %v1156_v63, 0.0 }
 0x1c3   :  { %v2212_v6 = vpack.c.bf16 %v1226_v4, %v1225_v2  ;;  %v2337_v7 = vpack.c.bf16 %v1276_v5, %v1275_v3 }
 0x1c4   :  { %v960_v8 = vpop.f32.mrb[88].mxu0  ;;  %v1160_v9 = vpop.f32.mrb[88].mxu1 }
 0x1c5   :  { %2374 = vst [vmem:[%s3261_s3 + $0xa8] sm:$0xff] %v2212_v6   ;;  %2399 = vst [vmem:[%s3261_s3 + $0x170] sm:$0xff] %v2337_v7   ;;  %v961_v10 = vadd.f32 %v3006_v53, %v960_v8  ;;  %v1161_v11 = vadd.f32 %v3006_v53, %v1160_v9  ;;  %v962_v12 = vpop.f32.mrb[89].mxu0  ;;  %v1162_v13 = vpop.f32.mrb[89].mxu1 }
 0x1c6   :  { %v963_v14 = vpop.f32.mrb[90].mxu0  ;;  %v1163_v15 = vpop.f32.mrb[90].mxu1 }
 0x1c7   :  { %v964_v16 = vadd.f32 %v3006_v53, %v963_v14  ;;  %v1164_v17 = vadd.f32 %v3006_v53, %v1163_v15  ;;  %v965_v18 = vpop.f32.mrb[91].mxu0  ;;  %v1165_v19 = vpop.f32.mrb[91].mxu1  ;;  %v1227_v20 = vmax.f32 %v961_v10, 0.0  ;;  %v1277_v21 = vmax.f32 %v1161_v11, 0.0 }
 0x1c9   :  { %v1228_v22 = vmax.f32 %v964_v16, 0.0  ;;  %v1278_v23 = vmax.f32 %v1164_v17, 0.0 }
 0x1cb   :  { %v2217_v24 = vpack.c.bf16 %v1228_v22, %v1227_v20  ;;  %v2342_v25 = vpack.c.bf16 %v1278_v23, %v1277_v21 }
 0x1cc   :  { %v968_v26 = vpop.f32.mrb[92].mxu0  ;;  %v1168_v27 = vpop.f32.mrb[92].mxu1 }
 0x1cd   :  { %2375 = vst [vmem:[%s3261_s3 + $0xb0] sm:$0xff] %v2217_v24   ;;  %2400 = vst [vmem:[%s3261_s3 + $0x178] sm:$0xff] %v2342_v25   ;;  %v969_v28 = vadd.f32 %v3006_v53, %v968_v26  ;;  %v1169_v29 = vadd.f32 %v3006_v53, %v1168_v27  ;;  %v970_v30 = vpop.f32.mrb[93].mxu0  ;;  %v1170_v31 = vpop.f32.mrb[93].mxu1 }
 0x1ce   :  { %v971_v32 = vpop.f32.mrb[94].mxu0  ;;  %v1171_v33 = vpop.f32.mrb[94].mxu1 }
 0x1cf   :  { %v972_v34 = vadd.f32 %v3006_v53, %v971_v32  ;;  %v1172_v35 = vadd.f32 %v3006_v53, %v1171_v33  ;;  %v973_v36 = vpop.f32.mrb[95].mxu0  ;;  %v1173_v37 = vpop.f32.mrb[95].mxu1  ;;  %v1229_v38 = vmax.f32 %v969_v28, 0.0  ;;  %v1279_v39 = vmax.f32 %v1169_v29, 0.0 }
 0x1d1   :  { %v1230_v40 = vmax.f32 %v972_v34, 0.0  ;;  %v1280_v41 = vmax.f32 %v1172_v35, 0.0 }
 0x1d3   :  { %v2222_v42 = vpack.c.bf16 %v1230_v40, %v1229_v38  ;;  %v2347_v43 = vpack.c.bf16 %v1280_v41, %v1279_v39 }
 0x1d4   :  { %v976_v44 = vpop.f32.mrb[96].mxu0  ;;  %v1176_v45 = vpop.f32.mrb[96].mxu1 }
 0x1d5   :  { %2376 = vst [vmem:[%s3261_s3 + $0xb8] sm:$0xff] %v2222_v42   ;;  %2401 = vst [vmem:[%s3261_s3 + $0x180] sm:$0xff] %v2347_v43   ;;  %v977_v46 = vadd.f32 %v3006_v53, %v976_v44  ;;  %v1177_v47 = vadd.f32 %v3006_v53, %v1176_v45  ;;  %v978_v48 = vpop.f32.mrb[97].mxu0  ;;  %v1178_v49 = vpop.f32.mrb[97].mxu1 }
 0x1d6   :  { %v979_v50 = vpop.f32.mrb[98].mxu0  ;;  %v1179_v51 = vpop.f32.mrb[98].mxu1 }
 0x1d7   :  { %v980_v52 = vadd.f32 %v3006_v53, %v979_v50  ;;  %v1180_v54 = vadd.f32 %v3006_v53, %v1179_v51  ;;  %v981_v55 = vpop.f32.mrb[99].mxu0  ;;  %v1181_v56 = vpop.f32.mrb[99].mxu1  ;;  %v1231_v57 = vmax.f32 %v977_v46, 0.0  ;;  %v1281_v58 = vmax.f32 %v1177_v47, 0.0 }
 0x1d9   :  { %v1232_v59 = vmax.f32 %v980_v52, 0.0  ;;  %v1282_v60 = vmax.f32 %v1180_v54, 0.0 }
 0x1db   :  { %v2227_v61 = vpack.c.bf16 %v1232_v59, %v1231_v57  ;;  %v2352_v62 = vpack.c.bf16 %v1282_v60, %v1281_v58 }
 0x1dd   :  { %2377 = vst [vmem:[%s3261_s3 + $0xc0] sm:$0xff] %v2227_v61   ;;  %2402 = vst [vmem:[%s3261_s3 + $0x188] sm:$0xff] %v2352_v62  }

// kernel: dqn_forward.5
= control target key start
LH: loop header
LB: loop body
LE: loop exit
PB: predicated region body
PF: predicated region fallthrough
CT: control target
= control target key end

     0   :  { %s937_s1 = inlined_call_operand.vmem [shape: bf16[512,128], index: 1, kind: input, shape index: {}]   ;;  %s938_s0 = inlined_call_operand.vmem [shape: bf16[50,512], index: 0, kind: input, shape index: {}]   ;;  %s939_s2 = inlined_call_operand.vmem [shape: f32[1,128], index: 2, kind: input, shape index: {}]   ;;  %s940_s3 = inlined_call_operand.vmem [shape: bf16[50,128], index: 3, kind: output, shape index: {}]  }
   0x1   :  { %v701_v0 = vld [vmem:[%s937_s1 + $0x40] sm:$0xff]   ;;  %v705_v4 = vld [vmem:[%s937_s1 + $0x48] sm:$0xff]   ;;  %v709_v8 = vld [vmem:[%s937_s1 + $0x50] sm:$0xff]  }
   0x2   :  { %v702_v1 = vld [vmem:[%s937_s1 + $0xc0] sm:$0xff]   ;;  %621 = vmatprep.subr.bf16.mxu0 %v701_v0  ;;  %v706_v5 = vld [vmem:[%s937_s1 + $0xc8] sm:$0xff]   ;;  %v710_v9 = vld [vmem:[%s937_s1 + $0xd0] sm:$0xff]  }
   0x3   :  { %v703_v2 = vld [vmem:[%s937_s1] sm:$0xff]   ;;  %661 = vmatprep.subr.bf16.mxu1 %v702_v1  ;;  %v707_v6 = vld [vmem:[%s937_s1 + $0x8] sm:$0xff]   ;;  %v711_v10 = vld [vmem:[%s937_s1 + $0x10] sm:$0xff]  }
   0x4   :  { %v704_v3 = vld [vmem:[%s937_s1 + $0x80] sm:$0xff]   ;;  %622 = vmatpush3.bf16.msra.mxu0 %v703_v2  ;;  %v708_v7 = vld [vmem:[%s937_s1 + $0x88] sm:$0xff]   ;;  %v712_v11 = vld [vmem:[%s937_s1 + $0x90] sm:$0xff]  }
   0x5   :  { %662 = vmatpush3.bf16.msra.mxu1 %v704_v3  ;;  %623 = vmatprep.subr.bf16.mxu0 %v705_v4  ;;  %v713_v12 = vld [vmem:[%s937_s1 + $0x58] sm:$0xff]   ;;  %v717_v16 = vld [vmem:[%s937_s1 + $0x60] sm:$0xff]   ;;  %v721_v20 = vld [vmem:[%s937_s1 + $0x68] sm:$0xff]  }
   0x6   :  { %663 = vmatprep.subr.bf16.mxu1 %v706_v5  ;;  %v714_v13 = vld [vmem:[%s937_s1 + $0xd8] sm:$0xff]   ;;  %v718_v17 = vld [vmem:[%s937_s1 + $0xe0] sm:$0xff]   ;;  %v722_v21 = vld [vmem:[%s937_s1 + $0xe8] sm:$0xff]  }
   0x7   :  { %v715_v14 = vld [vmem:[%s937_s1 + $0x18] sm:$0xff]   ;;  %v719_v18 = vld [vmem:[%s937_s1 + $0x20] sm:$0xff]   ;;  %v723_v22 = vld [vmem:[%s937_s1 + $0x28] sm:$0xff]  }
   0x8   :  { %624 = vmatpush3.bf16.msra.mxu0 %v707_v6  ;;  %v716_v15 = vld [vmem:[%s937_s1 + $0x98] sm:$0xff]   ;;  %v720_v19 = vld [vmem:[%s937_s1 + $0xa0] sm:$0xff]   ;;  %v724_v23 = vld [vmem:[%s937_s1 + $0xa8] sm:$0xff]  }
   0x9   :  { %664 = vmatpush3.bf16.msra.mxu1 %v708_v7  ;;  %625 = vmatprep.subr.bf16.mxu0 %v709_v8  ;;  %v725_v24 = vld [vmem:[%s937_s1 + $0x70] sm:$0xff]   ;;  %v729_v28 = vld [vmem:[%s937_s1 + $0x78] sm:$0xff]   ;;  %v27_v42 = vld [vmem:[%s938_s0 + $0x60] sm:$0x11] }
   0xa   :  { %665 = vmatprep.subr.bf16.mxu1 %v710_v9  ;;  %v726_v25 = vld [vmem:[%s937_s1 + $0xf0] sm:$0xff]   ;;  %v730_v29 = vld [vmem:[%s937_s1 + $0xf8] sm:$0xff]   ;;  %v28_v43 = vld [vmem:[%s938_s0 + $0x68] sm:$0x11]  ;;  %v555_v46 = vcombine.high %v27_v42, %v27_v42  ;;  %v554_v48 = vcombine.low %v27_v42, %v27_v42 }
   0xb   :  { %v727_v26 = vld [vmem:[%s937_s1 + $0x30] sm:$0xff]   ;;  %v731_v30 = vld [vmem:[%s937_s1 + $0x38] sm:$0xff]   ;;  %v557_v47 = vcombine.high %v28_v43, %v28_v43  ;;  %v556_v49 = vcombine.low %v28_v43, %v28_v43  ;;  %v916_v52 = vld [vmem:[%s939_s2] ss:$0 sm:$0xff] }
   0xc   :  { %626 = vmatpush3.bf16.msra.mxu0 %v711_v10  ;;  %v728_v27 = vld [vmem:[%s937_s1 + $0xb0] sm:$0xff]   ;;  %v732_v31 = vld [vmem:[%s937_s1 + $0xb8] sm:$0xff]  }
   0xd   :  { %666 = vmatpush3.bf16.msra.mxu1 %v712_v11  ;;  %627 = vmatprep.subr.bf16.mxu0 %v713_v12  ;;  %v733_v32 = vld [vmem:[%s938_s0] ss:$16 sps:$4 sm:$0xff]   ;;  %v735_v33 = vld [vmem:[%s938_s0 + $0x4] ss:$16 sps:$4 sm:$0xff]   ;;  %v736_v34 = vld [vmem:[%s938_s0 + $0x8] ss:$16 sps:$4 sm:$0xff]  }
   0xe   :  { %667 = vmatprep.subr.bf16.mxu1 %v714_v13  ;;  %v738_v35 = vld [vmem:[%s938_s0 + $0xc] ss:$16 sps:$4 sm:$0xff]   ;;  %398 = vmatprep.mubr.bf16.mxu0 %v735_v33  ;;  %v739_v36 = vld [vmem:[%s938_s0 + $0x24] ss:$16 sps:$4 sm:$0xff]   ;;  %v743_v38 = vld [vmem:[%s938_s0 + $0x20] ss:$16 sps:$4 sm:$0xff]  }
   0xf   :  { %462 = vmatprep.mubr.bf16.mxu1 %v738_v35  ;;  %v741_v37 = vld [vmem:[%s938_s0 + $0x2c] ss:$16 sps:$4 sm:$0xff]   ;;  %v744_v39 = vld [vmem:[%s938_s0 + $0x28] ss:$16 sps:$4 sm:$0xff]   ;;  %v745_v40 = vld [vmem:[%s938_s0 + $0x44] ss:$16 sps:$4 sm:$0xff]  }
  0x10   :  { %628 = vmatpush3.bf16.msra.mxu0 %v715_v14  ;;  %v747_v41 = vld [vmem:[%s938_s0 + $0x4c] ss:$16 sps:$4 sm:$0xff]   ;;  %v749_v44 = vld [vmem:[%s938_s0 + $0x40] ss:$16 sps:$4 sm:$0xff]   ;;  %v750_v45 = vld [vmem:[%s938_s0 + $0x48] ss:$16 sps:$4 sm:$0xff]  }
  0x11   :  { %668 = vmatpush3.bf16.msra.mxu1 %v716_v15  ;;  %629 = vmatprep.subr.bf16.mxu0 %v717_v16 }
  0x12   :  { %669 = vmatprep.subr.bf16.mxu1 %v718_v17 }
  0x14   :  { %630 = vmatpush3.bf16.msra.mxu0 %v719_v18 }
  0x15   :  { %670 = vmatpush3.bf16.msra.mxu1 %v720_v19  ;;  %631 = vmatprep.subr.bf16.mxu0 %v721_v20 }
  0x16   :  { %671 = vmatprep.subr.bf16.mxu1 %v722_v21 }
  0x18   :  { %632 = vmatpush3.bf16.msra.mxu0 %v723_v22 }
  0x19   :  { %672 = vmatpush3.bf16.msra.mxu1 %v724_v23  ;;  %633 = vmatprep.subr.bf16.mxu0 %v725_v24 }
  0x1a   :  { %673 = vmatprep.subr.bf16.mxu1 %v726_v25 }
  0x1c   :  { %634 = vmatpush3.bf16.msra.mxu0 %v727_v26 }
  0x1d   :  { %674 = vmatpush3.bf16.msra.mxu1 %v728_v27  ;;  %635 = vmatprep.subr.bf16.mxu0 %v729_v28 }
  0x1e   :  { %675 = vmatprep.subr.bf16.mxu1 %v730_v29 }
  0x20   :  { %636 = vmatpush3.bf16.msra.mxu0 %v731_v30 }
  0x21   :  { %676 = vmatpush3.bf16.msra.mxu1 %v732_v31 }
  0x23   :  { %399 = vmatmul.mubr.bf16.vlgmr.msra.gmra.mrb[0].mxu0 %v733_v32 }
  0x24   :  { %463 = vmatmul.mubr.bf16.vlgmr.msra.gmra.mrb[0].mxu1 %v736_v34  ;;  %406 = vmatprep.mubr.bf16.mxu0 %v739_v36 }
  0x25   :  { %470 = vmatprep.mubr.bf16.mxu1 %v741_v37 }
  0x2b   :  { %407 = vmatmul.mubr.bf16.gmra.mrb[4].mxu0 %v743_v38 }
  0x2c   :  { %471 = vmatmul.mubr.bf16.gmra.mrb[4].mxu1 %v744_v39  ;;  %414 = vmatprep.mubr.bf16.mxu0 %v745_v40 }
  0x2d   :  { %478 = vmatprep.mubr.bf16.mxu1 %v747_v41 }
  0x33   :  { %415 = vmatmul.mubr.bf16.gmra.mrb[8].mxu0 %v749_v44 }
  0x34   :  { %479 = vmatmul.mubr.bf16.gmra.mrb[8].mxu1 %v750_v45  ;;  %422 = vmatprep.mubr.bf16.mxu0 %v555_v46 }
  0x35   :  { %486 = vmatprep.mubr.bf16.mxu1 %v557_v47 }
  0x3b   :  { %423 = vmatmul.mubr.bf16.gmra.mrb[12].mxu0 %v554_v48 }
  0x3c   :  { %487 = vmatmul.mubr.bf16.gmra.mrb[12].mxu1 %v556_v49 }
  0xf6   :  { %v637_v50 = vpop.f32.mrb[0].mxu0 }
  0xf7   :  { %v677_v51 = vpop.f32.mrb[0].mxu1  ;;  %v638_v53 = vpop.f32.mrb[1].mxu0 }
  0xf8   :  { %v639_v54 = vadd.f32 %v638_v53, %v637_v50  ;;  %v678_v55 = vpop.f32.mrb[1].mxu1  ;;  %v640_v56 = vpop.f32.mrb[2].mxu0 }
  0xf9   :  { %v679_v57 = vadd.f32 %v678_v55, %v677_v51  ;;  %v680_v58 = vpop.f32.mrb[2].mxu1  ;;  %v641_v59 = vpop.f32.mrb[3].mxu0 }
  0xfa   :  { %v401_v60 = vadd.f32 %v639_v54, %v916_v52  ;;  %v642_v61 = vadd.f32 %v641_v59, %v640_v56  ;;  %v681_v62 = vpop.f32.mrb[3].mxu1 }
  0xfb   :  { %v682_v63 = vadd.f32 %v681_v62, %v680_v58 }
  0xfc   :  { %v465_v0 = vadd.f32 %v679_v57, %v401_v60  ;;  %v404_v1 = vadd.f32 %v642_v61, %v916_v52 }
  0xfe   :  { %v468_v2 = vadd.f32 %v682_v63, %v404_v1  ;;  %v643_v3 = vpop.f32.mrb[4].mxu0  ;;  %v494_v6 = vmax.f32 %v465_v0, 0.0 }
  0xff   :  { %v683_v4 = vpop.f32.mrb[4].mxu1  ;;  %v644_v5 = vpop.f32.mrb[5].mxu0 }
 0x100   :  { %v495_v7 = vmax.f32 %v468_v2, 0.0  ;;  %v645_v8 = vadd.f32 %v644_v5, %v643_v3  ;;  %v684_v9 = vpop.f32.mrb[5].mxu1  ;;  %v646_v10 = vpop.f32.mrb[6].mxu0 }
 0x101   :  { %v685_v11 = vadd.f32 %v684_v9, %v683_v4  ;;  %v686_v12 = vpop.f32.mrb[6].mxu1  ;;  %v647_v13 = vpop.f32.mrb[7].mxu0 }
 0x102   :  { %v607_v14 = vpack.c.bf16 %v495_v7, %v494_v6  ;;  %v409_v15 = vadd.f32 %v645_v8, %v916_v52  ;;  %v648_v16 = vadd.f32 %v647_v13, %v646_v10  ;;  %v687_v17 = vpop.f32.mrb[7].mxu1 }
 0x103   :  { %v688_v18 = vadd.f32 %v687_v17, %v686_v12 }
 0x104   :  { %608 = vst [vmem:[%s940_s3] sm:$0xff] %v607_v14   ;;  %v473_v19 = vadd.f32 %v685_v11, %v409_v15  ;;  %v412_v20 = vadd.f32 %v648_v16, %v916_v52 }
 0x106   :  { %v476_v21 = vadd.f32 %v688_v18, %v412_v20  ;;  %v649_v22 = vpop.f32.mrb[8].mxu0  ;;  %v496_v25 = vmax.f32 %v473_v19, 0.0 }
 0x107   :  { %v689_v23 = vpop.f32.mrb[8].mxu1  ;;  %v650_v24 = vpop.f32.mrb[9].mxu0 }
 0x108   :  { %v497_v26 = vmax.f32 %v476_v21, 0.0  ;;  %v651_v27 = vadd.f32 %v650_v24, %v649_v22  ;;  %v690_v28 = vpop.f32.mrb[9].mxu1  ;;  %v652_v29 = vpop.f32.mrb[10].mxu0 }
 0x109   :  { %v691_v30 = vadd.f32 %v690_v28, %v689_v23  ;;  %v692_v31 = vpop.f32.mrb[10].mxu1  ;;  %v653_v32 = vpop.f32.mrb[11].mxu0 }
 0x10a   :  { %v612_v33 = vpack.c.bf16 %v497_v26, %v496_v25  ;;  %v417_v34 = vadd.f32 %v651_v27, %v916_v52  ;;  %v654_v35 = vadd.f32 %v653_v32, %v652_v29  ;;  %v693_v36 = vpop.f32.mrb[11].mxu1 }
 0x10b   :  { %v694_v37 = vadd.f32 %v693_v36, %v692_v31 }
 0x10c   :  { %619 = vst [vmem:[%s940_s3 + $0x8] sm:$0xff] %v612_v33   ;;  %v481_v38 = vadd.f32 %v691_v30, %v417_v34  ;;  %v420_v39 = vadd.f32 %v654_v35, %v916_v52 }
 0x10e   :  { %v484_v40 = vadd.f32 %v694_v37, %v420_v39  ;;  %v655_v41 = vpop.f32.mrb[12].mxu0  ;;  %v498_v44 = vmax.f32 %v481_v38, 0.0 }
 0x10f   :  { %v695_v42 = vpop.f32.mrb[12].mxu1  ;;  %v656_v43 = vpop.f32.mrb[13].mxu0 }
 0x110   :  { %v499_v45 = vmax.f32 %v484_v40, 0.0  ;;  %v657_v46 = vadd.f32 %v656_v43, %v655_v41  ;;  %v696_v47 = vpop.f32.mrb[13].mxu1  ;;  %v658_v48 = vpop.f32.mrb[14].mxu0 }
 0x111   :  { %v697_v49 = vadd.f32 %v696_v47, %v695_v42  ;;  %v698_v50 = vpop.f32.mrb[14].mxu1  ;;  %v659_v51 = vpop.f32.mrb[15].mxu0 }
 0x112   :  { %v617_v53 = vpack.c.bf16 %v499_v45, %v498_v44  ;;  %v425_v54 = vadd.f32 %v657_v46, %v916_v52  ;;  %v699_v55 = vpop.f32.mrb[15].mxu1 }
 0x114   :  { %620 = vst [vmem:[%s940_s3 + $0x10] sm:$0xff] %v617_v53   ;;  %v489_v56 = vadd.f32 %v697_v49, %v425_v54 }
 0x116   :  { %v500_v57 = vmax.f32 %v489_v56, 0.0 }
 0x118   :  { %v603_v58 = vpack.c.bf16 %v500_v57, %v500_v57 }
 0x11a   :  { %536 = vst [vmem:[%s940_s3 + $0x18] sm:$0x1] %v603_v58 }

// kernel: dqn_forward.6
= control target key start
LH: loop header
LB: loop body
LE: loop exit
PB: predicated region body
PF: predicated region fallthrough
CT: control target
= control target key end

     0   :  { %s1197_s1 = inlined_call_operand.vmem [shape: bf16[640,128], index: 1, kind: input, shape index: {}]   ;;  %s1198_s0 = inlined_call_operand.vmem [shape: bf16[50,640], index: 0, kind: input, shape index: {}]   ;;  %s1199_s2 = inlined_call_operand.vmem [shape: f32[1,128], index: 2, kind: input, shape index: {}]   ;;  %s1200_s3 = inlined_call_operand.vmem [shape: bf16[50,128], index: 3, kind: output, shape index: {}]  }
   0x1   :  { %v922_v0 = vld [vmem:[%s1197_s1 + $0x40] sm:$0xff]   ;;  %v926_v4 = vld [vmem:[%s1197_s1 + $0x48] sm:$0xff]   ;;  %v930_v8 = vld [vmem:[%s1197_s1 + $0x50] sm:$0xff]  }
   0x2   :  { %v923_v1 = vld [vmem:[%s1197_s1 + $0xc0] sm:$0xff]   ;;  %790 = vmatprep.subr.bf16.mxu0 %v922_v0  ;;  %v927_v5 = vld [vmem:[%s1197_s1 + $0xc8] sm:$0xff]   ;;  %v931_v9 = vld [vmem:[%s1197_s1 + $0xd0] sm:$0xff]  }
   0x3   :  { %v924_v2 = vld [vmem:[%s1197_s1] sm:$0xff]   ;;  %830 = vmatprep.subr.bf16.mxu1 %v923_v1  ;;  %v928_v6 = vld [vmem:[%s1197_s1 + $0x8] sm:$0xff]   ;;  %v932_v10 = vld [vmem:[%s1197_s1 + $0x10] sm:$0xff]  }
   0x4   :  { %v925_v3 = vld [vmem:[%s1197_s1 + $0x80] sm:$0xff]   ;;  %791 = vmatpush3.bf16.msra.mxu0 %v924_v2  ;;  %v929_v7 = vld [vmem:[%s1197_s1 + $0x88] sm:$0xff]   ;;  %v933_v11 = vld [vmem:[%s1197_s1 + $0x90] sm:$0xff]  }
   0x5   :  { %831 = vmatpush3.bf16.msra.mxu1 %v925_v3  ;;  %792 = vmatprep.subr.bf16.mxu0 %v926_v4  ;;  %v934_v12 = vld [vmem:[%s1197_s1 + $0x58] sm:$0xff]   ;;  %v938_v16 = vld [vmem:[%s1197_s1 + $0x60] sm:$0xff]   ;;  %v942_v20 = vld [vmem:[%s1197_s1 + $0x68] sm:$0xff]  }
   0x6   :  { %832 = vmatprep.subr.bf16.mxu1 %v927_v5  ;;  %v935_v13 = vld [vmem:[%s1197_s1 + $0xd8] sm:$0xff]   ;;  %v939_v17 = vld [vmem:[%s1197_s1 + $0xe0] sm:$0xff]   ;;  %v943_v21 = vld [vmem:[%s1197_s1 + $0xe8] sm:$0xff]  }
   0x7   :  { %v936_v14 = vld [vmem:[%s1197_s1 + $0x18] sm:$0xff]   ;;  %v940_v18 = vld [vmem:[%s1197_s1 + $0x20] sm:$0xff]   ;;  %v944_v22 = vld [vmem:[%s1197_s1 + $0x28] sm:$0xff]  }
   0x8   :  { %793 = vmatpush3.bf16.msra.mxu0 %v928_v6  ;;  %v937_v15 = vld [vmem:[%s1197_s1 + $0x98] sm:$0xff]   ;;  %v941_v19 = vld [vmem:[%s1197_s1 + $0xa0] sm:$0xff]   ;;  %v945_v23 = vld [vmem:[%s1197_s1 + $0xa8] sm:$0xff]  }
   0x9   :  { %833 = vmatpush3.bf16.msra.mxu1 %v929_v7  ;;  %794 = vmatprep.subr.bf16.mxu0 %v930_v8  ;;  %v946_v24 = vld [vmem:[%s1197_s1 + $0x70] sm:$0xff]   ;;  %v950_v28 = vld [vmem:[%s1197_s1 + $0x78] sm:$0xff]   ;;  %v959_v35 = vld [vmem:[%s1198_s0 + $0xc] ss:$20 sps:$4 sm:$0xff]  }
   0xa   :  { %834 = vmatprep.subr.bf16.mxu1 %v931_v9  ;;  %v947_v25 = vld [vmem:[%s1197_s1 + $0xf0] sm:$0xff]   ;;  %v951_v29 = vld [vmem:[%s1197_s1 + $0xf8] sm:$0xff]   ;;  %v960_v36 = vld [vmem:[%s1197_s1 + $0x100] sm:$0xff]   ;;  %555 = vmatprep.mubr.bf16.mxu1 %v959_v35 }
   0xb   :  { %v948_v26 = vld [vmem:[%s1197_s1 + $0x30] sm:$0xff]   ;;  %v952_v30 = vld [vmem:[%s1197_s1 + $0x38] sm:$0xff]   ;;  %v961_v37 = vld [vmem:[%s1197_s1 + $0x108] sm:$0xff]  }
   0xc   :  { %795 = vmatpush3.bf16.msra.mxu0 %v932_v10  ;;  %v949_v27 = vld [vmem:[%s1197_s1 + $0xb0] sm:$0xff]   ;;  %v953_v31 = vld [vmem:[%s1197_s1 + $0xb8] sm:$0xff]   ;;  %v962_v38 = vld [vmem:[%s1198_s0 + $0x2c] ss:$20 sps:$4 sm:$0xff]  }
   0xd   :  { %835 = vmatpush3.bf16.msra.mxu1 %v933_v11  ;;  %796 = vmatprep.subr.bf16.mxu0 %v934_v12  ;;  %v954_v32 = vld [vmem:[%s1198_s0] ss:$20 sps:$4 sm:$0xff]   ;;  %v956_v33 = vld [vmem:[%s1198_s0 + $0x4] ss:$20 sps:$4 sm:$0xff]   ;;  %v957_v34 = vld [vmem:[%s1198_s0 + $0x8] ss:$20 sps:$4 sm:$0xff]  }
   0xe   :  { %836 = vmatprep.subr.bf16.mxu1 %v935_v13  ;;  %491 = vmatprep.mubr.bf16.mxu0 %v956_v33  ;;  %v964_v39 = vld [vmem:[%s1198_s0 + $0x34] ss:$20 sps:$4 sm:$0xff]   ;;  %v967_v42 = vld [vmem:[%s1198_s0 + $0x30] ss:$20 sps:$4 sm:$0xff]   ;;  %v969_v44 = vld [vmem:[%s1197_s1 + $0x118] sm:$0xff]  }
   0xf   :  { %v966_v40 = vld [vmem:[%s1198_s0 + $0x28] ss:$20 sps:$4 sm:$0xff]   ;;  %v968_v41 = vld [vmem:[%s1197_s1 + $0x110] sm:$0xff]   ;;  %v976_v46 = vld [vmem:[%s1197_s1 + $0x120] sm:$0xff]  }
  0x10   :  { %797 = vmatpush3.bf16.msra.mxu0 %v936_v14  ;;  %v970_v43 = vld [vmem:[%s1198_s0 + $0x54] ss:$20 sps:$4 sm:$0xff]   ;;  %v972_v45 = vld [vmem:[%s1198_s0 + $0x5c] ss:$20 sps:$4 sm:$0xff]   ;;  %v34_v48 = vld [vmem:[%s1198_s0 + $0x80] sm:$0x11] }
  0x11   :  { %837 = vmatpush3.bf16.msra.mxu1 %v937_v15  ;;  %798 = vmatprep.subr.bf16.mxu0 %v938_v16  ;;  %v33_v47 = vld [vmem:[%s1198_s0 + $0x78] sm:$0x11]  ;;  %v974_v49 = vld [vmem:[%s1198_s0 + $0x50] ss:$20 sps:$4 sm:$0xff]   ;;  %v717_v52 = vcombine.high %v34_v48, %v34_v48  ;;  %v977_v53 = vld [vmem:[%s1197_s1 + $0x128] sm:$0xff]   ;;  %v716_v56 = vcombine.low %v34_v48, %v34_v48 }
  0x12   :  { %838 = vmatprep.subr.bf16.mxu1 %v939_v17  ;;  %v975_v50 = vld [vmem:[%s1198_s0 + $0x58] ss:$20 sps:$4 sm:$0xff]   ;;  %v715_v51 = vcombine.high %v33_v47, %v33_v47  ;;  %v982_v54 = vld [vmem:[%s1197_s1 + $0x130] sm:$0xff]   ;;  %v714_v55 = vcombine.low %v33_v47, %v33_v47  ;;  %v987_v61 = vld [vmem:[%s1198_s0 + $0x88] ss:$0 sps:$4 sm:$0x11]  }
  0x13   :  { %v984_v57 = vld [vmem:[%s1198_s0 + $0x10] ss:$20 sps:$4 sm:$0xff]   ;;  %v985_v58 = vld [vmem:[%s1198_s0 + $0x60] ss:$20 sps:$4 sm:$0xff]   ;;  %v983_v59 = vld [vmem:[%s1197_s1 + $0x138] sm:$0xff]  }
  0x14   :  { %799 = vmatpush3.bf16.msra.mxu0 %v940_v18  ;;  %v986_v60 = vld [vmem:[%s1198_s0 + $0x38] ss:$20 sps:$4 sm:$0xff]   ;;  %v698_v0 = vld [vmem:[%s1199_s2] ss:$0 sm:$0xff] }
  0x15   :  { %839 = vmatpush3.bf16.msra.mxu1 %v941_v19  ;;  %800 = vmatprep.subr.bf16.mxu0 %v942_v20 }
  0x16   :  { %840 = vmatprep.subr.bf16.mxu1 %v943_v21 }
  0x18   :  { %801 = vmatpush3.bf16.msra.mxu0 %v944_v22 }
  0x19   :  { %841 = vmatpush3.bf16.msra.mxu1 %v945_v23  ;;  %802 = vmatprep.subr.bf16.mxu0 %v946_v24 }
  0x1a   :  { %842 = vmatprep.subr.bf16.mxu1 %v947_v25 }
  0x1c   :  { %803 = vmatpush3.bf16.msra.mxu0 %v948_v26 }
  0x1d   :  { %843 = vmatpush3.bf16.msra.mxu1 %v949_v27  ;;  %804 = vmatprep.subr.bf16.mxu0 %v950_v28 }
  0x1e   :  { %844 = vmatprep.subr.bf16.mxu1 %v951_v29 }
  0x20   :  { %805 = vmatpush3.bf16.msra.mxu0 %v952_v30 }
  0x21   :  { %845 = vmatpush3.bf16.msra.mxu1 %v953_v31  ;;  %882 = vmatprep.subr.bf16.mxu0 %v960_v36 }
  0x22   :  { %906 = vmatprep.subr.bf16.mxu1 %v960_v36 }
  0x23   :  { %492 = vmatmul.mubr.bf16.vlgmr.msra.gmra.mrb[0].mxu0 %v954_v32 }
  0x24   :  { %556 = vmatmul.mubr.bf16.vlgmr.msra.gmra.mrb[0].mxu1 %v957_v34  ;;  %883 = vmatpush3.bf16.msra.mxu0 %v960_v36 }
  0x25   :  { %914 = vmatpush3.bf16.msra.mxu1 %v960_v36  ;;  %884 = vmatprep.subr.bf16.mxu0 %v961_v37 }
  0x26   :  { %907 = vmatprep.subr.bf16.mxu1 %v961_v37  ;;  %499 = vmatprep.mubr.bf16.mxu0 %v962_v38 }
  0x27   :  { %563 = vmatprep.mubr.bf16.mxu1 %v964_v39 }
  0x28   :  { %885 = vmatpush3.bf16.msra.mxu0 %v961_v37 }
  0x29   :  { %915 = vmatpush3.bf16.msra.mxu1 %v961_v37  ;;  %886 = vmatprep.subr.bf16.mxu0 %v968_v41 }
  0x2a   :  { %908 = vmatprep.subr.bf16.mxu1 %v968_v41 }
  0x2b   :  { %500 = vmatmul.mubr.bf16.gmra.mrb[4].mxu0 %v966_v40 }
  0x2c   :  { %564 = vmatmul.mubr.bf16.gmra.mrb[4].mxu1 %v967_v42  ;;  %507 = vmatprep.mubr.bf16.mxu0 %v970_v43 }
  0x2d   :  { %887 = vmatpush3.bf16.msra.mxu0 %v968_v41  ;;  %571 = vmatprep.mubr.bf16.mxu1 %v972_v45 }
  0x2e   :  { %916 = vmatpush3.bf16.msra.mxu1 %v968_v41  ;;  %888 = vmatprep.subr.bf16.mxu0 %v969_v44 }
  0x2f   :  { %909 = vmatprep.subr.bf16.mxu1 %v969_v44 }
  0x31   :  { %889 = vmatpush3.bf16.msra.mxu0 %v969_v44 }
  0x32   :  { %917 = vmatpush3.bf16.msra.mxu1 %v969_v44  ;;  %890 = vmatprep.subr.bf16.mxu0 %v976_v46 }
  0x33   :  { %508 = vmatmul.mubr.bf16.gmra.mrb[8].mxu0 %v974_v49  ;;  %910 = vmatprep.subr.bf16.mxu1 %v976_v46 }
  0x34   :  { %572 = vmatmul.mubr.bf16.gmra.mrb[8].mxu1 %v975_v50  ;;  %515 = vmatprep.mubr.bf16.mxu0 %v715_v51 }
  0x35   :  { %891 = vmatpush3.bf16.msra.mxu0 %v976_v46  ;;  %579 = vmatprep.mubr.bf16.mxu1 %v717_v52 }
  0x36   :  { %918 = vmatpush3.bf16.msra.mxu1 %v976_v46  ;;  %892 = vmatprep.subr.bf16.mxu0 %v977_v53 }
  0x37   :  { %911 = vmatprep.subr.bf16.mxu1 %v977_v53 }
  0x39   :  { %893 = vmatpush3.bf16.msra.mxu0 %v977_v53 }
  0x3a   :  { %919 = vmatpush3.bf16.msra.mxu1 %v977_v53  ;;  %894 = vmatprep.subr.bf16.mxu0 %v982_v54 }
  0x3b   :  { %516 = vmatmul.mubr.bf16.gmra.mrb[12].mxu0 %v714_v55  ;;  %912 = vmatprep.subr.bf16.mxu1 %v982_v54 }
  0x3c   :  { %580 = vmatmul.mubr.bf16.gmra.mrb[12].mxu1 %v716_v56  ;;  %898 = vmatprep.mubr.bf16.mxu0 %v984_v57 }
  0x3d   :  { %895 = vmatpush3.bf16.msra.mxu0 %v982_v54  ;;  %902 = vmatprep.mubr.bf16.mxu1 %v985_v58 }
  0x3e   :  { %920 = vmatpush3.bf16.msra.mxu1 %v982_v54  ;;  %896 = vmatprep.subr.bf16.mxu0 %v983_v59 }
  0x3f   :  { %913 = vmatprep.subr.bf16.mxu1 %v983_v59 }
  0x41   :  { %897 = vmatpush3.bf16.msra.mxu0 %v983_v59 }
  0x42   :  { %921 = vmatpush3.bf16.msra.mxu1 %v983_v59 }
  0x44   :  { %899 = vmatmul.mubr.bf16.vlgmr.msra.gmra.mrb[16].mxu0 %v986_v60 }
  0x45   :  { %903 = vmatmul.mubr.bf16.vlgmr.msra.gmra.mrb[16].mxu1 %v987_v61 }
  0xf6   :  { %v806_v62 = vpop.f32.mrb[0].mxu0 }
  0xf7   :  { %v846_v63 = vpop.f32.mrb[0].mxu1  ;;  %v807_v1 = vpop.f32.mrb[1].mxu0 }
  0xf8   :  { %v808_v2 = vadd.f32 %v807_v1, %v806_v62  ;;  %v847_v3 = vpop.f32.mrb[1].mxu1  ;;  %v809_v4 = vpop.f32.mrb[2].mxu0 }
  0xf9   :  { %v848_v5 = vadd.f32 %v847_v3, %v846_v63  ;;  %v849_v6 = vpop.f32.mrb[2].mxu1  ;;  %v810_v7 = vpop.f32.mrb[3].mxu0 }
  0xfa   :  { %v494_v8 = vadd.f32 %v808_v2, %v698_v0  ;;  %v811_v9 = vadd.f32 %v810_v7, %v809_v4  ;;  %v850_v10 = vpop.f32.mrb[3].mxu1 }
  0xfb   :  { %v851_v11 = vadd.f32 %v850_v10, %v849_v6 }
  0xfc   :  { %v497_v12 = vadd.f32 %v811_v9, %v698_v0  ;;  %v558_v13 = vadd.f32 %v848_v5, %v494_v8 }
  0xfe   :  { %v812_v14 = vpop.f32.mrb[4].mxu0  ;;  %v561_v15 = vadd.f32 %v851_v11, %v497_v12 }
  0xff   :  { %v852_v16 = vpop.f32.mrb[4].mxu1  ;;  %v813_v17 = vpop.f32.mrb[5].mxu0 }
 0x100   :  { %v814_v18 = vadd.f32 %v813_v17, %v812_v14  ;;  %v853_v19 = vpop.f32.mrb[5].mxu1  ;;  %v815_v20 = vpop.f32.mrb[6].mxu0 }
 0x101   :  { %v854_v21 = vadd.f32 %v853_v19, %v852_v16  ;;  %v855_v22 = vpop.f32.mrb[6].mxu1  ;;  %v816_v23 = vpop.f32.mrb[7].mxu0 }
 0x102   :  { %v502_v24 = vadd.f32 %v814_v18, %v698_v0  ;;  %v817_v25 = vadd.f32 %v816_v23, %v815_v20  ;;  %v856_v26 = vpop.f32.mrb[7].mxu1 }
 0x103   :  { %v857_v27 = vadd.f32 %v856_v26, %v855_v22 }
 0x104   :  { %v505_v28 = vadd.f32 %v817_v25, %v698_v0  ;;  %v566_v29 = vadd.f32 %v854_v21, %v502_v24 }
 0x106   :  { %v818_v30 = vpop.f32.mrb[8].mxu0  ;;  %v569_v31 = vadd.f32 %v857_v27, %v505_v28 }
 0x107   :  { %v858_v32 = vpop.f32.mrb[8].mxu1  ;;  %v819_v33 = vpop.f32.mrb[9].mxu0 }
 0x108   :  { %v820_v34 = vadd.f32 %v819_v33, %v818_v30  ;;  %v859_v35 = vpop.f32.mrb[9].mxu1  ;;  %v821_v36 = vpop.f32.mrb[10].mxu0 }
 0x109   :  { %v860_v37 = vadd.f32 %v859_v35, %v858_v32  ;;  %v861_v38 = vpop.f32.mrb[10].mxu1  ;;  %v822_v39 = vpop.f32.mrb[11].mxu0 }
 0x10a   :  { %v510_v40 = vadd.f32 %v820_v34, %v698_v0  ;;  %v823_v41 = vadd.f32 %v822_v39, %v821_v36  ;;  %v862_v42 = vpop.f32.mrb[11].mxu1 }
 0x10b   :  { %v863_v43 = vadd.f32 %v862_v42, %v861_v38 }
 0x10c   :  { %v513_v44 = vadd.f32 %v823_v41, %v698_v0  ;;  %v574_v45 = vadd.f32 %v860_v37, %v510_v40 }
 0x10e   :  { %v824_v46 = vpop.f32.mrb[12].mxu0  ;;  %v577_v47 = vadd.f32 %v863_v43, %v513_v44 }
 0x10f   :  { %v864_v48 = vpop.f32.mrb[12].mxu1  ;;  %v825_v49 = vpop.f32.mrb[13].mxu0 }
 0x110   :  { %v826_v50 = vadd.f32 %v825_v49, %v824_v46  ;;  %v865_v51 = vpop.f32.mrb[13].mxu1  ;;  %v827_v52 = vpop.f32.mrb[14].mxu0 }
 0x111   :  { %v866_v53 = vadd.f32 %v865_v51, %v864_v48  ;;  %v867_v54 = vpop.f32.mrb[14].mxu1  ;;  %v828_v55 = vpop.f32.mrb[15].mxu0 }
 0x112   :  { %v518_v56 = vadd.f32 %v826_v50, %v698_v0  ;;  %v868_v57 = vpop.f32.mrb[15].mxu1 }
 0x114   :  { %v582_v58 = vadd.f32 %v866_v53, %v518_v56 }
 0x117   :  { %v900_v59 = vpop.f32.mrb[16].mxu0 }
 0x118   :  { %v630_v60 = vadd.f32 %v900_v59, %v566_v29  ;;  %v904_v61 = vpop.f32.mrb[16].mxu1  ;;  %v621_v62 = vpop.f32.mrb[17].mxu0 }
 0x119   :  { %v646_v63 = vadd.f32 %v904_v61, %v582_v58  ;;  %v622_v1 = vadd.f32 %v621_v62, %v558_v13  ;;  %v637_v2 = vpop.f32.mrb[17].mxu1  ;;  %v901_v3 = vpop.f32.mrb[18].mxu0 }
 0x11a   :  { %v638_v4 = vadd.f32 %v637_v2, %v574_v45  ;;  %v633_v5 = vadd.f32 %v901_v3, %v569_v31  ;;  %v905_v6 = vpop.f32.mrb[18].mxu1  ;;  %v624_v7 = vpop.f32.mrb[19].mxu0  ;;  %v653_v11 = vmax.f32 %v630_v60, 0.0 }
 0x11b   :  { %v657_v8 = vmax.f32 %v646_v63, 0.0  ;;  %v625_v9 = vadd.f32 %v624_v7, %v561_v15  ;;  %v640_v10 = vpop.f32.mrb[19].mxu1  ;;  %v651_v16 = vmax.f32 %v622_v1, 0.0 }
 0x11c   :  { %v654_v12 = vmax.f32 %v633_v5, 0.0  ;;  %v641_v0 = vadd.f32 %v640_v10, %v577_v47  ;;  %v655_v18 = vmax.f32 %v638_v4, 0.0 }
 0x11d   :  { %v772_v14 = vpack.c.bf16 %v657_v8, %v657_v8  ;;  %v652_v17 = vmax.f32 %v625_v9, 0.0 }
 0x11e   :  { %v781_v19 = vpack.c.bf16 %v654_v12, %v653_v11  ;;  %v656_v20 = vmax.f32 %v641_v0, 0.0 }
 0x11f   :  { %693 = vst [vmem:[%s1200_s3 + $0x18] sm:$0x1] %v772_v14  ;;  %v776_v13 = vpack.c.bf16 %v652_v17, %v651_v16 }
 0x120   :  { %788 = vst [vmem:[%s1200_s3 + $0x8] sm:$0xff] %v781_v19   ;;  %v786_v15 = vpack.c.bf16 %v656_v20, %v655_v18 }
 0x121   :  { %777 = vst [vmem:[%s1200_s3] sm:$0xff] %v776_v13  }
 0x122   :  { %789 = vst [vmem:[%s1200_s3 + $0x10] sm:$0xff] %v786_v15  }

// kernel: dqn_forward.7
= control target key start
LH: loop header
LB: loop body
LE: loop exit
PB: predicated region body
PF: predicated region fallthrough
CT: control target
= control target key end

     0   :  { %16 = vsyncpa [#allocation5], 0  ;;  %s8881_s17 = smov 0   ;;  %s8883_s18 = smov 0   ;;  %s10326_s0 = inlined_call_operand.vmem [shape: bf16[2,1600], index: 0, kind: input, shape index: {}]   ;;  %s10327_s1 = inlined_call_operand.vmem [shape: s8[1600,2048], index: 1, kind: input, shape index: {}]   ;;  %s10328_s2 = inlined_call_operand.vmem [shape: f32[1,2048], index: 2, kind: input, shape index: {}]   ;;  %s10329_s3 = inlined_call_operand.vmem [shape: f32[1,2048], index: 3, kind: input, shape index: {}]   ;;  %s10330_s4 = inlined_call_operand.vmem [shape: s8[2048,1024], index: 4, kind: input, shape index: {}]   ;;  %s10331_s5 = inlined_call_operand.vmem [shape: f32[1,1024], index: 5, kind: input, shape index: {}]   ;;  %s10332_s6 = inlined_call_operand.vmem [shape: f32[1,1024], index: 6, kind: input, shape index: {}]   ;;  %s10333_s7 = inlined_call_operand.vmem [shape: bf16[1024,256], index: 7, kind: input, shape index: {}]   ;;  %s10334_s8 = inlined_call_operand.vmem [shape: f32[1,256], index: 8, kind: input, shape index: {}]   ;;  %s10335_s9 = inlined_call_operand.vmem [shape: bf16[256,128], index: 9, kind: input, shape index: {}]   ;;  %s10336_s10 = inlined_call_operand.vmem [shape: f32[1,128], index: 10, kind: input, shape index: {}]   ;;  %s10337_s11 = inlined_call_operand.hbm [shape: f32[2,128], index: 11, kind: output, shape index: {}]  }
   0x1   :  { %s8885_s19 = smov 0  }
   0x2 LB: > { %s8897_s20 = sadd.s32 4294967295, %s8815_s19   ;;  %s8900_s21 = sadd.s32 1, %s8815_s19   ;;  %s8815_s19 = sphi %s8885_s19, %s10340_s19   ;;  %s8811_s18 = sphi %s8883_s18, %s10339_s18   ;;  %s8807_s17 = sphi %s8881_s17, %s10338_s17  }
   0x3   : > { %s47_s22 = ssub.s32 %s8815_s19, %s8900_s21  ;;  %s50_s23 = sadd.s32 1, %s8811_s18 }
   0x4   : > { %p48_p0 = scmp.eq.s32.totalorder %s47_s22, 0  ;;  %p57_p1 = scmp.ne.s32.totalorder %s8811_s18, %s8807_s17 }
   0x5   : > { %p58_p2 = scmp.eq.s32.totalorder %s8815_s19, 0  ;;  %p6977_p4 = scmp.ge.s32.totalorder %s8815_s19, 4 }
   0x6   : > { %s8909_s24 = scalar_select %p48_p0, %s8811_s18, %s50_s23  }
   0x7   : > { %p59_p3 = por %p58_p2, %p57_p1  ;;  %329 = sbr.rel (%p6977_p4) target bundleno = 119 (0x77), region = 44 }
   0xe   : > { %332 = sbr.rel (!%p59_p3) target bundleno = 119 (0x77), region = 48  ;;  %s334_s25 = sand.u32 (%p59_p3), 1, %s8811_s18  }
   0xf   : > { %s7139_s26 = sshll.u32 (%p59_p3), %s8815_s19, 5  ;;  %s8519_s27 = smul.u32 (%p59_p3), 1600, %s334_s25 }
  0x10   : > { %s8917_s30 = scalar_lea.vmem (%p59_p3), %s10327_s1, %s7139_s26 }
  0x11   : > { %v352_v0 = vld [vmem:[%s8917_s30] sm:$0xff] (%p59_p3)  ;;  %v354_v1 = vld [vmem:[%s8917_s30 + $0x8] sm:$0xff] (%p59_p3)  ;;  %v356_v2 = vld [vmem:[%s8917_s30 + $0x10] sm:$0xff] (%p59_p3)  ;;  %s8925_s12 = scalar_lea.vmem (%p59_p3), [#allocation3], %s8519_s27 }
  0x12   : > { %v358_v3 = vld [vmem:[%s8917_s30 + $0x18] sm:$0xff] (%p59_p3)  ;;  %v360_v4 = vld [vmem:[%s8917_s30 + $0x80] sm:$0xff] (%p59_p3)  ;;  %v362_v5 = vld [vmem:[%s8917_s30 + $0x88] sm:$0xff] (%p59_p3)  ;;  %353 = vst [vmem:[%s8925_s12] sm:$0xff] (%p59_p3), %v352_v0 }
  0x13   : > { %355 = vst [vmem:[%s8925_s12 + $0x8] sm:$0xff] (%p59_p3), %v354_v1  ;;  %357 = vst [vmem:[%s8925_s12 + $0x10] sm:$0xff] (%p59_p3), %v356_v2  ;;  %v364_v6 = vld [vmem:[%s8917_s30 + $0x90] sm:$0xff] (%p59_p3)  ;;  %v366_v7 = vld [vmem:[%s8917_s30 + $0x98] sm:$0xff] (%p59_p3) }
  0x14   : > { %359 = vst [vmem:[%s8925_s12 + $0x18] sm:$0xff] (%p59_p3), %v358_v3  ;;  %361 = vst [vmem:[%s8925_s12 + $0x20] sm:$0xff] (%p59_p3), %v360_v4  ;;  %v368_v8 = vld [vmem:[%s8917_s30 + $0x100] sm:$0xff] (%p59_p3)  ;;  %v370_v9 = vld [vmem:[%s8917_s30 + $0x108] sm:$0xff] (%p59_p3) }
  0x15   : > { %363 = vst [vmem:[%s8925_s12 + $0x28] sm:$0xff] %v362_v5  ;;  %365 = vst [vmem:[%s8925_s12 + $0x30] sm:$0xff] %v364_v6  ;;  %v372_v10 = vld [vmem:[%s8917_s30 + $0x110] sm:$0xff]  ;;  %v374_v11 = vld [vmem:[%s8917_s30 + $0x118] sm:$0xff] }
  0x16   : > { %367 = vst [vmem:[%s8925_s12 + $0x38] sm:$0xff] %v366_v7  ;;  %369 = vst [vmem:[%s8925_s12 + $0x40] sm:$0xff] %v368_v8  ;;  %v376_v12 = vld [vmem:[%s8917_s30 + $0x180] sm:$0xff]  ;;  %v378_v13 = vld [vmem:[%s8917_s30 + $0x188] sm:$0xff] }
  0x17   : > { %371 = vst [vmem:[%s8925_s12 + $0x48] sm:$0xff] %v370_v9  ;;  %373 = vst [vmem:[%s8925_s12 + $0x50] sm:$0xff] %v372_v10  ;;  %v380_v14 = vld [vmem:[%s8917_s30 + $0x190] sm:$0xff]  ;;  %v382_v15 = vld [vmem:[%s8917_s30 + $0x198] sm:$0xff] }
  0x18   : > { %375 = vst [vmem:[%s8925_s12 + $0x58] sm:$0xff] %v374_v11  ;;  %377 = vst [vmem:[%s8925_s12 + $0x60] sm:$0xff] %v376_v12  ;;  %v384_v16 = vld [vmem:[%s8917_s30 + $0x200] sm:$0xff]  ;;  %v386_v17 = vld [vmem:[%s8917_s30 + $0x208] sm:$0xff] }
  0x19   : > { %379 = vst [vmem:[%s8925_s12 + $0x68] sm:$0xff] %v378_v13  ;;  %381 = vst [vmem:[%s8925_s12 + $0x70] sm:$0xff] %v380_v14  ;;  %v388_v18 = vld [vmem:[%s8917_s30 + $0x210] sm:$0xff]  ;;  %v390_v19 = vld [vmem:[%s8917_s30 + $0x218] sm:$0xff] }
  0x1a   : > { %383 = vst [vmem:[%s8925_s12 + $0x78] sm:$0xff] %v382_v15  ;;  %385 = vst [vmem:[%s8925_s12 + $0x80] sm:$0xff] %v384_v16  ;;  %v392_v20 = vld [vmem:[%s8917_s30 + $0x280] sm:$0xff]  ;;  %v394_v21 = vld [vmem:[%s8917_s30 + $0x288] sm:$0xff] }
  0x1b   : > { %387 = vst [vmem:[%s8925_s12 + $0x88] sm:$0xff] %v386_v17  ;;  %389 = vst [vmem:[%s8925_s12 + $0x90] sm:$0xff] %v388_v18  ;;  %v396_v22 = vld [vmem:[%s8917_s30 + $0x290] sm:$0xff]  ;;  %v398_v23 = vld [vmem:[%s8917_s30 + $0x298] sm:$0xff] }
  0x1c   : > { %391 = vst [vmem:[%s8925_s12 + $0x98] sm:$0xff] %v390_v19  ;;  %393 = vst [vmem:[%s8925_s12 + $0xa0] sm:$0xff] %v392_v20  ;;  %v400_v24 = vld [vmem:[%s8917_s30 + $0x300] sm:$0xff]  ;;  %v402_v25 = vld [vmem:[%s8917_s30 + $0x308] sm:$0xff] }
  0x1d   : > { %395 = vst [vmem:[%s8925_s12 + $0xa8] sm:$0xff] %v394_v21  ;;  %397 = vst [vmem:[%s8925_s12 + $0xb0] sm:$0xff] %v396_v22  ;;  %v404_v26 = vld [vmem:[%s8917_s30 + $0x310] sm:$0xff]  ;;  %v406_v27 = vld [vmem:[%s8917_s30 + $0x318] sm:$0xff] }
  0x1e   : > { %399 = vst [vmem:[%s8925_s12 + $0xb8] sm:$0xff] %v398_v23  ;;  %401 = vst [vmem:[%s8925_s12 + $0xc0] sm:$0xff] %v400_v24  ;;  %v408_v28 = vld [vmem:[%s8917_s30 + $0x380] sm:$0xff]  ;;  %v410_v29 = vld [vmem:[%s8917_s30 + $0x388] sm:$0xff] }
  0x1f   : > { %403 = vst [vmem:[%s8925_s12 + $0xc8] sm:$0xff] %v402_v25  ;;  %405 = vst [vmem:[%s8925_s12 + $0xd0] sm:$0xff] %v404_v26  ;;  %v412_v30 = vld [vmem:[%s8917_s30 + $0x390] sm:$0xff]  ;;  %v414_v31 = vld [vmem:[%s8917_s30 + $0x398] sm:$0xff] }
  0x20   : > { %407 = vst [vmem:[%s8925_s12 + $0xd8] sm:$0xff] %v406_v27  ;;  %409 = vst [vmem:[%s8925_s12 + $0xe0] sm:$0xff] %v408_v28  ;;  %v416_v32 = vld [vmem:[%s8917_s30 + $0x400] sm:$0xff]  ;;  %v418_v33 = vld [vmem:[%s8917_s30 + $0x408] sm:$0xff] }
  0x21   : > { %411 = vst [vmem:[%s8925_s12 + $0xe8] sm:$0xff] %v410_v29  ;;  %413 = vst [vmem:[%s8925_s12 + $0xf0] sm:$0xff] %v412_v30  ;;  %v420_v34 = vld [vmem:[%s8917_s30 + $0x410] sm:$0xff]  ;;  %v422_v35 = vld [vmem:[%s8917_s30 + $0x418] sm:$0xff] }
  0x22   : > { %415 = vst [vmem:[%s8925_s12 + $0xf8] sm:$0xff] %v414_v31  ;;  %417 = vst [vmem:[%s8925_s12 + $0x100] sm:$0xff] %v416_v32  ;;  %v424_v36 = vld [vmem:[%s8917_s30 + $0x480] sm:$0xff]  ;;  %v426_v37 = vld [vmem:[%s8917_s30 + $0x488] sm:$0xff] }
  0x23   : > { %419 = vst [vmem:[%s8925_s12 + $0x108] sm:$0xff] %v418_v33  ;;  %421 = vst [vmem:[%s8925_s12 + $0x110] sm:$0xff] %v420_v34  ;;  %v428_v38 = vld [vmem:[%s8917_s30 + $0x490] sm:$0xff]  ;;  %v430_v39 = vld [vmem:[%s8917_s30 + $0x498] sm:$0xff] }
  0x24   : > { %423 = vst [vmem:[%s8925_s12 + $0x118] sm:$0xff] %v422_v35  ;;  %425 = vst [vmem:[%s8925_s12 + $0x120] sm:$0xff] %v424_v36  ;;  %v432_v40 = vld [vmem:[%s8917_s30 + $0x500] sm:$0xff]  ;;  %v434_v41 = vld [vmem:[%s8917_s30 + $0x508] sm:$0xff] }
  0x25   : > { %427 = vst [vmem:[%s8925_s12 + $0x128] sm:$0xff] %v426_v37  ;;  %429 = vst [vmem:[%s8925_s12 + $0x130] sm:$0xff] %v428_v38  ;;  %v436_v42 = vld [vmem:[%s8917_s30 + $0x510] sm:$0xff]  ;;  %v438_v43 = vld [vmem:[%s8917_s30 + $0x518] sm:$0xff] }
  0x26   : > { %431 = vst [vmem:[%s8925_s12 + $0x138] sm:$0xff] %v430_v39  ;;  %433 = vst [vmem:[%s8925_s12 + $0x140] sm:$0xff] %v432_v40  ;;  %v440_v44 = vld [vmem:[%s8917_s30 + $0x580] sm:$0xff]  ;;  %v442_v45 = vld [vmem:[%s8917_s30 + $0x588] sm:$0xff] }
  0x27   : > { %435 = vst [vmem:[%s8925_s12 + $0x148] sm:$0xff] %v434_v41  ;;  %437 = vst [vmem:[%s8925_s12 + $0x150] sm:$0xff] %v436_v42  ;;  %v444_v46 = vld [vmem:[%s8917_s30 + $0x590] sm:$0xff]  ;;  %v446_v47 = vld [vmem:[%s8917_s30 + $0x598] sm:$0xff] }
  0x28   : > { %439 = vst [vmem:[%s8925_s12 + $0x158] sm:$0xff] %v438_v43  ;;  %441 = vst [vmem:[%s8925_s12 + $0x160] sm:$0xff] %v440_v44  ;;  %v448_v48 = vld [vmem:[%s8917_s30 + $0x600] sm:$0xff]  ;;  %v450_v49 = vld [vmem:[%s8917_s30 + $0x608] sm:$0xff] }
  0x29   : > { %443 = vst [vmem:[%s8925_s12 + $0x168] sm:$0xff] %v442_v45  ;;  %445 = vst [vmem:[%s8925_s12 + $0x170] sm:$0xff] %v444_v46  ;;  %v452_v50 = vld [vmem:[%s8917_s30 + $0x610] sm:$0xff]  ;;  %v454_v51 = vld [vmem:[%s8917_s30 + $0x618] sm:$0xff] }
  0x2a   : > { %447 = vst [vmem:[%s8925_s12 + $0x178] sm:$0xff] %v446_v47  ;;  %449 = vst [vmem:[%s8925_s12 + $0x180] sm:$0xff] %v448_v48  ;;  %v456_v52 = vld [vmem:[%s8917_s30 + $0x680] sm:$0xff]  ;;  %v458_v53 = vld [vmem:[%s8917_s30 + $0x688] sm:$0xff] }
  0x2b   : > { %451 = vst [vmem:[%s8925_s12 + $0x188] sm:$0xff] %v450_v49  ;;  %453 = vst [vmem:[%s8925_s12 + $0x190] sm:$0xff] %v452_v50  ;;  %v460_v54 = vld [vmem:[%s8917_s30 + $0x690] sm:$0xff]  ;;  %v462_v55 = vld [vmem:[%s8917_s30 + $0x698] sm:$0xff] }
  0x2c   : > { %455 = vst [vmem:[%s8925_s12 + $0x198] sm:$0xff] %v454_v51  ;;  %457 = vst [vmem:[%s8925_s12 + $0x1a0] sm:$0xff] %v456_v52  ;;  %v464_v56 = vld [vmem:[%s8917_s30 + $0x700] sm:$0xff]  ;;  %v466_v57 = vld [vmem:[%s8917_s30 + $0x708] sm:$0xff] }
  0x2d   : > { %459 = vst [vmem:[%s8925_s12 + $0x1a8] sm:$0xff] %v458_v53  ;;  %461 = vst [vmem:[%s8925_s12 + $0x1b0] sm:$0xff] %v460_v54  ;;  %v468_v58 = vld [vmem:[%s8917_s30 + $0x710] sm:$0xff]  ;;  %v470_v59 = vld [vmem:[%s8917_s30 + $0x718] sm:$0xff] }
  0x2e   : > { %463 = vst [vmem:[%s8925_s12 + $0x1b8] sm:$0xff] %v462_v55  ;;  %465 = vst [vmem:[%s8925_s12 + $0x1c0] sm:$0xff] %v464_v56  ;;  %v472_v60 = vld [vmem:[%s8917_s30 + $0x780] sm:$0xff]  ;;  %v474_v61 = vld [vmem:[%s8917_s30 + $0x788] sm:$0xff] }
  0x2f   : > { %467 = vst [vmem:[%s8925_s12 + $0x1c8] sm:$0xff] %v466_v57  ;;  %469 = vst [vmem:[%s8925_s12 + $0x1d0] sm:$0xff] %v468_v58  ;;  %v476_v62 = vld [vmem:[%s8917_s30 + $0x790] sm:$0xff]  ;;  %v478_v63 = vld [vmem:[%s8917_s30 + $0x798] sm:$0xff] }
  0x30   : > { %471 = vst [vmem:[%s8925_s12 + $0x1d8] sm:$0xff] %v470_v59  ;;  %473 = vst [vmem:[%s8925_s12 + $0x1e0] sm:$0xff] %v472_v60  ;;  %v480_v0 = vld [vmem:[%s8917_s30 + $0x800] sm:$0xff]  ;;  %v482_v1 = vld [vmem:[%s8917_s30 + $0x808] sm:$0xff] }
  0x31   : > { %475 = vst [vmem:[%s8925_s12 + $0x1e8] sm:$0xff] %v474_v61  ;;  %477 = vst [vmem:[%s8925_s12 + $0x1f0] sm:$0xff] %v476_v62  ;;  %v484_v2 = vld [vmem:[%s8917_s30 + $0x810] sm:$0xff]  ;;  %v486_v3 = vld [vmem:[%s8917_s30 + $0x818] sm:$0xff] }
  0x32   : > { %479 = vst [vmem:[%s8925_s12 + $0x1f8] sm:$0xff] %v478_v63  ;;  %481 = vst [vmem:[%s8925_s12 + $0x200] sm:$0xff] %v480_v0  ;;  %v488_v4 = vld [vmem:[%s8917_s30 + $0x880] sm:$0xff]  ;;  %v490_v5 = vld [vmem:[%s8917_s30 + $0x888] sm:$0xff] }
  0x33   : > { %483 = vst [vmem:[%s8925_s12 + $0x208] sm:$0xff] %v482_v1  ;;  %485 = vst [vmem:[%s8925_s12 + $0x210] sm:$0xff] %v484_v2  ;;  %v492_v6 = vld [vmem:[%s8917_s30 + $0x890] sm:$0xff]  ;;  %v494_v7 = vld [vmem:[%s8917_s30 + $0x898] sm:$0xff] }
  0x34   : > { %487 = vst [vmem:[%s8925_s12 + $0x218] sm:$0xff] %v486_v3  ;;  %489 = vst [vmem:[%s8925_s12 + $0x220] sm:$0xff] %v488_v4  ;;  %v496_v8 = vld [vmem:[%s8917_s30 + $0x900] sm:$0xff]  ;;  %v498_v9 = vld [vmem:[%s8917_s30 + $0x908] sm:$0xff] }
  0x35   : > { %491 = vst [vmem:[%s8925_s12 + $0x228] sm:$0xff] %v490_v5  ;;  %493 = vst [vmem:[%s8925_s12 + $0x230] sm:$0xff] %v492_v6  ;;  %v500_v10 = vld [vmem:[%s8917_s30 + $0x910] sm:$0xff]  ;;  %v502_v11 = vld [vmem:[%s8917_s30 + $0x918] sm:$0xff] }
  0x36   : > { %495 = vst [vmem:[%s8925_s12 + $0x238] sm:$0xff] %v494_v7  ;;  %497 = vst [vmem:[%s8925_s12 + $0x240] sm:$0xff] %v496_v8  ;;  %v504_v12 = vld [vmem:[%s8917_s30 + $0x980] sm:$0xff]  ;;  %v506_v13 = vld [vmem:[%s8917_s30 + $0x988] sm:$0xff] }
  0x37   : > { %499 = vst [vmem:[%s8925_s12 + $0x248] sm:$0xff] %v498_v9  ;;  %501 = vst [vmem:[%s8925_s12 + $0x250] sm:$0xff] %v500_v10  ;;  %v508_v14 = vld [vmem:[%s8917_s30 + $0x990] sm:$0xff]  ;;  %v510_v15 = vld [vmem:[%s8917_s30 + $0x998] sm:$0xff] }
  0x38   : > { %503 = vst [vmem:[%s8925_s12 + $0x258] sm:$0xff] %v502_v11  ;;  %505 = vst [vmem:[%s8925_s12 + $0x260] sm:$0xff] %v504_v12  ;;  %v512_v16 = vld [vmem:[%s8917_s30 + $0xa00] sm:$0xff]  ;;  %v514_v17 = vld [vmem:[%s8917_s30 + $0xa08] sm:$0xff] }
  0x39   : > { %507 = vst [vmem:[%s8925_s12 + $0x268] sm:$0xff] %v506_v13  ;;  %509 = vst [vmem:[%s8925_s12 + $0x270] sm:$0xff] %v508_v14  ;;  %v516_v18 = vld [vmem:[%s8917_s30 + $0xa10] sm:$0xff]  ;;  %v518_v19 = vld [vmem:[%s8917_s30 + $0xa18] sm:$0xff] }
  0x3a   : > { %511 = vst [vmem:[%s8925_s12 + $0x278] sm:$0xff] %v510_v15  ;;  %513 = vst [vmem:[%s8925_s12 + $0x280] sm:$0xff] %v512_v16  ;;  %v520_v20 = vld [vmem:[%s8917_s30 + $0xa80] sm:$0xff]  ;;  %v522_v21 = vld [vmem:[%s8917_s30 + $0xa88] sm:$0xff] }
  0x3b   : > { %515 = vst [vmem:[%s8925_s12 + $0x288] sm:$0xff] %v514_v17  ;;  %517 = vst [vmem:[%s8925_s12 + $0x290] sm:$0xff] %v516_v18  ;;  %v524_v22 = vld [vmem:[%s8917_s30 + $0xa90] sm:$0xff]  ;;  %v526_v23 = vld [vmem:[%s8917_s30 + $0xa98] sm:$0xff] }
  0x3c   : > { %519 = vst [vmem:[%s8925_s12 + $0x298] sm:$0xff] %v518_v19  ;;  %521 = vst [vmem:[%s8925_s12 + $0x2a0] sm:$0xff] %v520_v20  ;;  %v528_v24 = vld [vmem:[%s8917_s30 + $0xb00] sm:$0xff]  ;;  %v530_v25 = vld [vmem:[%s8917_s30 + $0xb08] sm:$0xff] }
  0x3d   : > { %523 = vst [vmem:[%s8925_s12 + $0x2a8] sm:$0xff] %v522_v21  ;;  %525 = vst [vmem:[%s8925_s12 + $0x2b0] sm:$0xff] %v524_v22  ;;  %v532_v26 = vld [vmem:[%s8917_s30 + $0xb10] sm:$0xff]  ;;  %v534_v27 = vld [vmem:[%s8917_s30 + $0xb18] sm:$0xff] }
  0x3e   : > { %527 = vst [vmem:[%s8925_s12 + $0x2b8] sm:$0xff] %v526_v23  ;;  %529 = vst [vmem:[%s8925_s12 + $0x2c0] sm:$0xff] %v528_v24  ;;  %v536_v28 = vld [vmem:[%s8917_s30 + $0xb80] sm:$0xff]  ;;  %v538_v29 = vld [vmem:[%s8917_s30 + $0xb88] sm:$0xff] }
  0x3f   : > { %531 = vst [vmem:[%s8925_s12 + $0x2c8] sm:$0xff] %v530_v25  ;;  %533 = vst [vmem:[%s8925_s12 + $0x2d0] sm:$0xff] %v532_v26  ;;  %v540_v30 = vld [vmem:[%s8917_s30 + $0xb90] sm:$0xff]  ;;  %v542_v31 = vld [vmem:[%s8917_s30 + $0xb98] sm:$0xff] }
  0x40   : > { %535 = vst [vmem:[%s8925_s12 + $0x2d8] sm:$0xff] %v534_v27  ;;  %537 = vst [vmem:[%s8925_s12 + $0x2e0] sm:$0xff] %v536_v28  ;;  %v544_v32 = vld [vmem:[%s8917_s30 + $0xc00] sm:$0xff]  ;;  %v546_v33 = vld [vmem:[%s8917_s30 + $0xc08] sm:$0xff] }
  0x41   : > { %539 = vst [vmem:[%s8925_s12 + $0x2e8] sm:$0xff] %v538_v29  ;;  %541 = vst [vmem:[%s8925_s12 + $0x2f0] sm:$0xff] %v540_v30  ;;  %v548_v34 = vld [vmem:[%s8917_s30 + $0xc10] sm:$0xff]  ;;  %v550_v35 = vld [vmem:[%s8917_s30 + $0xc18] sm:$0xff] }
  0x42   : > { %543 = vst [vmem:[%s8925_s12 + $0x2f8] sm:$0xff] %v542_v31  ;;  %545 = vst [vmem:[%s8925_s12 + $0x300] sm:$0xff] %v544_v32  ;;  %v552_v36 = vld [vmem:[%s8917_s30 + $0xc80] sm:$0xff]  ;;  %v554_v37 = vld [vmem:[%s8917_s30 + $0xc88] sm:$0xff] }
  0x43   : > { %547 = vst [vmem:[%s8925_s12 + $0x308] sm:$0xff] %v546_v33  ;;  %549 = vst [vmem:[%s8925_s12 + $0x310] sm:$0xff] %v548_v34  ;;  %v556_v38 = vld [vmem:[%s8917_s30 + $0xc90] sm:$0xff]  ;;  %v558_v39 = vld [vmem:[%s8917_s30 + $0xc98] sm:$0xff] }
  0x44   : > { %551 = vst [vmem:[%s8925_s12 + $0x318] sm:$0xff] %v550_v35  ;;  %553 = vst [vmem:[%s8925_s12 + $0x320] sm:$0xff] %v552_v36  ;;  %v560_v40 = vld [vmem:[%s8917_s30 + $0xd00] sm:$0xff]  ;;  %v562_v41 = vld [vmem:[%s8917_s30 + $0xd08] sm:$0xff] }
  0x45   : > { %555 = vst [vmem:[%s8925_s12 + $0x328] sm:$0xff] %v554_v37  ;;  %557 = vst [vmem:[%s8925_s12 + $0x330] sm:$0xff] %v556_v38  ;;  %v564_v42 = vld [vmem:[%s8917_s30 + $0xd10] sm:$0xff]  ;;  %v566_v43 = vld [vmem:[%s8917_s30 + $0xd18] sm:$0xff] }
  0x46   : > { %559 = vst [vmem:[%s8925_s12 + $0x338] sm:$0xff] %v558_v39  ;;  %561 = vst [vmem:[%s8925_s12 + $0x340] sm:$0xff] %v560_v40  ;;  %v568_v44 = vld [vmem:[%s8917_s30 + $0xd80] sm:$0xff]  ;;  %v570_v45 = vld [vmem:[%s8917_s30 + $0xd88] sm:$0xff] }
  0x47   : > { %563 = vst [vmem:[%s8925_s12 + $0x348] sm:$0xff] %v562_v41  ;;  %565 = vst [vmem:[%s8925_s12 + $0x350] sm:$0xff] %v564_v42  ;;  %v572_v46 = vld [vmem:[%s8917_s30 + $0xd90] sm:$0xff]  ;;  %v574_v47 = vld [vmem:[%s8917_s30 + $0xd98] sm:$0xff] }
  0x48   : > { %567 = vst [vmem:[%s8925_s12 + $0x358] sm:$0xff] %v566_v43  ;;  %569 = vst [vmem:[%s8925_s12 + $0x360] sm:$0xff] %v568_v44  ;;  %v576_v48 = vld [vmem:[%s8917_s30 + $0xe00] sm:$0xff]  ;;  %v578_v49 = vld [vmem:[%s8917_s30 + $0xe08] sm:$0xff] }
  0x49   : > { %571 = vst [vmem:[%s8925_s12 + $0x368] sm:$0xff] %v570_v45  ;;  %573 = vst [vmem:[%s8925_s12 + $0x370] sm:$0xff] %v572_v46  ;;  %v580_v50 = vld [vmem:[%s8917_s30 + $0xe10] sm:$0xff]  ;;  %v582_v51 = vld [vmem:[%s8917_s30 + $0xe18] sm:$0xff] }
  0x4a   : > { %575 = vst [vmem:[%s8925_s12 + $0x378] sm:$0xff] %v574_v47  ;;  %577 = vst [vmem:[%s8925_s12 + $0x380] sm:$0xff] %v576_v48  ;;  %v584_v52 = vld [vmem:[%s8917_s30 + $0xe80] sm:$0xff]  ;;  %v586_v53 = vld [vmem:[%s8917_s30 + $0xe88] sm:$0xff] }
  0x4b   : > { %579 = vst [vmem:[%s8925_s12 + $0x388] sm:$0xff] %v578_v49  ;;  %581 = vst [vmem:[%s8925_s12 + $0x390] sm:$0xff] %v580_v50  ;;  %v588_v54 = vld [vmem:[%s8917_s30 + $0xe90] sm:$0xff]  ;;  %v590_v55 = vld [vmem:[%s8917_s30 + $0xe98] sm:$0xff] }
  0x4c   : > { %583 = vst [vmem:[%s8925_s12 + $0x398] sm:$0xff] %v582_v51  ;;  %585 = vst [vmem:[%s8925_s12 + $0x3a0] sm:$0xff] %v584_v52  ;;  %v592_v56 = vld [vmem:[%s8917_s30 + $0xf00] sm:$0xff]  ;;  %v594_v57 = vld [vmem:[%s8917_s30 + $0xf08] sm:$0xff] }
  0x4d   : > { %587 = vst [vmem:[%s8925_s12 + $0x3a8] sm:$0xff] %v586_v53  ;;  %589 = vst [vmem:[%s8925_s12 + $0x3b0] sm:$0xff] %v588_v54  ;;  %v596_v58 = vld [vmem:[%s8917_s30 + $0xf10] sm:$0xff]  ;;  %v598_v59 = vld [vmem:[%s8917_s30 + $0xf18] sm:$0xff] }
  0x4e   : > { %591 = vst [vmem:[%s8925_s12 + $0x3b8] sm:$0xff] %v590_v55  ;;  %593 = vst [vmem:[%s8925_s12 + $0x3c0] sm:$0xff] %v592_v56  ;;  %v600_v60 = vld [vmem:[%s8917_s30 + $0xf80] sm:$0xff]  ;;  %v602_v61 = vld [vmem:[%s8917_s30 + $0xf88] sm:$0xff] }
  0x4f   : > { %595 = vst [vmem:[%s8925_s12 + $0x3c8] sm:$0xff] %v594_v57  ;;  %597 = vst [vmem:[%s8925_s12 + $0x3d0] sm:$0xff] %v596_v58  ;;  %v604_v62 = vld [vmem:[%s8917_s30 + $0xf90] sm:$0xff]  ;;  %v606_v63 = vld [vmem:[%s8917_s30 + $0xf98] sm:$0xff] }
  0x50   : > { %599 = vst [vmem:[%s8925_s12 + $0x3d8] sm:$0xff] %v598_v59  ;;  %601 = vst [vmem:[%s8925_s12 + $0x3e0] sm:$0xff] %v600_v60  ;;  %v608_v0 = vld [vmem:[%s8917_s30 + $0x1000] sm:$0xff]  ;;  %v610_v1 = vld [vmem:[%s8917_s30 + $0x1008] sm:$0xff] }
  0x51   : > { %603 = vst [vmem:[%s8925_s12 + $0x3e8] sm:$0xff] %v602_v61  ;;  %605 = vst [vmem:[%s8925_s12 + $0x3f0] sm:$0xff] %v604_v62  ;;  %v612_v2 = vld [vmem:[%s8917_s30 + $0x1010] sm:$0xff]  ;;  %v614_v3 = vld [vmem:[%s8917_s30 + $0x1018] sm:$0xff] }
  0x52   : > { %607 = vst [vmem:[%s8925_s12 + $0x3f8] sm:$0xff] %v606_v63  ;;  %609 = vst [vmem:[%s8925_s12 + $0x400] sm:$0xff] %v608_v0  ;;  %v616_v4 = vld [vmem:[%s8917_s30 + $0x1080] sm:$0xff]  ;;  %v618_v5 = vld [vmem:[%s8917_s30 + $0x1088] sm:$0xff] }
  0x53   : > { %611 = vst [vmem:[%s8925_s12 + $0x408] sm:$0xff] %v610_v1  ;;  %613 = vst [vmem:[%s8925_s12 + $0x410] sm:$0xff] %v612_v2  ;;  %v620_v6 = vld [vmem:[%s8917_s30 + $0x1090] sm:$0xff]  ;;  %v622_v7 = vld [vmem:[%s8917_s30 + $0x1098] sm:$0xff] }
  0x54   : > { %615 = vst [vmem:[%s8925_s12 + $0x418] sm:$0xff] %v614_v3  ;;  %617 = vst [vmem:[%s8925_s12 + $0x420] sm:$0xff] %v616_v4  ;;  %v624_v8 = vld [vmem:[%s8917_s30 + $0x1100] sm:$0xff]  ;;  %v626_v9 = vld [vmem:[%s8917_s30 + $0x1108] sm:$0xff] }
  0x55   : > { %619 = vst [vmem:[%s8925_s12 + $0x428] sm:$0xff] %v618_v5  ;;  %621 = vst [vmem:[%s8925_s12 + $0x430] sm:$0xff] %v620_v6  ;;  %v628_v10 = vld [vmem:[%s8917_s30 + $0x1110] sm:$0xff]  ;;  %v630_v11 = vld [vmem:[%s8917_s30 + $0x1118] sm:$0xff] }
  0x56   : > { %623 = vst [vmem:[%s8925_s12 + $0x438] sm:$0xff] %v622_v7  ;;  %625 = vst [vmem:[%s8925_s12 + $0x440] sm:$0xff] %v624_v8  ;;  %v632_v12 = vld [vmem:[%s8917_s30 + $0x1180] sm:$0xff]  ;;  %v634_v13 = vld [vmem:[%s8917_s30 + $0x1188] sm:$0xff] }
  0x57   : > { %627 = vst [vmem:[%s8925_s12 + $0x448] sm:$0xff] %v626_v9  ;;  %629 = vst [vmem:[%s8925_s12 + $0x450] sm:$0xff] %v628_v10  ;;  %v636_v14 = vld [vmem:[%s8917_s30 + $0x1190] sm:$0xff]  ;;  %v638_v15 = vld [vmem:[%s8917_s30 + $0x1198] sm:$0xff] }
  0x58   : > { %631 = vst [vmem:[%s8925_s12 + $0x458] sm:$0xff] %v630_v11  ;;  %633 = vst [vmem:[%s8925_s12 + $0x460] sm:$0xff] %v632_v12  ;;  %v640_v16 = vld [vmem:[%s8917_s30 + $0x1200] sm:$0xff]  ;;  %v642_v17 = vld [vmem:[%s8917_s30 + $0x1208] sm:$0xff] }
  0x59   : > { %635 = vst [vmem:[%s8925_s12 + $0x468] sm:$0xff] %v634_v13  ;;  %637 = vst [vmem:[%s8925_s12 + $0x470] sm:$0xff] %v636_v14  ;;  %v644_v18 = vld [vmem:[%s8917_s30 + $0x1210] sm:$0xff]  ;;  %v646_v19 = vld [vmem:[%s8917_s30 + $0x1218] sm:$0xff] }
  0x5a   : > { %639 = vst [vmem:[%s8925_s12 + $0x478] sm:$0xff] %v638_v15  ;;  %641 = vst [vmem:[%s8925_s12 + $0x480] sm:$0xff] %v640_v16  ;;  %v648_v20 = vld [vmem:[%s8917_s30 + $0x1280] sm:$0xff]  ;;  %v650_v21 = vld [vmem:[%s8917_s30 + $0x1288] sm:$0xff] }
  0x5b   : > { %643 = vst [vmem:[%s8925_s12 + $0x488] sm:$0xff] %v642_v17  ;;  %645 = vst [vmem:[%s8925_s12 + $0x490] sm:$0xff] %v644_v18  ;;  %v652_v22 = vld [vmem:[%s8917_s30 + $0x1290] sm:$0xff]  ;;  %v654_v23 = vld [vmem:[%s8917_s30 + $0x1298] sm:$0xff] }
  0x5c   : > { %647 = vst [vmem:[%s8925_s12 + $0x498] sm:$0xff] %v646_v19  ;;  %649 = vst [vmem:[%s8925_s12 + $0x4a0] sm:$0xff] %v648_v20  ;;  %v656_v24 = vld [vmem:[%s8917_s30 + $0x1300] sm:$0xff]  ;;  %v658_v25 = vld [vmem:[%s8917_s30 + $0x1308] sm:$0xff] }
  0x5d   : > { %651 = vst [vmem:[%s8925_s12 + $0x4a8] sm:$0xff] %v650_v21  ;;  %653 = vst [vmem:[%s8925_s12 + $0x4b0] sm:$0xff] %v652_v22  ;;  %v660_v26 = vld [vmem:[%s8917_s30 + $0x1310] sm:$0xff]  ;;  %v662_v27 = vld [vmem:[%s8917_s30 + $0x1318] sm:$0xff] }
  0x5e   : > { %655 = vst [vmem:[%s8925_s12 + $0x4b8] sm:$0xff] %v654_v23  ;;  %657 = vst [vmem:[%s8925_s12 + $0x4c0] sm:$0xff] %v656_v24  ;;  %v664_v28 = vld [vmem:[%s8917_s30 + $0x1380] sm:$0xff]  ;;  %v666_v29 = vld [vmem:[%s8917_s30 + $0x1388] sm:$0xff] }
  0x5f   : > { %659 = vst [vmem:[%s8925_s12 + $0x4c8] sm:$0xff] %v658_v25  ;;  %661 = vst [vmem:[%s8925_s12 + $0x4d0] sm:$0xff] %v660_v26  ;;  %v668_v30 = vld [vmem:[%s8917_s30 + $0x1390] sm:$0xff]  ;;  %v670_v31 = vld [vmem:[%s8917_s30 + $0x1398] sm:$0xff] }
  0x60   : > { %663 = vst [vmem:[%s8925_s12 + $0x4d8] sm:$0xff] %v662_v27  ;;  %665 = vst [vmem:[%s8925_s12 + $0x4e0] sm:$0xff] %v664_v28  ;;  %v672_v32 = vld [vmem:[%s8917_s30 + $0x1400] sm:$0xff]  ;;  %v674_v33 = vld [vmem:[%s8917_s30 + $0x1408] sm:$0xff] }
  0x61   : > { %667 = vst [vmem:[%s8925_s12 + $0x4e8] sm:$0xff] %v666_v29  ;;  %669 = vst [vmem:[%s8925_s12 + $0x4f0] sm:$0xff] %v668_v30  ;;  %v676_v34 = vld [vmem:[%s8917_s30 + $0x1410] sm:$0xff]  ;;  %v678_v35 = vld [vmem:[%s8917_s30 + $0x1418] sm:$0xff] }
  0x62   : > { %671 = vst [vmem:[%s8925_s12 + $0x4f8] sm:$0xff] %v670_v31  ;;  %673 = vst [vmem:[%s8925_s12 + $0x500] sm:$0xff] %v672_v32  ;;  %v680_v36 = vld [vmem:[%s8917_s30 + $0x1480] sm:$0xff]  ;;  %v682_v37 = vld [vmem:[%s8917_s30 + $0x1488] sm:$0xff] }
  0x63   : > { %675 = vst [vmem:[%s8925_s12 + $0x508] sm:$0xff] %v674_v33  ;;  %677 = vst [vmem:[%s8925_s12 + $0x510] sm:$0xff] %v676_v34  ;;  %v684_v38 = vld [vmem:[%s8917_s30 + $0x1490] sm:$0xff]  ;;  %v686_v39 = vld [vmem:[%s8917_s30 + $0x1498] sm:$0xff] }
  0x64   : > { %679 = vst [vmem:[%s8925_s12 + $0x518] sm:$0xff] %v678_v35  ;;  %681 = vst [vmem:[%s8925_s12 + $0x520] sm:$0xff] %v680_v36  ;;  %v688_v40 = vld [vmem:[%s8917_s30 + $0x1500] sm:$0xff]  ;;  %v690_v41 = vld [vmem:[%s8917_s30 + $0x1508] sm:$0xff] }
  0x65   : > { %683 = vst [vmem:[%s8925_s12 + $0x528] sm:$0xff] %v682_v37  ;;  %685 = vst [vmem:[%s8925_s12 + $0x530] sm:$0xff] %v684_v38  ;;  %v692_v42 = vld [vmem:[%s8917_s30 + $0x1510] sm:$0xff]  ;;  %v694_v43 = vld [vmem:[%s8917_s30 + $0x1518] sm:$0xff] }
  0x66   : > { %687 = vst [vmem:[%s8925_s12 + $0x538] sm:$0xff] %v686_v39  ;;  %689 = vst [vmem:[%s8925_s12 + $0x540] sm:$0xff] %v688_v40  ;;  %v696_v44 = vld [vmem:[%s8917_s30 + $0x1580] sm:$0xff]  ;;  %v698_v45 = vld [vmem:[%s8917_s30 + $0x1588] sm:$0xff] }
  0x67   : > { %691 = vst [vmem:[%s8925_s12 + $0x548] sm:$0xff] %v690_v41  ;;  %693 = vst [vmem:[%s8925_s12 + $0x550] sm:$0xff] %v692_v42  ;;  %v700_v46 = vld [vmem:[%s8917_s30 + $0x1590] sm:$0xff]  ;;  %v702_v47 = vld [vmem:[%s8917_s30 + $0x1598] sm:$0xff] }
  0x68   : > { %695 = vst [vmem:[%s8925_s12 + $0x558] sm:$0xff] %v694_v43  ;;  %697 = vst [vmem:[%s8925_s12 + $0x560] sm:$0xff] %v696_v44  ;;  %v704_v48 = vld [vmem:[%s8917_s30 + $0x1600] sm:$0xff]  ;;  %v706_v49 = vld [vmem:[%s8917_s30 + $0x1608] sm:$0xff] }
  0x69   : > { %699 = vst [vmem:[%s8925_s12 + $0x568] sm:$0xff] %v698_v45  ;;  %701 = vst [vmem:[%s8925_s12 + $0x570] sm:$0xff] %v700_v46  ;;  %v708_v50 = vld [vmem:[%s8917_s30 + $0x1610] sm:$0xff]  ;;  %v710_v51 = vld [vmem:[%s8917_s30 + $0x1618] sm:$0xff] }
  0x6a   : > { %703 = vst [vmem:[%s8925_s12 + $0x578] sm:$0xff] %v702_v47  ;;  %705 = vst [vmem:[%s8925_s12 + $0x580] sm:$0xff] %v704_v48  ;;  %v712_v52 = vld [vmem:[%s8917_s30 + $0x1680] sm:$0xff]  ;;  %v714_v53 = vld [vmem:[%s8917_s30 + $0x1688] sm:$0xff] }
  0x6b   : > { %707 = vst [vmem:[%s8925_s12 + $0x588] sm:$0xff] %v706_v49  ;;  %709 = vst [vmem:[%s8925_s12 + $0x590] sm:$0xff] %v708_v50  ;;  %v716_v54 = vld [vmem:[%s8917_s30 + $0x1690] sm:$0xff]  ;;  %v718_v55 = vld [vmem:[%s8917_s30 + $0x1698] sm:$0xff] }
  0x6c   : > { %711 = vst [vmem:[%s8925_s12 + $0x598] sm:$0xff] %v710_v51  ;;  %713 = vst [vmem:[%s8925_s12 + $0x5a0] sm:$0xff] %v712_v52  ;;  %v720_v56 = vld [vmem:[%s8917_s30 + $0x1700] sm:$0xff]  ;;  %v722_v57 = vld [vmem:[%s8917_s30 + $0x1708] sm:$0xff] }
  0x6d   : > { %715 = vst [vmem:[%s8925_s12 + $0x5a8] sm:$0xff] %v714_v53  ;;  %717 = vst [vmem:[%s8925_s12 + $0x5b0] sm:$0xff] %v716_v54  ;;  %v724_v58 = vld [vmem:[%s8917_s30 + $0x1710] sm:$0xff]  ;;  %v726_v59 = vld [vmem:[%s8917_s30 + $0x1718] sm:$0xff] }
  0x6e   : > { %719 = vst [vmem:[%s8925_s12 + $0x5b8] sm:$0xff] %v718_v55  ;;  %721 = vst [vmem:[%s8925_s12 + $0x5c0] sm:$0xff] %v720_v56  ;;  %v728_v60 = vld [vmem:[%s8917_s30 + $0x1780] sm:$0xff]  ;;  %v730_v61 = vld [vmem:[%s8917_s30 + $0x1788] sm:$0xff] }
  0x6f   : > { %723 = vst [vmem:[%s8925_s12 + $0x5c8] sm:$0xff] %v722_v57  ;;  %725 = vst [vmem:[%s8925_s12 + $0x5d0] sm:$0xff] %v724_v58  ;;  %v732_v62 = vld [vmem:[%s8917_s30 + $0x1790] sm:$0xff]  ;;  %v734_v63 = vld [vmem:[%s8917_s30 + $0x1798] sm:$0xff] }
  0x70   : > { %727 = vst [vmem:[%s8925_s12 + $0x5d8] sm:$0xff] %v726_v59  ;;  %729 = vst [vmem:[%s8925_s12 + $0x5e0] sm:$0xff] %v728_v60  ;;  %v736_v0 = vld [vmem:[%s8917_s30 + $0x1800] sm:$0xff]  ;;  %v738_v1 = vld [vmem:[%s8917_s30 + $0x1808] sm:$0xff] }
  0x71   : > { %731 = vst [vmem:[%s8925_s12 + $0x5e8] sm:$0xff] %v730_v61  ;;  %733 = vst [vmem:[%s8925_s12 + $0x5f0] sm:$0xff] %v732_v62  ;;  %v740_v2 = vld [vmem:[%s8917_s30 + $0x1810] sm:$0xff]  ;;  %v742_v3 = vld [vmem:[%s8917_s30 + $0x1818] sm:$0xff] }
  0x72   : > { %735 = vst [vmem:[%s8925_s12 + $0x5f8] sm:$0xff] %v734_v63  ;;  %737 = vst [vmem:[%s8925_s12 + $0x600] sm:$0xff] %v736_v0  ;;  %v744_v4 = vld [vmem:[%s8917_s30 + $0x1880] sm:$0xff]  ;;  %v746_v5 = vld [vmem:[%s8917_s30 + $0x1888] sm:$0xff] }
  0x73   : > { %739 = vst [vmem:[%s8925_s12 + $0x608] sm:$0xff] %v738_v1  ;;  %741 = vst [vmem:[%s8925_s12 + $0x610] sm:$0xff] %v740_v2  ;;  %v748_v6 = vld [vmem:[%s8917_s30 + $0x1890] sm:$0xff]  ;;  %v750_v7 = vld [vmem:[%s8917_s30 + $0x1898] sm:$0xff] }
  0x74   : > { %743 = vst [vmem:[%s8925_s12 + $0x618] sm:$0xff] %v742_v3  ;;  %745 = vst [vmem:[%s8925_s12 + $0x620] sm:$0xff] %v744_v4 }
  0x75   : > { %747 = vst [vmem:[%s8925_s12 + $0x628] sm:$0xff] %v746_v5  ;;  %749 = vst [vmem:[%s8925_s12 + $0x630] sm:$0xff] %v748_v6 }
  0x76   : > { %751 = vst [vmem:[%s8925_s12 + $0x638] sm:$0xff] %v750_v7 }
  0x77 PF: > { %p6980_p5 = scmp.ge.s32.totalorder %s8815_s19, 1  ;;  %p782_p6 = scmp.lt.s32.totalorder %s8815_s19, 5 }
  0x79   : > { %p783_p7 = pnand %p6980_p5, %p782_p6 }
  0x7a   : > { %s789_s13 = sand.u32 (!%p783_p7), 1, %s8807_s17   ;;  %s6981_s14 = sshll.u32 (!%p783_p7), %s8897_s20, 2 }
  0x7b   : > { %786 = sbr.rel (%p783_p7) target bundleno = 1726 (0x6be), region = 83  ;;  %p839_p8 = scmp.lt.s32.totalorder (!%p783_p7), %s6981_s14, 15 }
  0x7c   : > { %s8520_s15 = smul.u32 (!%p783_p7), 1600, %s789_s13  ;;  %s6983_s16 = sshll.u32 (!%p783_p7), %s8897_s20, 4 }
  0x7d   : > { %p849_p9 = scmp.lt.s32.totalorder (!%p783_p7), %s6983_s16, 63  ;;  %p6986_p10 = scmp.ne.s32.totalorder (!%p783_p7), %s8897_s20, 0 }
  0x7e   : > { %s9341_s12 = scalar_lea.vmem (!%p783_p7), [#allocation3], %s8520_s15 }
  0x82   : > { %s10342_s14 = smov (!%p839_p8, %s6981_s14), 15  ;;  %s10344_s16 = smov (!%p849_p9, %s6983_s16), 63 }
  0x83   : > { %s841_s19 = scalar_lea.vmem %s10328_s2, %s10342_s14  ;;  %s846_s27 = scalar_lea.vmem %s10329_s3, %s10342_s14  ;;  %v8817_v8 = vmov (!%p6986_p10), 0.0  }
  0x84   : > { %s7140_s28 = sshll.u32 %s10344_s16, 6  ;;  %859 = sbr.rel (%p6986_p10) target bundleno = 139 (0x8b), region = 91  ;;  %860 = vst [vmem:[#allocation2] sm:$0xff] (!%p6986_p10), %v8817_v8  ;;  %861 = vst [vmem:[#allocation2 + $0x8] sm:$0xff] (!%p6986_p10), %v8817_v8 }
  0x85   : > { %s9339_s30 = scalar_lea.vmem %s10330_s4, %s7140_s28 }
  0x8b PF: > { %v863_v9 = vld [vmem:[%s9341_s12 + $0x8] sm:$0xff]  ;;  %v865_v10 = vld [vmem:[%s9341_s12 + $0x18] sm:$0xff]  ;;  %v862_v11 = vld [vmem:[%s9341_s12] sm:$0xff]  ;;  %v2676_v39 = vlaneseq  ;;  %v8818_v45 = vmov 1983009808   ;;  %vm2742_vm0 = vcmask 523264  }
  0x8c   : > { %v7163_v12 = vunpack.c.l.s8.bf16 %v863_v9  ;;  %v7167_v13 = vunpack.c.h.s8.bf16 %v863_v9  ;;  %v7563_v14 = vunpack.c.l.s8.bf16 %v865_v10  ;;  %v7567_v15 = vunpack.c.h.s8.bf16 %v865_v10  ;;  %v864_v16 = vld [vmem:[%s9341_s12 + $0x10] sm:$0xff]  ;;  %v867_v19 = vld [vmem:[%s9341_s12 + $0x28] sm:$0xff]  ;;  %v869_v20 = vld [vmem:[%s9341_s12 + $0x38] sm:$0xff]  ;;  %p6989_p11 = scmp.ne.s32.totalorder %s8897_s20, 3 }
  0x8d   : > { %v7165_v17 = vunpack.c.l.s8.bf16 %v862_v11  ;;  %v7565_v18 = vunpack.c.l.s8.bf16 %v864_v16  ;;  %v7169_v21 = vunpack.c.h.s8.bf16 %v862_v11  ;;  %v7569_v22 = vunpack.c.h.s8.bf16 %v864_v16  ;;  %v866_v25 = vld [vmem:[%s9341_s12 + $0x20] sm:$0xff]  ;;  %v868_v26 = vld [vmem:[%s9341_s12 + $0x30] sm:$0xff]  ;;  %v871_v31 = vld [vmem:[%s9341_s12 + $0x48] sm:$0xff] }
  0x8e   : > { %7164 = vmatprep.subr.bf16.mxu0 %v7163_v12  ;;  %7564 = vmatprep.subr.bf16.mxu1 %v7563_v14  ;;  %v7171_v23 = vunpack.c.l.s8.bf16 %v867_v19  ;;  %v7571_v24 = vunpack.c.l.s8.bf16 %v869_v20  ;;  %v7173_v27 = vunpack.c.l.s8.bf16 %v866_v25  ;;  %v7573_v28 = vunpack.c.l.s8.bf16 %v868_v26  ;;  %v873_v32 = vld [vmem:[%s9341_s12 + $0x58] sm:$0xff]  ;;  %v870_v37 = vld [vmem:[%s9341_s12 + $0x40] sm:$0xff]  ;;  %v872_v38 = vld [vmem:[%s9341_s12 + $0x50] sm:$0xff] }
  0x8f   : > { %7166 = vmatpush1.bf16.msra.mxu0 %v7165_v17  ;;  %7566 = vmatpush1.bf16.msra.mxu1 %v7565_v18  ;;  %v7175_v29 = vunpack.c.h.s8.bf16 %v867_v19  ;;  %v7575_v30 = vunpack.c.h.s8.bf16 %v869_v20  ;;  %v7177_v33 = vunpack.c.h.s8.bf16 %v866_v25  ;;  %v7577_v34 = vunpack.c.h.s8.bf16 %v868_v26  ;;  %v9359_v42 = vld [vmem:[%s10326_s0] sm:$0xff]  ;;  %v875_v48 = vld [vmem:[%s9341_s12 + $0x68] sm:$0xff]  ;;  %v877_v49 = vld [vmem:[%s9341_s12 + $0x78] sm:$0xff] }
  0x90   : > { %7168 = vmatprep.subr.bf16.mxu0 %v7167_v13  ;;  %7568 = vmatprep.subr.bf16.mxu1 %v7567_v15  ;;  %v7179_v35 = vunpack.c.l.s8.bf16 %v871_v31  ;;  %v7579_v36 = vunpack.c.l.s8.bf16 %v873_v32  ;;  %v7181_v40 = vunpack.c.l.s8.bf16 %v870_v37  ;;  %v7581_v41 = vunpack.c.l.s8.bf16 %v872_v38  ;;  %v874_v56 = vld [vmem:[%s9341_s12 + $0x60] sm:$0xff]  ;;  %v876_v57 = vld [vmem:[%s9341_s12 + $0x70] sm:$0xff]  ;;  %v879_v1 = vld [vmem:[%s9341_s12 + $0x88] sm:$0xff] }
  0x91   : > { %v7183_v43 = vunpack.c.h.s8.bf16 %v871_v31  ;;  %v7583_v44 = vunpack.c.h.s8.bf16 %v873_v32  ;;  %v2674_v46 = vunpack.c.l.s4 %v8818_v45  ;;  %v9361_v47 = vshrl.u32 %v2676_v39, 7  ;;  %v881_v2 = vld [vmem:[%s9341_s12 + $0x98] sm:$0xff]  ;;  %v878_v7 = vld [vmem:[%s9341_s12 + $0x80] sm:$0xff]  ;;  %v880_v8 = vld [vmem:[%s9341_s12 + $0x90] sm:$0xff] }
  0x92   : > { %v9366_v50 = vunpack.c.l.bf16 %v9359_v42  ;;  %v7185_v52 = vunpack.c.h.s8.bf16 %v870_v37  ;;  %v7585_v53 = vunpack.c.h.s8.bf16 %v872_v38  ;;  %v7187_v54 = vunpack.c.l.s8.bf16 %v875_v48  ;;  %v883_v13 = vld [vmem:[%s9341_s12 + $0xa8] sm:$0xff]  ;;  %v885_v14 = vld [vmem:[%s9341_s12 + $0xb8] sm:$0xff]  ;;  %v882_v19 = vld [vmem:[%s9341_s12 + $0xa0] sm:$0xff] }
  0x93   : > { %7170 = vmatpush1.bf16.msra.mxu0 %v7169_v21  ;;  %7570 = vmatpush1.bf16.msra.mxu1 %v7569_v22  ;;  %v2675_v51 = vunpack.c.0.s8 %v2674_v46  ;;  %v7587_v55 = vunpack.c.l.s8.bf16 %v877_v49  ;;  %v7189_v60 = vunpack.c.l.s8.bf16 %v874_v56  ;;  %v7589_v61 = vunpack.c.l.s8.bf16 %v876_v57  ;;  %v884_v20 = vld [vmem:[%s9341_s12 + $0xb0] sm:$0xff]  ;;  %v887_v25 = vld [vmem:[%s9341_s12 + $0xc8] sm:$0xff]  ;;  %v889_v26 = vld [vmem:[%s9341_s12 + $0xd8] sm:$0xff] }
  0x94   : > { %7172 = vmatprep.subr.bf16.mxu0 %v7171_v23  ;;  %7572 = vmatprep.subr.bf16.mxu1 %v7571_v24  ;;  %v7191_v62 = vunpack.c.h.s8.bf16 %v875_v48  ;;  %v7591_v63 = vunpack.c.h.s8.bf16 %v877_v49  ;;  %v7193_v3 = vunpack.c.h.s8.bf16 %v874_v56  ;;  %v7593_v4 = vunpack.c.h.s8.bf16 %v876_v57  ;;  %v886_v31 = vld [vmem:[%s9341_s12 + $0xc0] sm:$0xff]  ;;  %v888_v32 = vld [vmem:[%s9341_s12 + $0xd0] sm:$0xff]  ;;  %v891_v37 = vld [vmem:[%s9341_s12 + $0xe8] sm:$0xff] }
  0x95   : > { %v9371_v58 = vsub.s32 %v2675_v51, %v9361_v47  ;;  %v7195_v5 = vunpack.c.l.s8.bf16 %v879_v1  ;;  %v7595_v6 = vunpack.c.l.s8.bf16 %v881_v2  ;;  %v7197_v9 = vunpack.c.l.s8.bf16 %v878_v7  ;;  %v893_v38 = vld [vmem:[%s9341_s12 + $0xf8] sm:$0xff]  ;;  %v892_v45 = vld [vmem:[%s9341_s12 + $0xf0] sm:$0xff] }
  0x96   : > { %v7597_v10 = vunpack.c.l.s8.bf16 %v880_v8  ;;  %v7199_v11 = vunpack.c.h.s8.bf16 %v879_v1  ;;  %v7599_v12 = vunpack.c.h.s8.bf16 %v881_v2  ;;  %v7201_v15 = vunpack.c.h.s8.bf16 %v878_v7 }
  0x97   : > { %7174 = vmatpush1.bf16.msra.mxu0 %v7173_v27  ;;  %7574 = vmatpush1.bf16.msra.mxu1 %v7573_v28  ;;  %v9375_v59 = vrot.slane %v9366_v50, %v9371_v58  ;;  %v7601_v16 = vunpack.c.h.s8.bf16 %v880_v8  ;;  %v7203_v17 = vunpack.c.l.s8.bf16 %v883_v13  ;;  %v7603_v18 = vunpack.c.l.s8.bf16 %v885_v14 }
  0x98   : > { %7176 = vmatprep.subr.bf16.mxu0 %v7175_v29  ;;  %7576 = vmatprep.subr.bf16.mxu1 %v7575_v30  ;;  %v7205_v21 = vunpack.c.l.s8.bf16 %v882_v19  ;;  %v7605_v22 = vunpack.c.l.s8.bf16 %v884_v20  ;;  %v7207_v23 = vunpack.c.h.s8.bf16 %v883_v13  ;;  %v7607_v24 = vunpack.c.h.s8.bf16 %v885_v14 }
  0x99   : > { %v2687_v0 = vcombine.high %v9375_v59, %v9375_v59  ;;  %v7209_v27 = vunpack.c.h.s8.bf16 %v882_v19  ;;  %v7609_v28 = vunpack.c.h.s8.bf16 %v884_v20  ;;  %v7211_v29 = vunpack.c.l.s8.bf16 %v887_v25 }
  0x9a   : > { %v7611_v30 = vunpack.c.l.s8.bf16 %v889_v26  ;;  %v7217_v39 = vunpack.c.h.s8.bf16 %v886_v31  ;;  %v7621_v48 = vunpack.c.l.s8.bf16 %v892_v45  ;;  %v7223_v49 = vunpack.c.h.s8.bf16 %v891_v37 }
  0x9b   : > { %7178 = vmatpush1.bf16.msra.mxu0 %v7177_v33  ;;  %7578 = vmatpush1.bf16.msra.mxu1 %v7577_v34  ;;  %v7213_v33 = vunpack.c.l.s8.bf16 %v886_v31  ;;  %v7613_v34 = vunpack.c.l.s8.bf16 %v888_v32  ;;  %v7623_v51 = vunpack.c.h.s8.bf16 %v893_v38  ;;  %v7625_v56 = vunpack.c.h.s8.bf16 %v892_v45 }
  0x9c   : > { %7180 = vmatprep.subr.bf16.mxu0 %v7179_v35  ;;  %7580 = vmatprep.subr.bf16.mxu1 %v7579_v36  ;;  %v7215_v35 = vunpack.c.h.s8.bf16 %v887_v25  ;;  %v7615_v36 = vunpack.c.h.s8.bf16 %v889_v26 }
  0x9d   : > { %2809 = vmatprep.mubr.f32.mxu0 %v2687_v0  ;;  %3306 = vmatprep.mubr.f32.mxu1 %v2687_v0 }
  0x9f   : > { %7182 = vmatpush1.bf16.msra.mxu0 %v7181_v40  ;;  %7582 = vmatpush1.bf16.msra.mxu1 %v7581_v41  ;;  %v7617_v40 = vunpack.c.h.s8.bf16 %v888_v32  ;;  %v7219_v41 = vunpack.c.l.s8.bf16 %v891_v37 }
  0xa0   : > { %7184 = vmatprep.subr.bf16.mxu0 %v7183_v43  ;;  %7584 = vmatprep.subr.bf16.mxu1 %v7583_v44  ;;  %v7619_v43 = vunpack.c.l.s8.bf16 %v893_v38  ;;  %v890_v44 = vld [vmem:[%s9341_s12 + $0xe0] sm:$0xff] }
  0xa1   : > { %v7221_v46 = vunpack.c.l.s8.bf16 %v890_v44 }
  0xa3   : > { %7186 = vmatpush1.bf16.msra.mxu0 %v7185_v52  ;;  %7586 = vmatpush1.bf16.msra.mxu1 %v7585_v53  ;;  %v2672_v52 = vcombine.high %v9366_v50, %v9366_v50  ;;  %v895_v53 = vld [vmem:[%s9341_s12 + $0x108] sm:$0xff] }
  0xa4   : > { %7188 = vmatprep.subr.bf16.mxu0 %v7187_v54  ;;  %7588 = vmatprep.subr.bf16.mxu1 %v7587_v55  ;;  %v897_v54 = vld [vmem:[%s9341_s12 + $0x118] sm:$0xff]  ;;  %v7225_v55 = vunpack.c.h.s8.bf16 %v890_v44  ;;  %v7227_v57 = vunpack.c.l.s8.bf16 %v895_v53  ;;  %v7231_v1 = vunpack.c.h.s8.bf16 %v895_v53 }
  0xa5   : > { %v7631_v2 = vunpack.c.h.s8.bf16 %v897_v54 }
  0xa7   : > { %7190 = vmatpush1.bf16.msra.mxu0 %v7189_v60  ;;  %7590 = vmatpush1.bf16.msra.mxu1 %v7589_v61  ;;  %v7627_v60 = vunpack.c.l.s8.bf16 %v897_v54  ;;  %v894_v61 = vld [vmem:[%s9341_s12 + $0x100] sm:$0xff]  ;;  %v915_v54 = vld [vmem:[%s9341_s12 + $0x1a8] sm:$0xff] }
  0xa8   : > { %7192 = vmatprep.subr.bf16.mxu0 %v7191_v62  ;;  %7592 = vmatprep.subr.bf16.mxu1 %v7591_v63  ;;  %v896_v62 = vld [vmem:[%s9341_s12 + $0x110] sm:$0xff]  ;;  %v9402_v63 = vrot.slane %v2672_v52, %v9371_v58  ;;  %v7229_v50 = vunpack.c.l.s8.bf16 %v894_v61 }
  0xa9   : > { %v7629_v0 = vunpack.c.l.s8.bf16 %v896_v62  ;;  %v7633_v7 = vunpack.c.h.s8.bf16 %v896_v62  ;;  %v914_v62 = vld [vmem:[%s9341_s12 + $0x1a0] sm:$0xff] }
  0xab   : > { %7194 = vmatpush1.bf16.msra.mxu0 %v7193_v3  ;;  %7594 = vmatpush1.bf16.msra.mxu1 %v7593_v4  ;;  %v899_v3 = vld [vmem:[%s9341_s12 + $0x128] sm:$0xff]  ;;  %v901_v4 = vld [vmem:[%s9341_s12 + $0x138] sm:$0xff] }
  0xac   : > { %7196 = vmatprep.subr.bf16.mxu0 %v7195_v5  ;;  %7596 = vmatprep.subr.bf16.mxu1 %v7595_v6  ;;  %v2688_v5 = vcombine.high %v9402_v63, %v9402_v63  ;;  %v7233_v6 = vunpack.c.h.s8.bf16 %v894_v61  ;;  %v7235_v8 = vunpack.c.l.s8.bf16 %v899_v3  ;;  %v7639_v14 = vunpack.c.h.s8.bf16 %v901_v4 }
  0xaf   : > { %7198 = vmatpush1.bf16.msra.mxu0 %v7197_v9  ;;  %7598 = vmatpush1.bf16.msra.mxu1 %v7597_v10  ;;  %v7635_v9 = vunpack.c.l.s8.bf16 %v901_v4  ;;  %v898_v10 = vld [vmem:[%s9341_s12 + $0x120] sm:$0xff]  ;;  %v919_v4 = vld [vmem:[%s9341_s12 + $0x1c8] sm:$0xff] }
  0xb0   : > { %7200 = vmatprep.subr.bf16.mxu0 %v7199_v11  ;;  %7600 = vmatprep.subr.bf16.mxu1 %v7599_v12  ;;  %v900_v11 = vld [vmem:[%s9341_s12 + $0x130] sm:$0xff]  ;;  %v7237_v12 = vunpack.c.l.s8.bf16 %v898_v10 }
  0xb1   : > { %v7637_v13 = vunpack.c.l.s8.bf16 %v900_v11 }
  0xb3   : > { %7202 = vmatpush1.bf16.msra.mxu0 %v7201_v15  ;;  %7602 = vmatpush1.bf16.msra.mxu1 %v7601_v16  ;;  %v903_v15 = vld [vmem:[%s9341_s12 + $0x148] sm:$0xff]  ;;  %v905_v16 = vld [vmem:[%s9341_s12 + $0x158] sm:$0xff] }
  0xb4   : > { %7204 = vmatprep.subr.bf16.mxu0 %v7203_v17  ;;  %7604 = vmatprep.subr.bf16.mxu1 %v7603_v18  ;;  %v7241_v17 = vunpack.c.h.s8.bf16 %v898_v10  ;;  %v7641_v18 = vunpack.c.h.s8.bf16 %v900_v11  ;;  %v7243_v19 = vunpack.c.l.s8.bf16 %v903_v15  ;;  %v7643_v20 = vunpack.c.l.s8.bf16 %v905_v16  ;;  %v918_v10 = vld [vmem:[%s9341_s12 + $0x1c0] sm:$0xff]  ;;  %v920_v11 = vld [vmem:[%s9341_s12 + $0x1d0] sm:$0xff] }
  0xb5   : > { %v7247_v25 = vunpack.c.h.s8.bf16 %v903_v15  ;;  %v7647_v26 = vunpack.c.h.s8.bf16 %v905_v16  ;;  %v923_v15 = vld [vmem:[%s9341_s12 + $0x1e8] sm:$0xff]  ;;  %v925_v16 = vld [vmem:[%s9341_s12 + $0x1f8] sm:$0xff] }
  0xb7   : > { %7206 = vmatpush1.bf16.msra.mxu0 %v7205_v21  ;;  %7606 = vmatpush1.bf16.msra.mxu1 %v7605_v22  ;;  %v902_v21 = vld [vmem:[%s9341_s12 + $0x140] sm:$0xff]  ;;  %v904_v22 = vld [vmem:[%s9341_s12 + $0x150] sm:$0xff] }
  0xb8   : > { %7208 = vmatprep.subr.bf16.mxu0 %v7207_v23  ;;  %7608 = vmatprep.subr.bf16.mxu1 %v7607_v24  ;;  %v7245_v23 = vunpack.c.l.s8.bf16 %v902_v21  ;;  %v7645_v24 = vunpack.c.l.s8.bf16 %v904_v22 }
  0xbb   : > { %7210 = vmatpush1.bf16.msra.mxu0 %v7209_v27  ;;  %7610 = vmatpush1.bf16.msra.mxu1 %v7609_v28  ;;  %v907_v27 = vld [vmem:[%s9341_s12 + $0x168] sm:$0xff]  ;;  %v909_v28 = vld [vmem:[%s9341_s12 + $0x178] sm:$0xff] }
  0xbc   : > { %7212 = vmatprep.subr.bf16.mxu0 %v7211_v29  ;;  %7612 = vmatprep.subr.bf16.mxu1 %v7611_v30  ;;  %v7249_v29 = vunpack.c.h.s8.bf16 %v902_v21  ;;  %v7649_v30 = vunpack.c.h.s8.bf16 %v904_v22  ;;  %v7251_v31 = vunpack.c.l.s8.bf16 %v907_v27  ;;  %v7651_v32 = vunpack.c.l.s8.bf16 %v909_v28  ;;  %v922_v21 = vld [vmem:[%s9341_s12 + $0x1e0] sm:$0xff]  ;;  %v924_v22 = vld [vmem:[%s9341_s12 + $0x1f0] sm:$0xff] }
  0xbd   : > { %v7255_v37 = vunpack.c.h.s8.bf16 %v907_v27  ;;  %v7655_v38 = vunpack.c.h.s8.bf16 %v909_v28  ;;  %v9437_v27 = vunpack.c.h.bf16 %v9359_v42  ;;  %v927_v28 = vld [vmem:[%s9341_s12 + $0x208] sm:$0xff] }
  0xbf   : > { %7214 = vmatpush1.bf16.msra.mxu0 %v7213_v33  ;;  %7614 = vmatpush1.bf16.msra.mxu1 %v7613_v34  ;;  %v906_v33 = vld [vmem:[%s9341_s12 + $0x160] sm:$0xff]  ;;  %v908_v34 = vld [vmem:[%s9341_s12 + $0x170] sm:$0xff] }
  0xc0   : > { %7216 = vmatprep.subr.bf16.mxu0 %v7215_v35  ;;  %7616 = vmatprep.subr.bf16.mxu1 %v7615_v36  ;;  %v7253_v35 = vunpack.c.l.s8.bf16 %v906_v33  ;;  %v7653_v36 = vunpack.c.l.s8.bf16 %v908_v34 }
  0xc3   : > { %7218 = vmatpush1.bf16.msra.mxu0 %v7217_v39  ;;  %7618 = vmatpush1.bf16.msra.mxu1 %v7617_v40  ;;  %v911_v39 = vld [vmem:[%s9341_s12 + $0x188] sm:$0xff]  ;;  %v913_v40 = vld [vmem:[%s9341_s12 + $0x198] sm:$0xff] }
  0xc4   : > { %7220 = vmatprep.subr.bf16.mxu0 %v7219_v41  ;;  %7620 = vmatprep.subr.bf16.mxu1 %v7619_v43  ;;  %v7257_v41 = vunpack.c.h.s8.bf16 %v906_v33  ;;  %v7657_v43 = vunpack.c.h.s8.bf16 %v908_v34  ;;  %v7259_v44 = vunpack.c.l.s8.bf16 %v911_v39  ;;  %v7659_v45 = vunpack.c.l.s8.bf16 %v913_v40  ;;  %v926_v34 = vld [vmem:[%s9341_s12 + $0x200] sm:$0xff] }
  0xc5   : > { %v7263_v52 = vunpack.c.h.s8.bf16 %v911_v39  ;;  %v7663_v53 = vunpack.c.h.s8.bf16 %v913_v40  ;;  %v7293_v42 = vunpack.c.l.s8.bf16 %v926_v34  ;;  %v931_v40 = vld [vmem:[%s9341_s12 + $0x228] sm:$0xff] }
  0xc7   : > { %7222 = vmatpush1.bf16.msra.mxu0 %v7221_v46  ;;  %7622 = vmatpush1.bf16.msra.mxu1 %v7621_v48  ;;  %v910_v46 = vld [vmem:[%s9341_s12 + $0x180] sm:$0xff]  ;;  %v912_v48 = vld [vmem:[%s9341_s12 + $0x190] sm:$0xff] }
  0xc8   : > { %7224 = vmatprep.subr.bf16.mxu0 %v7223_v49  ;;  %7624 = vmatprep.subr.bf16.mxu1 %v7623_v51  ;;  %v7261_v49 = vunpack.c.l.s8.bf16 %v910_v46  ;;  %v7661_v51 = vunpack.c.l.s8.bf16 %v912_v48 }
  0xcb   : > { %7226 = vmatpush1.bf16.msra.mxu0 %v7225_v55  ;;  %7626 = vmatpush1.bf16.msra.mxu1 %v7625_v56  ;;  %v917_v55 = vld [vmem:[%s9341_s12 + $0x1b8] sm:$0xff]  ;;  %v7265_v56 = vunpack.c.h.s8.bf16 %v910_v46  ;;  %v7299_v46 = vunpack.c.l.s8.bf16 %v931_v40 }
  0xcc   : > { %7228 = vmatprep.subr.bf16.mxu0 %v7227_v57  ;;  %7628 = vmatprep.subr.bf16.mxu1 %v7627_v60  ;;  %v7665_v57 = vunpack.c.h.s8.bf16 %v912_v48  ;;  %v7267_v60 = vunpack.c.l.s8.bf16 %v915_v54  ;;  %v7667_v61 = vunpack.c.l.s8.bf16 %v917_v55 }
  0xce   : > { %2810 = vmatmul.mubr.f32.vlgmr.msra.gmra.mrb[0].mxu0 %v9375_v59  ;;  %3307 = vmatmul.mubr.f32.vlgmr.msra.gmra.mrb[0].mxu1 %v9375_v59  ;;  %v7239_v59 = vunpack.c.h.s8.bf16 %v899_v3  ;;  %v7671_v3 = vunpack.c.h.s8.bf16 %v917_v55  ;;  %v935_v55 = vld [vmem:[%s9341_s12 + $0x248] sm:$0xff] }
  0xcf   : > { %7230 = vmatpush1.bf16.msra.mxu0 %v7229_v50  ;;  %7630 = vmatpush1.bf16.msra.mxu1 %v7629_v0  ;;  %v916_v50 = vld [vmem:[%s9341_s12 + $0x1b0] sm:$0xff]  ;;  %v7269_v0 = vunpack.c.l.s8.bf16 %v914_v62 }
  0xd0   : > { %7232 = vmatprep.subr.bf16.mxu0 %v7231_v1  ;;  %7632 = vmatprep.subr.bf16.mxu1 %v7631_v2  ;;  %v7669_v1 = vunpack.c.l.s8.bf16 %v916_v50  ;;  %v7271_v2 = vunpack.c.h.s8.bf16 %v915_v54 }
  0xd1   : > { %2880 = vmatprep.mubr.f32.mxu0 %v2688_v5  ;;  %3377 = vmatprep.mubr.f32.mxu1 %v2688_v5  ;;  %v921_v5 = vld [vmem:[%s9341_s12 + $0x1d8] sm:$0xff] }
  0xd3   : > { %7234 = vmatpush1.bf16.msra.mxu0 %v7233_v6  ;;  %7634 = vmatpush1.bf16.msra.mxu1 %v7633_v7  ;;  %v7273_v6 = vunpack.c.h.s8.bf16 %v914_v62  ;;  %v7673_v7 = vunpack.c.h.s8.bf16 %v916_v50  ;;  %v934_v50 = vld [vmem:[%s9341_s12 + $0x240] sm:$0xff] }
  0xd4   : > { %7236 = vmatprep.subr.bf16.mxu0 %v7235_v8  ;;  %7636 = vmatprep.subr.bf16.mxu1 %v7635_v9  ;;  %v7275_v8 = vunpack.c.l.s8.bf16 %v919_v4  ;;  %v7675_v9 = vunpack.c.l.s8.bf16 %v921_v5 }
  0xd7   : > { %7238 = vmatpush1.bf16.msra.mxu0 %v7237_v12  ;;  %7638 = vmatpush1.bf16.msra.mxu1 %v7637_v13  ;;  %v7277_v12 = vunpack.c.l.s8.bf16 %v918_v10  ;;  %v7677_v13 = vunpack.c.l.s8.bf16 %v920_v11 }
  0xd8   : > { %7240 = vmatprep.subr.bf16.mxu0 %v7239_v59  ;;  %7640 = vmatprep.subr.bf16.mxu1 %v7639_v14  ;;  %v7279_v59 = vunpack.c.h.s8.bf16 %v919_v4  ;;  %v7679_v14 = vunpack.c.h.s8.bf16 %v921_v5  ;;  %v939_v5 = vld [vmem:[%s9341_s12 + $0x268] sm:$0xff] }
  0xdb   : > { %7242 = vmatpush1.bf16.msra.mxu0 %v7241_v17  ;;  %7642 = vmatpush1.bf16.msra.mxu1 %v7641_v18  ;;  %v7281_v17 = vunpack.c.h.s8.bf16 %v918_v10  ;;  %v7681_v18 = vunpack.c.h.s8.bf16 %v920_v11  ;;  %v938_v11 = vld [vmem:[%s9341_s12 + $0x260] sm:$0xff] }
  0xdc   : > { %7244 = vmatprep.subr.bf16.mxu0 %v7243_v19  ;;  %7644 = vmatprep.subr.bf16.mxu1 %v7643_v20  ;;  %v7283_v19 = vunpack.c.l.s8.bf16 %v923_v15  ;;  %v7683_v20 = vunpack.c.l.s8.bf16 %v925_v16 }
  0xdf   : > { %7246 = vmatpush1.bf16.msra.mxu0 %v7245_v23  ;;  %7646 = vmatpush1.bf16.msra.mxu1 %v7645_v24  ;;  %v7285_v23 = vunpack.c.l.s8.bf16 %v922_v21  ;;  %v7685_v24 = vunpack.c.l.s8.bf16 %v924_v22 }
  0xe0   : > { %7248 = vmatprep.subr.bf16.mxu0 %v7247_v25  ;;  %7648 = vmatprep.subr.bf16.mxu1 %v7647_v26  ;;  %v7287_v25 = vunpack.c.h.s8.bf16 %v923_v15  ;;  %v7687_v26 = vunpack.c.h.s8.bf16 %v925_v16  ;;  %v943_v16 = vld [vmem:[%s9341_s12 + $0x288] sm:$0xff] }
  0xe3   : > { %7250 = vmatpush1.bf16.msra.mxu0 %v7249_v29  ;;  %7650 = vmatpush1.bf16.msra.mxu1 %v7649_v30  ;;  %v929_v29 = vld [vmem:[%s9341_s12 + $0x218] sm:$0xff]  ;;  %v7289_v30 = vunpack.c.h.s8.bf16 %v922_v21 }
  0xe4   : > { %7252 = vmatprep.subr.bf16.mxu0 %v7251_v31  ;;  %7652 = vmatprep.subr.bf16.mxu1 %v7651_v32  ;;  %v7689_v31 = vunpack.c.h.s8.bf16 %v924_v22  ;;  %v7291_v32 = vunpack.c.l.s8.bf16 %v927_v28  ;;  %v7691_v33 = vunpack.c.l.s8.bf16 %v929_v29  ;;  %v7695_v39 = vunpack.c.h.s8.bf16 %v929_v29  ;;  %v942_v22 = vld [vmem:[%s9341_s12 + $0x280] sm:$0xff]  ;;  %v947_v29 = vld [vmem:[%s9341_s12 + $0x2a8] sm:$0xff] }
  0xe7   : > { %7254 = vmatpush1.bf16.msra.mxu0 %v7253_v35  ;;  %7654 = vmatpush1.bf16.msra.mxu1 %v7653_v36  ;;  %v928_v35 = vld [vmem:[%s9341_s12 + $0x210] sm:$0xff]  ;;  %v9445_v36 = vrot.slane %v9437_v27, %v9371_v58 }
  0xe8   : > { %7256 = vmatprep.subr.bf16.mxu0 %v7255_v37  ;;  %7656 = vmatprep.subr.bf16.mxu1 %v7655_v38  ;;  %v7693_v37 = vunpack.c.l.s8.bf16 %v928_v35  ;;  %v7295_v38 = vunpack.c.h.s8.bf16 %v927_v28 }
  0xeb   : > { %7258 = vmatpush1.bf16.msra.mxu0 %v7257_v41  ;;  %7658 = vmatpush1.bf16.msra.mxu1 %v7657_v43  ;;  %v933_v41 = vld [vmem:[%s9341_s12 + $0x238] sm:$0xff]  ;;  %v2704_v43 = vcombine.high %v9445_v36, %v9445_v36 }
  0xec   : > { %7260 = vmatprep.subr.bf16.mxu0 %v7259_v44  ;;  %7660 = vmatprep.subr.bf16.mxu1 %v7659_v45  ;;  %v7297_v44 = vunpack.c.h.s8.bf16 %v926_v34  ;;  %v7697_v45 = vunpack.c.h.s8.bf16 %v928_v35  ;;  %v7699_v48 = vunpack.c.l.s8.bf16 %v933_v41  ;;  %v7703_v54 = vunpack.c.h.s8.bf16 %v933_v41  ;;  %v946_v35 = vld [vmem:[%s9341_s12 + $0x2a0] sm:$0xff]  ;;  %v951_v41 = vld [vmem:[%s9341_s12 + $0x2c8] sm:$0xff] }
  0xef   : > { %7262 = vmatpush1.bf16.msra.mxu0 %v7261_v49  ;;  %7662 = vmatpush1.bf16.msra.mxu1 %v7661_v51  ;;  %v930_v49 = vld [vmem:[%s9341_s12 + $0x220] sm:$0xff]  ;;  %v932_v51 = vld [vmem:[%s9341_s12 + $0x230] sm:$0xff] }
  0xf0   : > { %7264 = vmatprep.subr.bf16.mxu0 %v7263_v52  ;;  %7664 = vmatprep.subr.bf16.mxu1 %v7663_v53  ;;  %v7301_v52 = vunpack.c.l.s8.bf16 %v930_v49  ;;  %v7701_v53 = vunpack.c.l.s8.bf16 %v932_v51 }
  0xf3   : > { %7266 = vmatpush1.bf16.msra.mxu0 %v7265_v56  ;;  %7666 = vmatpush1.bf16.msra.mxu1 %v7665_v57  ;;  %v937_v56 = vld [vmem:[%s9341_s12 + $0x258] sm:$0xff]  ;;  %v7305_v57 = vunpack.c.h.s8.bf16 %v930_v49  ;;  %v950_v49 = vld [vmem:[%s9341_s12 + $0x2c0] sm:$0xff] }
  0xf4   : > { %7268 = vmatprep.subr.bf16.mxu0 %v7267_v60  ;;  %7668 = vmatprep.subr.bf16.mxu1 %v7667_v61  ;;  %v7705_v60 = vunpack.c.h.s8.bf16 %v932_v51  ;;  %v7307_v61 = vunpack.c.l.s8.bf16 %v935_v55  ;;  %v7707_v62 = vunpack.c.l.s8.bf16 %v937_v56  ;;  %v7711_v4 = vunpack.c.h.s8.bf16 %v937_v56  ;;  %v952_v51 = vld [vmem:[%s9341_s12 + $0x2d0] sm:$0xff]  ;;  %v957_v56 = vld [vmem:[%s9341_s12 + $0x2f8] sm:$0xff] }
  0xf7   : > { %7270 = vmatpush1.bf16.msra.mxu0 %v7269_v0  ;;  %7670 = vmatpush1.bf16.msra.mxu1 %v7669_v1  ;;  %v936_v0 = vld [vmem:[%s9341_s12 + $0x250] sm:$0xff]  ;;  %v7309_v1 = vunpack.c.l.s8.bf16 %v934_v50 }
  0xf8   : > { %7272 = vmatprep.subr.bf16.mxu0 %v7271_v2  ;;  %7672 = vmatprep.subr.bf16.mxu1 %v7671_v3  ;;  %v7709_v2 = vunpack.c.l.s8.bf16 %v936_v0  ;;  %v7311_v3 = vunpack.c.h.s8.bf16 %v935_v55  ;;  %v955_v55 = vld [vmem:[%s9341_s12 + $0x2e8] sm:$0xff] }
  0xfb   : > { %7274 = vmatpush1.bf16.msra.mxu0 %v7273_v6  ;;  %7674 = vmatpush1.bf16.msra.mxu1 %v7673_v7  ;;  %v941_v6 = vld [vmem:[%s9341_s12 + $0x278] sm:$0xff]  ;;  %v7313_v7 = vunpack.c.h.s8.bf16 %v934_v50  ;;  %v954_v50 = vld [vmem:[%s9341_s12 + $0x2e0] sm:$0xff] }
  0xfc   : > { %7276 = vmatprep.subr.bf16.mxu0 %v7275_v8  ;;  %7676 = vmatprep.subr.bf16.mxu1 %v7675_v9  ;;  %v7713_v8 = vunpack.c.h.s8.bf16 %v936_v0  ;;  %v7315_v9 = vunpack.c.l.s8.bf16 %v939_v5  ;;  %v7715_v10 = vunpack.c.l.s8.bf16 %v941_v6  ;;  %v7719_v15 = vunpack.c.h.s8.bf16 %v941_v6  ;;  %v956_v0 = vld [vmem:[%s9341_s12 + $0x2f0] sm:$0xff]  ;;  %v961_v6 = vld [vmem:[%s9341_s12 + $0x318] sm:$0xff] }
  0xff   : > { %7278 = vmatpush1.bf16.msra.mxu0 %v7277_v12  ;;  %7678 = vmatpush1.bf16.msra.mxu1 %v7677_v13  ;;  %v940_v12 = vld [vmem:[%s9341_s12 + $0x270] sm:$0xff]  ;;  %v7317_v13 = vunpack.c.l.s8.bf16 %v938_v11 }
 0x100   : > { %7280 = vmatprep.subr.bf16.mxu0 %v7279_v59  ;;  %7680 = vmatprep.subr.bf16.mxu1 %v7679_v14  ;;  %v7717_v59 = vunpack.c.l.s8.bf16 %v940_v12  ;;  %v7319_v14 = vunpack.c.h.s8.bf16 %v939_v5  ;;  %v959_v5 = vld [vmem:[%s9341_s12 + $0x308] sm:$0xff] }
 0x103   : > { %7282 = vmatpush1.bf16.msra.mxu0 %v7281_v17  ;;  %7682 = vmatpush1.bf16.msra.mxu1 %v7681_v18  ;;  %v945_v17 = vld [vmem:[%s9341_s12 + $0x298] sm:$0xff]  ;;  %v7321_v18 = vunpack.c.h.s8.bf16 %v938_v11  ;;  %v7755_v11 = vunpack.c.l.s8.bf16 %v961_v6 }
 0x104   : > { %7284 = vmatprep.subr.bf16.mxu0 %v7283_v19  ;;  %7684 = vmatprep.subr.bf16.mxu1 %v7683_v20  ;;  %v7721_v19 = vunpack.c.h.s8.bf16 %v940_v12  ;;  %v7323_v20 = vunpack.c.l.s8.bf16 %v943_v16  ;;  %v7723_v21 = vunpack.c.l.s8.bf16 %v945_v17  ;;  %v7727_v28 = vunpack.c.h.s8.bf16 %v945_v17  ;;  %v958_v12 = vld [vmem:[%s9341_s12 + $0x300] sm:$0xff]  ;;  %v963_v17 = vld [vmem:[%s9341_s12 + $0x328] sm:$0xff] }
 0x107   : > { %7286 = vmatpush1.bf16.msra.mxu0 %v7285_v23  ;;  %7686 = vmatpush1.bf16.msra.mxu1 %v7685_v24  ;;  %v944_v23 = vld [vmem:[%s9341_s12 + $0x290] sm:$0xff]  ;;  %v7325_v24 = vunpack.c.l.s8.bf16 %v942_v22 }
 0x108   : > { %7288 = vmatprep.subr.bf16.mxu0 %v7287_v25  ;;  %7688 = vmatprep.subr.bf16.mxu1 %v7687_v26  ;;  %v7725_v25 = vunpack.c.l.s8.bf16 %v944_v23  ;;  %v7327_v26 = vunpack.c.h.s8.bf16 %v943_v16  ;;  %v7759_v16 = vunpack.c.h.s8.bf16 %v961_v6  ;;  %v979_v6 = vld [vmem:[%s9341_s12 + $0x3a8] sm:$0xff] }
 0x10b   : > { %7290 = vmatpush1.bf16.msra.mxu0 %v7289_v30  ;;  %7690 = vmatpush1.bf16.msra.mxu1 %v7689_v31  ;;  %v949_v30 = vld [vmem:[%s9341_s12 + $0x2b8] sm:$0xff]  ;;  %v7329_v31 = vunpack.c.h.s8.bf16 %v942_v22  ;;  %v7363_v22 = vunpack.c.l.s8.bf16 %v963_v17 }
 0x10c   : > { %7292 = vmatprep.subr.bf16.mxu0 %v7291_v32  ;;  %7692 = vmatprep.subr.bf16.mxu1 %v7691_v33  ;;  %v7729_v32 = vunpack.c.h.s8.bf16 %v944_v23  ;;  %v7331_v33 = vunpack.c.l.s8.bf16 %v947_v29  ;;  %v7731_v34 = vunpack.c.l.s8.bf16 %v949_v30 }
 0x10e   : > { %2881 = vmatmul.mubr.f32.vlgmr.msra.gmra.mrb[0].mxu0 %v9402_v63  ;;  %3378 = vmatmul.mubr.f32.vlgmr.msra.gmra.mrb[0].mxu1 %v9402_v63  ;;  %v7303_v63 = vunpack.c.h.s8.bf16 %v931_v40  ;;  %v7735_v40 = vunpack.c.h.s8.bf16 %v949_v30  ;;  %v967_v30 = vld [vmem:[%s9341_s12 + $0x348] sm:$0xff] }
 0x10f   : > { %7294 = vmatpush1.bf16.msra.mxu0 %v7293_v42  ;;  %7694 = vmatpush1.bf16.msra.mxu1 %v7693_v37  ;;  %v948_v42 = vld [vmem:[%s9341_s12 + $0x2b0] sm:$0xff]  ;;  %v7333_v37 = vunpack.c.l.s8.bf16 %v946_v35 }
 0x110   : > { %7296 = vmatprep.subr.bf16.mxu0 %v7295_v38  ;;  %7696 = vmatprep.subr.bf16.mxu1 %v7695_v39  ;;  %v7733_v38 = vunpack.c.l.s8.bf16 %v948_v42  ;;  %v7335_v39 = vunpack.c.h.s8.bf16 %v947_v29 }
 0x111   : > { %2951 = vmatprep.mubr.f32.mxu0 %v2704_v43  ;;  %3448 = vmatprep.mubr.f32.mxu1 %v2704_v43  ;;  %v953_v43 = vld [vmem:[%s9341_s12 + $0x2d8] sm:$0xff] }
 0x113   : > { %7298 = vmatpush1.bf16.msra.mxu0 %v7297_v44  ;;  %7698 = vmatpush1.bf16.msra.mxu1 %v7697_v45  ;;  %v7337_v44 = vunpack.c.h.s8.bf16 %v946_v35  ;;  %v7737_v45 = vunpack.c.h.s8.bf16 %v948_v42  ;;  %v966_v42 = vld [vmem:[%s9341_s12 + $0x340] sm:$0xff] }
 0x114   : > { %7300 = vmatprep.subr.bf16.mxu0 %v7299_v46  ;;  %7700 = vmatprep.subr.bf16.mxu1 %v7699_v48  ;;  %v7339_v46 = vunpack.c.l.s8.bf16 %v951_v41  ;;  %v7739_v48 = vunpack.c.l.s8.bf16 %v953_v43 }
 0x117   : > { %7302 = vmatpush1.bf16.msra.mxu0 %v7301_v52  ;;  %7702 = vmatpush1.bf16.msra.mxu1 %v7701_v53  ;;  %v7341_v52 = vunpack.c.l.s8.bf16 %v950_v49  ;;  %v7741_v53 = vunpack.c.l.s8.bf16 %v952_v51 }
 0x118   : > { %7304 = vmatprep.subr.bf16.mxu0 %v7303_v63  ;;  %7704 = vmatprep.subr.bf16.mxu1 %v7703_v54  ;;  %v7343_v63 = vunpack.c.h.s8.bf16 %v951_v41  ;;  %v7743_v54 = vunpack.c.h.s8.bf16 %v953_v43  ;;  %v971_v43 = vld [vmem:[%s9341_s12 + $0x368] sm:$0xff] }
 0x11b   : > { %7306 = vmatpush1.bf16.msra.mxu0 %v7305_v57  ;;  %7706 = vmatpush1.bf16.msra.mxu1 %v7705_v60  ;;  %v7345_v57 = vunpack.c.h.s8.bf16 %v950_v49  ;;  %v7745_v60 = vunpack.c.h.s8.bf16 %v952_v51  ;;  %v970_v51 = vld [vmem:[%s9341_s12 + $0x360] sm:$0xff] }
 0x11c   : > { %7308 = vmatprep.subr.bf16.mxu0 %v7307_v61  ;;  %7708 = vmatprep.subr.bf16.mxu1 %v7707_v62  ;;  %v7347_v61 = vunpack.c.l.s8.bf16 %v955_v55  ;;  %v7747_v62 = vunpack.c.l.s8.bf16 %v957_v56 }
 0x11f   : > { %7310 = vmatpush1.bf16.msra.mxu0 %v7309_v1  ;;  %7710 = vmatpush1.bf16.msra.mxu1 %v7709_v2  ;;  %v7349_v1 = vunpack.c.l.s8.bf16 %v954_v50  ;;  %v7749_v2 = vunpack.c.l.s8.bf16 %v956_v0 }
 0x120   : > { %7312 = vmatprep.subr.bf16.mxu0 %v7311_v3  ;;  %7712 = vmatprep.subr.bf16.mxu1 %v7711_v4  ;;  %v7351_v3 = vunpack.c.h.s8.bf16 %v955_v55  ;;  %v7751_v4 = vunpack.c.h.s8.bf16 %v957_v56  ;;  %v975_v56 = vld [vmem:[%s9341_s12 + $0x388] sm:$0xff] }
 0x123   : > { %7314 = vmatpush1.bf16.msra.mxu0 %v7313_v7  ;;  %7714 = vmatpush1.bf16.msra.mxu1 %v7713_v8  ;;  %v2689_v7 = vcombine.high %v9437_v27, %v9437_v27  ;;  %v7353_v8 = vunpack.c.h.s8.bf16 %v954_v50  ;;  %v7359_v27 = vunpack.c.h.s8.bf16 %v959_v5 }
 0x124   : > { %7316 = vmatprep.subr.bf16.mxu0 %v7315_v9  ;;  %7716 = vmatprep.subr.bf16.mxu1 %v7715_v10  ;;  %v7753_v9 = vunpack.c.h.s8.bf16 %v956_v0  ;;  %v7355_v10 = vunpack.c.l.s8.bf16 %v959_v5  ;;  %v974_v0 = vld [vmem:[%s9341_s12 + $0x380] sm:$0xff] }
 0x127   : > { %7318 = vmatpush1.bf16.msra.mxu0 %v7317_v13  ;;  %7718 = vmatpush1.bf16.msra.mxu1 %v7717_v59  ;;  %v960_v13 = vld [vmem:[%s9341_s12 + $0x310] sm:$0xff]  ;;  %v9486_v59 = vrot.slane %v2689_v7, %v9371_v58  ;;  %v981_v7 = vld [vmem:[%s9341_s12 + $0x3b8] sm:$0xff] }
 0x128   : > { %7320 = vmatprep.subr.bf16.mxu0 %v7319_v14  ;;  %7720 = vmatprep.subr.bf16.mxu1 %v7719_v15  ;;  %v7357_v14 = vunpack.c.l.s8.bf16 %v958_v12  ;;  %v7757_v15 = vunpack.c.l.s8.bf16 %v960_v13 }
 0x12b   : > { %7322 = vmatpush1.bf16.msra.mxu0 %v7321_v18  ;;  %7722 = vmatpush1.bf16.msra.mxu1 %v7721_v19  ;;  %v965_v18 = vld [vmem:[%s9341_s12 + $0x338] sm:$0xff]  ;;  %v2705_v19 = vcombine.high %v9486_v59, %v9486_v59 }
 0x12c   : > { %7324 = vmatprep.subr.bf16.mxu0 %v7323_v20  ;;  %7724 = vmatprep.subr.bf16.mxu1 %v7723_v21  ;;  %v7361_v20 = vunpack.c.h.s8.bf16 %v958_v12  ;;  %v7761_v21 = vunpack.c.h.s8.bf16 %v960_v13  ;;  %v7763_v23 = vunpack.c.l.s8.bf16 %v965_v18  ;;  %v7767_v29 = vunpack.c.h.s8.bf16 %v965_v18  ;;  %v978_v12 = vld [vmem:[%s9341_s12 + $0x3a0] sm:$0xff]  ;;  %v980_v13 = vld [vmem:[%s9341_s12 + $0x3b0] sm:$0xff]  ;;  %v985_v18 = vld [vmem:[%s9341_s12 + $0x3d8] sm:$0xff] }
 0x12f   : > { %7326 = vmatpush1.bf16.msra.mxu0 %v7325_v24  ;;  %7726 = vmatpush1.bf16.msra.mxu1 %v7725_v25  ;;  %v962_v24 = vld [vmem:[%s9341_s12 + $0x320] sm:$0xff]  ;;  %v964_v25 = vld [vmem:[%s9341_s12 + $0x330] sm:$0xff] }
 0x130   : > { %7328 = vmatprep.subr.bf16.mxu0 %v7327_v26  ;;  %7728 = vmatprep.subr.bf16.mxu1 %v7727_v28  ;;  %v7365_v26 = vunpack.c.l.s8.bf16 %v962_v24  ;;  %v7765_v28 = vunpack.c.l.s8.bf16 %v964_v25 }
 0x133   : > { %7330 = vmatpush1.bf16.msra.mxu0 %v7329_v31  ;;  %7730 = vmatpush1.bf16.msra.mxu1 %v7729_v32  ;;  %v969_v31 = vld [vmem:[%s9341_s12 + $0x358] sm:$0xff]  ;;  %v7369_v32 = vunpack.c.h.s8.bf16 %v962_v24  ;;  %v984_v24 = vld [vmem:[%s9341_s12 + $0x3d0] sm:$0xff] }
 0x134   : > { %7332 = vmatprep.subr.bf16.mxu0 %v7331_v33  ;;  %7732 = vmatprep.subr.bf16.mxu1 %v7731_v34  ;;  %v7769_v33 = vunpack.c.h.s8.bf16 %v964_v25  ;;  %v7371_v34 = vunpack.c.l.s8.bf16 %v967_v30  ;;  %v7771_v35 = vunpack.c.l.s8.bf16 %v969_v31  ;;  %v7775_v41 = vunpack.c.h.s8.bf16 %v969_v31 }
 0x137   : > { %7334 = vmatpush1.bf16.msra.mxu0 %v7333_v37  ;;  %7734 = vmatpush1.bf16.msra.mxu1 %v7733_v38  ;;  %v968_v37 = vld [vmem:[%s9341_s12 + $0x350] sm:$0xff]  ;;  %v7373_v38 = vunpack.c.l.s8.bf16 %v966_v42 }
 0x138   : > { %7336 = vmatprep.subr.bf16.mxu0 %v7335_v39  ;;  %7736 = vmatprep.subr.bf16.mxu1 %v7735_v40  ;;  %v7773_v39 = vunpack.c.l.s8.bf16 %v968_v37  ;;  %v7375_v40 = vunpack.c.h.s8.bf16 %v967_v30  ;;  %v989_v30 = vld [vmem:[%s9341_s12 + $0x3f8] sm:$0xff] }
 0x13b   : > { %7338 = vmatpush1.bf16.msra.mxu0 %v7337_v44  ;;  %7738 = vmatpush1.bf16.msra.mxu1 %v7737_v45  ;;  %v973_v44 = vld [vmem:[%s9341_s12 + $0x378] sm:$0xff]  ;;  %v7377_v45 = vunpack.c.h.s8.bf16 %v966_v42  ;;  %v988_v42 = vld [vmem:[%s9341_s12 + $0x3f0] sm:$0xff] }
 0x13c   : > { %7340 = vmatprep.subr.bf16.mxu0 %v7339_v46  ;;  %7740 = vmatprep.subr.bf16.mxu1 %v7739_v48  ;;  %v7777_v46 = vunpack.c.h.s8.bf16 %v968_v37  ;;  %v7379_v48 = vunpack.c.l.s8.bf16 %v971_v43  ;;  %v7779_v49 = vunpack.c.l.s8.bf16 %v973_v44  ;;  %v7783_v55 = vunpack.c.h.s8.bf16 %v973_v44  ;;  %v9523_v37 = vld [vmem:[%s10326_s0 + $0x8] sm:$0x1f] }
 0x13d   : > { %v993_v44 = vld [vmem:[%s9341_s12 + $0x418] sm:$0xff] }
 0x13f   : > { %7342 = vmatpush1.bf16.msra.mxu0 %v7341_v52  ;;  %7742 = vmatpush1.bf16.msra.mxu1 %v7741_v53  ;;  %v972_v52 = vld [vmem:[%s9341_s12 + $0x370] sm:$0xff]  ;;  %v7381_v53 = vunpack.c.l.s8.bf16 %v970_v51 }
 0x140   : > { %7344 = vmatprep.subr.bf16.mxu0 %v7343_v63  ;;  %7744 = vmatprep.subr.bf16.mxu1 %v7743_v54  ;;  %v7781_v63 = vunpack.c.l.s8.bf16 %v972_v52  ;;  %v7383_v54 = vunpack.c.h.s8.bf16 %v971_v43  ;;  %v991_v43 = vld [vmem:[%s9341_s12 + $0x408] sm:$0xff] }
 0x143   : > { %7346 = vmatpush1.bf16.msra.mxu0 %v7345_v57  ;;  %7746 = vmatpush1.bf16.msra.mxu1 %v7745_v60  ;;  %v977_v57 = vld [vmem:[%s9341_s12 + $0x398] sm:$0xff]  ;;  %v7385_v60 = vunpack.c.h.s8.bf16 %v970_v51  ;;  %v7819_v51 = vunpack.c.l.s8.bf16 %v993_v44 }
 0x144   : > { %7348 = vmatprep.subr.bf16.mxu0 %v7347_v61  ;;  %7748 = vmatprep.subr.bf16.mxu1 %v7747_v62  ;;  %v7785_v61 = vunpack.c.h.s8.bf16 %v972_v52  ;;  %v7387_v62 = vunpack.c.l.s8.bf16 %v975_v56  ;;  %v7787_v50 = vunpack.c.l.s8.bf16 %v977_v57  ;;  %v7791_v5 = vunpack.c.h.s8.bf16 %v977_v57  ;;  %v990_v52 = vld [vmem:[%s9341_s12 + $0x400] sm:$0xff] }
 0x145   : > { %v7823_v57 = vunpack.c.h.s8.bf16 %v993_v44 }
 0x147   : > { %7350 = vmatpush1.bf16.msra.mxu0 %v7349_v1  ;;  %7750 = vmatpush1.bf16.msra.mxu1 %v7749_v2  ;;  %v976_v1 = vld [vmem:[%s9341_s12 + $0x390] sm:$0xff]  ;;  %v7389_v2 = vunpack.c.l.s8.bf16 %v974_v0 }
 0x148   : > { %7352 = vmatprep.subr.bf16.mxu0 %v7351_v3  ;;  %7752 = vmatprep.subr.bf16.mxu1 %v7751_v4  ;;  %v7789_v3 = vunpack.c.l.s8.bf16 %v976_v1  ;;  %v7391_v4 = vunpack.c.h.s8.bf16 %v975_v56  ;;  %v7423_v56 = vunpack.c.h.s8.bf16 %v991_v43 }
 0x14b   : > { %7354 = vmatpush1.bf16.msra.mxu0 %v7353_v8  ;;  %7754 = vmatpush1.bf16.msra.mxu1 %v7753_v9  ;;  %v7393_v8 = vunpack.c.h.s8.bf16 %v974_v0  ;;  %v7793_v9 = vunpack.c.h.s8.bf16 %v976_v1 }
 0x14c   : > { %7356 = vmatprep.subr.bf16.mxu0 %v7355_v10  ;;  %7756 = vmatprep.subr.bf16.mxu1 %v7755_v11  ;;  %v7395_v10 = vunpack.c.l.s8.bf16 %v979_v6  ;;  %v7795_v11 = vunpack.c.l.s8.bf16 %v981_v7 }
 0x14e   : > { %2952 = vmatmul.mubr.f32.vlgmr.msra.gmra.mrb[0].mxu0 %v9445_v36  ;;  %3449 = vmatmul.mubr.f32.vlgmr.msra.gmra.mrb[0].mxu1 %v9445_v36  ;;  %v7367_v36 = vunpack.c.h.s8.bf16 %v963_v17  ;;  %v983_v17 = vld [vmem:[%s9341_s12 + $0x3c8] sm:$0xff] }
 0x14f   : > { %7358 = vmatpush1.bf16.msra.mxu0 %v7357_v14  ;;  %7758 = vmatpush1.bf16.msra.mxu1 %v7757_v15  ;;  %v7397_v14 = vunpack.c.l.s8.bf16 %v978_v12  ;;  %v7797_v15 = vunpack.c.l.s8.bf16 %v980_v13 }
 0x150   : > { %7360 = vmatprep.subr.bf16.mxu0 %v7359_v27  ;;  %7760 = vmatprep.subr.bf16.mxu1 %v7759_v16  ;;  %v7399_v27 = vunpack.c.h.s8.bf16 %v979_v6  ;;  %v7799_v16 = vunpack.c.h.s8.bf16 %v981_v7 }
 0x151   : > { %3022 = vmatprep.mubr.f32.mxu0 %v2705_v19  ;;  %3519 = vmatprep.mubr.f32.mxu1 %v2705_v19  ;;  %v7401_v19 = vunpack.c.h.s8.bf16 %v978_v12 }
 0x153   : > { %7362 = vmatpush1.bf16.msra.mxu0 %v7361_v20  ;;  %7762 = vmatpush1.bf16.msra.mxu1 %v7761_v21  ;;  %v7801_v20 = vunpack.c.h.s8.bf16 %v980_v13  ;;  %v7403_v21 = vunpack.c.l.s8.bf16 %v983_v17 }
 0x154   : > { %7364 = vmatprep.subr.bf16.mxu0 %v7363_v22  ;;  %7764 = vmatprep.subr.bf16.mxu1 %v7763_v23  ;;  %v7803_v22 = vunpack.c.l.s8.bf16 %v985_v18  ;;  %v982_v23 = vld [vmem:[%s9341_s12 + $0x3c0] sm:$0xff] }
 0x155   : > { %v7405_v25 = vunpack.c.l.s8.bf16 %v982_v23  ;;  %v7409_v31 = vunpack.c.h.s8.bf16 %v982_v23 }
 0x157   : > { %7366 = vmatpush1.bf16.msra.mxu0 %v7365_v26  ;;  %7766 = vmatpush1.bf16.msra.mxu1 %v7765_v28  ;;  %v7805_v26 = vunpack.c.l.s8.bf16 %v984_v24  ;;  %v7407_v28 = vunpack.c.h.s8.bf16 %v983_v17 }
 0x158   : > { %7368 = vmatprep.subr.bf16.mxu0 %v7367_v36  ;;  %7768 = vmatprep.subr.bf16.mxu1 %v7767_v29  ;;  %v7807_v36 = vunpack.c.h.s8.bf16 %v985_v18  ;;  %v987_v29 = vld [vmem:[%s9341_s12 + $0x3e8] sm:$0xff] }
 0x15b   : > { %7370 = vmatpush1.bf16.msra.mxu0 %v7369_v32  ;;  %7770 = vmatpush1.bf16.msra.mxu1 %v7769_v33  ;;  %v7809_v32 = vunpack.c.h.s8.bf16 %v984_v24  ;;  %v7411_v33 = vunpack.c.l.s8.bf16 %v987_v29 }
 0x15c   : > { %7372 = vmatprep.subr.bf16.mxu0 %v7371_v34  ;;  %7772 = vmatprep.subr.bf16.mxu1 %v7771_v35  ;;  %v7811_v34 = vunpack.c.l.s8.bf16 %v989_v30  ;;  %v986_v35 = vld [vmem:[%s9341_s12 + $0x3e0] sm:$0xff] }
 0x15f   : > { %7374 = vmatpush1.bf16.msra.mxu0 %v7373_v38  ;;  %7774 = vmatpush1.bf16.msra.mxu1 %v7773_v39  ;;  %v7413_v38 = vunpack.c.l.s8.bf16 %v986_v35  ;;  %v7813_v39 = vunpack.c.l.s8.bf16 %v988_v42 }
 0x160   : > { %7376 = vmatprep.subr.bf16.mxu0 %v7375_v40  ;;  %7776 = vmatprep.subr.bf16.mxu1 %v7775_v41  ;;  %v7415_v40 = vunpack.c.h.s8.bf16 %v987_v29  ;;  %v7815_v41 = vunpack.c.h.s8.bf16 %v989_v30 }
 0x163   : > { %7378 = vmatpush1.bf16.msra.mxu0 %v7377_v45  ;;  %7778 = vmatpush1.bf16.msra.mxu1 %v7777_v46  ;;  %v9528_v45 = vunpack.c.l.bf16 %v9523_v37  ;;  %v7417_v46 = vunpack.c.h.s8.bf16 %v986_v35 }
 0x164   : > { %7380 = vmatprep.subr.bf16.mxu0 %v7379_v48  ;;  %7780 = vmatprep.subr.bf16.mxu1 %v7779_v49  ;;  %v7817_v48 = vunpack.c.h.s8.bf16 %v988_v42  ;;  %v7419_v49 = vunpack.c.l.s8.bf16 %v991_v43 }
 0x167   : > { %7382 = vmatpush1.bf16.msra.mxu0 %v7381_v53  ;;  %7782 = vmatpush1.bf16.msra.mxu1 %v7781_v63  ;;  %v992_v53 = vld [vmem:[%s9341_s12 + $0x410] sm:$0xff]  ;;  %v9534_v63 = vrot.slane %v9528_v45, %v9371_v58 }
 0x168   : > { %7384 = vmatprep.subr.bf16.mxu0 %v7383_v54  ;;  %7784 = vmatprep.subr.bf16.mxu1 %v7783_v55  ;;  %v7421_v54 = vunpack.c.l.s8.bf16 %v990_v52  ;;  %v7821_v55 = vunpack.c.l.s8.bf16 %v992_v53  ;;  %v7825_v0 = vunpack.c.h.s8.bf16 %v992_v53 }
 0x16b   : > { %7386 = vmatpush1.bf16.msra.mxu0 %v7385_v60  ;;  %7786 = vmatpush1.bf16.msra.mxu1 %v7785_v61  ;;  %v995_v60 = vld [vmem:[%s9341_s12 + $0x428] sm:$0xff]  ;;  %v997_v61 = vld [vmem:[%s9341_s12 + $0x438] sm:$0xff] }
 0x16c   : > { %7388 = vmatprep.subr.bf16.mxu0 %v7387_v62  ;;  %7788 = vmatprep.subr.bf16.mxu1 %v7787_v50  ;;  %v2721_v62 = vcombine.high %v9534_v63, %v9534_v63  ;;  %v7425_v50 = vunpack.c.h.s8.bf16 %v990_v52  ;;  %v7427_v1 = vunpack.c.l.s8.bf16 %v995_v60  ;;  %v7831_v7 = vunpack.c.h.s8.bf16 %v997_v61 }
 0x16f   : > { %7390 = vmatpush1.bf16.msra.mxu0 %v7389_v2  ;;  %7790 = vmatpush1.bf16.msra.mxu1 %v7789_v3  ;;  %v7827_v2 = vunpack.c.l.s8.bf16 %v997_v61  ;;  %v994_v3 = vld [vmem:[%s9341_s12 + $0x420] sm:$0xff] }
 0x170   : > { %7392 = vmatprep.subr.bf16.mxu0 %v7391_v4  ;;  %7792 = vmatprep.subr.bf16.mxu1 %v7791_v5  ;;  %v996_v4 = vld [vmem:[%s9341_s12 + $0x430] sm:$0xff]  ;;  %v7429_v5 = vunpack.c.l.s8.bf16 %v994_v3 }
 0x171   : > { %v7829_v6 = vunpack.c.l.s8.bf16 %v996_v4 }
 0x173   : > { %7394 = vmatpush1.bf16.msra.mxu0 %v7393_v8  ;;  %7794 = vmatpush1.bf16.msra.mxu1 %v7793_v9  ;;  %v999_v8 = vld [vmem:[%s9341_s12 + $0x448] sm:$0xff]  ;;  %v1001_v9 = vld [vmem:[%s9341_s12 + $0x458] sm:$0xff] }
 0x174   : > { %7396 = vmatprep.subr.bf16.mxu0 %v7395_v10  ;;  %7796 = vmatprep.subr.bf16.mxu1 %v7795_v11  ;;  %v7433_v10 = vunpack.c.h.s8.bf16 %v994_v3  ;;  %v7833_v11 = vunpack.c.h.s8.bf16 %v996_v4  ;;  %v7435_v12 = vunpack.c.l.s8.bf16 %v999_v8  ;;  %v7835_v13 = vunpack.c.l.s8.bf16 %v1001_v9  ;;  %v1014_v4 = vld [vmem:[%s9341_s12 + $0x4c0] sm:$0xff] }
 0x175   : > { %v7439_v17 = vunpack.c.h.s8.bf16 %v999_v8  ;;  %v7839_v18 = vunpack.c.h.s8.bf16 %v1001_v9  ;;  %v1019_v9 = vld [vmem:[%s9341_s12 + $0x4e8] sm:$0xff] }
 0x177   : > { %7398 = vmatpush1.bf16.msra.mxu0 %v7397_v14  ;;  %7798 = vmatpush1.bf16.msra.mxu1 %v7797_v15  ;;  %v998_v14 = vld [vmem:[%s9341_s12 + $0x440] sm:$0xff]  ;;  %v1000_v15 = vld [vmem:[%s9341_s12 + $0x450] sm:$0xff] }
 0x178   : > { %7400 = vmatprep.subr.bf16.mxu0 %v7399_v27  ;;  %7800 = vmatprep.subr.bf16.mxu1 %v7799_v16  ;;  %v7437_v27 = vunpack.c.l.s8.bf16 %v998_v14  ;;  %v7837_v16 = vunpack.c.l.s8.bf16 %v1000_v15 }
 0x17b   : > { %7402 = vmatpush1.bf16.msra.mxu0 %v7401_v19  ;;  %7802 = vmatpush1.bf16.msra.mxu1 %v7801_v20  ;;  %v1003_v19 = vld [vmem:[%s9341_s12 + $0x468] sm:$0xff]  ;;  %v1005_v20 = vld [vmem:[%s9341_s12 + $0x478] sm:$0xff] }
 0x17c   : > { %7404 = vmatprep.subr.bf16.mxu0 %v7403_v21  ;;  %7804 = vmatprep.subr.bf16.mxu1 %v7803_v22  ;;  %v7441_v21 = vunpack.c.h.s8.bf16 %v998_v14  ;;  %v7841_v22 = vunpack.c.h.s8.bf16 %v1000_v15  ;;  %v7443_v23 = vunpack.c.l.s8.bf16 %v1003_v19  ;;  %v7843_v24 = vunpack.c.l.s8.bf16 %v1005_v20  ;;  %v1018_v15 = vld [vmem:[%s9341_s12 + $0x4e0] sm:$0xff] }
 0x17d   : > { %v7447_v29 = vunpack.c.h.s8.bf16 %v1003_v19  ;;  %v7847_v30 = vunpack.c.h.s8.bf16 %v1005_v20  ;;  %v1023_v20 = vld [vmem:[%s9341_s12 + $0x508] sm:$0xff] }
 0x17f   : > { %7406 = vmatpush1.bf16.msra.mxu0 %v7405_v25  ;;  %7806 = vmatpush1.bf16.msra.mxu1 %v7805_v26  ;;  %v1002_v25 = vld [vmem:[%s9341_s12 + $0x460] sm:$0xff]  ;;  %v1004_v26 = vld [vmem:[%s9341_s12 + $0x470] sm:$0xff] }
 0x180   : > { %7408 = vmatprep.subr.bf16.mxu0 %v7407_v28  ;;  %7808 = vmatprep.subr.bf16.mxu1 %v7807_v36  ;;  %v7445_v28 = vunpack.c.l.s8.bf16 %v1002_v25  ;;  %v7845_v36 = vunpack.c.l.s8.bf16 %v1004_v26 }
 0x183   : > { %7410 = vmatpush1.bf16.msra.mxu0 %v7409_v31  ;;  %7810 = vmatpush1.bf16.msra.mxu1 %v7809_v32  ;;  %v1007_v31 = vld [vmem:[%s9341_s12 + $0x488] sm:$0xff]  ;;  %v1009_v32 = vld [vmem:[%s9341_s12 + $0x498] sm:$0xff] }
 0x184   : > { %7412 = vmatprep.subr.bf16.mxu0 %v7411_v33  ;;  %7812 = vmatprep.subr.bf16.mxu1 %v7811_v34  ;;  %v7449_v33 = vunpack.c.h.s8.bf16 %v1002_v25  ;;  %v7849_v34 = vunpack.c.h.s8.bf16 %v1004_v26  ;;  %v7451_v35 = vunpack.c.l.s8.bf16 %v1007_v31  ;;  %v7851_v42 = vunpack.c.l.s8.bf16 %v1009_v32 }
 0x185   : > { %v7455_v43 = vunpack.c.h.s8.bf16 %v1007_v31  ;;  %v7855_v44 = vunpack.c.h.s8.bf16 %v1009_v32  ;;  %v7483_v25 = vunpack.c.l.s8.bf16 %v1023_v20 }
 0x187   : > { %7414 = vmatpush1.bf16.msra.mxu0 %v7413_v38  ;;  %7814 = vmatpush1.bf16.msra.mxu1 %v7813_v39  ;;  %v1006_v38 = vld [vmem:[%s9341_s12 + $0x480] sm:$0xff]  ;;  %v1008_v39 = vld [vmem:[%s9341_s12 + $0x490] sm:$0xff] }
 0x188   : > { %7416 = vmatprep.subr.bf16.mxu0 %v7415_v40  ;;  %7816 = vmatprep.subr.bf16.mxu1 %v7815_v41  ;;  %v7453_v40 = vunpack.c.l.s8.bf16 %v1006_v38  ;;  %v7853_v41 = vunpack.c.l.s8.bf16 %v1008_v39 }
 0x18b   : > { %7418 = vmatpush1.bf16.msra.mxu0 %v7417_v46  ;;  %7818 = vmatpush1.bf16.msra.mxu1 %v7817_v48  ;;  %v1011_v46 = vld [vmem:[%s9341_s12 + $0x4a8] sm:$0xff]  ;;  %v1013_v48 = vld [vmem:[%s9341_s12 + $0x4b8] sm:$0xff] }
 0x18c   : > { %7420 = vmatprep.subr.bf16.mxu0 %v7419_v49  ;;  %7820 = vmatprep.subr.bf16.mxu1 %v7819_v51  ;;  %v7457_v49 = vunpack.c.h.s8.bf16 %v1006_v38  ;;  %v7857_v51 = vunpack.c.h.s8.bf16 %v1008_v39  ;;  %v7459_v52 = vunpack.c.l.s8.bf16 %v1011_v46  ;;  %v7859_v53 = vunpack.c.l.s8.bf16 %v1013_v48 }
 0x18d   : > { %v7863_v61 = vunpack.c.h.s8.bf16 %v1013_v48 }
 0x18e   : > { %3023 = vmatmul.mubr.f32.vlgmr.msra.gmra.mrb[0].mxu0 %v9486_v59  ;;  %3520 = vmatmul.mubr.f32.vlgmr.msra.gmra.mrb[0].mxu1 %v9486_v59  ;;  %v7431_v59 = vunpack.c.h.s8.bf16 %v995_v60  ;;  %v7463_v60 = vunpack.c.h.s8.bf16 %v1011_v46 }
 0x18f   : > { %7422 = vmatpush1.bf16.msra.mxu0 %v7421_v54  ;;  %7822 = vmatpush1.bf16.msra.mxu1 %v7821_v55  ;;  %v1010_v54 = vld [vmem:[%s9341_s12 + $0x4a0] sm:$0xff]  ;;  %v1012_v55 = vld [vmem:[%s9341_s12 + $0x4b0] sm:$0xff] }
 0x190   : > { %7424 = vmatprep.subr.bf16.mxu0 %v7423_v56  ;;  %7824 = vmatprep.subr.bf16.mxu1 %v7823_v57  ;;  %v7461_v56 = vunpack.c.l.s8.bf16 %v1010_v54  ;;  %v7861_v57 = vunpack.c.l.s8.bf16 %v1012_v55 }
 0x191   : > { %3093 = vmatprep.mubr.f32.mxu0 %v2721_v62  ;;  %3590 = vmatprep.mubr.f32.mxu1 %v2721_v62  ;;  %v1015_v62 = vld [vmem:[%s9341_s12 + $0x4c8] sm:$0xff] }
 0x193   : > { %7426 = vmatpush1.bf16.msra.mxu0 %v7425_v50  ;;  %7826 = vmatpush1.bf16.msra.mxu1 %v7825_v0  ;;  %v1017_v50 = vld [vmem:[%s9341_s12 + $0x4d8] sm:$0xff]  ;;  %v7465_v0 = vunpack.c.h.s8.bf16 %v1010_v54 }
 0x194   : > { %7428 = vmatprep.subr.bf16.mxu0 %v7427_v1  ;;  %7828 = vmatprep.subr.bf16.mxu1 %v7827_v2  ;;  %v7865_v1 = vunpack.c.h.s8.bf16 %v1012_v55  ;;  %v7467_v2 = vunpack.c.l.s8.bf16 %v1015_v62  ;;  %v7867_v3 = vunpack.c.l.s8.bf16 %v1017_v50  ;;  %v7871_v8 = vunpack.c.h.s8.bf16 %v1017_v50 }
 0x197   : > { %7430 = vmatpush1.bf16.msra.mxu0 %v7429_v5  ;;  %7830 = vmatpush1.bf16.msra.mxu1 %v7829_v6  ;;  %v1016_v5 = vld [vmem:[%s9341_s12 + $0x4d0] sm:$0xff]  ;;  %v7469_v6 = vunpack.c.l.s8.bf16 %v1014_v4 }
 0x198   : > { %7432 = vmatprep.subr.bf16.mxu0 %v7431_v59  ;;  %7832 = vmatprep.subr.bf16.mxu1 %v7831_v7  ;;  %v7869_v59 = vunpack.c.l.s8.bf16 %v1016_v5  ;;  %v7471_v7 = vunpack.c.h.s8.bf16 %v1015_v62 }
 0x19b   : > { %7434 = vmatpush1.bf16.msra.mxu0 %v7433_v10  ;;  %7834 = vmatpush1.bf16.msra.mxu1 %v7833_v11  ;;  %v1021_v10 = vld [vmem:[%s9341_s12 + $0x4f8] sm:$0xff]  ;;  %v7473_v11 = vunpack.c.h.s8.bf16 %v1014_v4 }
 0x19c   : > { %7436 = vmatprep.subr.bf16.mxu0 %v7435_v12  ;;  %7836 = vmatprep.subr.bf16.mxu1 %v7835_v13  ;;  %v7873_v12 = vunpack.c.h.s8.bf16 %v1016_v5  ;;  %v7475_v13 = vunpack.c.l.s8.bf16 %v1019_v9  ;;  %v7875_v14 = vunpack.c.l.s8.bf16 %v1021_v10  ;;  %v7879_v19 = vunpack.c.h.s8.bf16 %v1021_v10 }
 0x19f   : > { %7438 = vmatpush1.bf16.msra.mxu0 %v7437_v27  ;;  %7838 = vmatpush1.bf16.msra.mxu1 %v7837_v16  ;;  %v1020_v27 = vld [vmem:[%s9341_s12 + $0x4f0] sm:$0xff]  ;;  %v7477_v16 = vunpack.c.l.s8.bf16 %v1018_v15 }
 0x1a0   : > { %7440 = vmatprep.subr.bf16.mxu0 %v7439_v17  ;;  %7840 = vmatprep.subr.bf16.mxu1 %v7839_v18  ;;  %v7877_v17 = vunpack.c.l.s8.bf16 %v1020_v27  ;;  %v7479_v18 = vunpack.c.h.s8.bf16 %v1019_v9 }
 0x1a3   : > { %7442 = vmatpush1.bf16.msra.mxu0 %v7441_v21  ;;  %7842 = vmatpush1.bf16.msra.mxu1 %v7841_v22  ;;  %v1025_v21 = vld [vmem:[%s9341_s12 + $0x518] sm:$0xff]  ;;  %v2706_v22 = vcombine.high %v9528_v45, %v9528_v45  ;;  %v7487_v45 = vunpack.c.h.s8.bf16 %v1023_v20 }
 0x1a4   : > { %7444 = vmatprep.subr.bf16.mxu0 %v7443_v23  ;;  %7844 = vmatprep.subr.bf16.mxu1 %v7843_v24  ;;  %v7481_v23 = vunpack.c.h.s8.bf16 %v1018_v15  ;;  %v7881_v24 = vunpack.c.h.s8.bf16 %v1020_v27  ;;  %v7883_v26 = vunpack.c.l.s8.bf16 %v1025_v21  ;;  %v7887_v32 = vunpack.c.h.s8.bf16 %v1025_v21 }
 0x1a7   : > { %7446 = vmatpush1.bf16.msra.mxu0 %v7445_v28  ;;  %7846 = vmatpush1.bf16.msra.mxu1 %v7845_v36  ;;  %v1022_v28 = vld [vmem:[%s9341_s12 + $0x500] sm:$0xff]  ;;  %v1024_v36 = vld [vmem:[%s9341_s12 + $0x510] sm:$0xff] }
 0x1a8   : > { %7448 = vmatprep.subr.bf16.mxu0 %v7447_v29  ;;  %7848 = vmatprep.subr.bf16.mxu1 %v7847_v30  ;;  %v9575_v29 = vrot.slane %v2706_v22, %v9371_v58  ;;  %v7485_v30 = vunpack.c.l.s8.bf16 %v1022_v28  ;;  %v7885_v31 = vunpack.c.l.s8.bf16 %v1024_v36  ;;  %v7889_v38 = vunpack.c.h.s8.bf16 %v1024_v36  ;;  %v1043_v22 = vld [vmem:[%s9341_s12 + $0x5a8] sm:$0xff]  ;;  %v1042_v36 = vld [vmem:[%s9341_s12 + $0x5a0] sm:$0xff] }
 0x1ab   : > { %7450 = vmatpush1.bf16.msra.mxu0 %v7449_v33  ;;  %7850 = vmatpush1.bf16.msra.mxu1 %v7849_v34  ;;  %v1027_v33 = vld [vmem:[%s9341_s12 + $0x528] sm:$0xff]  ;;  %v1029_v34 = vld [vmem:[%s9341_s12 + $0x538] sm:$0xff] }
 0x1ac   : > { %7452 = vmatprep.subr.bf16.mxu0 %v7451_v35  ;;  %7852 = vmatprep.subr.bf16.mxu1 %v7851_v42  ;;  %v2722_v35 = vcombine.high %v9575_v29, %v9575_v29  ;;  %v7489_v42 = vunpack.c.h.s8.bf16 %v1022_v28  ;;  %v7491_v39 = vunpack.c.l.s8.bf16 %v1027_v33  ;;  %v7895_v48 = vunpack.c.h.s8.bf16 %v1029_v34 }
 0x1af   : > { %7454 = vmatpush1.bf16.msra.mxu0 %v7453_v40  ;;  %7854 = vmatpush1.bf16.msra.mxu1 %v7853_v41  ;;  %v7891_v40 = vunpack.c.l.s8.bf16 %v1029_v34  ;;  %v1026_v41 = vld [vmem:[%s9341_s12 + $0x520] sm:$0xff]  ;;  %v1047_v34 = vld [vmem:[%s9341_s12 + $0x5c8] sm:$0xff] }
 0x1b0   : > { %7456 = vmatprep.subr.bf16.mxu0 %v7455_v43  ;;  %7856 = vmatprep.subr.bf16.mxu1 %v7855_v44  ;;  %v1028_v43 = vld [vmem:[%s9341_s12 + $0x530] sm:$0xff]  ;;  %v7493_v44 = vunpack.c.l.s8.bf16 %v1026_v41 }
 0x1b1   : > { %v7893_v46 = vunpack.c.l.s8.bf16 %v1028_v43 }
 0x1b3   : > { %7458 = vmatpush1.bf16.msra.mxu0 %v7457_v49  ;;  %7858 = vmatpush1.bf16.msra.mxu1 %v7857_v51  ;;  %v1031_v49 = vld [vmem:[%s9341_s12 + $0x548] sm:$0xff]  ;;  %v1033_v51 = vld [vmem:[%s9341_s12 + $0x558] sm:$0xff] }
 0x1b4   : > { %7460 = vmatprep.subr.bf16.mxu0 %v7459_v52  ;;  %7860 = vmatprep.subr.bf16.mxu1 %v7859_v53  ;;  %v7497_v52 = vunpack.c.h.s8.bf16 %v1026_v41  ;;  %v7897_v53 = vunpack.c.h.s8.bf16 %v1028_v43  ;;  %v7499_v54 = vunpack.c.l.s8.bf16 %v1031_v49  ;;  %v7899_v55 = vunpack.c.l.s8.bf16 %v1033_v51  ;;  %v1046_v41 = vld [vmem:[%s9341_s12 + $0x5c0] sm:$0xff]  ;;  %v1048_v43 = vld [vmem:[%s9341_s12 + $0x5d0] sm:$0xff] }
 0x1b5   : > { %v7503_v62 = vunpack.c.h.s8.bf16 %v1031_v49  ;;  %v7903_v50 = vunpack.c.h.s8.bf16 %v1033_v51  ;;  %v1051_v49 = vld [vmem:[%s9341_s12 + $0x5e8] sm:$0xff]  ;;  %v1053_v51 = vld [vmem:[%s9341_s12 + $0x5f8] sm:$0xff] }
 0x1b7   : > { %7462 = vmatpush1.bf16.msra.mxu0 %v7461_v56  ;;  %7862 = vmatpush1.bf16.msra.mxu1 %v7861_v57  ;;  %v1030_v56 = vld [vmem:[%s9341_s12 + $0x540] sm:$0xff]  ;;  %v1032_v57 = vld [vmem:[%s9341_s12 + $0x550] sm:$0xff] }
 0x1b8   : > { %7464 = vmatprep.subr.bf16.mxu0 %v7463_v60  ;;  %7864 = vmatprep.subr.bf16.mxu1 %v7863_v61  ;;  %v7501_v60 = vunpack.c.l.s8.bf16 %v1030_v56  ;;  %v7901_v61 = vunpack.c.l.s8.bf16 %v1032_v57 }
 0x1bb   : > { %7466 = vmatpush1.bf16.msra.mxu0 %v7465_v0  ;;  %7866 = vmatpush1.bf16.msra.mxu1 %v7865_v1  ;;  %v1035_v0 = vld [vmem:[%s9341_s12 + $0x568] sm:$0xff]  ;;  %v1037_v1 = vld [vmem:[%s9341_s12 + $0x578] sm:$0xff] }
 0x1bc   : > { %7468 = vmatprep.subr.bf16.mxu0 %v7467_v2  ;;  %7868 = vmatprep.subr.bf16.mxu1 %v7867_v3  ;;  %v7505_v2 = vunpack.c.h.s8.bf16 %v1030_v56  ;;  %v7905_v3 = vunpack.c.h.s8.bf16 %v1032_v57  ;;  %v7507_v4 = vunpack.c.l.s8.bf16 %v1035_v0  ;;  %v7907_v5 = vunpack.c.l.s8.bf16 %v1037_v1  ;;  %v1050_v56 = vld [vmem:[%s9341_s12 + $0x5e0] sm:$0xff]  ;;  %v1052_v57 = vld [vmem:[%s9341_s12 + $0x5f0] sm:$0xff] }
 0x1bd   : > { %v7511_v9 = vunpack.c.h.s8.bf16 %v1035_v0  ;;  %v7911_v10 = vunpack.c.h.s8.bf16 %v1037_v1  ;;  %v1055_v0 = vld [vmem:[%s9341_s12 + $0x608] sm:$0xff]  ;;  %v1057_v1 = vld [vmem:[%s9341_s12 + $0x618] sm:$0xff] }
 0x1bf   : > { %7470 = vmatpush1.bf16.msra.mxu0 %v7469_v6  ;;  %7870 = vmatpush1.bf16.msra.mxu1 %v7869_v59  ;;  %v1034_v6 = vld [vmem:[%s9341_s12 + $0x560] sm:$0xff]  ;;  %v1036_v59 = vld [vmem:[%s9341_s12 + $0x570] sm:$0xff] }
 0x1c0   : > { %7472 = vmatprep.subr.bf16.mxu0 %v7471_v7  ;;  %7872 = vmatprep.subr.bf16.mxu1 %v7871_v8  ;;  %v7509_v7 = vunpack.c.l.s8.bf16 %v1034_v6  ;;  %v7909_v8 = vunpack.c.l.s8.bf16 %v1036_v59 }
 0x1c3   : > { %7474 = vmatpush1.bf16.msra.mxu0 %v7473_v11  ;;  %7874 = vmatpush1.bf16.msra.mxu1 %v7873_v12  ;;  %v1039_v11 = vld [vmem:[%s9341_s12 + $0x588] sm:$0xff]  ;;  %v1041_v12 = vld [vmem:[%s9341_s12 + $0x598] sm:$0xff] }
 0x1c4   : > { %7476 = vmatprep.subr.bf16.mxu0 %v7475_v13  ;;  %7876 = vmatprep.subr.bf16.mxu1 %v7875_v14  ;;  %v7513_v13 = vunpack.c.h.s8.bf16 %v1034_v6  ;;  %v7913_v14 = vunpack.c.h.s8.bf16 %v1036_v59  ;;  %v7515_v15 = vunpack.c.l.s8.bf16 %v1039_v11  ;;  %v7915_v27 = vunpack.c.l.s8.bf16 %v1041_v12  ;;  %v1054_v6 = vld [vmem:[%s9341_s12 + $0x600] sm:$0xff]  ;;  %v1056_v59 = vld [vmem:[%s9341_s12 + $0x610] sm:$0xff] }
 0x1c5   : > { %v7519_v20 = vunpack.c.h.s8.bf16 %v1039_v11  ;;  %v7919_v21 = vunpack.c.h.s8.bf16 %v1041_v12  ;;  %v1059_v11 = vld [vmem:[%s9341_s12 + $0x628] sm:$0xff]  ;;  %v1061_v12 = vld [vmem:[%s9341_s12 + $0x638] sm:$0xff] }
 0x1c7   : > { %7478 = vmatpush1.bf16.msra.mxu0 %v7477_v16  ;;  %7878 = vmatpush1.bf16.msra.mxu1 %v7877_v17  ;;  %v1038_v16 = vld [vmem:[%s9341_s12 + $0x580] sm:$0xff]  ;;  %v1040_v17 = vld [vmem:[%s9341_s12 + $0x590] sm:$0xff] }
 0x1c8   : > { %7480 = vmatprep.subr.bf16.mxu0 %v7479_v18  ;;  %7880 = vmatprep.subr.bf16.mxu1 %v7879_v19  ;;  %v7517_v18 = vunpack.c.l.s8.bf16 %v1038_v16  ;;  %v7917_v19 = vunpack.c.l.s8.bf16 %v1040_v17 }
 0x1cb   : > { %7482 = vmatpush1.bf16.msra.mxu0 %v7481_v23  ;;  %7882 = vmatpush1.bf16.msra.mxu1 %v7881_v24  ;;  %v1045_v23 = vld [vmem:[%s9341_s12 + $0x5b8] sm:$0xff]  ;;  %v7521_v24 = vunpack.c.h.s8.bf16 %v1038_v16  ;;  %v1058_v16 = vld [vmem:[%s9341_s12 + $0x620] sm:$0xff] }
 0x1cc   : > { %7484 = vmatprep.subr.bf16.mxu0 %v7483_v25  ;;  %7884 = vmatprep.subr.bf16.mxu1 %v7883_v26  ;;  %v7921_v25 = vunpack.c.h.s8.bf16 %v1040_v17  ;;  %v7523_v26 = vunpack.c.l.s8.bf16 %v1043_v22  ;;  %v7923_v28 = vunpack.c.l.s8.bf16 %v1045_v23  ;;  %v1060_v17 = vld [vmem:[%s9341_s12 + $0x630] sm:$0xff] }
 0x1ce   : > { %3094 = vmatmul.mubr.f32.vlgmr.msra.gmra.mrb[0].mxu0 %v9534_v63  ;;  %3591 = vmatmul.mubr.f32.vlgmr.msra.gmra.mrb[0].mxu1 %v9534_v63  ;;  %v7495_v63 = vunpack.c.h.s8.bf16 %v1027_v33  ;;  %v7927_v33 = vunpack.c.h.s8.bf16 %v1045_v23  ;;  %v3798_v23 = vld [vmem:[%s9339_s30 + $0x18] sm:$0xff] }
 0x1cf   : > { %7486 = vmatpush1.bf16.msra.mxu0 %v7485_v30  ;;  %7886 = vmatpush1.bf16.msra.mxu1 %v7885_v31  ;;  %v1044_v30 = vld [vmem:[%s9341_s12 + $0x5b0] sm:$0xff]  ;;  %v7525_v31 = vunpack.c.l.s8.bf16 %v1042_v36 }
 0x1d0   : > { %7488 = vmatprep.subr.bf16.mxu0 %v7487_v45  ;;  %7888 = vmatprep.subr.bf16.mxu1 %v7887_v32  ;;  %v7925_v45 = vunpack.c.l.s8.bf16 %v1044_v30  ;;  %v7527_v32 = vunpack.c.h.s8.bf16 %v1043_v22  ;;  %v3796_v22 = vld [vmem:[%s9339_s30 + $0x8] sm:$0xff] }
 0x1d1   : > { %3164 = vmatprep.mubr.f32.mxu0 %v2722_v35  ;;  %3661 = vmatprep.mubr.f32.mxu1 %v2722_v35  ;;  %v1049_v35 = vld [vmem:[%s9341_s12 + $0x5d8] sm:$0xff] }
 0x1d3   : > { %7490 = vmatpush1.bf16.msra.mxu0 %v7489_v42  ;;  %7890 = vmatpush1.bf16.msra.mxu1 %v7889_v38  ;;  %v7529_v42 = vunpack.c.h.s8.bf16 %v1042_v36  ;;  %v7929_v38 = vunpack.c.h.s8.bf16 %v1044_v30  ;;  %v8091_v36 = vunpack.c.l.s8.bf16 %v3798_v23  ;;  %v3795_v30 = vld [vmem:[%s9339_s30] sm:$0xff] }
 0x1d4   : > { %7492 = vmatprep.subr.bf16.mxu0 %v7491_v39  ;;  %7892 = vmatprep.subr.bf16.mxu1 %v7891_v40  ;;  %v7531_v39 = vunpack.c.l.s8.bf16 %v1047_v34  ;;  %v7931_v40 = vunpack.c.l.s8.bf16 %v1049_v35 }
 0x1d7   : > { %7494 = vmatpush1.bf16.msra.mxu0 %v7493_v44  ;;  %7894 = vmatpush1.bf16.msra.mxu1 %v7893_v46  ;;  %v7533_v44 = vunpack.c.l.s8.bf16 %v1046_v41  ;;  %v7933_v46 = vunpack.c.l.s8.bf16 %v1048_v43 }
 0x1d8   : > { %7496 = vmatprep.subr.bf16.mxu0 %v7495_v63  ;;  %7896 = vmatprep.subr.bf16.mxu1 %v7895_v48  ;;  %v7535_v63 = vunpack.c.h.s8.bf16 %v1047_v34  ;;  %v7935_v48 = vunpack.c.h.s8.bf16 %v1049_v35  ;;  %v8095_v34 = vunpack.c.h.s8.bf16 %v3798_v23  ;;  %v3804_v35 = vld [vmem:[%s9339_s30 + $0x48] sm:$0xff]  ;;  %v3838_v23 = vld [vmem:[%s9339_s30 + $0x158] sm:$0xff] }
 0x1db   : > { %7498 = vmatpush1.bf16.msra.mxu0 %v7497_v52  ;;  %7898 = vmatpush1.bf16.msra.mxu1 %v7897_v53  ;;  %v7537_v52 = vunpack.c.h.s8.bf16 %v1046_v41  ;;  %v7937_v53 = vunpack.c.h.s8.bf16 %v1048_v43  ;;  %v3803_v43 = vld [vmem:[%s9339_s30 + $0x40] sm:$0xff] }
 0x1dc   : > { %7500 = vmatprep.subr.bf16.mxu0 %v7499_v54  ;;  %7900 = vmatprep.subr.bf16.mxu1 %v7899_v55  ;;  %v7539_v54 = vunpack.c.l.s8.bf16 %v1051_v49  ;;  %v7939_v55 = vunpack.c.l.s8.bf16 %v1053_v51 }
 0x1df   : > { %7502 = vmatpush1.bf16.msra.mxu0 %v7501_v60  ;;  %7902 = vmatpush1.bf16.msra.mxu1 %v7901_v61  ;;  %v7541_v60 = vunpack.c.l.s8.bf16 %v1050_v56  ;;  %v7941_v61 = vunpack.c.l.s8.bf16 %v1052_v57 }
 0x1e0   : > { %7504 = vmatprep.subr.bf16.mxu0 %v7503_v62  ;;  %7904 = vmatprep.subr.bf16.mxu1 %v7903_v50  ;;  %v7543_v62 = vunpack.c.h.s8.bf16 %v1051_v49  ;;  %v7943_v50 = vunpack.c.h.s8.bf16 %v1053_v51  ;;  %v3812_v51 = vld [vmem:[%s9339_s30 + $0x88] sm:$0xff] }
 0x1e3   : > { %7506 = vmatpush1.bf16.msra.mxu0 %v7505_v2  ;;  %7906 = vmatpush1.bf16.msra.mxu1 %v7905_v3  ;;  %v7545_v2 = vunpack.c.h.s8.bf16 %v1050_v56  ;;  %v7945_v3 = vunpack.c.h.s8.bf16 %v1052_v57  ;;  %v3811_v57 = vld [vmem:[%s9339_s30 + $0x80] sm:$0xff] }
 0x1e4   : > { %7508 = vmatprep.subr.bf16.mxu0 %v7507_v4  ;;  %7908 = vmatprep.subr.bf16.mxu1 %v7907_v5  ;;  %v7547_v4 = vunpack.c.l.s8.bf16 %v1055_v0  ;;  %v7947_v5 = vunpack.c.l.s8.bf16 %v1057_v1 }
 0x1e7   : > { %7510 = vmatpush1.bf16.msra.mxu0 %v7509_v7  ;;  %7910 = vmatpush1.bf16.msra.mxu1 %v7909_v8  ;;  %v7549_v7 = vunpack.c.l.s8.bf16 %v1054_v6  ;;  %v7949_v8 = vunpack.c.l.s8.bf16 %v1056_v59 }
 0x1e8   : > { %7512 = vmatprep.subr.bf16.mxu0 %v7511_v9  ;;  %7912 = vmatprep.subr.bf16.mxu1 %v7911_v10  ;;  %v7551_v9 = vunpack.c.h.s8.bf16 %v1055_v0  ;;  %v7951_v10 = vunpack.c.h.s8.bf16 %v1057_v1  ;;  %v3820_v1 = vld [vmem:[%s9339_s30 + $0xc8] sm:$0xff] }
 0x1eb   : > { %7514 = vmatpush1.bf16.msra.mxu0 %v7513_v13  ;;  %7914 = vmatpush1.bf16.msra.mxu1 %v7913_v14  ;;  %v7553_v13 = vunpack.c.h.s8.bf16 %v1054_v6  ;;  %v7953_v14 = vunpack.c.h.s8.bf16 %v1056_v59  ;;  %v3819_v59 = vld [vmem:[%s9339_s30 + $0xc0] sm:$0xff] }
 0x1ec   : > { %7516 = vmatprep.subr.bf16.mxu0 %v7515_v15  ;;  %7916 = vmatprep.subr.bf16.mxu1 %v7915_v27  ;;  %v7555_v15 = vunpack.c.l.s8.bf16 %v1059_v11  ;;  %v7955_v27 = vunpack.c.l.s8.bf16 %v1061_v12 }
 0x1ef   : > { %7518 = vmatpush1.bf16.msra.mxu0 %v7517_v18  ;;  %7918 = vmatpush1.bf16.msra.mxu1 %v7917_v19  ;;  %v8819_v18 = vmov 0.0   ;;  %v7557_v19 = vunpack.c.l.s8.bf16 %v1058_v16 }
 0x1f0   : > { %7520 = vmatprep.subr.bf16.mxu0 %v7519_v20  ;;  %7920 = vmatprep.subr.bf16.mxu1 %v7919_v21  ;;  %v7957_v20 = vunpack.c.l.s8.bf16 %v1060_v17  ;;  %v7959_v21 = vunpack.c.h.s8.bf16 %v1061_v12  ;;  %v3828_v12 = vld [vmem:[%s9339_s30 + $0x108] sm:$0xff] }
 0x1f3   : > { %7522 = vmatpush1.bf16.msra.mxu0 %v7521_v24  ;;  %7922 = vmatpush1.bf16.msra.mxu1 %v7921_v25  ;;  %v2667_v24 = vunpack.c.h.bf16 %v9523_v37  ;;  %v7561_v25 = vunpack.c.h.s8.bf16 %v1058_v16  ;;  %v7967_v37 = vunpack.c.h.s8.bf16 %v3796_v22 }
 0x1f4   : > { %7524 = vmatprep.subr.bf16.mxu0 %v7523_v26  ;;  %7924 = vmatprep.subr.bf16.mxu1 %v7923_v28  ;;  %v7961_v26 = vunpack.c.h.s8.bf16 %v1060_v17  ;;  %v7963_v28 = vunpack.c.l.s8.bf16 %v3796_v22  ;;  %v3827_v17 = vld [vmem:[%s9339_s30 + $0x100] sm:$0xff]  ;;  %v3836_v22 = vld [vmem:[%s9339_s30 + $0x148] sm:$0xff] }
 0x1f7   : > { %7526 = vmatpush1.bf16.msra.mxu0 %v7525_v31  ;;  %7926 = vmatpush1.bf16.msra.mxu1 %v7925_v45  ;;  %v3797_v31 = vld [vmem:[%s9339_s30 + $0x10] sm:$0xff]  ;;  %v2729_v45 = vrot.slane %v2667_v24, %v9371_v58  ;;  %v8001_v24 = vunpack.c.h.s8.bf16 %v3827_v17 }
 0x1f8   : > { %7528 = vmatprep.subr.bf16.mxu0 %v7527_v32  ;;  %7928 = vmatprep.subr.bf16.mxu1 %v7927_v33  ;;  %v7965_v32 = vunpack.c.l.s8.bf16 %v3795_v30  ;;  %v8093_v33 = vunpack.c.l.s8.bf16 %v3797_v31 }
 0x1fb   : > { %7530 = vmatpush1.bf16.msra.mxu0 %v7529_v42  ;;  %7930 = vmatpush1.bf16.msra.mxu1 %v7929_v38  ;;  %v3806_v42 = vld [vmem:[%s9339_s30 + $0x58] sm:$0xff]  ;;  %v7969_v38 = vunpack.c.h.s8.bf16 %v3795_v30  ;;  %v3837_v30 = vld [vmem:[%s9339_s30 + $0x150] sm:$0xff] }
 0x1fc   : > { %7532 = vmatprep.subr.bf16.mxu0 %v7531_v39  ;;  %7932 = vmatprep.subr.bf16.mxu1 %v7931_v40  ;;  %v8097_v39 = vunpack.c.h.s8.bf16 %v3797_v31  ;;  %v7971_v40 = vunpack.c.l.s8.bf16 %v3804_v35  ;;  %v8099_v41 = vunpack.c.l.s8.bf16 %v3806_v42  ;;  %v8103_v49 = vunpack.c.h.s8.bf16 %v3806_v42 }
 0x1fd   : > { %v8137_v42 = vunpack.c.h.s8.bf16 %v3837_v30 }
 0x1ff   : > { %7534 = vmatpush1.bf16.msra.mxu0 %v7533_v44  ;;  %7934 = vmatpush1.bf16.msra.mxu1 %v7933_v46  ;;  %v3805_v44 = vld [vmem:[%s9339_s30 + $0x50] sm:$0xff]  ;;  %v7973_v46 = vunpack.c.l.s8.bf16 %v3803_v43 }
 0x200   : > { %7536 = vmatprep.subr.bf16.mxu0 %v7535_v63  ;;  %7936 = vmatprep.subr.bf16.mxu1 %v7935_v48  ;;  %v8101_v63 = vunpack.c.l.s8.bf16 %v3805_v44  ;;  %v7975_v48 = vunpack.c.h.s8.bf16 %v3804_v35 }
 0x203   : > { %7538 = vmatpush1.bf16.msra.mxu0 %v7537_v52  ;;  %7938 = vmatpush1.bf16.msra.mxu1 %v7937_v53  ;;  %v3814_v52 = vld [vmem:[%s9339_s30 + $0x98] sm:$0xff]  ;;  %v7977_v53 = vunpack.c.h.s8.bf16 %v3803_v43 }
 0x204   : > { %7540 = vmatprep.subr.bf16.mxu0 %v7539_v54  ;;  %7940 = vmatprep.subr.bf16.mxu1 %v7939_v55  ;;  %v8105_v54 = vunpack.c.h.s8.bf16 %v3805_v44  ;;  %v7979_v55 = vunpack.c.l.s8.bf16 %v3812_v51  ;;  %v8107_v56 = vunpack.c.l.s8.bf16 %v3814_v52  ;;  %v8111_v0 = vunpack.c.h.s8.bf16 %v3814_v52  ;;  %v3854_v52 = vld [vmem:[%s9339_s30 + $0x1d8] sm:$0xff] }
 0x207   : > { %7542 = vmatpush1.bf16.msra.mxu0 %v7541_v60  ;;  %7942 = vmatpush1.bf16.msra.mxu1 %v7941_v61  ;;  %v3813_v60 = vld [vmem:[%s9339_s30 + $0x90] sm:$0xff]  ;;  %v7981_v61 = vunpack.c.l.s8.bf16 %v3811_v57 }
 0x208   : > { %7544 = vmatprep.subr.bf16.mxu0 %v7543_v62  ;;  %7944 = vmatprep.subr.bf16.mxu1 %v7943_v50  ;;  %v8109_v62 = vunpack.c.l.s8.bf16 %v3813_v60  ;;  %v7983_v50 = vunpack.c.h.s8.bf16 %v3812_v51  ;;  %v3852_v51 = vld [vmem:[%s9339_s30 + $0x1c8] sm:$0xff] }
 0x20b   : > { %7546 = vmatpush1.bf16.msra.mxu0 %v7545_v2  ;;  %7946 = vmatpush1.bf16.msra.mxu1 %v7945_v3  ;;  %v3822_v2 = vld [vmem:[%s9339_s30 + $0xd8] sm:$0xff]  ;;  %v7985_v3 = vunpack.c.h.s8.bf16 %v3811_v57 }
 0x20c   : > { %7548 = vmatprep.subr.bf16.mxu0 %v7547_v4  ;;  %7948 = vmatprep.subr.bf16.mxu1 %v7947_v5  ;;  %v8113_v4 = vunpack.c.h.s8.bf16 %v3813_v60  ;;  %v7987_v5 = vunpack.c.l.s8.bf16 %v3820_v1  ;;  %v8115_v6 = vunpack.c.l.s8.bf16 %v3822_v2 }
 0x20e   : > { %3165 = vmatmul.mubr.f32.vlgmr.msra.gmra.mrb[0].mxu0 %v9575_v29  ;;  %3662 = vmatmul.mubr.f32.vlgmr.msra.gmra.mrb[0].mxu1 %v9575_v29  ;;  %v7559_v29 = vunpack.c.h.s8.bf16 %v1059_v11  ;;  %v8119_v11 = vunpack.c.h.s8.bf16 %v3822_v2  ;;  %v3862_v2 = vld [vmem:[%s9339_s30 + $0x218] sm:$0xff] }
 0x20f   : > { %7550 = vmatpush1.bf16.msra.mxu0 %v7549_v7  ;;  %7950 = vmatpush1.bf16.msra.mxu1 %v7949_v8  ;;  %v3821_v7 = vld [vmem:[%s9339_s30 + $0xd0] sm:$0xff]  ;;  %v7989_v8 = vunpack.c.l.s8.bf16 %v3819_v59 }
 0x210   : > { %7552 = vmatprep.subr.bf16.mxu0 %v7551_v9  ;;  %7952 = vmatprep.subr.bf16.mxu1 %v7951_v10  ;;  %v8117_v9 = vunpack.c.l.s8.bf16 %v3821_v7  ;;  %v7991_v10 = vunpack.c.h.s8.bf16 %v3820_v1  ;;  %v3860_v1 = vld [vmem:[%s9339_s30 + $0x208] sm:$0xff] }
 0x211   : > { %3235 = vmatprep.mubr.f32.mxu0 %v8819_v18  ;;  %3732 = vmatprep.mubr.f32.mxu1 %v8819_v18  ;;  %v3829_v18 = vld [vmem:[%s9339_s30 + $0x110] sm:$0xff] }
 0x213   : > { %7554 = vmatpush1.bf16.msra.mxu0 %v7553_v13  ;;  %7954 = vmatpush1.bf16.msra.mxu1 %v7953_v14  ;;  %v3830_v13 = vld [vmem:[%s9339_s30 + $0x118] sm:$0xff]  ;;  %v7993_v14 = vunpack.c.h.s8.bf16 %v3819_v59  ;;  %v3739_v59 = vld [vmem:[%s841_s19] sm:$0xf] }
 0x214   : > { %7556 = vmatprep.subr.bf16.mxu0 %v7555_v15  ;;  %7956 = vmatprep.subr.bf16.mxu1 %v7955_v27  ;;  %v8121_v15 = vunpack.c.h.s8.bf16 %v3821_v7  ;;  %v7995_v27 = vunpack.c.l.s8.bf16 %v3828_v12  ;;  %v8123_v16 = vunpack.c.l.s8.bf16 %v3830_v13  ;;  %v9667_v7 = vsub.s32 1, %v9361_v47 }
 0x217   : > { %7558 = vmatpush1.bf16.msra.mxu0 %v7557_v19  ;;  %7958 = vmatpush1.bf16.msra.mxu1 %v7957_v20  ;;  %v7997_v19 = vunpack.c.l.s8.bf16 %v3827_v17  ;;  %v8125_v20 = vunpack.c.l.s8.bf16 %v3829_v18 }
 0x218   : > { %7560 = vmatprep.subr.bf16.mxu0 %v7559_v29  ;;  %7960 = vmatprep.subr.bf16.mxu1 %v7959_v21  ;;  %v7999_v29 = vunpack.c.h.s8.bf16 %v3828_v12  ;;  %v8127_v21 = vunpack.c.h.s8.bf16 %v3830_v13  ;;  %v3748_v12 = vrot.slane %v3739_v59, %v9667_v7 }
 0x21b   : > { %7562 = vmatpush1.bf16.msra.mxu0 %v7561_v25  ;;  %7962 = vmatpush1.bf16.msra.mxu1 %v7961_v26  ;;  %v8129_v25 = vunpack.c.h.s8.bf16 %v3829_v18  ;;  %v8003_v26 = vunpack.c.l.s8.bf16 %v3836_v22 }
 0x21c   : > { %7964 = vmatprep.subr.bf16.mxu0 %v7963_v28  ;;  %8092 = vmatprep.subr.bf16.mxu1 %v8091_v36  ;;  %v8131_v28 = vunpack.c.l.s8.bf16 %v3838_v23  ;;  %v3835_v36 = vld [vmem:[%s9339_s30 + $0x140] sm:$0xff] }
 0x21d   : > { %v8005_v31 = vunpack.c.l.s8.bf16 %v3835_v36  ;;  %v8009_v35 = vunpack.c.h.s8.bf16 %v3835_v36 }
 0x21e   : > { %6987 = vmatmul.mubr.msk.f32.vlgmr.msra.gmra.mrb[0].mxu0 %vm2742_vm0, %v2729_v45  ;;  %6988 = vmatmul.mubr.msk.f32.vlgmr.msra.gmra.mrb[0].mxu1 %vm2742_vm0, %v2729_v45  ;;  %v8133_v45 = vunpack.c.l.s8.bf16 %v3837_v30 }
 0x21f   : > { %7966 = vmatpush1.bf16.msra.mxu0 %v7965_v32  ;;  %8094 = vmatpush1.bf16.msra.mxu1 %v8093_v33  ;;  %v8007_v32 = vunpack.c.h.s8.bf16 %v3836_v22  ;;  %v8135_v33 = vunpack.c.h.s8.bf16 %v3838_v23 }
 0x220   : > { %7968 = vmatprep.subr.bf16.mxu0 %v7967_v37  ;;  %8096 = vmatprep.subr.bf16.mxu1 %v8095_v34  ;;  %v3844_v37 = vld [vmem:[%s9339_s30 + $0x188] sm:$0xff]  ;;  %v3846_v34 = vld [vmem:[%s9339_s30 + $0x198] sm:$0xff] }
 0x223   : > { %7970 = vmatpush1.bf16.msra.mxu0 %v7969_v38  ;;  %8098 = vmatpush1.bf16.msra.mxu1 %v8097_v39  ;;  %v8011_v38 = vunpack.c.l.s8.bf16 %v3844_v37  ;;  %v8139_v39 = vunpack.c.l.s8.bf16 %v3846_v34 }
 0x224   : > { %7972 = vmatprep.subr.bf16.mxu0 %v7971_v40  ;;  %8100 = vmatprep.subr.bf16.mxu1 %v8099_v41  ;;  %v3843_v40 = vld [vmem:[%s9339_s30 + $0x180] sm:$0xff]  ;;  %v3845_v41 = vld [vmem:[%s9339_s30 + $0x190] sm:$0xff] }
 0x225   : > { %v8013_v43 = vunpack.c.l.s8.bf16 %v3843_v40  ;;  %v8141_v44 = vunpack.c.l.s8.bf16 %v3845_v41 }
 0x227   : > { %7974 = vmatpush1.bf16.msra.mxu0 %v7973_v46  ;;  %8102 = vmatpush1.bf16.msra.mxu1 %v8101_v63  ;;  %v8015_v46 = vunpack.c.h.s8.bf16 %v3844_v37  ;;  %v8143_v63 = vunpack.c.h.s8.bf16 %v3846_v34  ;;  %v8031_v37 = vunpack.c.h.s8.bf16 %v3860_v1  ;;  %v8159_v34 = vunpack.c.h.s8.bf16 %v3862_v2 }
 0x228   : > { %7976 = vmatprep.subr.bf16.mxu0 %v7975_v48  ;;  %8104 = vmatprep.subr.bf16.mxu1 %v8103_v49  ;;  %v8017_v48 = vunpack.c.h.s8.bf16 %v3843_v40  ;;  %v8145_v49 = vunpack.c.h.s8.bf16 %v3845_v41 }
 0x22b   : > { %7978 = vmatpush1.bf16.msra.mxu0 %v7977_v53  ;;  %8106 = vmatpush1.bf16.msra.mxu1 %v8105_v54  ;;  %v8019_v53 = vunpack.c.l.s8.bf16 %v3852_v51  ;;  %v8147_v54 = vunpack.c.l.s8.bf16 %v3854_v52 }
 0x22c   : > { %7980 = vmatprep.subr.bf16.mxu0 %v7979_v55  ;;  %8108 = vmatprep.subr.bf16.mxu1 %v8107_v56  ;;  %v3851_v55 = vld [vmem:[%s9339_s30 + $0x1c0] sm:$0xff]  ;;  %v3853_v56 = vld [vmem:[%s9339_s30 + $0x1d0] sm:$0xff] }
 0x22d   : > { %v8021_v57 = vunpack.c.l.s8.bf16 %v3851_v55  ;;  %v8149_v60 = vunpack.c.l.s8.bf16 %v3853_v56 }
 0x22f   : > { %7982 = vmatpush1.bf16.msra.mxu0 %v7981_v61  ;;  %8110 = vmatpush1.bf16.msra.mxu1 %v8109_v62  ;;  %v8023_v61 = vunpack.c.h.s8.bf16 %v3852_v51  ;;  %v8151_v62 = vunpack.c.h.s8.bf16 %v3854_v52  ;;  %v3876_v52 = vld [vmem:[%s9339_s30 + $0x288] sm:$0xff] }
 0x230   : > { %7984 = vmatprep.subr.bf16.mxu0 %v7983_v50  ;;  %8112 = vmatprep.subr.bf16.mxu1 %v8111_v0  ;;  %v8025_v50 = vunpack.c.h.s8.bf16 %v3851_v55  ;;  %v8153_v0 = vunpack.c.h.s8.bf16 %v3853_v56  ;;  %v8043_v56 = vunpack.c.l.s8.bf16 %v3876_v52 }
 0x233   : > { %7986 = vmatpush1.bf16.msra.mxu0 %v7985_v3  ;;  %8114 = vmatpush1.bf16.msra.mxu1 %v8113_v4  ;;  %v8027_v3 = vunpack.c.l.s8.bf16 %v3860_v1  ;;  %v8155_v4 = vunpack.c.l.s8.bf16 %v3862_v2  ;;  %v3884_v2 = vld [vmem:[%s9339_s30 + $0x2c8] sm:$0xff] }
 0x234   : > { %7988 = vmatprep.subr.bf16.mxu0 %v7987_v5  ;;  %8116 = vmatprep.subr.bf16.mxu1 %v8115_v6  ;;  %v9656_v5 = vsub.s32 0, %v9361_v47  ;;  %v9659_v6 = vsub.s32 2, %v9361_v47 }
 0x237   : > { %7990 = vmatpush1.bf16.msra.mxu0 %v7989_v8  ;;  %8118 = vmatpush1.bf16.msra.mxu1 %v8117_v9  ;;  %v9670_v8 = vsub.s32 3, %v9361_v47  ;;  %v3765_v9 = vld [vmem:[%s846_s27] sm:$0xf] }
 0x238   : > { %7992 = vmatprep.subr.bf16.mxu0 %v7991_v10  ;;  %8120 = vmatprep.subr.bf16.mxu1 %v8119_v11  ;;  %v3744_v10 = vrot.slane %v3739_v59, %v9656_v5  ;;  %v3752_v11 = vrot.slane %v3739_v59, %v9659_v6  ;;  %v3774_v17 = vrot.slane %v3765_v9, %v9667_v7 }
 0x239   : > { %v3756_v13 = vrot.slane %v3739_v59, %v9670_v8 }
 0x23b   : > { %7994 = vmatpush1.bf16.msra.mxu0 %v7993_v14  ;;  %8122 = vmatpush1.bf16.msra.mxu1 %v8121_v15  ;;  %v3770_v14 = vrot.slane %v3765_v9, %v9656_v5  ;;  %v3778_v15 = vrot.slane %v3765_v9, %v9659_v6 }
 0x23c   : > { %7996 = vmatprep.subr.bf16.mxu0 %v7995_v27  ;;  %8124 = vmatprep.subr.bf16.mxu1 %v8123_v16 }
 0x23f   : > { %7998 = vmatpush1.bf16.msra.mxu0 %v7997_v19  ;;  %8126 = vmatpush1.bf16.msra.mxu1 %v8125_v20 }
 0x240   : > { %8000 = vmatprep.subr.bf16.mxu0 %v7999_v29  ;;  %8128 = vmatprep.subr.bf16.mxu1 %v8127_v21  ;;  %v3782_v21 = vrot.slane %v3765_v9, %v9670_v8  ;;  %v8051_v9 = vunpack.c.l.s8.bf16 %v3884_v2 }
 0x243   : > { %8002 = vmatpush1.bf16.msra.mxu0 %v8001_v24  ;;  %8130 = vmatpush1.bf16.msra.mxu1 %v8129_v25 }
 0x244   : > { %8004 = vmatprep.subr.bf16.mxu0 %v8003_v26  ;;  %8132 = vmatprep.subr.bf16.mxu1 %v8131_v28  ;;  %v3859_v26 = vld [vmem:[%s9339_s30 + $0x200] sm:$0xff]  ;;  %v3861_v28 = vld [vmem:[%s9339_s30 + $0x210] sm:$0xff] }
 0x245   : > { %v8161_v40 = vunpack.c.h.s8.bf16 %v3861_v28 }
 0x247   : > { %8006 = vmatpush1.bf16.msra.mxu0 %v8005_v31  ;;  %8134 = vmatpush1.bf16.msra.mxu1 %v8133_v45  ;;  %v8029_v45 = vunpack.c.l.s8.bf16 %v3859_v26 }
 0x248   : > { %8008 = vmatprep.subr.bf16.mxu0 %v8007_v32  ;;  %8136 = vmatprep.subr.bf16.mxu1 %v8135_v33  ;;  %v8157_v32 = vunpack.c.l.s8.bf16 %v3861_v28 }
 0x24b   : > { %8010 = vmatpush1.bf16.msra.mxu0 %v8009_v35  ;;  %8138 = vmatpush1.bf16.msra.mxu1 %v8137_v42  ;;  %v3868_v35 = vld [vmem:[%s9339_s30 + $0x248] sm:$0xff]  ;;  %v3870_v42 = vld [vmem:[%s9339_s30 + $0x258] sm:$0xff] }
 0x24c   : > { %8012 = vmatprep.subr.bf16.mxu0 %v8011_v38  ;;  %8140 = vmatprep.subr.bf16.mxu1 %v8139_v39  ;;  %v8033_v39 = vunpack.c.h.s8.bf16 %v3859_v26  ;;  %v8035_v41 = vunpack.c.l.s8.bf16 %v3868_v35  ;;  %v8167_v51 = vunpack.c.h.s8.bf16 %v3870_v42 }
 0x24f   : > { %8014 = vmatpush1.bf16.msra.mxu0 %v8013_v43  ;;  %8142 = vmatpush1.bf16.msra.mxu1 %v8141_v44  ;;  %v8163_v43 = vunpack.c.l.s8.bf16 %v3870_v42  ;;  %v3867_v44 = vld [vmem:[%s9339_s30 + $0x240] sm:$0xff]  ;;  %v3901_v42 = vld [vmem:[%s9339_s30 + $0x350] sm:$0xff] }
 0x250   : > { %8016 = vmatprep.subr.bf16.mxu0 %v8015_v46  ;;  %8144 = vmatprep.subr.bf16.mxu1 %v8143_v63  ;;  %v3869_v46 = vld [vmem:[%s9339_s30 + $0x250] sm:$0xff]  ;;  %v8037_v63 = vunpack.c.l.s8.bf16 %v3867_v44 }
 0x251   : > { %v8169_v55 = vunpack.c.h.s8.bf16 %v3869_v46 }
 0x253   : > { %8018 = vmatpush1.bf16.msra.mxu0 %v8017_v48  ;;  %8146 = vmatpush1.bf16.msra.mxu1 %v8145_v49  ;;  %v8165_v48 = vunpack.c.l.s8.bf16 %v3869_v46  ;;  %v8039_v49 = vunpack.c.h.s8.bf16 %v3868_v35  ;;  %v3899_v35 = vld [vmem:[%s9339_s30 + $0x340] sm:$0xff]  ;;  %v3910_v46 = vld [vmem:[%s9339_s30 + $0x398] sm:$0xff] }
 0x254   : > { %8020 = vmatprep.subr.bf16.mxu0 %v8019_v53  ;;  %8148 = vmatprep.subr.bf16.mxu1 %v8147_v54  ;;  %v3878_v53 = vld [vmem:[%s9339_s30 + $0x298] sm:$0xff]  ;;  %v8041_v54 = vunpack.c.h.s8.bf16 %v3867_v44  ;;  %v3908_v44 = vld [vmem:[%s9339_s30 + $0x388] sm:$0xff] }
 0x255   : > { %v8175_v1 = vunpack.c.h.s8.bf16 %v3878_v53 }
 0x257   : > { %8022 = vmatpush1.bf16.msra.mxu0 %v8021_v57  ;;  %8150 = vmatpush1.bf16.msra.mxu1 %v8149_v60  ;;  %v8171_v57 = vunpack.c.l.s8.bf16 %v3878_v53  ;;  %v3875_v60 = vld [vmem:[%s9339_s30 + $0x280] sm:$0xff]  ;;  %v3909_v53 = vld [vmem:[%s9339_s30 + $0x390] sm:$0xff] }
 0x258   : > { %8024 = vmatprep.subr.bf16.mxu0 %v8023_v61  ;;  %8152 = vmatprep.subr.bf16.mxu1 %v8151_v62  ;;  %v3877_v61 = vld [vmem:[%s9339_s30 + $0x290] sm:$0xff]  ;;  %v8045_v62 = vunpack.c.l.s8.bf16 %v3875_v60 }
 0x259   : > { %v8177_v59 = vunpack.c.h.s8.bf16 %v3877_v61 }
 0x25b   : > { %8026 = vmatpush1.bf16.msra.mxu0 %v8025_v50  ;;  %8154 = vmatpush1.bf16.msra.mxu1 %v8153_v0  ;;  %v8173_v50 = vunpack.c.l.s8.bf16 %v3877_v61  ;;  %v8047_v0 = vunpack.c.h.s8.bf16 %v3876_v52  ;;  %v3907_v52 = vld [vmem:[%s9339_s30 + $0x380] sm:$0xff]  ;;  %v3918_v61 = vld [vmem:[%s9339_s30 + $0x3d8] sm:$0xff] }
 0x25c   : > { %8028 = vmatprep.subr.bf16.mxu0 %v8027_v3  ;;  %8156 = vmatprep.subr.bf16.mxu1 %v8155_v4  ;;  %v3886_v3 = vld [vmem:[%s9339_s30 + $0x2d8] sm:$0xff]  ;;  %v8049_v4 = vunpack.c.h.s8.bf16 %v3875_v60  ;;  %v3916_v60 = vld [vmem:[%s9339_s30 + $0x3c8] sm:$0xff] }
 0x2f1   : > { %v3237_v27 = vpop.f32.mrb[0].mxu0  ;;  %v3734_v16 = vpop.f32.mrb[0].mxu1 }
 0x2f2   : > { %v3761_v18 = vmul.f32 %v3744_v10, %v3237_v27  ;;  %v3763_v19 = vmul.f32 %v3752_v11, %v3734_v16  ;;  %v3239_v20 = vpop.f32.mrb[1].mxu0  ;;  %v3736_v29 = vpop.f32.mrb[1].mxu1  ;;  %v8179_v10 = vunpack.c.l.s8.bf16 %v3886_v3  ;;  %v3883_v11 = vld [vmem:[%s9339_s30 + $0x2c0] sm:$0xff]  ;;  %v8183_v27 = vunpack.c.h.s8.bf16 %v3886_v3  ;;  %v3892_v16 = vld [vmem:[%s9339_s30 + $0x308] sm:$0xff]  ;;  %v3917_v3 = vld [vmem:[%s9339_s30 + $0x3d0] sm:$0xff] }
 0x2f3   : > { %v3762_v22 = vmul.f32 %v3748_v12, %v3239_v20  ;;  %v3764_v23 = vmul.f32 %v3756_v13, %v3736_v29  ;;  %v3885_v12 = vld [vmem:[%s9339_s30 + $0x2d0] sm:$0xff]  ;;  %v8053_v13 = vunpack.c.l.s8.bf16 %v3883_v11  ;;  %v8059_v20 = vunpack.c.l.s8.bf16 %v3892_v16 }
 0x2f4   : > { %v3787_v24 = vadd.f32 %v3770_v14, %v3761_v18  ;;  %v9685_v25 = vadd.f32 %v3778_v15, %v3763_v19  ;;  %v8181_v14 = vunpack.c.l.s8.bf16 %v3885_v12  ;;  %v8055_v15 = vunpack.c.h.s8.bf16 %v3884_v2  ;;  %v3915_v2 = vld [vmem:[%s9339_s30 + $0x3c0] sm:$0xff] }
 0x2f5   : > { %v3788_v36 = vadd.f32 %v3774_v17, %v3762_v22  ;;  %v3790_v30 = vadd.f32 %v3782_v21, %v3764_v23  ;;  %v3894_v17 = vld [vmem:[%s9339_s30 + $0x318] sm:$0xff]  ;;  %v8057_v18 = vunpack.c.h.s8.bf16 %v3883_v11  ;;  %v8185_v19 = vunpack.c.h.s8.bf16 %v3885_v12  ;;  %v3891_v21 = vld [vmem:[%s9339_s30 + $0x300] sm:$0xff]  ;;  %v3893_v22 = vld [vmem:[%s9339_s30 + $0x310] sm:$0xff] }
 0x2f6   : > { %v9691_v33 = vmax.f32 %v3787_v24, 0.0  ;;  %v8187_v29 = vunpack.c.l.s8.bf16 %v3894_v17  ;;  %v8061_v23 = vunpack.c.l.s8.bf16 %v3891_v21  ;;  %v8189_v24 = vunpack.c.l.s8.bf16 %v3893_v22  ;;  %v3800_v11 = vld [vmem:[%s9339_s30 + $0x28] sm:$0xff]  ;;  %v3802_v12 = vld [vmem:[%s9339_s30 + $0x38] sm:$0xff] }
 0x2f7   : > { %v9689_v31 = vmax.f32 %v3788_v36, 0.0  ;;  %v9697_v38 = vmax.f32 %v3790_v30, 0.0  ;;  %v8063_v26 = vunpack.c.h.s8.bf16 %v3892_v16  ;;  %v8191_v28 = vunpack.c.h.s8.bf16 %v3894_v17  ;;  %v3900_v36 = vld [vmem:[%s9339_s30 + $0x348] sm:$0xff]  ;;  %v3902_v30 = vld [vmem:[%s9339_s30 + $0x358] sm:$0xff]  ;;  %v3799_v16 = vld [vmem:[%s9339_s30 + $0x20] sm:$0xff] }
 0x2f8   : > { %v3801_v17 = vld [vmem:[%s9339_s30 + $0x30] sm:$0xff] }
 0x2f9   : > { %5013 = vmatprep.mubr.f32.mxu0 %v9689_v31  ;;  %5155 = vmatprep.mubr.f32.mxu1 %v9689_v31 }
 0x2fa   : > { %5014 = vmatmul.mubr.f32.vlgmr.msra.gmra.mrb[2].mxu0 %v9691_v33  ;;  %5156 = vmatmul.mubr.f32.vlgmr.msra.gmra.mrb[2].mxu1 %v9691_v33 }
 0x2fb   : > { %8030 = vmatpush1.bf16.msra.mxu0 %v8029_v45  ;;  %8158 = vmatpush1.bf16.msra.mxu1 %v8157_v32  ;;  %v8065_v45 = vunpack.c.h.s8.bf16 %v3891_v21  ;;  %v8193_v32 = vunpack.c.h.s8.bf16 %v3893_v22  ;;  %v8351_v21 = vunpack.c.h.s8.bf16 %v3802_v12  ;;  %v3808_v22 = vld [vmem:[%s9339_s30 + $0x68] sm:$0xff] }
 0x2fc   : > { %5084 = vmatprep.mubr.f32.mxu0 %v9697_v38  ;;  %5226 = vmatprep.mubr.f32.mxu1 %v9697_v38 }
 0x2fd   : > { %8032 = vmatprep.subr.bf16.mxu0 %v8031_v37  ;;  %8160 = vmatprep.subr.bf16.mxu1 %v8159_v34  ;;  %v8067_v37 = vunpack.c.l.s8.bf16 %v3900_v36  ;;  %v8195_v34 = vunpack.c.l.s8.bf16 %v3902_v30 }
 0x2ff   : > { %8034 = vmatpush1.bf16.msra.mxu0 %v8033_v39  ;;  %8162 = vmatpush1.bf16.msra.mxu1 %v8161_v40  ;;  %v8069_v39 = vunpack.c.l.s8.bf16 %v3899_v35  ;;  %v8197_v40 = vunpack.c.l.s8.bf16 %v3901_v42 }
 0x300   : > { %8036 = vmatprep.subr.bf16.mxu0 %v8035_v41  ;;  %8164 = vmatprep.subr.bf16.mxu1 %v8163_v43  ;;  %v8071_v41 = vunpack.c.h.s8.bf16 %v3900_v36  ;;  %v8199_v43 = vunpack.c.h.s8.bf16 %v3902_v30  ;;  %v3809_v30 = vld [vmem:[%s9339_s30 + $0x70] sm:$0xff] }
 0x303   : > { %8038 = vmatpush1.bf16.msra.mxu0 %v8037_v63  ;;  %8166 = vmatpush1.bf16.msra.mxu1 %v8165_v48  ;;  %v8073_v63 = vunpack.c.h.s8.bf16 %v3899_v35  ;;  %v8201_v48 = vunpack.c.h.s8.bf16 %v3901_v42  ;;  %v3818_v35 = vld [vmem:[%s9339_s30 + $0xb8] sm:$0xff] }
 0x304   : > { %8040 = vmatprep.subr.bf16.mxu0 %v8039_v49  ;;  %8168 = vmatprep.subr.bf16.mxu1 %v8167_v51  ;;  %v8075_v49 = vunpack.c.l.s8.bf16 %v3908_v44  ;;  %v8203_v51 = vunpack.c.l.s8.bf16 %v3910_v46 }
 0x307   : > { %8042 = vmatpush1.bf16.msra.mxu0 %v8041_v54  ;;  %8170 = vmatpush1.bf16.msra.mxu1 %v8169_v55  ;;  %v8077_v54 = vunpack.c.l.s8.bf16 %v3907_v52  ;;  %v8205_v55 = vunpack.c.l.s8.bf16 %v3909_v53 }
 0x308   : > { %8044 = vmatprep.subr.bf16.mxu0 %v8043_v56  ;;  %8172 = vmatprep.subr.bf16.mxu1 %v8171_v57  ;;  %v8079_v56 = vunpack.c.h.s8.bf16 %v3908_v44  ;;  %v8207_v57 = vunpack.c.h.s8.bf16 %v3910_v46  ;;  %v3817_v44 = vld [vmem:[%s9339_s30 + $0xb0] sm:$0xff] }
 0x30b   : > { %8046 = vmatpush1.bf16.msra.mxu0 %v8045_v62  ;;  %8174 = vmatpush1.bf16.msra.mxu1 %v8173_v50  ;;  %v8081_v62 = vunpack.c.h.s8.bf16 %v3907_v52  ;;  %v8209_v50 = vunpack.c.h.s8.bf16 %v3909_v53  ;;  %v3826_v52 = vld [vmem:[%s9339_s30 + $0xf8] sm:$0xff] }
 0x30c   : > { %8048 = vmatprep.subr.bf16.mxu0 %v8047_v0  ;;  %8176 = vmatprep.subr.bf16.mxu1 %v8175_v1  ;;  %v8083_v0 = vunpack.c.l.s8.bf16 %v3916_v60  ;;  %v8211_v1 = vunpack.c.l.s8.bf16 %v3918_v61 }
 0x30f   : > { %8050 = vmatpush1.bf16.msra.mxu0 %v8049_v4  ;;  %8178 = vmatpush1.bf16.msra.mxu1 %v8177_v59  ;;  %v8085_v4 = vunpack.c.l.s8.bf16 %v3915_v2  ;;  %v8213_v59 = vunpack.c.l.s8.bf16 %v3917_v3 }
 0x310   : > { %8052 = vmatprep.subr.bf16.mxu0 %v8051_v9  ;;  %8180 = vmatprep.subr.bf16.mxu1 %v8179_v10  ;;  %v8087_v9 = vunpack.c.h.s8.bf16 %v3916_v60  ;;  %v8215_v10 = vunpack.c.h.s8.bf16 %v3918_v61  ;;  %v3825_v60 = vld [vmem:[%s9339_s30 + $0xf0] sm:$0xff] }
 0x313   : > { %8054 = vmatpush1.bf16.msra.mxu0 %v8053_v13  ;;  %8182 = vmatpush1.bf16.msra.mxu1 %v8181_v14  ;;  %v8089_v13 = vunpack.c.h.s8.bf16 %v3915_v2  ;;  %v8217_v14 = vunpack.c.h.s8.bf16 %v3917_v3  ;;  %v3834_v2 = vld [vmem:[%s9339_s30 + $0x138] sm:$0xff] }
 0x314   : > { %8056 = vmatprep.subr.bf16.mxu0 %v8055_v15  ;;  %8184 = vmatprep.subr.bf16.mxu1 %v8183_v27  ;;  %v8219_v15 = vunpack.c.l.s8.bf16 %v3800_v11  ;;  %v8347_v27 = vunpack.c.l.s8.bf16 %v3802_v12 }
 0x317   : > { %8058 = vmatpush1.bf16.msra.mxu0 %v8057_v18  ;;  %8186 = vmatpush1.bf16.msra.mxu1 %v8185_v19  ;;  %v8221_v18 = vunpack.c.l.s8.bf16 %v3799_v16  ;;  %v9734_v19 = vmax.f32 %v9685_v25, 0.0  ;;  %v8353_v25 = vunpack.c.h.s8.bf16 %v3801_v17 }
 0x318   : > { %8060 = vmatprep.subr.bf16.mxu0 %v8059_v20  ;;  %8188 = vmatprep.subr.bf16.mxu1 %v8187_v29  ;;  %v8349_v20 = vunpack.c.l.s8.bf16 %v3801_v17  ;;  %v8223_v29 = vunpack.c.h.s8.bf16 %v3800_v11  ;;  %v3833_v11 = vld [vmem:[%s9339_s30 + $0x130] sm:$0xff] }
 0x31b   : > { %8062 = vmatpush1.bf16.msra.mxu0 %v8061_v23  ;;  %8190 = vmatpush1.bf16.msra.mxu1 %v8189_v24  ;;  %v3810_v23 = vld [vmem:[%s9339_s30 + $0x78] sm:$0xff]  ;;  %v8225_v24 = vunpack.c.h.s8.bf16 %v3799_v16 }
 0x31c   : > { %8064 = vmatprep.subr.bf16.mxu0 %v8063_v26  ;;  %8192 = vmatprep.subr.bf16.mxu1 %v8191_v28  ;;  %v8227_v26 = vunpack.c.l.s8.bf16 %v3808_v22  ;;  %v3807_v28 = vld [vmem:[%s9339_s30 + $0x60] sm:$0xff]  ;;  %v8355_v36 = vunpack.c.l.s8.bf16 %v3810_v23  ;;  %v3842_v16 = vld [vmem:[%s9339_s30 + $0x178] sm:$0xff] }
 0x31d   : > { %v8233_v42 = vunpack.c.h.s8.bf16 %v3807_v28 }
 0x31f   : > { %8066 = vmatpush1.bf16.msra.mxu0 %v8065_v45  ;;  %8194 = vmatpush1.bf16.msra.mxu1 %v8193_v32  ;;  %v8229_v45 = vunpack.c.l.s8.bf16 %v3807_v28  ;;  %v8357_v32 = vunpack.c.l.s8.bf16 %v3809_v30  ;;  %v3848_v28 = vld [vmem:[%s9339_s30 + $0x1a8] sm:$0xff] }
 0x320   : > { %8068 = vmatprep.subr.bf16.mxu0 %v8067_v37  ;;  %8196 = vmatprep.subr.bf16.mxu1 %v8195_v34  ;;  %v8231_v37 = vunpack.c.h.s8.bf16 %v3808_v22  ;;  %v8359_v34 = vunpack.c.h.s8.bf16 %v3810_v23  ;;  %v3841_v22 = vld [vmem:[%s9339_s30 + $0x170] sm:$0xff] }
 0x323   : > { %8070 = vmatpush1.bf16.msra.mxu0 %v8069_v39  ;;  %8198 = vmatpush1.bf16.msra.mxu1 %v8197_v40  ;;  %v8361_v39 = vunpack.c.h.s8.bf16 %v3809_v30 }
 0x324   : > { %8072 = vmatprep.subr.bf16.mxu0 %v8071_v41  ;;  %8200 = vmatprep.subr.bf16.mxu1 %v8199_v43  ;;  %v3815_v41 = vld [vmem:[%s9339_s30 + $0xa0] sm:$0xff]  ;;  %v8363_v43 = vunpack.c.l.s8.bf16 %v3818_v35 }
 0x325   : > { %v8237_v46 = vunpack.c.l.s8.bf16 %v3815_v41  ;;  %v8241_v53 = vunpack.c.h.s8.bf16 %v3815_v41  ;;  %v3856_v41 = vld [vmem:[%s9339_s30 + $0x1e8] sm:$0xff] }
 0x327   : > { %8074 = vmatpush1.bf16.msra.mxu0 %v8073_v63  ;;  %8202 = vmatpush1.bf16.msra.mxu1 %v8201_v48  ;;  %v8365_v63 = vunpack.c.l.s8.bf16 %v3817_v44 }
 0x328   : > { %8076 = vmatprep.subr.bf16.mxu0 %v8075_v49  ;;  %8204 = vmatprep.subr.bf16.mxu1 %v8203_v51  ;;  %v8367_v49 = vunpack.c.h.s8.bf16 %v3818_v35  ;;  %v3824_v51 = vld [vmem:[%s9339_s30 + $0xe8] sm:$0xff] }
 0x32b   : > { %8078 = vmatpush1.bf16.msra.mxu0 %v8077_v54  ;;  %8206 = vmatpush1.bf16.msra.mxu1 %v8205_v55  ;;  %v8369_v54 = vunpack.c.h.s8.bf16 %v3817_v44  ;;  %v8243_v55 = vunpack.c.l.s8.bf16 %v3824_v51 }
 0x32c   : > { %8080 = vmatprep.subr.bf16.mxu0 %v8079_v56  ;;  %8208 = vmatprep.subr.bf16.mxu1 %v8207_v57  ;;  %v3823_v56 = vld [vmem:[%s9339_s30 + $0xe0] sm:$0xff]  ;;  %v8371_v57 = vunpack.c.l.s8.bf16 %v3826_v52 }
 0x32d   : > { %v8245_v61 = vunpack.c.l.s8.bf16 %v3823_v56  ;;  %v8249_v3 = vunpack.c.h.s8.bf16 %v3823_v56  ;;  %v3864_v56 = vld [vmem:[%s9339_s30 + $0x228] sm:$0xff] }
 0x32f   : > { %8082 = vmatpush1.bf16.msra.mxu0 %v8081_v62  ;;  %8210 = vmatpush1.bf16.msra.mxu1 %v8209_v50  ;;  %v8373_v62 = vunpack.c.l.s8.bf16 %v3825_v60  ;;  %v8247_v50 = vunpack.c.h.s8.bf16 %v3824_v51  ;;  %v3857_v51 = vld [vmem:[%s9339_s30 + $0x1f0] sm:$0xff] }
 0x330   : > { %8084 = vmatprep.subr.bf16.mxu0 %v8083_v0  ;;  %8212 = vmatprep.subr.bf16.mxu1 %v8211_v1  ;;  %v8375_v0 = vunpack.c.h.s8.bf16 %v3826_v52  ;;  %v3832_v1 = vld [vmem:[%s9339_s30 + $0x128] sm:$0xff] }
 0x333   : > { %8086 = vmatpush1.bf16.msra.mxu0 %v8085_v4  ;;  %8214 = vmatpush1.bf16.msra.mxu1 %v8213_v59  ;;  %v8377_v4 = vunpack.c.h.s8.bf16 %v3825_v60  ;;  %v8251_v59 = vunpack.c.l.s8.bf16 %v3832_v1 }
 0x334   : > { %8088 = vmatprep.subr.bf16.mxu0 %v8087_v9  ;;  %8216 = vmatprep.subr.bf16.mxu1 %v8215_v10  ;;  %v3831_v9 = vld [vmem:[%s9339_s30 + $0x120] sm:$0xff]  ;;  %v8379_v10 = vunpack.c.l.s8.bf16 %v3834_v2 }
 0x335   : > { %v8253_v12 = vunpack.c.l.s8.bf16 %v3831_v9  ;;  %v8257_v17 = vunpack.c.h.s8.bf16 %v3831_v9 }
 0x337   : > { %8090 = vmatpush1.bf16.msra.mxu0 %v8089_v13  ;;  %8218 = vmatpush1.bf16.msra.mxu1 %v8217_v14  ;;  %v8381_v13 = vunpack.c.l.s8.bf16 %v3833_v11  ;;  %v8255_v14 = vunpack.c.h.s8.bf16 %v3832_v1  ;;  %v3865_v1 = vld [vmem:[%s9339_s30 + $0x230] sm:$0xff] }
 0x338   : > { %8220 = vmatprep.subr.bf16.mxu0 %v8219_v15  ;;  %8348 = vmatprep.subr.bf16.mxu1 %v8347_v27  ;;  %v8383_v15 = vunpack.c.h.s8.bf16 %v3834_v2  ;;  %v3840_v27 = vld [vmem:[%s9339_s30 + $0x168] sm:$0xff] }
 0x33a   : > { %5085 = vmatmul.mubr.f32.vlgmr.msra.gmra.mrb[2].mxu0 %v9734_v19  ;;  %5227 = vmatmul.mubr.f32.vlgmr.msra.gmra.mrb[2].mxu1 %v9734_v19 }
 0x33b   : > { %8222 = vmatpush1.bf16.msra.mxu0 %v8221_v18  ;;  %5297 = vmatprep.mubr.f32.mxu0 %v9689_v31  ;;  %v8385_v18 = vunpack.c.h.s8.bf16 %v3833_v11 }
 0x33c   : > { %8350 = vmatpush1.bf16.msra.mxu1 %v8349_v20  ;;  %5439 = vmatprep.mubr.f32.mxu1 %v9689_v31  ;;  %v3816_v31 = vld [vmem:[%s9339_s30 + $0xa8] sm:$0xff]  ;;  %v8259_v20 = vunpack.c.l.s8.bf16 %v3840_v27 }
 0x33d   : > { %8224 = vmatprep.subr.bf16.mxu0 %v8223_v29  ;;  %8352 = vmatprep.subr.bf16.mxu1 %v8351_v21  ;;  %v8235_v40 = vunpack.c.l.s8.bf16 %v3816_v31  ;;  %v8239_v48 = vunpack.c.h.s8.bf16 %v3816_v31  ;;  %v3839_v29 = vld [vmem:[%s9339_s30 + $0x160] sm:$0xff]  ;;  %v8387_v21 = vunpack.c.l.s8.bf16 %v3842_v16  ;;  %v3849_v31 = vld [vmem:[%s9339_s30 + $0x1b0] sm:$0xff] }
 0x33e   : > { %v8261_v23 = vunpack.c.l.s8.bf16 %v3839_v29  ;;  %v8265_v30 = vunpack.c.h.s8.bf16 %v3839_v29  ;;  %v3882_v29 = vld [vmem:[%s9339_s30 + $0x2b8] sm:$0xff] }
 0x33f   : > { %8226 = vmatpush1.bf16.msra.mxu0 %v8225_v24  ;;  %v8389_v24 = vunpack.c.l.s8.bf16 %v3841_v22 }
 0x340   : > { %8354 = vmatpush1.bf16.msra.mxu1 %v8353_v25  ;;  %8228 = vmatprep.subr.bf16.mxu0 %v8227_v26  ;;  %v8263_v25 = vunpack.c.h.s8.bf16 %v3840_v27  ;;  %v8391_v26 = vunpack.c.h.s8.bf16 %v3842_v16  ;;  %v3873_v27 = vld [vmem:[%s9339_s30 + $0x270] sm:$0xff] }
 0x341   : > { %8356 = vmatprep.subr.bf16.mxu1 %v8355_v36  ;;  %v3850_v36 = vld [vmem:[%s9339_s30 + $0x1b8] sm:$0xff] }
 0x343   : > { %8230 = vmatpush1.bf16.msra.mxu0 %v8229_v45  ;;  %v8393_v45 = vunpack.c.h.s8.bf16 %v3841_v22 }
 0x344   : > { %8358 = vmatpush1.bf16.msra.mxu1 %v8357_v32  ;;  %8232 = vmatprep.subr.bf16.mxu0 %v8231_v37  ;;  %v8267_v32 = vunpack.c.l.s8.bf16 %v3848_v28  ;;  %v3847_v37 = vld [vmem:[%s9339_s30 + $0x1a0] sm:$0xff] }
 0x345   : > { %8360 = vmatprep.subr.bf16.mxu1 %v8359_v34  ;;  %v8395_v34 = vunpack.c.l.s8.bf16 %v3850_v36  ;;  %v8269_v35 = vunpack.c.l.s8.bf16 %v3847_v37  ;;  %v8273_v44 = vunpack.c.h.s8.bf16 %v3847_v37 }
 0x347   : > { %8234 = vmatpush1.bf16.msra.mxu0 %v8233_v42  ;;  %v8397_v42 = vunpack.c.l.s8.bf16 %v3849_v31 }
 0x348   : > { %8362 = vmatpush1.bf16.msra.mxu1 %v8361_v39  ;;  %8236 = vmatprep.subr.bf16.mxu0 %v8235_v40  ;;  %v8271_v39 = vunpack.c.h.s8.bf16 %v3848_v28  ;;  %v8399_v40 = vunpack.c.h.s8.bf16 %v3850_v36 }
 0x349   : > { %8364 = vmatprep.subr.bf16.mxu1 %v8363_v43  ;;  %v3858_v43 = vld [vmem:[%s9339_s30 + $0x1f8] sm:$0xff] }
 0x34b   : > { %8238 = vmatpush1.bf16.msra.mxu0 %v8237_v46  ;;  %v8401_v46 = vunpack.c.h.s8.bf16 %v3849_v31 }
 0x34c   : > { %8366 = vmatpush1.bf16.msra.mxu1 %v8365_v63  ;;  %8240 = vmatprep.subr.bf16.mxu0 %v8239_v48  ;;  %v8275_v63 = vunpack.c.l.s8.bf16 %v3856_v41  ;;  %v3855_v48 = vld [vmem:[%s9339_s30 + $0x1e0] sm:$0xff] }
 0x34d   : > { %8368 = vmatprep.subr.bf16.mxu1 %v8367_v49  ;;  %v8403_v49 = vunpack.c.l.s8.bf16 %v3858_v43  ;;  %v8277_v52 = vunpack.c.l.s8.bf16 %v3855_v48  ;;  %v8281_v60 = vunpack.c.h.s8.bf16 %v3855_v48 }
 0x34f   : > { %8242 = vmatpush1.bf16.msra.mxu0 %v8241_v53  ;;  %v8405_v53 = vunpack.c.l.s8.bf16 %v3857_v51 }
 0x350   : > { %8370 = vmatpush1.bf16.msra.mxu1 %v8369_v54  ;;  %8244 = vmatprep.subr.bf16.mxu0 %v8243_v55  ;;  %v8279_v54 = vunpack.c.h.s8.bf16 %v3856_v41  ;;  %v8407_v55 = vunpack.c.h.s8.bf16 %v3858_v43 }
 0x351   : > { %8372 = vmatprep.subr.bf16.mxu1 %v8371_v57  ;;  %v3866_v57 = vld [vmem:[%s9339_s30 + $0x238] sm:$0xff] }
 0x352   : > { %v8415_v9 = vunpack.c.h.s8.bf16 %v3866_v57 }
 0x353   : > { %8246 = vmatpush1.bf16.msra.mxu0 %v8245_v61  ;;  %v8409_v61 = vunpack.c.h.s8.bf16 %v3857_v51 }
 0x354   : > { %8374 = vmatpush1.bf16.msra.mxu1 %v8373_v62  ;;  %8248 = vmatprep.subr.bf16.mxu0 %v8247_v50  ;;  %v8283_v62 = vunpack.c.l.s8.bf16 %v3864_v56  ;;  %v3863_v50 = vld [vmem:[%s9339_s30 + $0x220] sm:$0xff] }
 0x355   : > { %8376 = vmatprep.subr.bf16.mxu1 %v8375_v0  ;;  %v8411_v0 = vunpack.c.l.s8.bf16 %v3866_v57  ;;  %v8285_v2 = vunpack.c.l.s8.bf16 %v3863_v50  ;;  %v8289_v11 = vunpack.c.h.s8.bf16 %v3863_v50 }
 0x357   : > { %8250 = vmatpush1.bf16.msra.mxu0 %v8249_v3  ;;  %v8413_v3 = vunpack.c.l.s8.bf16 %v3865_v1 }
 0x358   : > { %8378 = vmatpush1.bf16.msra.mxu1 %v8377_v4  ;;  %8252 = vmatprep.subr.bf16.mxu0 %v8251_v59  ;;  %v8287_v4 = vunpack.c.h.s8.bf16 %v3864_v56  ;;  %v3872_v59 = vld [vmem:[%s9339_s30 + $0x268] sm:$0xff] }
 0x359   : > { %8380 = vmatprep.subr.bf16.mxu1 %v8379_v10  ;;  %v3874_v10 = vld [vmem:[%s9339_s30 + $0x278] sm:$0xff] }
 0x35b   : > { %8254 = vmatpush1.bf16.msra.mxu0 %v8253_v12  ;;  %v8417_v12 = vunpack.c.h.s8.bf16 %v3865_v1 }
 0x35c   : > { %8382 = vmatpush1.bf16.msra.mxu1 %v8381_v13  ;;  %8256 = vmatprep.subr.bf16.mxu0 %v8255_v14  ;;  %v8291_v13 = vunpack.c.l.s8.bf16 %v3872_v59  ;;  %v3871_v14 = vld [vmem:[%s9339_s30 + $0x260] sm:$0xff] }
 0x35d   : > { %8384 = vmatprep.subr.bf16.mxu1 %v8383_v15  ;;  %v8419_v15 = vunpack.c.l.s8.bf16 %v3874_v10  ;;  %v8293_v16 = vunpack.c.l.s8.bf16 %v3871_v14 }
 0x35f   : > { %8258 = vmatpush1.bf16.msra.mxu0 %v8257_v17  ;;  %v8295_v17 = vunpack.c.h.s8.bf16 %v3872_v59 }
 0x360   : > { %8386 = vmatpush1.bf16.msra.mxu1 %v8385_v18  ;;  %8260 = vmatprep.subr.bf16.mxu0 %v8259_v20  ;;  %v8423_v18 = vunpack.c.h.s8.bf16 %v3874_v10  ;;  %v3880_v20 = vld [vmem:[%s9339_s30 + $0x2a8] sm:$0xff] }
 0x361   : > { %8388 = vmatprep.subr.bf16.mxu1 %v8387_v21  ;;  %v8297_v21 = vunpack.c.h.s8.bf16 %v3871_v14  ;;  %v8299_v22 = vunpack.c.l.s8.bf16 %v3880_v20  ;;  %v8303_v36 = vunpack.c.h.s8.bf16 %v3880_v20 }
 0x363   : > { %8262 = vmatpush1.bf16.msra.mxu0 %v8261_v23  ;;  %v3879_v23 = vld [vmem:[%s9339_s30 + $0x2a0] sm:$0xff] }
 0x364   : > { %8390 = vmatpush1.bf16.msra.mxu1 %v8389_v24  ;;  %8264 = vmatprep.subr.bf16.mxu0 %v8263_v25  ;;  %v8427_v24 = vunpack.c.l.s8.bf16 %v3882_v29  ;;  %v3881_v25 = vld [vmem:[%s9339_s30 + $0x2b0] sm:$0xff]  ;;  %v8305_v37 = vunpack.c.h.s8.bf16 %v3879_v23 }
 0x365   : > { %8392 = vmatprep.subr.bf16.mxu1 %v8391_v26  ;;  %v8301_v26 = vunpack.c.l.s8.bf16 %v3879_v23  ;;  %v8429_v28 = vunpack.c.l.s8.bf16 %v3881_v25 }
 0x367   : > { %8266 = vmatpush1.bf16.msra.mxu0 %v8265_v30  ;;  %v8431_v30 = vunpack.c.h.s8.bf16 %v3882_v29 }
 0x368   : > { %8394 = vmatpush1.bf16.msra.mxu1 %v8393_v45  ;;  %8268 = vmatprep.subr.bf16.mxu0 %v8267_v32  ;;  %v3888_v45 = vld [vmem:[%s9339_s30 + $0x2e8] sm:$0xff]  ;;  %v3890_v32 = vld [vmem:[%s9339_s30 + $0x2f8] sm:$0xff] }
 0x369   : > { %8396 = vmatprep.subr.bf16.mxu1 %v8395_v34  ;;  %v8433_v34 = vunpack.c.h.s8.bf16 %v3881_v25  ;;  %v8307_v31 = vunpack.c.l.s8.bf16 %v3888_v45  ;;  %v8311_v43 = vunpack.c.h.s8.bf16 %v3888_v45 }
 0x36b   : > { %8270 = vmatpush1.bf16.msra.mxu0 %v8269_v35  ;;  %v3887_v35 = vld [vmem:[%s9339_s30 + $0x2e0] sm:$0xff] }
 0x36c   : > { %8398 = vmatpush1.bf16.msra.mxu1 %v8397_v42  ;;  %8272 = vmatprep.subr.bf16.mxu0 %v8271_v39  ;;  %v8435_v42 = vunpack.c.l.s8.bf16 %v3890_v32  ;;  %v3889_v39 = vld [vmem:[%s9339_s30 + $0x2f0] sm:$0xff]  ;;  %v8313_v48 = vunpack.c.h.s8.bf16 %v3887_v35 }
 0x36d   : > { %8400 = vmatprep.subr.bf16.mxu1 %v8399_v40  ;;  %v8309_v40 = vunpack.c.l.s8.bf16 %v3887_v35  ;;  %v8437_v41 = vunpack.c.l.s8.bf16 %v3889_v39 }
 0x36f   : > { %8274 = vmatpush1.bf16.msra.mxu0 %v8273_v44  ;;  %v8439_v44 = vunpack.c.h.s8.bf16 %v3890_v32 }
 0x370   : > { %8402 = vmatpush1.bf16.msra.mxu1 %v8401_v46  ;;  %8276 = vmatprep.subr.bf16.mxu0 %v8275_v63  ;;  %v3896_v46 = vld [vmem:[%s9339_s30 + $0x328] sm:$0xff]  ;;  %v3898_v63 = vld [vmem:[%s9339_s30 + $0x338] sm:$0xff] }
 0x371   : > { %8404 = vmatprep.subr.bf16.mxu1 %v8403_v49  ;;  %v8441_v49 = vunpack.c.h.s8.bf16 %v3889_v39  ;;  %v8315_v51 = vunpack.c.l.s8.bf16 %v3896_v46  ;;  %v8319_v57 = vunpack.c.h.s8.bf16 %v3896_v46 }
 0x373   : > { %8278 = vmatpush1.bf16.msra.mxu0 %v8277_v52  ;;  %v3895_v52 = vld [vmem:[%s9339_s30 + $0x320] sm:$0xff] }
 0x374   : > { %8406 = vmatpush1.bf16.msra.mxu1 %v8405_v53  ;;  %8280 = vmatprep.subr.bf16.mxu0 %v8279_v54  ;;  %v8443_v53 = vunpack.c.l.s8.bf16 %v3898_v63  ;;  %v3897_v54 = vld [vmem:[%s9339_s30 + $0x330] sm:$0xff]  ;;  %v8321_v50 = vunpack.c.h.s8.bf16 %v3895_v52 }
 0x375   : > { %8408 = vmatprep.subr.bf16.mxu1 %v8407_v55  ;;  %v8317_v55 = vunpack.c.l.s8.bf16 %v3895_v52  ;;  %v8445_v56 = vunpack.c.l.s8.bf16 %v3897_v54 }
 0x377   : > { %8282 = vmatpush1.bf16.msra.mxu0 %v8281_v60  ;;  %v8447_v60 = vunpack.c.h.s8.bf16 %v3898_v63  ;;  %v4947_v63 = vld [vmem:[#allocation2] sm:$0xff] }
 0x378   : > { %8410 = vmatpush1.bf16.msra.mxu1 %v8409_v61  ;;  %8284 = vmatprep.subr.bf16.mxu0 %v8283_v62  ;;  %v3904_v61 = vld [vmem:[%s9339_s30 + $0x368] sm:$0xff]  ;;  %v3906_v62 = vld [vmem:[%s9339_s30 + $0x378] sm:$0xff] }
 0x379   : > { %8412 = vmatprep.subr.bf16.mxu1 %v8411_v0  ;;  %v8449_v0 = vunpack.c.h.s8.bf16 %v3897_v54  ;;  %v8323_v1 = vunpack.c.l.s8.bf16 %v3904_v61  ;;  %v8327_v10 = vunpack.c.h.s8.bf16 %v3904_v61 }
 0x37a   : > { %5298 = vmatmul.mubr.f32.vlgmr.msra.gmra.mrb[4].mxu0 %v9691_v33 }
 0x37b   : > { %5440 = vmatmul.mubr.f32.vlgmr.msra.gmra.mrb[4].mxu1 %v9691_v33  ;;  %8286 = vmatpush1.bf16.msra.mxu0 %v8285_v2  ;;  %v8421_v33 = vunpack.c.l.s8.bf16 %v3873_v27  ;;  %v3903_v2 = vld [vmem:[%s9339_s30 + $0x360] sm:$0xff] }
 0x37c   : > { %5368 = vmatprep.mubr.f32.mxu0 %v9697_v38  ;;  %8414 = vmatpush1.bf16.msra.mxu1 %v8413_v3  ;;  %v8451_v3 = vunpack.c.l.s8.bf16 %v3906_v62  ;;  %v8325_v59 = vunpack.c.l.s8.bf16 %v3903_v2  ;;  %v8329_v14 = vunpack.c.h.s8.bf16 %v3903_v2  ;;  %v8560_v2 = vld [vmem:[%s10333_s7 + $0x200] ss:$8 sps:$4 sm:$0xff] (!%p6989_p11)  }
 0x37d   : > { %5510 = vmatprep.mubr.f32.mxu1 %v9697_v38  ;;  %8288 = vmatprep.subr.bf16.mxu0 %v8287_v4  ;;  %v8425_v38 = vunpack.c.h.s8.bf16 %v3873_v27  ;;  %v3905_v4 = vld [vmem:[%s9339_s30 + $0x370] sm:$0xff] }
 0x37e   : > { %8416 = vmatprep.subr.bf16.mxu1 %v8415_v9  ;;  %v8453_v9 = vunpack.c.l.s8.bf16 %v3905_v4 }
 0x37f   : > { %8290 = vmatpush1.bf16.msra.mxu0 %v8289_v11  ;;  %v8455_v11 = vunpack.c.h.s8.bf16 %v3906_v62 }
 0x380   : > { %8418 = vmatpush1.bf16.msra.mxu1 %v8417_v12  ;;  %8292 = vmatprep.subr.bf16.mxu0 %v8291_v13  ;;  %v3912_v12 = vld [vmem:[%s9339_s30 + $0x3a8] sm:$0xff]  ;;  %v3914_v13 = vld [vmem:[%s9339_s30 + $0x3b8] sm:$0xff] }
 0x381   : > { %8420 = vmatprep.subr.bf16.mxu1 %v8419_v15  ;;  %v8457_v15 = vunpack.c.h.s8.bf16 %v3905_v4  ;;  %v8331_v27 = vunpack.c.l.s8.bf16 %v3912_v12  ;;  %v8335_v29 = vunpack.c.h.s8.bf16 %v3912_v12  ;;  %v8563_v4 = vld [vmem:[%s10333_s7 + $0x214] ss:$8 sps:$4 sm:$0xff] (!%p6989_p11)   ;;  %v8571_v12 = vld [vmem:[%s10333_s7 + $0x20] ss:$8 sps:$4 sm:$0xff] (!%p6989_p11)  }
 0x383   : > { %8294 = vmatpush1.bf16.msra.mxu0 %v8293_v16  ;;  %v3911_v16 = vld [vmem:[%s9339_s30 + $0x3a0] sm:$0xff] }
 0x384   : > { %8422 = vmatpush1.bf16.msra.mxu1 %v8421_v33  ;;  %8296 = vmatprep.subr.bf16.mxu0 %v8295_v17  ;;  %v8459_v33 = vunpack.c.l.s8.bf16 %v3914_v13  ;;  %v3913_v17 = vld [vmem:[%s9339_s30 + $0x3b0] sm:$0xff]  ;;  %v8337_v23 = vunpack.c.h.s8.bf16 %v3911_v16 }
 0x385   : > { %8424 = vmatprep.subr.bf16.mxu1 %v8423_v18  ;;  %v8333_v18 = vunpack.c.l.s8.bf16 %v3911_v16  ;;  %v8461_v20 = vunpack.c.l.s8.bf16 %v3913_v17  ;;  %v8578_v16 = vld [vmem:[%s10333_s7 + $0x230] ss:$8 sps:$4 sm:$0xff] (!%p6989_p11)  }
 0x387   : > { %8298 = vmatpush1.bf16.msra.mxu0 %v8297_v21  ;;  %v8463_v21 = vunpack.c.h.s8.bf16 %v3914_v13  ;;  %v8572_v13 = vld [vmem:[%s10333_s7 + $0x220] ss:$8 sps:$4 sm:$0xff] (!%p6989_p11)  }
 0x388   : > { %8426 = vmatpush1.bf16.msra.mxu1 %v8425_v38  ;;  %8300 = vmatprep.subr.bf16.mxu0 %v8299_v22  ;;  %v3920_v38 = vld [vmem:[%s9339_s30 + $0x3e8] sm:$0xff]  ;;  %v3922_v22 = vld [vmem:[%s9339_s30 + $0x3f8] sm:$0xff] }
 0x389   : > { %8428 = vmatprep.subr.bf16.mxu1 %v8427_v24  ;;  %v8465_v24 = vunpack.c.h.s8.bf16 %v3913_v17  ;;  %v8339_v25 = vunpack.c.l.s8.bf16 %v3920_v38  ;;  %v8343_v32 = vunpack.c.h.s8.bf16 %v3920_v38  ;;  %v8581_v17 = vld [vmem:[%s10333_s7 + $0x244] ss:$8 sps:$4 sm:$0xff] (!%p6989_p11)   ;;  %v8589_v38 = vld [vmem:[%s10333_s7 + $0x50] ss:$8 sps:$4 sm:$0xff] (!%p6989_p11)  }
 0x38b   : > { %8302 = vmatpush1.bf16.msra.mxu0 %v8301_v26  ;;  %v3919_v26 = vld [vmem:[%s9339_s30 + $0x3e0] sm:$0xff] }
 0x38c   : > { %8430 = vmatpush1.bf16.msra.mxu1 %v8429_v28  ;;  %8304 = vmatprep.subr.bf16.mxu0 %v8303_v36  ;;  %v8467_v28 = vunpack.c.l.s8.bf16 %v3922_v22  ;;  %v3921_v36 = vld [vmem:[%s9339_s30 + $0x3f0] sm:$0xff] }
 0x38d   : > { %8432 = vmatprep.subr.bf16.mxu1 %v8431_v30  ;;  %v8341_v30 = vunpack.c.l.s8.bf16 %v3919_v26  ;;  %v8469_v45 = vunpack.c.l.s8.bf16 %v3921_v36 }
 0x38f   : > { %8306 = vmatpush1.bf16.msra.mxu0 %v8305_v37  ;;  %v8471_v37 = vunpack.c.h.s8.bf16 %v3922_v22  ;;  %v8590_v22 = vld [vmem:[%s10333_s7 + $0x250] ss:$8 sps:$4 sm:$0xff] (!%p6989_p11)  }
 0x390   : > { %8434 = vmatpush1.bf16.msra.mxu1 %v8433_v34  ;;  %8308 = vmatprep.subr.bf16.mxu0 %v8307_v31  ;;  %v8345_v34 = vunpack.c.h.s8.bf16 %v3919_v26  ;;  %v8473_v31 = vunpack.c.h.s8.bf16 %v3921_v36  ;;  %v8596_v26 = vld [vmem:[%s10333_s7 + $0x260] ss:$8 sps:$4 sm:$0xff] (!%p6989_p11)   ;;  %v8599_v36 = vld [vmem:[%s10333_s7 + $0x274] ss:$8 sps:$4 sm:$0xff] (!%p6989_p11)  }
 0x391   : > { %8436 = vmatprep.subr.bf16.mxu1 %v8435_v42 }
 0x393   : > { %8310 = vmatpush1.bf16.msra.mxu0 %v8309_v40 }
 0x394   : > { %8438 = vmatpush1.bf16.msra.mxu1 %v8437_v41  ;;  %8312 = vmatprep.subr.bf16.mxu0 %v8311_v43 }
 0x395   : > { %8440 = vmatprep.subr.bf16.mxu1 %v8439_v44 }
 0x397   : > { %8314 = vmatpush1.bf16.msra.mxu0 %v8313_v48 }
 0x398   : > { %8442 = vmatpush1.bf16.msra.mxu1 %v8441_v49  ;;  %8316 = vmatprep.subr.bf16.mxu0 %v8315_v51 }
 0x399   : > { %8444 = vmatprep.subr.bf16.mxu1 %v8443_v53 }
 0x39b   : > { %8318 = vmatpush1.bf16.msra.mxu0 %v8317_v55 }
 0x39c   : > { %8446 = vmatpush1.bf16.msra.mxu1 %v8445_v56  ;;  %8320 = vmatprep.subr.bf16.mxu0 %v8319_v57 }
 0x39d   : > { %8448 = vmatprep.subr.bf16.mxu1 %v8447_v60  ;;  %v4948_v60 = vld [vmem:[#allocation2 + $0x8] sm:$0xff] }
 0x39f   : > { %8322 = vmatpush1.bf16.msra.mxu0 %v8321_v50  ;;  %v8555_v50 = vld [vmem:[%s10333_s7 + $0x4] ss:$8 sps:$4 sm:$0xff] (!%p6989_p11)  }
 0x3a0   : > { %8450 = vmatpush1.bf16.msra.mxu1 %v8449_v0  ;;  %8324 = vmatprep.subr.bf16.mxu0 %v8323_v1  ;;  %v8557_v0 = vld [vmem:[%s10333_s7 + $0x204] ss:$8 sps:$4 sm:$0xff] (!%p6989_p11)   ;;  %v8559_v1 = vld [vmem:[%s10333_s7] ss:$8 sps:$4 sm:$0xff] (!%p6989_p11)  }
 0x3a1   : > { %8452 = vmatprep.subr.bf16.mxu1 %v8451_v3  ;;  %v8561_v3 = vld [vmem:[%s10333_s7 + $0x14] ss:$8 sps:$4 sm:$0xff] (!%p6989_p11)  }
 0x3a3   : > { %8326 = vmatpush1.bf16.msra.mxu0 %v8325_v59  ;;  %v8565_v59 = vld [vmem:[%s10333_s7 + $0x10] ss:$8 sps:$4 sm:$0xff] (!%p6989_p11)  }
 0x3a4   : > { %8454 = vmatpush1.bf16.msra.mxu1 %v8453_v9  ;;  %8328 = vmatprep.subr.bf16.mxu0 %v8327_v10  ;;  %v8566_v9 = vld [vmem:[%s10333_s7 + $0x210] ss:$8 sps:$4 sm:$0xff] (!%p6989_p11)   ;;  %v8567_v10 = vld [vmem:[%s10333_s7 + $0x24] ss:$8 sps:$4 sm:$0xff] (!%p6989_p11)  }
 0x3a5   : > { %8456 = vmatprep.subr.bf16.mxu1 %v8455_v11  ;;  %v8569_v11 = vld [vmem:[%s10333_s7 + $0x224] ss:$8 sps:$4 sm:$0xff] (!%p6989_p11)  }
 0x3a7   : > { %8330 = vmatpush1.bf16.msra.mxu0 %v8329_v14  ;;  %v8573_v14 = vld [vmem:[%s10333_s7 + $0x34] ss:$8 sps:$4 sm:$0xff] (!%p6989_p11)  }
 0x3a8   : > { %8458 = vmatpush1.bf16.msra.mxu1 %v8457_v15  ;;  %8332 = vmatprep.subr.bf16.mxu0 %v8331_v27  ;;  %v8575_v15 = vld [vmem:[%s10333_s7 + $0x234] ss:$8 sps:$4 sm:$0xff] (!%p6989_p11)   ;;  %v8577_v27 = vld [vmem:[%s10333_s7 + $0x30] ss:$8 sps:$4 sm:$0xff] (!%p6989_p11)  }
 0x3a9   : > { %8460 = vmatprep.subr.bf16.mxu1 %v8459_v33  ;;  %v8579_v33 = vld [vmem:[%s10333_s7 + $0x44] ss:$8 sps:$4 sm:$0xff] (!%p6989_p11)  }
 0x3ab   : > { %8334 = vmatpush1.bf16.msra.mxu0 %v8333_v18  ;;  %v8583_v18 = vld [vmem:[%s10333_s7 + $0x40] ss:$8 sps:$4 sm:$0xff] (!%p6989_p11)  }
 0x3ac   : > { %8462 = vmatpush1.bf16.msra.mxu1 %v8461_v20  ;;  %8336 = vmatprep.subr.bf16.mxu0 %v8335_v29  ;;  %v8584_v20 = vld [vmem:[%s10333_s7 + $0x240] ss:$8 sps:$4 sm:$0xff] (!%p6989_p11)   ;;  %v8585_v29 = vld [vmem:[%s10333_s7 + $0x54] ss:$8 sps:$4 sm:$0xff] (!%p6989_p11)  }
 0x3ad   : > { %8464 = vmatprep.subr.bf16.mxu1 %v8463_v21  ;;  %v8587_v21 = vld [vmem:[%s10333_s7 + $0x254] ss:$8 sps:$4 sm:$0xff] (!%p6989_p11)  }
 0x3af   : > { %8338 = vmatpush1.bf16.msra.mxu0 %v8337_v23  ;;  %v8591_v23 = vld [vmem:[%s10333_s7 + $0x64] ss:$8 sps:$4 sm:$0xff] (!%p6989_p11)  }
 0x3b0   : > { %8466 = vmatpush1.bf16.msra.mxu1 %v8465_v24  ;;  %8340 = vmatprep.subr.bf16.mxu0 %v8339_v25  ;;  %v8593_v24 = vld [vmem:[%s10333_s7 + $0x264] ss:$8 sps:$4 sm:$0xff] (!%p6989_p11)   ;;  %v8595_v25 = vld [vmem:[%s10333_s7 + $0x60] ss:$8 sps:$4 sm:$0xff] (!%p6989_p11)  }
 0x3b1   : > { %8468 = vmatprep.subr.bf16.mxu1 %v8467_v28  ;;  %v8597_v28 = vld [vmem:[%s10333_s7 + $0x74] ss:$8 sps:$4 sm:$0xff] (!%p6989_p11)  }
 0x3b3   : > { %8342 = vmatpush1.bf16.msra.mxu0 %v8341_v30  ;;  %v8601_v30 = vld [vmem:[%s10333_s7 + $0x70] ss:$8 sps:$4 sm:$0xff] (!%p6989_p11)  }
 0x3b4   : > { %8470 = vmatpush1.bf16.msra.mxu1 %v8469_v45  ;;  %8344 = vmatprep.subr.bf16.mxu0 %v8343_v32  ;;  %v8602_v45 = vld [vmem:[%s10333_s7 + $0x270] ss:$8 sps:$4 sm:$0xff] (!%p6989_p11)   ;;  %v8603_v32 = vld [vmem:[%s10333_s7 + $0x84] ss:$8 sps:$4 sm:$0xff] (!%p6989_p11)  }
 0x3b5   : > { %8472 = vmatprep.subr.bf16.mxu1 %v8471_v37  ;;  %v8605_v37 = vld [vmem:[%s10333_s7 + $0x284] ss:$8 sps:$4 sm:$0xff] (!%p6989_p11)  }
 0x3b7   : > { %8346 = vmatpush1.bf16.msra.mxu0 %v8345_v34  ;;  %v8607_v34 = vld [vmem:[%s10333_s7 + $0x80] ss:$8 sps:$4 sm:$0xff] (!%p6989_p11)  }
 0x3b8   : > { %8474 = vmatpush1.bf16.msra.mxu1 %v8473_v31  ;;  %6631 = vmatprep.subr.bf16.mxu0 (!%p6989_p11), %v8557_v0  ;;  %v8608_v31 = vld [vmem:[%s10333_s7 + $0x280] ss:$8 sps:$4 sm:$0xff] (!%p6989_p11)  }
 0x3b9   : > { %6549 = vmatprep.subr.bf16.mxu1 (!%p6989_p11), %v8555_v50  ;;  %v8629_v50 = vld [vmem:[%s10333_s7 + $0x2c4] ss:$8 sps:$4 sm:$0xff] (!%p6989_p11)  }
 0x3ba   : > { %5369 = vmatmul.mubr.f32.vlgmr.msra.gmra.mrb[4].mxu0 %v9734_v19 }
 0x3bb   : > { %5511 = vmatmul.mubr.f32.vlgmr.msra.gmra.mrb[4].mxu1 %v9734_v19  ;;  %6632 = vmatpush1.bf16.msra.mxu0 (!%p6989_p11), %v8560_v2 }
 0x3bc   : > { %6550 = vmatpush1.bf16.msra.mxu1 (!%p6989_p11), %v8559_v1  ;;  %6633 = vmatprep.subr.bf16.mxu0 (!%p6989_p11), %v8563_v4 }
 0x3bd   : > { %6551 = vmatprep.subr.bf16.mxu1 (!%p6989_p11), %v8561_v3 }
 0x3bf   : > { %6634 = vmatpush1.bf16.msra.mxu0 (!%p6989_p11), %v8566_v9 }
 0x3c0   : > { %6552 = vmatpush1.bf16.msra.mxu1 (!%p6989_p11), %v8565_v59  ;;  %6635 = vmatprep.subr.bf16.mxu0 (!%p6989_p11), %v8569_v11 }
 0x3c1   : > { %6553 = vmatprep.subr.bf16.mxu1 (!%p6989_p11), %v8567_v10  ;;  %v8632_v10 = vld [vmem:[%s10333_s7 + $0x2c0] ss:$8 sps:$4 sm:$0xff] (!%p6989_p11)  }
 0x3c3   : > { %6636 = vmatpush1.bf16.msra.mxu0 (!%p6989_p11), %v8572_v13 }
 0x3c4   : > { %6554 = vmatpush1.bf16.msra.mxu1 (!%p6989_p11), %v8571_v12  ;;  %6637 = vmatprep.subr.bf16.mxu0 (!%p6989_p11), %v8575_v15 }
 0x3c5   : > { %6555 = vmatprep.subr.bf16.mxu1 (!%p6989_p11), %v8573_v14 }
 0x3c7   : > { %6638 = vmatpush1.bf16.msra.mxu0 (!%p6989_p11), %v8578_v16  ;;  %v8635_v16 = vld [vmem:[%s10333_s7 + $0x2d4] ss:$8 sps:$4 sm:$0xff] (!%p6989_p11)  }
 0x3c8   : > { %6556 = vmatpush1.bf16.msra.mxu1 (!%p6989_p11), %v8577_v27  ;;  %6639 = vmatprep.subr.bf16.mxu0 (!%p6989_p11), %v8581_v17 }
 0x3c9   : > { %6557 = vmatprep.subr.bf16.mxu1 (!%p6989_p11), %v8579_v33 }
 0x3cb   : > { %6640 = vmatpush1.bf16.msra.mxu0 (!%p6989_p11), %v8584_v20  ;;  %v8637_v20 = vld [vmem:[%s10333_s7 + $0xd0] ss:$8 sps:$4 sm:$0xff] (!%p6989_p11)  }
 0x3cc   : > { %6558 = vmatpush1.bf16.msra.mxu1 (!%p6989_p11), %v8583_v18  ;;  %6641 = vmatprep.subr.bf16.mxu0 (!%p6989_p11), %v8587_v21 }
 0x3cd   : > { %6559 = vmatprep.subr.bf16.mxu1 (!%p6989_p11), %v8585_v29 }
 0x3cf   : > { %6642 = vmatpush1.bf16.msra.mxu0 (!%p6989_p11), %v8590_v22 }
 0x3d0   : > { %6560 = vmatpush1.bf16.msra.mxu1 (!%p6989_p11), %v8589_v38  ;;  %6643 = vmatprep.subr.bf16.mxu0 (!%p6989_p11), %v8593_v24  ;;  %v8638_v24 = vld [vmem:[%s10333_s7 + $0x2d0] ss:$8 sps:$4 sm:$0xff] (!%p6989_p11)  }
 0x3d1   : > { %6561 = vmatprep.subr.bf16.mxu1 (!%p6989_p11), %v8591_v23 }
 0x3d3   : > { %6644 = vmatpush1.bf16.msra.mxu0 (!%p6989_p11), %v8596_v26 }
 0x3d4   : > { %6562 = vmatpush1.bf16.msra.mxu1 (!%p6989_p11), %v8595_v25  ;;  %6645 = vmatprep.subr.bf16.mxu0 (!%p6989_p11), %v8599_v36  ;;  %v8639_v25 = vld [vmem:[%s10333_s7 + $0xe4] ss:$8 sps:$4 sm:$0xff] (!%p6989_p11)  }
 0x3d5   : > { %6563 = vmatprep.subr.bf16.mxu1 (!%p6989_p11), %v8597_v28 }
 0x3d7   : > { %6646 = vmatpush1.bf16.msra.mxu0 (!%p6989_p11), %v8602_v45  ;;  %v8641_v45 = vld [vmem:[%s10333_s7 + $0x2e4] ss:$8 sps:$4 sm:$0xff] (!%p6989_p11)  }
 0x3d8   : > { %6564 = vmatpush1.bf16.msra.mxu1 (!%p6989_p11), %v8601_v30  ;;  %6647 = vmatprep.subr.bf16.mxu0 (!%p6989_p11), %v8605_v37 }
 0x3d9   : > { %6565 = vmatprep.subr.bf16.mxu1 (!%p6989_p11), %v8603_v32 }
 0x3db   : > { %6648 = vmatpush1.bf16.msra.mxu0 (!%p6989_p11), %v8608_v31 }
 0x3dc   : > { %6566 = vmatpush1.bf16.msra.mxu1 (!%p6989_p11), %v8607_v34 }
 0x40d   : > { %v5086_v35 = vpop.f32.mrb[2].mxu0  ;;  %v5228_v42 = vpop.f32.mrb[2].mxu1 }
 0x40e   : > { %v5088_v39 = vpop.f32.mrb[3].mxu0  ;;  %v5230_v40 = vpop.f32.mrb[3].mxu1 }
 0x40f   : > { %v5525_v41 = vcombine.low %v5086_v35, %v5088_v39  ;;  %v5526_v43 = vcombine.low %v5228_v42, %v5230_v40  ;;  %v8609_v35 = vld [vmem:[%s10333_s7 + $0x94] ss:$8 sps:$4 sm:$0xff] (!%p6989_p11)   ;;  %v8613_v39 = vld [vmem:[%s10333_s7 + $0x90] ss:$8 sps:$4 sm:$0xff] (!%p6989_p11)  }
 0x410   : > { %v8611_v42 = vld [vmem:[%s10333_s7 + $0x294] ss:$8 sps:$4 sm:$0xff] (!%p6989_p11)   ;;  %v8614_v40 = vld [vmem:[%s10333_s7 + $0x290] ss:$8 sps:$4 sm:$0xff] (!%p6989_p11)   ;;  %6567 = vmatprep.subr.bf16.mxu1 (!%p6989_p11), %v8609_v35 }
 0x411   : > { %v5533_v44 = vrot.slane %v5525_v41, %v9371_v58  ;;  %v5540_v46 = vrot.slane %v5526_v43, %v9371_v58  ;;  %v8615_v41 = vld [vmem:[%s10333_s7 + $0xa4] ss:$8 sps:$4 sm:$0xff] (!%p6989_p11)   ;;  %6649 = vmatprep.subr.bf16.mxu0 (!%p6989_p11), %v8611_v42  ;;  %6568 = vmatpush1.bf16.msra.mxu1 (!%p6989_p11), %v8613_v39 }
 0x412   : > { %v8617_v43 = vld [vmem:[%s10333_s7 + $0x2a4] ss:$8 sps:$4 sm:$0xff] (!%p6989_p11)   ;;  %6650 = vmatpush1.bf16.msra.mxu0 (!%p6989_p11), %v8614_v40  ;;  %6569 = vmatprep.subr.bf16.mxu1 (!%p6989_p11), %v8615_v41  ;;  %v8643_v41 = vld [vmem:[%s10333_s7 + $0xe0] ss:$8 sps:$4 sm:$0xff] (!%p6989_p11)  }
 0x413   : > { %v5541_v48 = vcombine.low %v5533_v44, %v5540_v46  ;;  %v8619_v44 = vld [vmem:[%s10333_s7 + $0xa0] ss:$8 sps:$4 sm:$0xff] (!%p6989_p11)   ;;  %6651 = vmatprep.subr.bf16.mxu0 (!%p6989_p11), %v8617_v43 }
 0x414   : > { %v8620_v46 = vld [vmem:[%s10333_s7 + $0x2a0] ss:$8 sps:$4 sm:$0xff] (!%p6989_p11)  }
 0x415   : > { %v5561_v49 = vadd.f32 %v5541_v48, %v4947_v63  ;;  %v8621_v63 = vld [vmem:[%s10333_s7 + $0xb4] ss:$8 sps:$4 sm:$0xff] (!%p6989_p11)   ;;  %6570 = vmatpush1.bf16.msra.mxu1 (!%p6989_p11), %v8619_v44  ;;  %v8644_v43 = vld [vmem:[%s10333_s7 + $0x2e0] ss:$8 sps:$4 sm:$0xff] (!%p6989_p11)  }
 0x416   : > { %v8623_v48 = vld [vmem:[%s10333_s7 + $0x2b4] ss:$8 sps:$4 sm:$0xff] (!%p6989_p11)   ;;  %6652 = vmatpush1.bf16.msra.mxu0 (!%p6989_p11), %v8620_v46  ;;  %6571 = vmatprep.subr.bf16.mxu1 (!%p6989_p11), %v8621_v63 }
 0x417   : > { %5563 = vst [vmem:[#allocation2] sm:$0xff] %v5561_v49  ;;  %v8625_v49 = vld [vmem:[%s10333_s7 + $0xb0] ss:$8 sps:$4 sm:$0xff] (!%p6989_p11)   ;;  %6653 = vmatprep.subr.bf16.mxu0 (!%p6989_p11), %v8623_v48  ;;  %v8645_v63 = vld [vmem:[%s10333_s7 + $0xf4] ss:$8 sps:$4 sm:$0xff] (!%p6989_p11)  }
 0x419   : > { %6572 = vmatpush1.bf16.msra.mxu1 (!%p6989_p11), %v8625_v49  ;;  %v8647_v49 = vld [vmem:[%s10333_s7 + $0x2f4] ss:$8 sps:$4 sm:$0xff] (!%p6989_p11)  }
 0x41e   : > { %v5569_v29 = vld [vmem:[#allocation2] sm:$0xff] (!%p6989_p11) }
 0x48d   : > { %v5370_v51 = vpop.f32.mrb[4].mxu0 }
 0x48e   : > { %v5512_v52 = vpop.f32.mrb[4].mxu1  ;;  %v5372_v53 = vpop.f32.mrb[5].mxu0 }
 0x48f   : > { %v5542_v54 = vcombine.low %v5370_v51, %v5372_v53  ;;  %v5514_v55 = vpop.f32.mrb[5].mxu1  ;;  %v5591_v51 = vsub.s32 (!%p6989_p11), 4, %v9361_v47  ;;  %v5643_v53 = vld [vmem:[%s10332_s6] sm:$0xff] (!%p6989_p11) }
 0x490   : > { %v5543_v19 = vcombine.low %v5512_v52, %v5514_v55  ;;  %v5571_v52 = vld [vmem:[%s10331_s5] sm:$0xff] (!%p6989_p11)  ;;  %v5599_v55 = vsub.s32 (!%p6989_p11), 6, %v9361_v47  ;;  %v5648_v1 = vrot.slane (!%p6989_p11), %v5643_v53, %v9656_v5  ;;  %v5652_v2 = vrot.slane (!%p6989_p11), %v5643_v53, %v9667_v7 }
 0x491   : > { %v5550_v56 = vrot.slane %v5542_v54, %v9371_v58  ;;  %v5595_v54 = vsub.s32 (!%p6989_p11), 5, %v9361_v47  ;;  %v5588_v0 = vrot.slane (!%p6989_p11), %v5571_v52, %v9670_v8  ;;  %v5656_v4 = vrot.slane (!%p6989_p11), %v5643_v53, %v9659_v6 }
 0x492   : > { %v5557_v57 = vrot.slane %v5543_v19, %v9371_v58  ;;  %5568 = sbr.rel (%p6989_p11) target bundleno = 1701 (0x6a5), region = 95  ;;  %v8626_v19 = vld [vmem:[%s10333_s7 + $0x2b0] ss:$8 sps:$4 sm:$0xff] (!%p6989_p11)   ;;  %v5660_v59 = vrot.slane (!%p6989_p11), %v5643_v53, %v9670_v8  ;;  %v5592_v9 = vrot.slane (!%p6989_p11), %v5571_v52, %v5591_v51  ;;  %v5677_v12 = vcombine.low (!%p6989_p11), %v5648_v1, %v5652_v2 }
 0x493   : > { %v5596_v13 = vrot.slane (!%p6989_p11), %v5571_v52, %v5595_v54  ;;  %v5600_v14 = vrot.slane (!%p6989_p11), %v5571_v52, %v5599_v55  ;;  %6654 = vmatpush1.bf16.msra.mxu0 (!%p6989_p11), %v8626_v19  ;;  %v5664_v22 = vrot.slane (!%p6989_p11), %v5643_v53, %v5591_v51  ;;  %v5668_v23 = vrot.slane (!%p6989_p11), %v5643_v53, %v5595_v54 }
 0x494   : > { %v5558_v61 = vcombine.low %v5550_v56, %v5557_v57  ;;  %v8627_v56 = vld [vmem:[%s10333_s7 + $0xc4] ss:$8 sps:$4 sm:$0xff] (!%p6989_p11)   ;;  %v5576_v57 = vrot.slane (!%p6989_p11), %v5571_v52, %v9656_v5  ;;  %v5678_v15 = vcombine.low (!%p6989_p11), %v5656_v4, %v5660_v59  ;;  %6655 = vmatprep.subr.bf16.mxu0 (!%p6989_p11), %v8629_v50  ;;  %v5685_v17 = vrot.slane (!%p6989_p11), %v5677_v12, %v9371_v58  ;;  %v8651_v59 = vld [vmem:[%s10333_s7 + $0x100] ss:$8 sps:$4 sm:$0xff] (!%p6989_p11)  }
 0x495   : > { %6573 = vmatprep.subr.bf16.mxu1 (!%p6989_p11), %v8627_v56  ;;  %v5622_v18 = vcombine.low (!%p6989_p11), %v5592_v9, %v5596_v13  ;;  %v5672_v36 = vrot.slane (!%p6989_p11), %v5643_v53, %v5599_v55  ;;  %v5694_v34 = vcombine.low (!%p6989_p11), %v5664_v22, %v5668_v23  ;;  %v8650_v56 = vld [vmem:[%s10333_s7 + $0x2f0] ss:$8 sps:$4 sm:$0xff] (!%p6989_p11)   ;;  %v8656_v50 = vld [vmem:[%s10333_s7 + $0x304] ss:$8 sps:$4 sm:$0xff] (!%p6989_p11)   ;;  %v8675_v23 = vld [vmem:[%s10333_s7 + $0x140] ss:$8 sps:$4 sm:$0xff] (!%p6989_p11)  }
 0x496   : > { %v5562_v62 = vadd.f32 %v5558_v61, %v4948_v60  ;;  %v5580_v60 = vrot.slane (!%p6989_p11), %v5571_v52, %v9667_v7  ;;  %v5584_v61 = vrot.slane (!%p6989_p11), %v5571_v52, %v9659_v6  ;;  %v8633_v6 = vld [vmem:[%s10333_s7 + $0xd4] ss:$8 sps:$4 sm:$0xff] (!%p6989_p11)   ;;  %v5692_v21 = vrot.slane (!%p6989_p11), %v5678_v15, %v9371_v58  ;;  %v8665_v15 = vld [vmem:[%s10333_s7 + $0x124] ss:$8 sps:$4 sm:$0xff] (!%p6989_p11)   ;;  %v8672_v22 = vld [vmem:[%s10333_s7 + $0x330] ss:$8 sps:$4 sm:$0xff] (!%p6989_p11)  }
 0x497   : > { %v5630_v28 = vrot.slane (!%p6989_p11), %v5622_v18, %v9371_v58  ;;  %6656 = vmatpush1.bf16.msra.mxu0 (!%p6989_p11), %v8632_v10  ;;  %v5702_v40 = vrot.slane (!%p6989_p11), %v5694_v34, %v9371_v58  ;;  %v8671_v18 = vld [vmem:[%s10333_s7 + $0x134] ss:$8 sps:$4 sm:$0xff] (!%p6989_p11)  }
 0x498   : > { %5564 = vst [vmem:[#allocation2 + $0x8] sm:$0xff] %v5562_v62  ;;  %v5603_v62 = vsub.s32 (!%p6989_p11), 7, %v9361_v47  ;;  %v5605_v3 = vcombine.low (!%p6989_p11), %v5576_v57, %v5580_v60  ;;  %v8631_v47 = vld [vmem:[%s10333_s7 + $0xc0] ss:$8 sps:$4 sm:$0xff] (!%p6989_p11)   ;;  %v5606_v11 = vcombine.low (!%p6989_p11), %v5584_v61, %v5588_v0  ;;  %v5693_v32 = vcombine.low (!%p6989_p11), %v5685_v17, %v5692_v21  ;;  %6657 = vmatprep.subr.bf16.mxu0 (!%p6989_p11), %v8635_v16  ;;  %v8653_v60 = vld [vmem:[%s10333_s7 + $0x104] ss:$8 sps:$4 sm:$0xff] (!%p6989_p11)  }
 0x499   : > { %6574 = vmatpush1.bf16.msra.mxu1 %v8631_v47  ;;  %v8659_v47 = vld [vmem:[%s10333_s7 + $0x114] ss:$8 sps:$4 sm:$0xff]   ;;  %v8660_v16 = vld [vmem:[%s10333_s7 + $0x310] ss:$8 sps:$4 sm:$0xff]   ;;  %v8668_v17 = vld [vmem:[%s10333_s7 + $0x324] ss:$8 sps:$4 sm:$0xff]  }
 0x49a   : > { %v5613_v8 = vrot.slane %v5605_v3, %v9371_v58  ;;  %v5604_v27 = vrot.slane %v5571_v52, %v5603_v62  ;;  %v5620_v33 = vrot.slane %v5606_v11, %v9371_v58  ;;  %v5676_v30 = vrot.slane %v5643_v53, %v5603_v62  ;;  %6575 = vmatprep.subr.bf16.mxu1 %v8633_v6  ;;  %v8649_v53 = vld [vmem:[%s10333_s7 + $0xf0] ss:$8 sps:$4 sm:$0xff]   ;;  %v8674_v21 = vld [vmem:[%s10333_s7 + $0x334] ss:$8 sps:$4 sm:$0xff]  }
 0x49b   : > { %6658 = vmatpush1.bf16.msra.mxu0 %v8638_v24  ;;  %v8657_v6 = vld [vmem:[%s10333_s7 + $0x110] ss:$8 sps:$4 sm:$0xff]   ;;  %v8680_v24 = vld [vmem:[%s10333_s7 + $0x344] ss:$8 sps:$4 sm:$0xff]   ;;  %v8695_v34 = vld [vmem:[%s10333_s7 + $0x174] ss:$8 sps:$4 sm:$0xff]  }
 0x49c   : > { %v5623_v38 = vcombine.low %v5600_v14, %v5604_v27  ;;  %v5621_v26 = vcombine.low %v5613_v8, %v5620_v33  ;;  %v5695_v42 = vcombine.low %v5672_v36, %v5676_v30  ;;  %6659 = vmatprep.subr.bf16.mxu0 %v8641_v45  ;;  %v8654_v14 = vld [vmem:[%s10333_s7 + $0x300] ss:$8 sps:$4 sm:$0xff]   ;;  %v8662_v8 = vld [vmem:[%s10333_s7 + $0x314] ss:$8 sps:$4 sm:$0xff]   ;;  %v8689_v30 = vld [vmem:[%s10333_s7 + $0x164] ss:$8 sps:$4 sm:$0xff]  }
 0x49d   : > { %6576 = vmatpush1.bf16.msra.mxu1 %v8637_v20  ;;  %v8663_v33 = vld [vmem:[%s10333_s7 + $0x120] ss:$8 sps:$4 sm:$0xff]   ;;  %v8686_v36 = vld [vmem:[%s10333_s7 + $0x354] ss:$8 sps:$4 sm:$0xff]   ;;  %v8684_v45 = vld [vmem:[%s10333_s7 + $0x350] ss:$8 sps:$4 sm:$0xff]  }
 0x49e   : > { %v5637_v37 = vrot.slane %v5623_v38, %v9371_v58  ;;  %v5641_v31 = vmul.f32 %v5621_v26, %v5569_v29  ;;  %v5709_v46 = vrot.slane %v5695_v42, %v9371_v58  ;;  %6577 = vmatprep.subr.bf16.mxu1 %v8639_v25  ;;  %v8666_v20 = vld [vmem:[%s10333_s7 + $0x320] ss:$8 sps:$4 sm:$0xff]   ;;  %v8669_v29 = vld [vmem:[%s10333_s7 + $0x130] ss:$8 sps:$4 sm:$0xff]   ;;  %v8677_v38 = vld [vmem:[%s10333_s7 + $0x144] ss:$8 sps:$4 sm:$0xff]  }
 0x49f   : > { %v5570_v35 = vld [vmem:[#allocation2 + $0x8] sm:$0xff]  ;;  %6660 = vmatpush1.bf16.msra.mxu0 %v8644_v43  ;;  %v8683_v25 = vld [vmem:[%s10333_s7 + $0x154] ss:$8 sps:$4 sm:$0xff]  }
 0x4a0   : > { %v5638_v39 = vcombine.low %v5630_v28, %v5637_v37  ;;  %v5713_v44 = vadd.f32 %v5693_v32, %v5641_v31  ;;  %v5710_v52 = vcombine.low %v5702_v40, %v5709_v46  ;;  %6661 = vmatprep.subr.bf16.mxu0 %v8647_v49  ;;  %v8678_v26 = vld [vmem:[%s10333_s7 + $0x340] ss:$8 sps:$4 sm:$0xff]   ;;  %v8681_v28 = vld [vmem:[%s10333_s7 + $0x150] ss:$8 sps:$4 sm:$0xff]   ;;  %v8692_v37 = vld [vmem:[%s10333_s7 + $0x364] ss:$8 sps:$4 sm:$0xff]  }
 0x4a1   : > { %6578 = vmatpush1.bf16.msra.mxu1 %v8643_v41  ;;  %v8687_v32 = vld [vmem:[%s10333_s7 + $0x160] ss:$8 sps:$4 sm:$0xff]   ;;  %v8698_v42 = vld [vmem:[%s10333_s7 + $0x374] ss:$8 sps:$4 sm:$0xff]   ;;  %v8696_v40 = vld [vmem:[%s10333_s7 + $0x370] ss:$8 sps:$4 sm:$0xff]  }
 0x4a2   : > { %v5642_v48 = vmul.f32 %v5638_v39, %v5570_v35  ;;  %v5715_v51 = vmax.f32 %v5713_v44, 0.0  ;;  %6579 = vmatprep.subr.bf16.mxu1 %v8645_v63  ;;  %v8690_v31 = vld [vmem:[%s10333_s7 + $0x360] ss:$8 sps:$4 sm:$0xff]   ;;  %v8693_v35 = vld [vmem:[%s10333_s7 + $0x170] ss:$8 sps:$4 sm:$0xff]  }
 0x4a3   : > { %6662 = vmatpush1.bf16.msra.mxu0 %v8650_v56  ;;  %v8701_v39 = vld [vmem:[%s10333_s7 + $0x184] ss:$8 sps:$4 sm:$0xff]   ;;  %v8699_v41 = vld [vmem:[%s10333_s7 + $0x180] ss:$8 sps:$4 sm:$0xff]   ;;  %v8707_v46 = vld [vmem:[%s10333_s7 + $0x194] ss:$8 sps:$4 sm:$0xff]  }
 0x4a4   : > { %v5719_v54 = vcombine.high %v5715_v51, %v5715_v51  ;;  %v5726_v55 = vrot.slane %v5715_v51, %v9371_v58  ;;  %v5714_v19 = vadd.f32 %v5710_v52, %v5642_v48  ;;  %6672 = vmatprep.subr.bf16.mxu0 %v8656_v50  ;;  %v8704_v43 = vld [vmem:[%s10333_s7 + $0x384] ss:$8 sps:$4 sm:$0xff]   ;;  %v8702_v44 = vld [vmem:[%s10333_s7 + $0x380] ss:$8 sps:$4 sm:$0xff]   ;;  %v8705_v63 = vld [vmem:[%s10333_s7 + $0x190] ss:$8 sps:$4 sm:$0xff]  }
 0x4a5   : > { %6580 = vmatpush1.bf16.msra.mxu1 %v8649_v53  ;;  %v8710_v48 = vld [vmem:[%s10333_s7 + $0x394] ss:$8 sps:$4 sm:$0xff]   ;;  %v8713_v49 = vld [vmem:[%s10333_s7 + $0x1a4] ss:$8 sps:$4 sm:$0xff]   ;;  %v8708_v51 = vld [vmem:[%s10333_s7 + $0x390] ss:$8 sps:$4 sm:$0xff]  }
 0x4a6   : > { %v5734_v57 = vcombine.high %v5726_v55, %v5726_v55  ;;  %v5716_v61 = vmax.f32 %v5714_v19, 0.0  ;;  %v10034_v62 = vrot.slane %v5719_v54, %v9371_v58  ;;  %v5761_v0 = vpack.c.bf16 %v5726_v55, %v5726_v55  ;;  %6590 = vmatprep.subr.bf16.mxu1 %v8653_v60  ;;  %v8711_v52 = vld [vmem:[%s10333_s7 + $0x1a0] ss:$8 sps:$4 sm:$0xff]   ;;  %v8716_v53 = vld [vmem:[%s10333_s7 + $0x3a4] ss:$8 sps:$4 sm:$0xff]  }
 0x4a7   : > { %v8719_v54 = vld [vmem:[%s10333_s7 + $0x1b4] ss:$8 sps:$4 sm:$0xff]   ;;  %v8714_v55 = vld [vmem:[%s10333_s7 + $0x3a0] ss:$8 sps:$4 sm:$0xff]   ;;  %v8717_v19 = vld [vmem:[%s10333_s7 + $0x1b0] ss:$8 sps:$4 sm:$0xff]  }
 0x4a8   : > { %v5762_v1 = vpack.c.bf16 %v5734_v57, %v5734_v57  ;;  %v5736_v2 = vcombine.high %v5716_v61, %v5716_v61  ;;  %v5743_v3 = vrot.slane %v5716_v61, %v9371_v58  ;;  %v5735_v4 = vcombine.high %v10034_v62, %v10034_v62  ;;  %v8722_v56 = vld [vmem:[%s10333_s7 + $0x3b4] ss:$8 sps:$4 sm:$0xff]   ;;  %v8725_v57 = vld [vmem:[%s10333_s7 + $0x1c4] ss:$8 sps:$4 sm:$0xff]   ;;  %v8720_v60 = vld [vmem:[%s10333_s7 + $0x3b0] ss:$8 sps:$4 sm:$0xff]  }
 0x4a9   : > { %v8723_v61 = vld [vmem:[%s10333_s7 + $0x1c0] ss:$8 sps:$4 sm:$0xff]   ;;  %v8728_v50 = vld [vmem:[%s10333_s7 + $0x3c4] ss:$8 sps:$4 sm:$0xff]  }
 0x4aa   : > { %6581 = vmatprep.mubr.bf16.mxu1 %v5762_v1  ;;  %v5751_v9 = vcombine.high %v5743_v3, %v5743_v3  ;;  %v5764_v10 = vpack.c.bf16 %v5735_v4, %v5735_v4  ;;  %v5765_v11 = vpack.c.bf16 %v5743_v3, %v5743_v3  ;;  %v10049_v12 = vrot.slane %v5736_v2, %v9371_v58  ;;  %v8726_v1 = vld [vmem:[%s10333_s7 + $0x3c0] ss:$8 sps:$4 sm:$0xff]   ;;  %v8729_v2 = vld [vmem:[%s10333_s7 + $0x1d0] ss:$8 sps:$4 sm:$0xff]   ;;  %v8734_v3 = vld [vmem:[%s10333_s7 + $0x3d4] ss:$8 sps:$4 sm:$0xff]  }
 0x4ab   : > { %6582 = vmatmul.mubr.bf16.vlgmr.msra.gmra.mrb[0].mxu1 %v5761_v0  ;;  %v8731_v0 = vld [vmem:[%s10333_s7 + $0x1d4] ss:$8 sps:$4 sm:$0xff]   ;;  %v8737_v4 = vld [vmem:[%s10333_s7 + $0x1e4] ss:$8 sps:$4 sm:$0xff]  }
 0x4ac   : > { %v5766_v13 = vpack.c.bf16 %v5751_v9, %v5751_v9  ;;  %6591 = vmatpush1.bf16.msra.mxu1 %v8651_v59  ;;  %6622 = vmatprep.mubr.bf16.mxu1 %v5764_v10  ;;  %v5752_v58 = vcombine.high %v10049_v12, %v10049_v12  ;;  %v8732_v59 = vld [vmem:[%s10333_s7 + $0x3d0] ss:$8 sps:$4 sm:$0xff]   ;;  %v8735_v9 = vld [vmem:[%s10333_s7 + $0x1e0] ss:$8 sps:$4 sm:$0xff]   ;;  %v8743_v10 = vld [vmem:[%s10333_s7 + $0x1f4] ss:$8 sps:$4 sm:$0xff]  }
 0x4ad   : > { %6592 = vmatprep.subr.bf16.mxu1 %v8659_v47  ;;  %v8740_v47 = vld [vmem:[%s10333_s7 + $0x3e4] ss:$8 sps:$4 sm:$0xff]  }
 0x4ae   : > { %6663 = vmatprep.mubr.bf16.mxu0 %v5766_v13  ;;  %v5768_v27 = vpack.c.bf16 %v5752_v58, %v5752_v58  ;;  %v8741_v13 = vld [vmem:[%s10333_s7 + $0x1f0] ss:$8 sps:$4 sm:$0xff]   ;;  %v5763_v58 = vpack.c.bf16 %v10034_v62, %v10034_v62  ;;  %v8750_v62 = vld [vmem:[%s10335_s9 + $0x8] sm:$0xff]  }
 0x4af   : > { %6664 = vmatmul.mubr.bf16.vlgmr.msra.gmra.mrb[0].mxu0 %v5765_v11  ;;  %v8738_v11 = vld [vmem:[%s10333_s7 + $0x3e0] ss:$8 sps:$4 sm:$0xff]  }
 0x4b0   : > { %6673 = vmatpush1.bf16.msra.mxu0 %v8654_v14  ;;  %6593 = vmatpush1.bf16.msra.mxu1 %v8657_v6  ;;  %v8746_v14 = vld [vmem:[%s10333_s7 + $0x3f4] ss:$8 sps:$4 sm:$0xff]   ;;  %v8747_v6 = vld [vmem:[%s10335_s9 + $0x40] sm:$0xff]  }
 0x4b1   : > { %6674 = vmatprep.subr.bf16.mxu0 %v8662_v8  ;;  %6594 = vmatprep.subr.bf16.mxu1 %v8665_v15  ;;  %v8744_v8 = vld [vmem:[%s10333_s7 + $0x3f0] ss:$8 sps:$4 sm:$0xff]   ;;  %v8748_v15 = vld [vmem:[%s10335_s9] sm:$0xff]  }
 0x4b2   : > { %6704 = vmatprep.mubr.bf16.mxu0 %v5768_v27  ;;  %v8749_v27 = vld [vmem:[%s10335_s9 + $0x48] sm:$0xff]  }
 0x4b4   : > { %6675 = vmatpush1.bf16.msra.mxu0 %v8660_v16  ;;  %6595 = vmatpush1.bf16.msra.mxu1 %v8663_v33  ;;  %v5767_v16 = vpack.c.bf16 %v10049_v12, %v10049_v12  ;;  %v8751_v33 = vld [vmem:[%s10335_s9 + $0x50] sm:$0xff]   ;;  %v8753_v12 = vld [vmem:[%s10335_s9 + $0x58] sm:$0xff]  }
 0x4b5   : > { %6676 = vmatprep.subr.bf16.mxu0 %v8668_v17  ;;  %6596 = vmatprep.subr.bf16.mxu1 %v8671_v18  ;;  %v8752_v17 = vld [vmem:[%s10335_s9 + $0x10] sm:$0xff]   ;;  %v8754_v18 = vld [vmem:[%s10335_s9 + $0x18] sm:$0xff]  }
 0x4b8   : > { %6677 = vmatpush1.bf16.msra.mxu0 %v8666_v20  ;;  %6597 = vmatpush1.bf16.msra.mxu1 %v8669_v29  ;;  %v8755_v20 = vld [vmem:[%s10335_s9 + $0x60] sm:$0xff]  }
 0x4b9   : > { %6678 = vmatprep.subr.bf16.mxu0 %v8674_v21  ;;  %6598 = vmatprep.subr.bf16.mxu1 %v8677_v38  ;;  %v8756_v29 = vld [vmem:[%s10335_s9 + $0x20] sm:$0xff]   ;;  %v8757_v21 = vld [vmem:[%s10335_s9 + $0x68] sm:$0xff]  }
 0x4ba   : > { %v8758_v38 = vld [vmem:[%s10335_s9 + $0x28] sm:$0xff]  }
 0x4bc   : > { %6679 = vmatpush1.bf16.msra.mxu0 %v8672_v22  ;;  %6599 = vmatpush1.bf16.msra.mxu1 %v8675_v23  ;;  %v8759_v22 = vld [vmem:[%s10335_s9 + $0x70] sm:$0xff]  }
 0x4bd   : > { %6680 = vmatprep.subr.bf16.mxu0 %v8680_v24  ;;  %6600 = vmatprep.subr.bf16.mxu1 %v8683_v25  ;;  %v8760_v23 = vld [vmem:[%s10335_s9 + $0x30] sm:$0xff]   ;;  %v8761_v24 = vld [vmem:[%s10335_s9 + $0x78] sm:$0xff]  }
 0x4be   : > { %v8762_v25 = vld [vmem:[%s10335_s9 + $0x38] sm:$0xff]  }
 0x4c0   : > { %6681 = vmatpush1.bf16.msra.mxu0 %v8678_v26  ;;  %6601 = vmatpush1.bf16.msra.mxu1 %v8681_v28  ;;  %v5897_v26 = vld [vmem:[%s10334_s8] sm:$0x3] }
 0x4c1   : > { %6682 = vmatprep.subr.bf16.mxu0 %v8686_v36  ;;  %6602 = vmatprep.subr.bf16.mxu1 %v8689_v30  ;;  %v5902_v28 = vrot.slane %v5897_v26, %v9656_v5  ;;  %v5906_v36 = vrot.slane %v5897_v26, %v9667_v7  ;;  %v7118_v7 = vld [vmem:[%s10336_s10] ss:$0 sm:$0xff] }
 0x4c4   : > { %6683 = vmatpush1.bf16.msra.mxu0 %v8684_v45  ;;  %6603 = vmatpush1.bf16.msra.mxu1 %v8687_v32 }
 0x4c5   : > { %6684 = vmatprep.subr.bf16.mxu0 %v8692_v37  ;;  %6604 = vmatprep.subr.bf16.mxu1 %v8695_v34 }
 0x4c8   : > { %6685 = vmatpush1.bf16.msra.mxu0 %v8690_v31  ;;  %6605 = vmatpush1.bf16.msra.mxu1 %v8693_v35 }
 0x4c9   : > { %6686 = vmatprep.subr.bf16.mxu0 %v8698_v42  ;;  %6606 = vmatprep.subr.bf16.mxu1 %v8701_v39 }
 0x4cc   : > { %6687 = vmatpush1.bf16.msra.mxu0 %v8696_v40  ;;  %6607 = vmatpush1.bf16.msra.mxu1 %v8699_v41 }
 0x4cd   : > { %6688 = vmatprep.subr.bf16.mxu0 %v8704_v43  ;;  %6608 = vmatprep.subr.bf16.mxu1 %v8707_v46 }
 0x4d0   : > { %6689 = vmatpush1.bf16.msra.mxu0 %v8702_v44  ;;  %6609 = vmatpush1.bf16.msra.mxu1 %v8705_v63 }
 0x4d1   : > { %6690 = vmatprep.subr.bf16.mxu0 %v8710_v48  ;;  %6610 = vmatprep.subr.bf16.mxu1 %v8713_v49 }
 0x4d4   : > { %6691 = vmatpush1.bf16.msra.mxu0 %v8708_v51  ;;  %6611 = vmatpush1.bf16.msra.mxu1 %v8711_v52 }
 0x4d5   : > { %6692 = vmatprep.subr.bf16.mxu0 %v8716_v53  ;;  %6612 = vmatprep.subr.bf16.mxu1 %v8719_v54 }
 0x4d8   : > { %6693 = vmatpush1.bf16.msra.mxu0 %v8714_v55  ;;  %6613 = vmatpush1.bf16.msra.mxu1 %v8717_v19 }
 0x4d9   : > { %6694 = vmatprep.subr.bf16.mxu0 %v8722_v56  ;;  %6614 = vmatprep.subr.bf16.mxu1 %v8725_v57 }
 0x4dc   : > { %6695 = vmatpush1.bf16.msra.mxu0 %v8720_v60  ;;  %6615 = vmatpush1.bf16.msra.mxu1 %v8723_v61 }
 0x4dd   : > { %6696 = vmatprep.subr.bf16.mxu0 %v8728_v50  ;;  %6616 = vmatprep.subr.bf16.mxu1 %v8731_v0 }
 0x4e0   : > { %6697 = vmatpush1.bf16.msra.mxu0 %v8726_v1  ;;  %6617 = vmatpush1.bf16.msra.mxu1 %v8729_v2 }
 0x4e1   : > { %6698 = vmatprep.subr.bf16.mxu0 %v8734_v3  ;;  %6618 = vmatprep.subr.bf16.mxu1 %v8737_v4 }
 0x4e4   : > { %6699 = vmatpush1.bf16.msra.mxu0 %v8732_v59  ;;  %6619 = vmatpush1.bf16.msra.mxu1 %v8735_v9 }
 0x4e5   : > { %6700 = vmatprep.subr.bf16.mxu0 %v8740_v47  ;;  %6620 = vmatprep.subr.bf16.mxu1 %v8743_v10 }
 0x4e8   : > { %6701 = vmatpush1.bf16.msra.mxu0 %v8738_v11  ;;  %6621 = vmatpush1.bf16.msra.mxu1 %v8741_v13 }
 0x4e9   : > { %6702 = vmatprep.subr.bf16.mxu0 %v8746_v14  ;;  %7141 = vmatprep.subr.bf16.mxu1 %v8747_v6 }
 0x4eb   : > { %6623 = vmatmul.mubr.bf16.vlgmr.msra.gmra.mrb[0].mxu1 %v5763_v58 }
 0x4ec   : > { %6703 = vmatpush1.bf16.msra.mxu0 %v8744_v8  ;;  %7142 = vmatpush3.bf16.msra.mxu1 %v8748_v15 }
 0x4ed   : > { %7143 = vmatprep.subr.bf16.mxu1 %v8749_v27 }
 0x4ef   : > { %6705 = vmatmul.mubr.bf16.vlgmr.msra.gmra.mrb[0].mxu0 %v5767_v16 }
 0x4f0   : > { %7144 = vmatpush3.bf16.msra.mxu1 %v8750_v62 }
 0x4f1   : > { %7145 = vmatprep.subr.bf16.mxu1 %v8751_v33 }
 0x4f4   : > { %7146 = vmatpush3.bf16.msra.mxu1 %v8752_v17 }
 0x4f5   : > { %7147 = vmatprep.subr.bf16.mxu1 %v8753_v12 }
 0x4f8   : > { %7148 = vmatpush3.bf16.msra.mxu1 %v8754_v18 }
 0x4f9   : > { %7149 = vmatprep.subr.bf16.mxu1 %v8755_v20 }
 0x4fc   : > { %7150 = vmatpush3.bf16.msra.mxu1 %v8756_v29 }
 0x4fd   : > { %7151 = vmatprep.subr.bf16.mxu1 %v8757_v21 }
 0x500   : > { %7152 = vmatpush3.bf16.msra.mxu1 %v8758_v38 }
 0x501   : > { %7153 = vmatprep.subr.bf16.mxu1 %v8759_v22 }
 0x504   : > { %7154 = vmatpush3.bf16.msra.mxu1 %v8760_v23 }
 0x505   : > { %7155 = vmatprep.subr.bf16.mxu1 %v8761_v24 }
 0x508   : > { %7156 = vmatpush3.bf16.msra.mxu1 %v8762_v25 }
 0x5be   : > { %v6624_v30 = vpop.f32.mrb[0].mxu1 }
 0x5bf   : > { %v8507_v45 = vadd.f32 %v6624_v30, %v5902_v28  ;;  %v6626_v32 = vpop.f32.mrb[1].mxu1 }
 0x5c0   : > { %v8509_v37 = vadd.f32 %v6626_v32, %v5906_v36  ;;  %v6628_v34 = vpop.f32.mrb[2].mxu1 }
 0x5c1   : > { %v6629_v35 = vpop.f32.mrb[3].mxu1 }
 0x5c2   : > { %v6706_v31 = vpop.f32.mrb[0].mxu0 }
 0x5c3   : > { %v8508_v42 = vadd.f32 %v8507_v45, %v6706_v31  ;;  %v6708_v39 = vpop.f32.mrb[1].mxu0 }
 0x5c4   : > { %v8510_v40 = vadd.f32 %v8509_v37, %v6708_v39  ;;  %v6710_v41 = vpop.f32.mrb[2].mxu0 }
 0x5c5   : > { %v6713_v43 = vmax.f32 %v8508_v42, 0.0  ;;  %v6711_v44 = vpop.f32.mrb[3].mxu0 }
 0x5c6   : > { %v6714_v46 = vmax.f32 %v8510_v40, 0.0 }
 0x5c7   : > { %v6715_v48 = vpack.c.bf16 %v6713_v43, %v6713_v43 }
 0x5c8   : > { %v6716_v63 = vpack.c.bf16 %v6714_v46, %v6714_v46 }
 0x5ca   : > { %6884 = vmatprep.mubr.bf16.mxu1 %v6716_v63 }
 0x5cb   : > { %6885 = vmatmul.mubr.bf16.vlgmr.msra.gmra.mrb[4].mxu1 %v6715_v48 }
 0x69e   : > { %v7157_v5 = vpop.f32.mrb[4].mxu1 }
 0x69f   : > { %v7158_v49 = vpop.f32.mrb[5].mxu1 }
 0x6a0   : > { %v7159_v51 = vadd.f32 %v7158_v49, %v7157_v5  ;;  %v7160_v52 = vpop.f32.mrb[6].mxu1 }
 0x6a1   : > { %v7161_v53 = vpop.f32.mrb[7].mxu1 }
 0x6a2   : > { %v6887_v54 = vadd.f32 %v7159_v51, %v7118_v7 }
 0x6a4   : > { %6892 = vst [vmem:[#allocation4] sm:$0x3] %v6887_v54 }
 0x6a5 PF: > { %p8525_p12 = scmp.eq.s32.totalorder %s8897_s20, 3  ;;  %s8820_s23 = smov [#allocation4]  }
 0x6a6   : > { %s6900_s25 = sshll.u32 %s8820_s23, 4  ;;  %s6901_s25 = int_to_ptr.vmem [resolvable:$true] %s6900_s25 }
 0x6a7   : > { %s8763_s26 = scalar_lea.vmem %s6901_s25, 32  ;;  %p8770_p2 = scmp.lt.s32.totalorder %s6901_s25, %s6901_s25 }
 0x6a8   : > { %p8764_p13 = scmp.ne.s32.totalorder %s6901_s25, %s8763_s26  ;;  %p8771_p3 = scmp.lt.s32.totalorder %s8763_s26, %s8763_s26 }
 0x6aa   : > { %p8765_p0 = pnand %p8764_p13, %p8525_p12  ;;  %p8772_p4 = por %p8771_p3, %p8770_p2 }
 0x6ac   : > { %p8766_p1 = pneg %p8765_p0 }
 0x6ae   : > { %p8773_p5 = pnand %p8772_p4, %p8766_p1 }
 0x6b0   : > { %8776 = shalt.err (!%p8773_p5)
}
 0x6b1   : > { %s8777_s19 = scalar_lea.hbm %s10337_s11, 32 }
 0x6b2   : > { %p8778_p6 = scmp.ne.s32.totalorder %s10337_s11, %s8777_s19  ;;  %p8783_p9 = scmp.lt.u32.totalorder %s8777_s19, %s10337_s11 }
 0x6b4   : > { %p8779_p7 = pnand %p8778_p6, %p8525_p12 }
 0x6b6   : > { %p8780_p8 = pneg %p8779_p7 }
 0x6b8   : > { %p8785_p10 = pnand %p8783_p9, %p8780_p8 }
 0x6ba   : > { %8788 = shalt.err (!%p8785_p10)
}
 0x6bb   : > { %8522 = dma.vmem_to_hbm [thread:$0]  (%p8525_p12), %s6901_s25, 32, %s10337_s11, [#allocation5]  }
 0x6bc   : > { %8802 = dma.done.wait (%p8525_p12), [#allocation5], 32  }
 0x6bd   : > { %8804 = vsyncadd (%p8525_p12), [#allocation5], 4294967264 }
 0x6be PF: > { %p19_p11 = scmp.ge.s32.totalorder %s8900_s21, 6   ;;  %s10338_s17 = smov %s8811_s18 }
 0x6bf   : > { %s10339_s18 = smov %s8909_s24  ;;  %s10340_s19 = smov %s8900_s21 }
 0x6c0   :  { %21 = sbr.rel (!%p19_p11) target bundleno = 2 (0x2), region = 136 }
 0x6c7   :  { %6913 = vsyncpa [#allocation5], 1 }
 0x6c8   :  { %6915 = vsyncpa [#allocation5 + $0x1], 1 }

</bundles_post_ra>
